<compile_context>
chip_gen: v7x
topology: tpu7x:2x2x1
jax: 0.10.0
libtpu: 0.0.40
codegen_flags: <defaults>
</compile_context>

<pallas_src>
import functools

import jax
import jax.numpy as jnp
from jax.experimental import pallas as pl
from jax.experimental.pallas import tpu as pltpu


def _lstm_cell(gates, c_prev, H):
    """Apply LSTM gate nonlinearities. gates:(B,4H) f32, c_prev:(B,H) f32."""
    i = jax.nn.sigmoid(gates[:, 0:H])
    f = jax.nn.sigmoid(gates[:, H:2 * H])
    g = jnp.tanh(gates[:, 2 * H:3 * H])
    o = jax.nn.sigmoid(gates[:, 3 * H:4 * H])
    c = f * c_prev + i * g
    h = o * jnp.tanh(c)
    return h, c


def emotion_kernel(
    T, B, H,                                  # static, bound via functools.partial
    # inputs
    x2d_ref,                                  # (T*B, IN_pad) bf16, time-major rows
    w_ih0_ref,                                # (IN_pad, 8H)  bf16  [fwd | bwd]
    b0_ref,                                   # (1, 8H)       f32   [fwd | bwd]
    w_hh0f_ref,                               # (H, 4H)       bf16
    w_hh0b_ref,                               # (H, 4H)       bf16
    w_ih1f_hbm,                               # (2H, 4H)      bf16  (HBM)
    b1f_ref,                                  # (1, 4H)       f32
    w_hh1f_hbm,                               # (H, 4H)       bf16  (HBM)
    w_ih1b_hbm,                               # (2H, 4H)      bf16  (HBM)
    b1b_ref,                                  # (1, 4H)       f32
    w_fc1_hbm, b_fc1_ref,                     # fc1 with bn1 folded in (weight in HBM)
    w_fc2_hbm, b_fc2_ref,                     # fc2 with bn2 folded in (weight in HBM)
    w_out_hbm, b_out_ref,                     # output linear, lane-padded (weight HBM)
    # outputs
    out_ref,                                  # (B, NC_pad)   f32
    # scratch
    proj0_scr,                                # (T*B, 8H)     f32
    out0_scr,                                 # (T*B, 2H)     bf16
    proj1_scr,                                # (T*B, 4H)     f32
    w_ih1f_buf, w_hh1f_buf, w_ih1b_buf,       # VMEM landing buffers for HBM weights
    w_fc1_buf, w_fc2_buf, w_out_buf,
    dma_sems,                                 # DMA semaphores, one per late weight
):
    f32 = jnp.float32
    bf16 = jnp.bfloat16

    # ---- kick off DMAs for weights that are only needed after layer-0; they
    #      complete under the layer-0 recurrence instead of serializing up front ----
    late_copies = (
        pltpu.make_async_copy(w_ih1f_hbm, w_ih1f_buf, dma_sems.at[0]),
        pltpu.make_async_copy(w_hh1f_hbm, w_hh1f_buf, dma_sems.at[1]),
        pltpu.make_async_copy(w_ih1b_hbm, w_ih1b_buf, dma_sems.at[2]),
        pltpu.make_async_copy(w_fc1_hbm, w_fc1_buf, dma_sems.at[3]),
        pltpu.make_async_copy(w_fc2_hbm, w_fc2_buf, dma_sems.at[4]),
        pltpu.make_async_copy(w_out_hbm, w_out_buf, dma_sems.at[5]),
    )
    for cp in late_copies:
        cp.start()

    # ---- hoisted layer-0 input projection (both directions, bias folded in) ----
    proj0_scr[...] = (
        jnp.dot(x2d_ref[...], w_ih0_ref[...], preferred_element_type=f32)
        + b0_ref[...]
    )

    # ---- layer 0: interleaved forward / backward, fully unrolled; one small
    #      per-direction (B,H)@(H,4H) matmul per step (no zero-block staging) ----
    w_hh0f = w_hh0f_ref[...]
    w_hh0b = w_hh0b_ref[...]
    h_f = jnp.zeros((B, H), bf16)
    c_f = jnp.zeros((B, H), f32)
    h_b = jnp.zeros((B, H), bf16)
    c_b = jnp.zeros((B, H), f32)
    for s in range(T):
        tf = s
        tb = T - 1 - s
        g_f = (jnp.dot(h_f, w_hh0f, preferred_element_type=f32)
               + proj0_scr[tf * B:tf * B + B, 0:4 * H])
        g_b = (jnp.dot(h_b, w_hh0b, preferred_element_type=f32)
               + proj0_scr[tb * B:tb * B + B, 4 * H:8 * H])
        hf_new, c_f = _lstm_cell(g_f, c_f, H)
        hb_new, c_b = _lstm_cell(g_b, c_b, H)
        h_f = hf_new.astype(bf16)
        h_b = hb_new.astype(bf16)
        out0_scr[tf * B:tf * B + B, 0:H] = h_f
        out0_scr[tb * B:tb * B + B, H:2 * H] = h_b

    # ---- layer-1 / head weights must be resident from here on ----
    for cp in late_copies:
        cp.wait()

    # ---- hoisted layer-1 forward input projection over the full sequence ----
    proj1_scr[...] = (
        jnp.dot(out0_scr[...], w_ih1f_buf[...], preferred_element_type=f32)
        + b1f_ref[...]
    )

    # ---- layer 1 backward: its output at t=T-1 is its first step (zero state),
    #      so the h @ W_hh term vanishes.  Hoisted ahead of the serial forward
    #      recurrence together with its half of the fc1 matmul ----
    x_last = out0_scr[(T - 1) * B:T * B, :]                              # (B, 2H) bf16
    g_b1 = (jnp.dot(x_last, w_ih1b_buf[...], preferred_element_type=f32)
            + b1b_ref[...])
    h1b, _ = _lstm_cell(g_b1, jnp.zeros((B, H), f32), H)
    y_bwd = jnp.dot(h1b.astype(bf16), w_fc1_buf[H:2 * H, :],
                    preferred_element_type=f32)                          # (B, 256)

    # ---- layer 1 forward: only the final hidden state is needed ----
    w_hh1f = w_hh1f_buf[...]
    h1 = jnp.zeros((B, H), bf16)
    c1 = jnp.zeros((B, H), f32)
    for t in range(T):
        g = (jnp.dot(h1, w_hh1f, preferred_element_type=f32)
             + proj1_scr[t * B:t * B + B, :])
        h1_new, c1 = _lstm_cell(g, c1, H)
        h1 = h1_new.astype(bf16)

    # ---- MLP head: fc1(+bn1) -> relu -> fc2(+bn2) -> relu -> output ----
    # (dropout layers are identity in eval mode; fc1 split into fwd/bwd halves)
    y = (jnp.dot(h1, w_fc1_buf[0:H, :], preferred_element_type=f32)
         + y_bwd + b_fc1_ref[...])
    y = jnp.maximum(y, 0.0)
    y = (jnp.dot(y.astype(bf16), w_fc2_buf[...], preferred_element_type=f32)
         + b_fc2_ref[...])
    y = jnp.maximum(y, 0.0)
    out_ref[...] = (jnp.dot(y.astype(bf16), w_out_buf[...],
                            preferred_element_type=f32) + b_out_ref[...])


def init_params(key, input_size=120, hidden_size=128, num_classes=8):
    """Deterministic synthetic parameters mirroring the PyTorch module's shapes."""
    H = hidden_size
    ks = iter(jax.random.split(key, 64))
    u = lambda shape, scale: jax.random.uniform(next(ks), shape, jnp.float32,
                                                -scale, scale)
    p = {}
    lstm_scale = 1.0 / (H ** 0.5)
    for name, in_f in (("0f", input_size), ("0b", input_size),
                       ("1f", 2 * H), ("1b", 2 * H)):
        p[f"w_ih{name}"] = u((in_f, 4 * H), lstm_scale)      # pre-transposed (in, 4H)
        p[f"w_hh{name}"] = u((H, 4 * H), lstm_scale)
        b_ih = u((4 * H,), lstm_scale)
        b_hh = u((4 * H,), lstm_scale)
        p[f"b{name}"] = (b_ih + b_hh).reshape(1, 4 * H)

    def linear(in_f, out_f):
        s = 1.0 / (in_f ** 0.5)
        return u((in_f, out_f), s), u((1, out_f), s)

    p["w_fc1"], p["b_fc1"] = linear(2 * H, 256)
    p["w_fc2"], p["b_fc2"] = linear(256, 128)
    p["w_out"], p["b_out"] = linear(128, num_classes)

    def bn(n):
        gamma = 1.0 + 0.1 * jax.random.normal(next(ks), (n,), jnp.float32)
        beta = 0.1 * jax.random.normal(next(ks), (n,), jnp.float32)
        mean = 0.1 * jax.random.normal(next(ks), (n,), jnp.float32)
        var = 1.0 + 0.1 * jnp.abs(jax.random.normal(next(ks), (n,), jnp.float32))
        eps = 1e-5
        scale = gamma / jnp.sqrt(var + eps)
        bias = beta - mean * scale
        return scale.reshape(1, n), bias.reshape(1, n)

    p["s_bn1"], p["t_bn1"] = bn(256)
    p["s_bn2"], p["t_bn2"] = bn(128)
    return p


def prepare_params(p, input_size, hidden_size):
    """Concat/pad/fold/cast raw params into the layout the kernel consumes."""
    H = hidden_size
    bf16 = jnp.bfloat16
    in_pad = ((input_size + 127) // 128) * 128

    # layer-0: concat the two directions' input weights / biases, pad IN to 128
    w_ih0 = jnp.concatenate([p["w_ih0f"], p["w_ih0b"]], axis=1)          # (IN, 8H)
    w_ih0 = jnp.pad(w_ih0, ((0, in_pad - input_size), (0, 0)))
    b0 = jnp.concatenate([p["b0f"], p["b0b"]], axis=1)                   # (1, 8H)

    # fold eval-mode BatchNorm into the preceding linear layers
    w_fc1 = p["w_fc1"] * p["s_bn1"]
    b_fc1 = p["b_fc1"] * p["s_bn1"] + p["t_bn1"]
    w_fc2 = p["w_fc2"] * p["s_bn2"]
    b_fc2 = p["b_fc2"] * p["s_bn2"] + p["t_bn2"]

    # pad output head to a full 128-lane store
    nc = p["w_out"].shape[1]
    nc_pad = ((nc + 127) // 128) * 128
    w_out = jnp.pad(p["w_out"], ((0, 0), (0, nc_pad - nc)))
    b_out = jnp.pad(p["b_out"], ((0, 0), (0, nc_pad - nc)))

    return {
        "w_ih0": w_ih0.astype(bf16), "b0": b0,
        "w_hh0f": p["w_hh0f"].astype(bf16),
        "w_hh0b": p["w_hh0b"].astype(bf16),
        "w_ih1f": p["w_ih1f"].astype(bf16), "b1f": p["b1f"],
        "w_hh1f": p["w_hh1f"].astype(bf16),
        "w_ih1b": p["w_ih1b"].astype(bf16), "b1b": p["b1b"],
        "w_fc1": w_fc1.astype(bf16), "b_fc1": b_fc1,
        "w_fc2": w_fc2.astype(bf16), "b_fc2": b_fc2,
        "w_out": w_out.astype(bf16), "b_out": b_out,
    }


@functools.partial(jax.jit, static_argnames=("num_classes",))
def emotion_forward(x, prep, num_classes=8):
    """x: (B, T, input_size) float32 — batch-first like the PyTorch module."""
    B, T, IN = x.shape
    H = prep["w_hh1f"].shape[0]
    IN_pad = prep["w_ih0"].shape[0]
    NC_pad = prep["w_out"].shape[1]
    FC1_OUT = prep["w_fc1"].shape[1]
    FC2_OUT = prep["w_fc2"].shape[1]
    B_pad = max(8, ((B + 7) // 8) * 8)
    bf16 = jnp.bfloat16

    # pad batch to a full sublane, pad features to 128 lanes, go time-major
    xp = jnp.pad(x.astype(jnp.float32),
                 ((0, B_pad - B), (0, 0), (0, IN_pad - IN)))
    x2d = jnp.transpose(xp, (1, 0, 2)).reshape(T * B_pad, IN_pad).astype(bf16)

    kernel = functools.partial(emotion_kernel, T, B_pad, H)
    args = (
        x2d,
        prep["w_ih0"], prep["b0"], prep["w_hh0f"], prep["w_hh0b"],
        prep["w_ih1f"], prep["b1f"], prep["w_hh1f"],
        prep["w_ih1b"], prep["b1b"],
        prep["w_fc1"], prep["b_fc1"],
        prep["w_fc2"], prep["b_fc2"],
        prep["w_out"], prep["b_out"],
    )
    vmem = pl.BlockSpec(memory_space=pltpu.MemorySpace.VMEM)
    hbm = pl.BlockSpec(memory_space=pl.ANY)   # weights DMA'd manually inside kernel
    in_specs = [
        vmem,                 # x2d
        vmem, vmem,           # w_ih0, b0
        vmem, vmem,           # w_hh0f, w_hh0b
        hbm, vmem,            # w_ih1f (HBM), b1f
        hbm,                  # w_hh1f (HBM)
        hbm, vmem,            # w_ih1b (HBM), b1b
        hbm, vmem,            # w_fc1  (HBM), b_fc1
        hbm, vmem,            # w_fc2  (HBM), b_fc2
        hbm, vmem,            # w_out  (HBM), b_out
    ]
    out = pl.pallas_call(
        kernel,
        out_shape=jax.ShapeDtypeStruct((B_pad, NC_pad), jnp.float32),
        in_specs=in_specs,
        out_specs=vmem,
        scratch_shapes=[
            pltpu.VMEM((T * B_pad, 8 * H), jnp.float32),   # layer-0 input projections
            pltpu.VMEM((T * B_pad, 2 * H), bf16),          # layer-0 bidir outputs
            pltpu.VMEM((T * B_pad, 4 * H), jnp.float32),   # layer-1 fwd projections
            pltpu.VMEM((2 * H, 4 * H), bf16),              # w_ih1f landing buffer
            pltpu.VMEM((H, 4 * H), bf16),                  # w_hh1f landing buffer
            pltpu.VMEM((2 * H, 4 * H), bf16),              # w_ih1b landing buffer
            pltpu.VMEM((2 * H, FC1_OUT), bf16),            # w_fc1 landing buffer
            pltpu.VMEM((FC1_OUT, FC2_OUT), bf16),          # w_fc2 landing buffer
            pltpu.VMEM((FC2_OUT, NC_pad), bf16),           # w_out landing buffer
            pltpu.SemaphoreType.DMA((6,)),
        ],
    )(*args)
    return out[:B, :num_classes]


if __name__ == "__main__":
    key = jax.random.PRNGKey(0)
    k_param, k_x = jax.random.split(key)

    B, T, INPUT, H, NC = 2, 8, 120, 128, 8
    raw = init_params(k_param, input_size=INPUT, hidden_size=H, num_classes=NC)
    prep = prepare_params(raw, INPUT, H)
    x = jax.random.normal(k_x, (B, T, INPUT), jnp.float32)

    out = emotion_forward(x, prep, num_classes=NC)
    out = jax.block_until_ready(out)
    assert out.shape == (B, NC) and out.dtype == jnp.float32
    assert bool(jnp.all(jnp.isfinite(out)))
    print("KERNEL_OK")
</pallas_src>

<mosaic_0001>
module attributes {stable_mosaic.version = 11 : i64} {
  func.func @emotion_kernel(%arg0: memref<64x128xbf16, #tpu.memory_space<vmem>>, %arg1: memref<128x1024xbf16, #tpu.memory_space<vmem>>, %arg2: memref<1x1024xf32, #tpu.memory_space<vmem>>, %arg3: memref<128x512xbf16, #tpu.memory_space<vmem>>, %arg4: memref<128x512xbf16, #tpu.memory_space<vmem>>, %arg5: memref<256x512xbf16, #tpu.memory_space<any>>, %arg6: memref<1x512xf32, #tpu.memory_space<vmem>>, %arg7: memref<128x512xbf16, #tpu.memory_space<any>>, %arg8: memref<256x512xbf16, #tpu.memory_space<any>>, %arg9: memref<1x512xf32, #tpu.memory_space<vmem>>, %arg10: memref<256x256xbf16, #tpu.memory_space<any>>, %arg11: memref<1x256xf32, #tpu.memory_space<vmem>>, %arg12: memref<256x128xbf16, #tpu.memory_space<any>>, %arg13: memref<1x128xf32, #tpu.memory_space<vmem>>, %arg14: memref<128x128xbf16, #tpu.memory_space<any>>, %arg15: memref<1x128xf32, #tpu.memory_space<vmem>>, %arg16: memref<8x128xf32, #tpu.memory_space<vmem>>, %arg17: memref<64x1024xf32, #tpu.memory_space<vmem>>, %arg18: memref<64x256xbf16, #tpu.memory_space<vmem>>, %arg19: memref<64x512xf32, #tpu.memory_space<vmem>>, %arg20: memref<256x512xbf16, #tpu.memory_space<vmem>>, %arg21: memref<128x512xbf16, #tpu.memory_space<vmem>>, %arg22: memref<256x512xbf16, #tpu.memory_space<vmem>>, %arg23: memref<256x256xbf16, #tpu.memory_space<vmem>>, %arg24: memref<256x128xbf16, #tpu.memory_space<vmem>>, %arg25: memref<128x128xbf16, #tpu.memory_space<vmem>>, %arg26: memref<6x!tpu.dma_semaphore, #tpu.memory_space<semaphore_mem>>) attributes {dimension_semantics = [], scalar_prefetch = 0 : i64, scratch_operands = 10 : i64, tpu.core_type = #tpu.core_type<tc>} {
    %c0_i32 = arith.constant 0 : i32
    %0 = tpu.memref_slice %arg26[%c0_i32] : memref<6x!tpu.dma_semaphore, #tpu.memory_space<semaphore_mem>> -> memref<1x!tpu.dma_semaphore, #tpu.memory_space<semaphore_mem>>
    %1 = tpu.memref_squeeze %0 : memref<1x!tpu.dma_semaphore, #tpu.memory_space<semaphore_mem>> -> memref<!tpu.dma_semaphore, #tpu.memory_space<semaphore_mem>>
    tpu.enqueue_dma source(%arg5 : memref<256x512xbf16, #tpu.memory_space<any>>) target(%arg20 : memref<256x512xbf16, #tpu.memory_space<vmem>>) target_semaphore(%1 : memref<!tpu.dma_semaphore, #tpu.memory_space<semaphore_mem>>)
    %c1_i32 = arith.constant 1 : i32
    %2 = tpu.memref_slice %arg26[%c1_i32] : memref<6x!tpu.dma_semaphore, #tpu.memory_space<semaphore_mem>> -> memref<1x!tpu.dma_semaphore, #tpu.memory_space<semaphore_mem>>
    %3 = tpu.memref_squeeze %2 : memref<1x!tpu.dma_semaphore, #tpu.memory_space<semaphore_mem>> -> memref<!tpu.dma_semaphore, #tpu.memory_space<semaphore_mem>>
    tpu.enqueue_dma source(%arg7 : memref<128x512xbf16, #tpu.memory_space<any>>) target(%arg21 : memref<128x512xbf16, #tpu.memory_space<vmem>>) target_semaphore(%3 : memref<!tpu.dma_semaphore, #tpu.memory_space<semaphore_mem>>)
    %c2_i32 = arith.constant 2 : i32
    %4 = tpu.memref_slice %arg26[%c2_i32] : memref<6x!tpu.dma_semaphore, #tpu.memory_space<semaphore_mem>> -> memref<1x!tpu.dma_semaphore, #tpu.memory_space<semaphore_mem>>
    %5 = tpu.memref_squeeze %4 : memref<1x!tpu.dma_semaphore, #tpu.memory_space<semaphore_mem>> -> memref<!tpu.dma_semaphore, #tpu.memory_space<semaphore_mem>>
    tpu.enqueue_dma source(%arg8 : memref<256x512xbf16, #tpu.memory_space<any>>) target(%arg22 : memref<256x512xbf16, #tpu.memory_space<vmem>>) target_semaphore(%5 : memref<!tpu.dma_semaphore, #tpu.memory_space<semaphore_mem>>)
    %c3_i32 = arith.constant 3 : i32
    %6 = tpu.memref_slice %arg26[%c3_i32] : memref<6x!tpu.dma_semaphore, #tpu.memory_space<semaphore_mem>> -> memref<1x!tpu.dma_semaphore, #tpu.memory_space<semaphore_mem>>
    %7 = tpu.memref_squeeze %6 : memref<1x!tpu.dma_semaphore, #tpu.memory_space<semaphore_mem>> -> memref<!tpu.dma_semaphore, #tpu.memory_space<semaphore_mem>>
    tpu.enqueue_dma source(%arg10 : memref<256x256xbf16, #tpu.memory_space<any>>) target(%arg23 : memref<256x256xbf16, #tpu.memory_space<vmem>>) target_semaphore(%7 : memref<!tpu.dma_semaphore, #tpu.memory_space<semaphore_mem>>)
    %c4_i32 = arith.constant 4 : i32
    %8 = tpu.memref_slice %arg26[%c4_i32] : memref<6x!tpu.dma_semaphore, #tpu.memory_space<semaphore_mem>> -> memref<1x!tpu.dma_semaphore, #tpu.memory_space<semaphore_mem>>
    %9 = tpu.memref_squeeze %8 : memref<1x!tpu.dma_semaphore, #tpu.memory_space<semaphore_mem>> -> memref<!tpu.dma_semaphore, #tpu.memory_space<semaphore_mem>>
    tpu.enqueue_dma source(%arg12 : memref<256x128xbf16, #tpu.memory_space<any>>) target(%arg24 : memref<256x128xbf16, #tpu.memory_space<vmem>>) target_semaphore(%9 : memref<!tpu.dma_semaphore, #tpu.memory_space<semaphore_mem>>)
    %c5_i32 = arith.constant 5 : i32
    %10 = tpu.memref_slice %arg26[%c5_i32] : memref<6x!tpu.dma_semaphore, #tpu.memory_space<semaphore_mem>> -> memref<1x!tpu.dma_semaphore, #tpu.memory_space<semaphore_mem>>
    %11 = tpu.memref_squeeze %10 : memref<1x!tpu.dma_semaphore, #tpu.memory_space<semaphore_mem>> -> memref<!tpu.dma_semaphore, #tpu.memory_space<semaphore_mem>>
    tpu.enqueue_dma source(%arg14 : memref<128x128xbf16, #tpu.memory_space<any>>) target(%arg25 : memref<128x128xbf16, #tpu.memory_space<vmem>>) target_semaphore(%11 : memref<!tpu.dma_semaphore, #tpu.memory_space<semaphore_mem>>)
    %c0 = arith.constant 0 : index
    %c0_0 = arith.constant 0 : index
    %12 = vector.load %arg0[%c0, %c0_0] : memref<64x128xbf16, #tpu.memory_space<vmem>>, vector<64x128xbf16>
    %c0_1 = arith.constant 0 : index
    %c0_2 = arith.constant 0 : index
    %13 = vector.load %arg1[%c0_1, %c0_2] : memref<128x1024xbf16, #tpu.memory_space<vmem>>, vector<128x1024xbf16>
    %cst = arith.constant dense<0.000000e+00> : vector<64x1024xf32>
    %14 = tpu.matmul %12, %13, %cst {dimension_numbers = #tpu.dot_dimension_numbers<[1], [0], [0], [1], [0, 0, 1, 1], [], []>} : vector<64x128xbf16>, vector<128x1024xbf16>, vector<64x1024xf32> -> vector<64x1024xf32>
    %c0_3 = arith.constant 0 : index
    %c0_4 = arith.constant 0 : index
    %15 = vector.load %arg2[%c0_3, %c0_4] : memref<1x1024xf32, #tpu.memory_space<vmem>>, vector<1x1024xf32>
    %16 = vector.broadcast %15 : vector<1x1024xf32> to vector<64x1024xf32>
    %17 = arith.addf %14, %16 : vector<64x1024xf32>
    %c0_5 = arith.constant 0 : index
    %c0_6 = arith.constant 0 : index
    %18 = vector.load %arg17[%c0_5, %c0_6] : memref<64x1024xf32, #tpu.memory_space<vmem>>, vector<64x1024xf32>
    tpu.vector_store %arg17[%c0_5, %c0_6], %17 {strides = array<i32>} : memref<64x1024xf32, #tpu.memory_space<vmem>>, vector<64x1024xf32>,
    %c0_7 = arith.constant 0 : index
    %c0_8 = arith.constant 0 : index
    %19 = vector.load %arg3[%c0_7, %c0_8] : memref<128x512xbf16, #tpu.memory_space<vmem>>, vector<128x512xbf16>
    %c0_9 = arith.constant 0 : index
    %c0_10 = arith.constant 0 : index
    %20 = vector.load %arg4[%c0_9, %c0_10] : memref<128x512xbf16, #tpu.memory_space<vmem>>, vector<128x512xbf16>
    %cst_11 = arith.constant 0.000000e+00 : bf16
    %21 = vector.broadcast %cst_11 : bf16 to vector<8x128xbf16>
    %cst_12 = arith.constant 0.000000e+00 : f32
    %22 = vector.broadcast %cst_12 : f32 to vector<8x128xf32>
    %cst_13 = arith.constant 0.000000e+00 : bf16
    %23 = vector.broadcast %cst_13 : bf16 to vector<8x128xbf16>
    %cst_14 = arith.constant 0.000000e+00 : f32
    %24 = vector.broadcast %cst_14 : f32 to vector<8x128xf32>
    %cst_15 = arith.constant dense<0.000000e+00> : vector<8x512xf32>
    %25 = tpu.matmul %21, %19, %cst_15 {dimension_numbers = #tpu.dot_dimension_numbers<[1], [0], [0], [1], [0, 0, 1, 1], [], []>} : vector<8x128xbf16>, vector<128x512xbf16>, vector<8x512xf32> -> vector<8x512xf32>
    %c0_16 = arith.constant 0 : index
    %c0_17 = arith.constant 0 : index
    %26 = vector.load %arg17[%c0_16, %c0_17] : memref<64x1024xf32, #tpu.memory_space<vmem>>, vector<8x512xf32>
    %27 = arith.addf %25, %26 : vector<8x512xf32>
    %cst_18 = arith.constant dense<0.000000e+00> : vector<8x512xf32>
    %28 = tpu.matmul %23, %20, %cst_18 {dimension_numbers = #tpu.dot_dimension_numbers<[1], [0], [0], [1], [0, 0, 1, 1], [], []>} : vector<8x128xbf16>, vector<128x512xbf16>, vector<8x512xf32> -> vector<8x512xf32>
    %c56 = arith.constant 56 : index
    %c512 = arith.constant 512 : index
    %29 = vector.load %arg17[%c56, %c512] : memref<64x1024xf32, #tpu.memory_space<vmem>>, vector<8x512xf32>
    %30 = arith.addf %28, %29 : vector<8x512xf32>
    %31 = vector.extract_strided_slice %27 {offsets = [0, 0], sizes = [8, 128], strides = [1, 1]} : vector<8x512xf32> to vector<8x128xf32>
    %32 = arith.negf %31 : vector<8x128xf32>
    %33 = math.exp %32 : vector<8x128xf32>
    %cst_19 = arith.constant 1.000000e+00 : f32
    %34 = vector.broadcast %cst_19 : f32 to vector<8x128xf32>
    %35 = arith.addf %34, %33 : vector<8x128xf32>
    %36 = arith.divf %34, %35 : vector<8x128xf32>
    %37 = vector.extract_strided_slice %27 {offsets = [0, 128], sizes = [8, 128], strides = [1, 1]} : vector<8x512xf32> to vector<8x128xf32>
    %38 = arith.negf %37 : vector<8x128xf32>
    %39 = math.exp %38 : vector<8x128xf32>
    %cst_20 = arith.constant 1.000000e+00 : f32
    %40 = vector.broadcast %cst_20 : f32 to vector<8x128xf32>
    %41 = arith.addf %40, %39 : vector<8x128xf32>
    %42 = arith.divf %40, %41 : vector<8x128xf32>
    %43 = vector.extract_strided_slice %27 {offsets = [0, 256], sizes = [8, 128], strides = [1, 1]} : vector<8x512xf32> to vector<8x128xf32>
    %44 = math.tanh %43 : vector<8x128xf32>
    %45 = vector.extract_strided_slice %27 {offsets = [0, 384], sizes = [8, 128], strides = [1, 1]} : vector<8x512xf32> to vector<8x128xf32>
    %46 = arith.negf %45 : vector<8x128xf32>
    %47 = math.exp %46 : vector<8x128xf32>
    %cst_21 = arith.constant 1.000000e+00 : f32
    %48 = vector.broadcast %cst_21 : f32 to vector<8x128xf32>
    %49 = arith.addf %48, %47 : vector<8x128xf32>
    %50 = arith.divf %48, %49 : vector<8x128xf32>
    %51 = arith.mulf %42, %22 : vector<8x128xf32>
    %52 = arith.mulf %36, %44 : vector<8x128xf32>
    %53 = arith.addf %51, %52 : vector<8x128xf32>
    %54 = math.tanh %53 : vector<8x128xf32>
    %55 = arith.mulf %50, %54 : vector<8x128xf32>
    %56 = vector.extract_strided_slice %30 {offsets = [0, 0], sizes = [8, 128], strides = [1, 1]} : vector<8x512xf32> to vector<8x128xf32>
    %57 = arith.negf %56 : vector<8x128xf32>
    %58 = math.exp %57 : vector<8x128xf32>
    %cst_22 = arith.constant 1.000000e+00 : f32
    %59 = vector.broadcast %cst_22 : f32 to vector<8x128xf32>
    %60 = arith.addf %59, %58 : vector<8x128xf32>
    %61 = arith.divf %59, %60 : vector<8x128xf32>
    %62 = vector.extract_strided_slice %30 {offsets = [0, 128], sizes = [8, 128], strides = [1, 1]} : vector<8x512xf32> to vector<8x128xf32>
    %63 = arith.negf %62 : vector<8x128xf32>
    %64 = math.exp %63 : vector<8x128xf32>
    %cst_23 = arith.constant 1.000000e+00 : f32
    %65 = vector.broadcast %cst_23 : f32 to vector<8x128xf32>
    %66 = arith.addf %65, %64 : vector<8x128xf32>
    %67 = arith.divf %65, %66 : vector<8x128xf32>
    %68 = vector.extract_strided_slice %30 {offsets = [0, 256], sizes = [8, 128], strides = [1, 1]} : vector<8x512xf32> to vector<8x128xf32>
    %69 = math.tanh %68 : vector<8x128xf32>
    %70 = vector.extract_strided_slice %30 {offsets = [0, 384], sizes = [8, 128], strides = [1, 1]} : vector<8x512xf32> to vector<8x128xf32>
    %71 = arith.negf %70 : vector<8x128xf32>
    %72 = math.exp %71 : vector<8x128xf32>
    %cst_24 = arith.constant 1.000000e+00 : f32
    %73 = vector.broadcast %cst_24 : f32 to vector<8x128xf32>
    %74 = arith.addf %73, %72 : vector<8x128xf32>
    %75 = arith.divf %73, %74 : vector<8x128xf32>
    %76 = arith.mulf %67, %24 : vector<8x128xf32>
    %77 = arith.mulf %61, %69 : vector<8x128xf32>
    %78 = arith.addf %76, %77 : vector<8x128xf32>
    %79 = math.tanh %78 : vector<8x128xf32>
    %80 = arith.mulf %75, %79 : vector<8x128xf32>
    %81 = arith.truncf %55 : vector<8x128xf32> to vector<8x128xbf16>
    %82 = arith.truncf %80 : vector<8x128xf32> to vector<8x128xbf16>
    %c0_25 = arith.constant 0 : index
    %c0_26 = arith.constant 0 : index
    %83 = vector.load %arg18[%c0_25, %c0_26] : memref<64x256xbf16, #tpu.memory_space<vmem>>, vector<8x128xbf16>
    tpu.vector_store %arg18[%c0_25, %c0_26], %81 {strides = array<i32>} : memref<64x256xbf16, #tpu.memory_space<vmem>>, vector<8x128xbf16>,
    %c56_27 = arith.constant 56 : index
    %c128 = arith.constant 128 : index
    %84 = vector.load %arg18[%c56_27, %c128] : memref<64x256xbf16, #tpu.memory_space<vmem>>, vector<8x128xbf16>
    tpu.vector_store %arg18[%c56_27, %c128], %82 {strides = array<i32>} : memref<64x256xbf16, #tpu.memory_space<vmem>>, vector<8x128xbf16>,
    %cst_28 = arith.constant dense<0.000000e+00> : vector<8x512xf32>
    %85 = tpu.matmul %81, %19, %cst_28 {dimension_numbers = #tpu.dot_dimension_numbers<[1], [0], [0], [1], [0, 0, 1, 1], [], []>} : vector<8x128xbf16>, vector<128x512xbf16>, vector<8x512xf32> -> vector<8x512xf32>
    %c8 = arith.constant 8 : index
    %c0_29 = arith.constant 0 : index
    %86 = vector.load %arg17[%c8, %c0_29] : memref<64x1024xf32, #tpu.memory_space<vmem>>, vector<8x512xf32>
    %87 = arith.addf %85, %86 : vector<8x512xf32>
    %cst_30 = arith.constant dense<0.000000e+00> : vector<8x512xf32>
    %88 = tpu.matmul %82, %20, %cst_30 {dimension_numbers = #tpu.dot_dimension_numbers<[1], [0], [0], [1], [0, 0, 1, 1], [], []>} : vector<8x128xbf16>, vector<128x512xbf16>, vector<8x512xf32> -> vector<8x512xf32>
    %c48 = arith.constant 48 : index
    %c512_31 = arith.constant 512 : index
    %89 = vector.load %arg17[%c48, %c512_31] : memref<64x1024xf32, #tpu.memory_space<vmem>>, vector<8x512xf32>
    %90 = arith.addf %88, %89 : vector<8x512xf32>
    %91 = vector.extract_strided_slice %87 {offsets = [0, 0], sizes = [8, 128], strides = [1, 1]} : vector<8x512xf32> to vector<8x128xf32>
    %92 = arith.negf %91 : vector<8x128xf32>
    %93 = math.exp %92 : vector<8x128xf32>
    %cst_32 = arith.constant 1.000000e+00 : f32
    %94 = vector.broadcast %cst_32 : f32 to vector<8x128xf32>
    %95 = arith.addf %94, %93 : vector<8x128xf32>
    %96 = arith.divf %94, %95 : vector<8x128xf32>
    %97 = vector.extract_strided_slice %87 {offsets = [0, 128], sizes = [8, 128], strides = [1, 1]} : vector<8x512xf32> to vector<8x128xf32>
    %98 = arith.negf %97 : vector<8x128xf32>
    %99 = math.exp %98 : vector<8x128xf32>
    %cst_33 = arith.constant 1.000000e+00 : f32
    %100 = vector.broadcast %cst_33 : f32 to vector<8x128xf32>
    %101 = arith.addf %100, %99 : vector<8x128xf32>
    %102 = arith.divf %100, %101 : vector<8x128xf32>
    %103 = vector.extract_strided_slice %87 {offsets = [0, 256], sizes = [8, 128], strides = [1, 1]} : vector<8x512xf32> to vector<8x128xf32>
    %104 = math.tanh %103 : vector<8x128xf32>
    %105 = vector.extract_strided_slice %87 {offsets = [0, 384], sizes = [8, 128], strides = [1, 1]} : vector<8x512xf32> to vector<8x128xf32>
    %106 = arith.negf %105 : vector<8x128xf32>
    %107 = math.exp %106 : vector<8x128xf32>
    %cst_34 = arith.constant 1.000000e+00 : f32
    %108 = vector.broadcast %cst_34 : f32 to vector<8x128xf32>
    %109 = arith.addf %108, %107 : vector<8x128xf32>
    %110 = arith.divf %108, %109 : vector<8x128xf32>
    %111 = arith.mulf %102, %53 : vector<8x128xf32>
    %112 = arith.mulf %96, %104 : vector<8x128xf32>
    %113 = arith.addf %111, %112 : vector<8x128xf32>
    %114 = math.tanh %113 : vector<8x128xf32>
    %115 = arith.mulf %110, %114 : vector<8x128xf32>
    %116 = vector.extract_strided_slice %90 {offsets = [0, 0], sizes = [8, 128], strides = [1, 1]} : vector<8x512xf32> to vector<8x128xf32>
    %117 = arith.negf %116 : vector<8x128xf32>
    %118 = math.exp %117 : vector<8x128xf32>
    %cst_35 = arith.constant 1.000000e+00 : f32
    %119 = vector.broadcast %cst_35 : f32 to vector<8x128xf32>
    %120 = arith.addf %119, %118 : vector<8x128xf32>
    %121 = arith.divf %119, %120 : vector<8x128xf32>
    %122 = vector.extract_strided_slice %90 {offsets = [0, 128], sizes = [8, 128], strides = [1, 1]} : vector<8x512xf32> to vector<8x128xf32>
    %123 = arith.negf %122 : vector<8x128xf32>
    %124 = math.exp %123 : vector<8x128xf32>
    %cst_36 = arith.constant 1.000000e+00 : f32
    %125 = vector.broadcast %cst_36 : f32 to vector<8x128xf32>
    %126 = arith.addf %125, %124 : vector<8x128xf32>
    %127 = arith.divf %125, %126 : vector<8x128xf32>
    %128 = vector.extract_strided_slice %90 {offsets = [0, 256], sizes = [8, 128], strides = [1, 1]} : vector<8x512xf32> to vector<8x128xf32>
    %129 = math.tanh %128 : vector<8x128xf32>
    %130 = vector.extract_strided_slice %90 {offsets = [0, 384], sizes = [8, 128], strides = [1, 1]} : vector<8x512xf32> to vector<8x128xf32>
    %131 = arith.negf %130 : vector<8x128xf32>
    %132 = math.exp %131 : vector<8x128xf32>
    %cst_37 = arith.constant 1.000000e+00 : f32
    %133 = vector.broadcast %cst_37 : f32 to vector<8x128xf32>
    %134 = arith.addf %133, %132 : vector<8x128xf32>
    %135 = arith.divf %133, %134 : vector<8x128xf32>
    %136 = arith.mulf %127, %78 : vector<8x128xf32>
    %137 = arith.mulf %121, %129 : vector<8x128xf32>
    %138 = arith.addf %136, %137 : vector<8x128xf32>
    %139 = math.tanh %138 : vector<8x128xf32>
    %140 = arith.mulf %135, %139 : vector<8x128xf32>
    %141 = arith.truncf %115 : vector<8x128xf32> to vector<8x128xbf16>
    %142 = arith.truncf %140 : vector<8x128xf32> to vector<8x128xbf16>
    %c8_38 = arith.constant 8 : index
    %c0_39 = arith.constant 0 : index
    %143 = vector.load %arg18[%c8_38, %c0_39] : memref<64x256xbf16, #tpu.memory_space<vmem>>, vector<8x128xbf16>
    tpu.vector_store %arg18[%c8_38, %c0_39], %141 {strides = array<i32>} : memref<64x256xbf16, #tpu.memory_space<vmem>>, vector<8x128xbf16>,
    %c48_40 = arith.constant 48 : index
    %c128_41 = arith.constant 128 : index
    %144 = vector.load %arg18[%c48_40, %c128_41] : memref<64x256xbf16, #tpu.memory_space<vmem>>, vector<8x128xbf16>
    tpu.vector_store %arg18[%c48_40, %c128_41], %142 {strides = array<i32>} : memref<64x256xbf16, #tpu.memory_space<vmem>>, vector<8x128xbf16>,
    %cst_42 = arith.constant dense<0.000000e+00> : vector<8x512xf32>
    %145 = tpu.matmul %141, %19, %cst_42 {dimension_numbers = #tpu.dot_dimension_numbers<[1], [0], [0], [1], [0, 0, 1, 1], [], []>} : vector<8x128xbf16>, vector<128x512xbf16>, vector<8x512xf32> -> vector<8x512xf32>
    %c16 = arith.constant 16 : index
    %c0_43 = arith.constant 0 : index
    %146 = vector.load %arg17[%c16, %c0_43] : memref<64x1024xf32, #tpu.memory_space<vmem>>, vector<8x512xf32>
    %147 = arith.addf %145, %146 : vector<8x512xf32>
    %cst_44 = arith.constant dense<0.000000e+00> : vector<8x512xf32>
    %148 = tpu.matmul %142, %20, %cst_44 {dimension_numbers = #tpu.dot_dimension_numbers<[1], [0], [0], [1], [0, 0, 1, 1], [], []>} : vector<8x128xbf16>, vector<128x512xbf16>, vector<8x512xf32> -> vector<8x512xf32>
    %c40 = arith.constant 40 : index
    %c512_45 = arith.constant 512 : index
    %149 = vector.load %arg17[%c40, %c512_45] : memref<64x1024xf32, #tpu.memory_space<vmem>>, vector<8x512xf32>
    %150 = arith.addf %148, %149 : vector<8x512xf32>
    %151 = vector.extract_strided_slice %147 {offsets = [0, 0], sizes = [8, 128], strides = [1, 1]} : vector<8x512xf32> to vector<8x128xf32>
    %152 = arith.negf %151 : vector<8x128xf32>
    %153 = math.exp %152 : vector<8x128xf32>
    %cst_46 = arith.constant 1.000000e+00 : f32
    %154 = vector.broadcast %cst_46 : f32 to vector<8x128xf32>
    %155 = arith.addf %154, %153 : vector<8x128xf32>
    %156 = arith.divf %154, %155 : vector<8x128xf32>
    %157 = vector.extract_strided_slice %147 {offsets = [0, 128], sizes = [8, 128], strides = [1, 1]} : vector<8x512xf32> to vector<8x128xf32>
    %158 = arith.negf %157 : vector<8x128xf32>
    %159 = math.exp %158 : vector<8x128xf32>
    %cst_47 = arith.constant 1.000000e+00 : f32
    %160 = vector.broadcast %cst_47 : f32 to vector<8x128xf32>
    %161 = arith.addf %160, %159 : vector<8x128xf32>
    %162 = arith.divf %160, %161 : vector<8x128xf32>
    %163 = vector.extract_strided_slice %147 {offsets = [0, 256], sizes = [8, 128], strides = [1, 1]} : vector<8x512xf32> to vector<8x128xf32>
    %164 = math.tanh %163 : vector<8x128xf32>
    %165 = vector.extract_strided_slice %147 {offsets = [0, 384], sizes = [8, 128], strides = [1, 1]} : vector<8x512xf32> to vector<8x128xf32>
    %166 = arith.negf %165 : vector<8x128xf32>
    %167 = math.exp %166 : vector<8x128xf32>
    %cst_48 = arith.constant 1.000000e+00 : f32
    %168 = vector.broadcast %cst_48 : f32 to vector<8x128xf32>
    %169 = arith.addf %168, %167 : vector<8x128xf32>
    %170 = arith.divf %168, %169 : vector<8x128xf32>
    %171 = arith.mulf %162, %113 : vector<8x128xf32>
    %172 = arith.mulf %156, %164 : vector<8x128xf32>
    %173 = arith.addf %171, %172 : vector<8x128xf32>
    %174 = math.tanh %173 : vector<8x128xf32>
    %175 = arith.mulf %170, %174 : vector<8x128xf32>
    %176 = vector.extract_strided_slice %150 {offsets = [0, 0], sizes = [8, 128], strides = [1, 1]} : vector<8x512xf32> to vector<8x128xf32>
    %177 = arith.negf %176 : vector<8x128xf32>
    %178 = math.exp %177 : vector<8x128xf32>
    %cst_49 = arith.constant 1.000000e+00 : f32
    %179 = vector.broadcast %cst_49 : f32 to vector<8x128xf32>
    %180 = arith.addf %179, %178 : vector<8x128xf32>
    %181 = arith.divf %179, %180 : vector<8x128xf32>
    %182 = vector.extract_strided_slice %150 {offsets = [0, 128], sizes = [8, 128], strides = [1, 1]} : vector<8x512xf32> to vector<8x128xf32>
    %183 = arith.negf %182 : vector<8x128xf32>
    %184 = math.exp %183 : vector<8x128xf32>
    %cst_50 = arith.constant 1.000000e+00 : f32
    %185 = vector.broadcast %cst_50 : f32 to vector<8x128xf32>
    %186 = arith.addf %185, %184 : vector<8x128xf32>
    %187 = arith.divf %185, %186 : vector<8x128xf32>
    %188 = vector.extract_strided_slice %150 {offsets = [0, 256], sizes = [8, 128], strides = [1, 1]} : vector<8x512xf32> to vector<8x128xf32>
    %189 = math.tanh %188 : vector<8x128xf32>
    %190 = vector.extract_strided_slice %150 {offsets = [0, 384], sizes = [8, 128], strides = [1, 1]} : vector<8x512xf32> to vector<8x128xf32>
    %191 = arith.negf %190 : vector<8x128xf32>
    %192 = math.exp %191 : vector<8x128xf32>
    %cst_51 = arith.constant 1.000000e+00 : f32
    %193 = vector.broadcast %cst_51 : f32 to vector<8x128xf32>
    %194 = arith.addf %193, %192 : vector<8x128xf32>
    %195 = arith.divf %193, %194 : vector<8x128xf32>
    %196 = arith.mulf %187, %138 : vector<8x128xf32>
    %197 = arith.mulf %181, %189 : vector<8x128xf32>
    %198 = arith.addf %196, %197 : vector<8x128xf32>
    %199 = math.tanh %198 : vector<8x128xf32>
    %200 = arith.mulf %195, %199 : vector<8x128xf32>
    %201 = arith.truncf %175 : vector<8x128xf32> to vector<8x128xbf16>
    %202 = arith.truncf %200 : vector<8x128xf32> to vector<8x128xbf16>
    %c16_52 = arith.constant 16 : index
    %c0_53 = arith.constant 0 : index
    %203 = vector.load %arg18[%c16_52, %c0_53] : memref<64x256xbf16, #tpu.memory_space<vmem>>, vector<8x128xbf16>
    tpu.vector_store %arg18[%c16_52, %c0_53], %201 {strides = array<i32>} : memref<64x256xbf16, #tpu.memory_space<vmem>>, vector<8x128xbf16>,
    %c40_54 = arith.constant 40 : index
    %c128_55 = arith.constant 128 : index
    %204 = vector.load %arg18[%c40_54, %c128_55] : memref<64x256xbf16, #tpu.memory_space<vmem>>, vector<8x128xbf16>
    tpu.vector_store %arg18[%c40_54, %c128_55], %202 {strides = array<i32>} : memref<64x256xbf16, #tpu.memory_space<vmem>>, vector<8x128xbf16>,
    %cst_56 = arith.constant dense<0.000000e+00> : vector<8x512xf32>
    %205 = tpu.matmul %201, %19, %cst_56 {dimension_numbers = #tpu.dot_dimension_numbers<[1], [0], [0], [1], [0, 0, 1, 1], [], []>} : vector<8x128xbf16>, vector<128x512xbf16>, vector<8x512xf32> -> vector<8x512xf32>
    %c24 = arith.constant 24 : index
    %c0_57 = arith.constant 0 : index
    %206 = vector.load %arg17[%c24, %c0_57] : memref<64x1024xf32, #tpu.memory_space<vmem>>, vector<8x512xf32>
    %207 = arith.addf %205, %206 : vector<8x512xf32>
    %cst_58 = arith.constant dense<0.000000e+00> : vector<8x512xf32>
    %208 = tpu.matmul %202, %20, %cst_58 {dimension_numbers = #tpu.dot_dimension_numbers<[1], [0], [0], [1], [0, 0, 1, 1], [], []>} : vector<8x128xbf16>, vector<128x512xbf16>, vector<8x512xf32> -> vector<8x512xf32>
    %c32 = arith.constant 32 : index
    %c512_59 = arith.constant 512 : index
    %209 = vector.load %arg17[%c32, %c512_59] : memref<64x1024xf32, #tpu.memory_space<vmem>>, vector<8x512xf32>
    %210 = arith.addf %208, %209 : vector<8x512xf32>
    %211 = vector.extract_strided_slice %207 {offsets = [0, 0], sizes = [8, 128], strides = [1, 1]} : vector<8x512xf32> to vector<8x128xf32>
    %212 = arith.negf %211 : vector<8x128xf32>
    %213 = math.exp %212 : vector<8x128xf32>
    %cst_60 = arith.constant 1.000000e+00 : f32
    %214 = vector.broadcast %cst_60 : f32 to vector<8x128xf32>
    %215 = arith.addf %214, %213 : vector<8x128xf32>
    %216 = arith.divf %214, %215 : vector<8x128xf32>
    %217 = vector.extract_strided_slice %207 {offsets = [0, 128], sizes = [8, 128], strides = [1, 1]} : vector<8x512xf32> to vector<8x128xf32>
    %218 = arith.negf %217 : vector<8x128xf32>
    %219 = math.exp %218 : vector<8x128xf32>
    %cst_61 = arith.constant 1.000000e+00 : f32
    %220 = vector.broadcast %cst_61 : f32 to vector<8x128xf32>
    %221 = arith.addf %220, %219 : vector<8x128xf32>
    %222 = arith.divf %220, %221 : vector<8x128xf32>
    %223 = vector.extract_strided_slice %207 {offsets = [0, 256], sizes = [8, 128], strides = [1, 1]} : vector<8x512xf32> to vector<8x128xf32>
    %224 = math.tanh %223 : vector<8x128xf32>
    %225 = vector.extract_strided_slice %207 {offsets = [0, 384], sizes = [8, 128], strides = [1, 1]} : vector<8x512xf32> to vector<8x128xf32>
    %226 = arith.negf %225 : vector<8x128xf32>
    %227 = math.exp %226 : vector<8x128xf32>
    %cst_62 = arith.constant 1.000000e+00 : f32
    %228 = vector.broadcast %cst_62 : f32 to vector<8x128xf32>
    %229 = arith.addf %228, %227 : vector<8x128xf32>
    %230 = arith.divf %228, %229 : vector<8x128xf32>
    %231 = arith.mulf %222, %173 : vector<8x128xf32>
    %232 = arith.mulf %216, %224 : vector<8x128xf32>
    %233 = arith.addf %231, %232 : vector<8x128xf32>
    %234 = math.tanh %233 : vector<8x128xf32>
    %235 = arith.mulf %230, %234 : vector<8x128xf32>
    %236 = vector.extract_strided_slice %210 {offsets = [0, 0], sizes = [8, 128], strides = [1, 1]} : vector<8x512xf32> to vector<8x128xf32>
    %237 = arith.negf %236 : vector<8x128xf32>
    %238 = math.exp %237 : vector<8x128xf32>
    %cst_63 = arith.constant 1.000000e+00 : f32
    %239 = vector.broadcast %cst_63 : f32 to vector<8x128xf32>
    %240 = arith.addf %239, %238 : vector<8x128xf32>
    %241 = arith.divf %239, %240 : vector<8x128xf32>
    %242 = vector.extract_strided_slice %210 {offsets = [0, 128], sizes = [8, 128], strides = [1, 1]} : vector<8x512xf32> to vector<8x128xf32>
    %243 = arith.negf %242 : vector<8x128xf32>
    %244 = math.exp %243 : vector<8x128xf32>
    %cst_64 = arith.constant 1.000000e+00 : f32
    %245 = vector.broadcast %cst_64 : f32 to vector<8x128xf32>
    %246 = arith.addf %245, %244 : vector<8x128xf32>
    %247 = arith.divf %245, %246 : vector<8x128xf32>
    %248 = vector.extract_strided_slice %210 {offsets = [0, 256], sizes = [8, 128], strides = [1, 1]} : vector<8x512xf32> to vector<8x128xf32>
    %249 = math.tanh %248 : vector<8x128xf32>
    %250 = vector.extract_strided_slice %210 {offsets = [0, 384], sizes = [8, 128], strides = [1, 1]} : vector<8x512xf32> to vector<8x128xf32>
    %251 = arith.negf %250 : vector<8x128xf32>
    %252 = math.exp %251 : vector<8x128xf32>
    %cst_65 = arith.constant 1.000000e+00 : f32
    %253 = vector.broadcast %cst_65 : f32 to vector<8x128xf32>
    %254 = arith.addf %253, %252 : vector<8x128xf32>
    %255 = arith.divf %253, %254 : vector<8x128xf32>
    %256 = arith.mulf %247, %198 : vector<8x128xf32>
    %257 = arith.mulf %241, %249 : vector<8x128xf32>
    %258 = arith.addf %256, %257 : vector<8x128xf32>
    %259 = math.tanh %258 : vector<8x128xf32>
    %260 = arith.mulf %255, %259 : vector<8x128xf32>
    %261 = arith.truncf %235 : vector<8x128xf32> to vector<8x128xbf16>
    %262 = arith.truncf %260 : vector<8x128xf32> to vector<8x128xbf16>
    %c24_66 = arith.constant 24 : index
    %c0_67 = arith.constant 0 : index
    %263 = vector.load %arg18[%c24_66, %c0_67] : memref<64x256xbf16, #tpu.memory_space<vmem>>, vector<8x128xbf16>
    tpu.vector_store %arg18[%c24_66, %c0_67], %261 {strides = array<i32>} : memref<64x256xbf16, #tpu.memory_space<vmem>>, vector<8x128xbf16>,
    %c32_68 = arith.constant 32 : index
    %c128_69 = arith.constant 128 : index
    %264 = vector.load %arg18[%c32_68, %c128_69] : memref<64x256xbf16, #tpu.memory_space<vmem>>, vector<8x128xbf16>
    tpu.vector_store %arg18[%c32_68, %c128_69], %262 {strides = array<i32>} : memref<64x256xbf16, #tpu.memory_space<vmem>>, vector<8x128xbf16>,
    %cst_70 = arith.constant dense<0.000000e+00> : vector<8x512xf32>
    %265 = tpu.matmul %261, %19, %cst_70 {dimension_numbers = #tpu.dot_dimension_numbers<[1], [0], [0], [1], [0, 0, 1, 1], [], []>} : vector<8x128xbf16>, vector<128x512xbf16>, vector<8x512xf32> -> vector<8x512xf32>
    %c32_71 = arith.constant 32 : index
    %c0_72 = arith.constant 0 : index
    %266 = vector.load %arg17[%c32_71, %c0_72] : memref<64x1024xf32, #tpu.memory_space<vmem>>, vector<8x512xf32>
    %267 = arith.addf %265, %266 : vector<8x512xf32>
    %cst_73 = arith.constant dense<0.000000e+00> : vector<8x512xf32>
    %268 = tpu.matmul %262, %20, %cst_73 {dimension_numbers = #tpu.dot_dimension_numbers<[1], [0], [0], [1], [0, 0, 1, 1], [], []>} : vector<8x128xbf16>, vector<128x512xbf16>, vector<8x512xf32> -> vector<8x512xf32>
    %c24_74 = arith.constant 24 : index
    %c512_75 = arith.constant 512 : index
    %269 = vector.load %arg17[%c24_74, %c512_75] : memref<64x1024xf32, #tpu.memory_space<vmem>>, vector<8x512xf32>
    %270 = arith.addf %268, %269 : vector<8x512xf32>
    %271 = vector.extract_strided_slice %267 {offsets = [0, 0], sizes = [8, 128], strides = [1, 1]} : vector<8x512xf32> to vector<8x128xf32>
    %272 = arith.negf %271 : vector<8x128xf32>
    %273 = math.exp %272 : vector<8x128xf32>
    %cst_76 = arith.constant 1.000000e+00 : f32
    %274 = vector.broadcast %cst_76 : f32 to vector<8x128xf32>
    %275 = arith.addf %274, %273 : vector<8x128xf32>
    %276 = arith.divf %274, %275 : vector<8x128xf32>
    %277 = vector.extract_strided_slice %267 {offsets = [0, 128], sizes = [8, 128], strides = [1, 1]} : vector<8x512xf32> to vector<8x128xf32>
    %278 = arith.negf %277 : vector<8x128xf32>
    %279 = math.exp %278 : vector<8x128xf32>
    %cst_77 = arith.constant 1.000000e+00 : f32
    %280 = vector.broadcast %cst_77 : f32 to vector<8x128xf32>
    %281 = arith.addf %280, %279 : vector<8x128xf32>
    %282 = arith.divf %280, %281 : vector<8x128xf32>
    %283 = vector.extract_strided_slice %267 {offsets = [0, 256], sizes = [8, 128], strides = [1, 1]} : vector<8x512xf32> to vector<8x128xf32>
    %284 = math.tanh %283 : vector<8x128xf32>
    %285 = vector.extract_strided_slice %267 {offsets = [0, 384], sizes = [8, 128], strides = [1, 1]} : vector<8x512xf32> to vector<8x128xf32>
    %286 = arith.negf %285 : vector<8x128xf32>
    %287 = math.exp %286 : vector<8x128xf32>
    %cst_78 = arith.constant 1.000000e+00 : f32
    %288 = vector.broadcast %cst_78 : f32 to vector<8x128xf32>
    %289 = arith.addf %288, %287 : vector<8x128xf32>
    %290 = arith.divf %288, %289 : vector<8x128xf32>
    %291 = arith.mulf %282, %233 : vector<8x128xf32>
    %292 = arith.mulf %276, %284 : vector<8x128xf32>
    %293 = arith.addf %291, %292 : vector<8x128xf32>
    %294 = math.tanh %293 : vector<8x128xf32>
    %295 = arith.mulf %290, %294 : vector<8x128xf32>
    %296 = vector.extract_strided_slice %270 {offsets = [0, 0], sizes = [8, 128], strides = [1, 1]} : vector<8x512xf32> to vector<8x128xf32>
    %297 = arith.negf %296 : vector<8x128xf32>
    %298 = math.exp %297 : vector<8x128xf32>
    %cst_79 = arith.constant 1.000000e+00 : f32
    %299 = vector.broadcast %cst_79 : f32 to vector<8x128xf32>
    %300 = arith.addf %299, %298 : vector<8x128xf32>
    %301 = arith.divf %299, %300 : vector<8x128xf32>
    %302 = vector.extract_strided_slice %270 {offsets = [0, 128], sizes = [8, 128], strides = [1, 1]} : vector<8x512xf32> to vector<8x128xf32>
    %303 = arith.negf %302 : vector<8x128xf32>
    %304 = math.exp %303 : vector<8x128xf32>
    %cst_80 = arith.constant 1.000000e+00 : f32
    %305 = vector.broadcast %cst_80 : f32 to vector<8x128xf32>
    %306 = arith.addf %305, %304 : vector<8x128xf32>
    %307 = arith.divf %305, %306 : vector<8x128xf32>
    %308 = vector.extract_strided_slice %270 {offsets = [0, 256], sizes = [8, 128], strides = [1, 1]} : vector<8x512xf32> to vector<8x128xf32>
    %309 = math.tanh %308 : vector<8x128xf32>
    %310 = vector.extract_strided_slice %270 {offsets = [0, 384], sizes = [8, 128], strides = [1, 1]} : vector<8x512xf32> to vector<8x128xf32>
    %311 = arith.negf %310 : vector<8x128xf32>
    %312 = math.exp %311 : vector<8x128xf32>
    %cst_81 = arith.constant 1.000000e+00 : f32
    %313 = vector.broadcast %cst_81 : f32 to vector<8x128xf32>
    %314 = arith.addf %313, %312 : vector<8x128xf32>
    %315 = arith.divf %313, %314 : vector<8x128xf32>
    %316 = arith.mulf %307, %258 : vector<8x128xf32>
    %317 = arith.mulf %301, %309 : vector<8x128xf32>
    %318 = arith.addf %316, %317 : vector<8x128xf32>
    %319 = math.tanh %318 : vector<8x128xf32>
    %320 = arith.mulf %315, %319 : vector<8x128xf32>
    %321 = arith.truncf %295 : vector<8x128xf32> to vector<8x128xbf16>
    %322 = arith.truncf %320 : vector<8x128xf32> to vector<8x128xbf16>
    %c32_82 = arith.constant 32 : index
    %c0_83 = arith.constant 0 : index
    %323 = vector.load %arg18[%c32_82, %c0_83] : memref<64x256xbf16, #tpu.memory_space<vmem>>, vector<8x128xbf16>
    tpu.vector_store %arg18[%c32_82, %c0_83], %321 {strides = array<i32>} : memref<64x256xbf16, #tpu.memory_space<vmem>>, vector<8x128xbf16>,
    %c24_84 = arith.constant 24 : index
    %c128_85 = arith.constant 128 : index
    %324 = vector.load %arg18[%c24_84, %c128_85] : memref<64x256xbf16, #tpu.memory_space<vmem>>, vector<8x128xbf16>
    tpu.vector_store %arg18[%c24_84, %c128_85], %322 {strides = array<i32>} : memref<64x256xbf16, #tpu.memory_space<vmem>>, vector<8x128xbf16>,
    %cst_86 = arith.constant dense<0.000000e+00> : vector<8x512xf32>
    %325 = tpu.matmul %321, %19, %cst_86 {dimension_numbers = #tpu.dot_dimension_numbers<[1], [0], [0], [1], [0, 0, 1, 1], [], []>} : vector<8x128xbf16>, vector<128x512xbf16>, vector<8x512xf32> -> vector<8x512xf32>
    %c40_87 = arith.constant 40 : index
    %c0_88 = arith.constant 0 : index
    %326 = vector.load %arg17[%c40_87, %c0_88] : memref<64x1024xf32, #tpu.memory_space<vmem>>, vector<8x512xf32>
    %327 = arith.addf %325, %326 : vector<8x512xf32>
    %cst_89 = arith.constant dense<0.000000e+00> : vector<8x512xf32>
    %328 = tpu.matmul %322, %20, %cst_89 {dimension_numbers = #tpu.dot_dimension_numbers<[1], [0], [0], [1], [0, 0, 1, 1], [], []>} : vector<8x128xbf16>, vector<128x512xbf16>, vector<8x512xf32> -> vector<8x512xf32>
    %c16_90 = arith.constant 16 : index
    %c512_91 = arith.constant 512 : index
    %329 = vector.load %arg17[%c16_90, %c512_91] : memref<64x1024xf32, #tpu.memory_space<vmem>>, vector<8x512xf32>
    %330 = arith.addf %328, %329 : vector<8x512xf32>
    %331 = vector.extract_strided_slice %327 {offsets = [0, 0], sizes = [8, 128], strides = [1, 1]} : vector<8x512xf32> to vector<8x128xf32>
    %332 = arith.negf %331 : vector<8x128xf32>
    %333 = math.exp %332 : vector<8x128xf32>
    %cst_92 = arith.constant 1.000000e+00 : f32
    %334 = vector.broadcast %cst_92 : f32 to vector<8x128xf32>
    %335 = arith.addf %334, %333 : vector<8x128xf32>
    %336 = arith.divf %334, %335 : vector<8x128xf32>
    %337 = vector.extract_strided_slice %327 {offsets = [0, 128], sizes = [8, 128], strides = [1, 1]} : vector<8x512xf32> to vector<8x128xf32>
    %338 = arith.negf %337 : vector<8x128xf32>
    %339 = math.exp %338 : vector<8x128xf32>
    %cst_93 = arith.constant 1.000000e+00 : f32
    %340 = vector.broadcast %cst_93 : f32 to vector<8x128xf32>
    %341 = arith.addf %340, %339 : vector<8x128xf32>
    %342 = arith.divf %340, %341 : vector<8x128xf32>
    %343 = vector.extract_strided_slice %327 {offsets = [0, 256], sizes = [8, 128], strides = [1, 1]} : vector<8x512xf32> to vector<8x128xf32>
    %344 = math.tanh %343 : vector<8x128xf32>
    %345 = vector.extract_strided_slice %327 {offsets = [0, 384], sizes = [8, 128], strides = [1, 1]} : vector<8x512xf32> to vector<8x128xf32>
    %346 = arith.negf %345 : vector<8x128xf32>
    %347 = math.exp %346 : vector<8x128xf32>
    %cst_94 = arith.constant 1.000000e+00 : f32
    %348 = vector.broadcast %cst_94 : f32 to vector<8x128xf32>
    %349 = arith.addf %348, %347 : vector<8x128xf32>
    %350 = arith.divf %348, %349 : vector<8x128xf32>
    %351 = arith.mulf %342, %293 : vector<8x128xf32>
    %352 = arith.mulf %336, %344 : vector<8x128xf32>
    %353 = arith.addf %351, %352 : vector<8x128xf32>
    %354 = math.tanh %353 : vector<8x128xf32>
    %355 = arith.mulf %350, %354 : vector<8x128xf32>
    %356 = vector.extract_strided_slice %330 {offsets = [0, 0], sizes = [8, 128], strides = [1, 1]} : vector<8x512xf32> to vector<8x128xf32>
    %357 = arith.negf %356 : vector<8x128xf32>
    %358 = math.exp %357 : vector<8x128xf32>
    %cst_95 = arith.constant 1.000000e+00 : f32
    %359 = vector.broadcast %cst_95 : f32 to vector<8x128xf32>
    %360 = arith.addf %359, %358 : vector<8x128xf32>
    %361 = arith.divf %359, %360 : vector<8x128xf32>
    %362 = vector.extract_strided_slice %330 {offsets = [0, 128], sizes = [8, 128], strides = [1, 1]} : vector<8x512xf32> to vector<8x128xf32>
    %363 = arith.negf %362 : vector<8x128xf32>
    %364 = math.exp %363 : vector<8x128xf32>
    %cst_96 = arith.constant 1.000000e+00 : f32
    %365 = vector.broadcast %cst_96 : f32 to vector<8x128xf32>
    %366 = arith.addf %365, %364 : vector<8x128xf32>
    %367 = arith.divf %365, %366 : vector<8x128xf32>
    %368 = vector.extract_strided_slice %330 {offsets = [0, 256], sizes = [8, 128], strides = [1, 1]} : vector<8x512xf32> to vector<8x128xf32>
    %369 = math.tanh %368 : vector<8x128xf32>
    %370 = vector.extract_strided_slice %330 {offsets = [0, 384], sizes = [8, 128], strides = [1, 1]} : vector<8x512xf32> to vector<8x128xf32>
    %371 = arith.negf %370 : vector<8x128xf32>
    %372 = math.exp %371 : vector<8x128xf32>
    %cst_97 = arith.constant 1.000000e+00 : f32
    %373 = vector.broadcast %cst_97 : f32 to vector<8x128xf32>
    %374 = arith.addf %373, %372 : vector<8x128xf32>
    %375 = arith.divf %373, %374 : vector<8x128xf32>
    %376 = arith.mulf %367, %318 : vector<8x128xf32>
    %377 = arith.mulf %361, %369 : vector<8x128xf32>
    %378 = arith.addf %376, %377 : vector<8x128xf32>
    %379 = math.tanh %378 : vector<8x128xf32>
    %380 = arith.mulf %375, %379 : vector<8x128xf32>
    %381 = arith.truncf %355 : vector<8x128xf32> to vector<8x128xbf16>
    %382 = arith.truncf %380 : vector<8x128xf32> to vector<8x128xbf16>
    %c40_98 = arith.constant 40 : index
    %c0_99 = arith.constant 0 : index
    %383 = vector.load %arg18[%c40_98, %c0_99] : memref<64x256xbf16, #tpu.memory_space<vmem>>, vector<8x128xbf16>
    tpu.vector_store %arg18[%c40_98, %c0_99], %381 {strides = array<i32>} : memref<64x256xbf16, #tpu.memory_space<vmem>>, vector<8x128xbf16>,
    %c16_100 = arith.constant 16 : index
    %c128_101 = arith.constant 128 : index
    %384 = vector.load %arg18[%c16_100, %c128_101] : memref<64x256xbf16, #tpu.memory_space<vmem>>, vector<8x128xbf16>
    tpu.vector_store %arg18[%c16_100, %c128_101], %382 {strides = array<i32>} : memref<64x256xbf16, #tpu.memory_space<vmem>>, vector<8x128xbf16>,
    %cst_102 = arith.constant dense<0.000000e+00> : vector<8x512xf32>
    %385 = tpu.matmul %381, %19, %cst_102 {dimension_numbers = #tpu.dot_dimension_numbers<[1], [0], [0], [1], [0, 0, 1, 1], [], []>} : vector<8x128xbf16>, vector<128x512xbf16>, vector<8x512xf32> -> vector<8x512xf32>
    %c48_103 = arith.constant 48 : index
    %c0_104 = arith.constant 0 : index
    %386 = vector.load %arg17[%c48_103, %c0_104] : memref<64x1024xf32, #tpu.memory_space<vmem>>, vector<8x512xf32>
    %387 = arith.addf %385, %386 : vector<8x512xf32>
    %cst_105 = arith.constant dense<0.000000e+00> : vector<8x512xf32>
    %388 = tpu.matmul %382, %20, %cst_105 {dimension_numbers = #tpu.dot_dimension_numbers<[1], [0], [0], [1], [0, 0, 1, 1], [], []>} : vector<8x128xbf16>, vector<128x512xbf16>, vector<8x512xf32> -> vector<8x512xf32>
    %c8_106 = arith.constant 8 : index
    %c512_107 = arith.constant 512 : index
    %389 = vector.load %arg17[%c8_106, %c512_107] : memref<64x1024xf32, #tpu.memory_space<vmem>>, vector<8x512xf32>
    %390 = arith.addf %388, %389 : vector<8x512xf32>
    %391 = vector.extract_strided_slice %387 {offsets = [0, 0], sizes = [8, 128], strides = [1, 1]} : vector<8x512xf32> to vector<8x128xf32>
    %392 = arith.negf %391 : vector<8x128xf32>
    %393 = math.exp %392 : vector<8x128xf32>
    %cst_108 = arith.constant 1.000000e+00 : f32
    %394 = vector.broadcast %cst_108 : f32 to vector<8x128xf32>
    %395 = arith.addf %394, %393 : vector<8x128xf32>
    %396 = arith.divf %394, %395 : vector<8x128xf32>
    %397 = vector.extract_strided_slice %387 {offsets = [0, 128], sizes = [8, 128], strides = [1, 1]} : vector<8x512xf32> to vector<8x128xf32>
    %398 = arith.negf %397 : vector<8x128xf32>
    %399 = math.exp %398 : vector<8x128xf32>
    %cst_109 = arith.constant 1.000000e+00 : f32
    %400 = vector.broadcast %cst_109 : f32 to vector<8x128xf32>
    %401 = arith.addf %400, %399 : vector<8x128xf32>
    %402 = arith.divf %400, %401 : vector<8x128xf32>
    %403 = vector.extract_strided_slice %387 {offsets = [0, 256], sizes = [8, 128], strides = [1, 1]} : vector<8x512xf32> to vector<8x128xf32>
    %404 = math.tanh %403 : vector<8x128xf32>
    %405 = vector.extract_strided_slice %387 {offsets = [0, 384], sizes = [8, 128], strides = [1, 1]} : vector<8x512xf32> to vector<8x128xf32>
    %406 = arith.negf %405 : vector<8x128xf32>
    %407 = math.exp %406 : vector<8x128xf32>
    %cst_110 = arith.constant 1.000000e+00 : f32
    %408 = vector.broadcast %cst_110 : f32 to vector<8x128xf32>
    %409 = arith.addf %408, %407 : vector<8x128xf32>
    %410 = arith.divf %408, %409 : vector<8x128xf32>
    %411 = arith.mulf %402, %353 : vector<8x128xf32>
    %412 = arith.mulf %396, %404 : vector<8x128xf32>
    %413 = arith.addf %411, %412 : vector<8x128xf32>
    %414 = math.tanh %413 : vector<8x128xf32>
    %415 = arith.mulf %410, %414 : vector<8x128xf32>
    %416 = vector.extract_strided_slice %390 {offsets = [0, 0], sizes = [8, 128], strides = [1, 1]} : vector<8x512xf32> to vector<8x128xf32>
    %417 = arith.negf %416 : vector<8x128xf32>
    %418 = math.exp %417 : vector<8x128xf32>
    %cst_111 = arith.constant 1.000000e+00 : f32
    %419 = vector.broadcast %cst_111 : f32 to vector<8x128xf32>
    %420 = arith.addf %419, %418 : vector<8x128xf32>
    %421 = arith.divf %419, %420 : vector<8x128xf32>
    %422 = vector.extract_strided_slice %390 {offsets = [0, 128], sizes = [8, 128], strides = [1, 1]} : vector<8x512xf32> to vector<8x128xf32>
    %423 = arith.negf %422 : vector<8x128xf32>
    %424 = math.exp %423 : vector<8x128xf32>
    %cst_112 = arith.constant 1.000000e+00 : f32
    %425 = vector.broadcast %cst_112 : f32 to vector<8x128xf32>
    %426 = arith.addf %425, %424 : vector<8x128xf32>
    %427 = arith.divf %425, %426 : vector<8x128xf32>
    %428 = vector.extract_strided_slice %390 {offsets = [0, 256], sizes = [8, 128], strides = [1, 1]} : vector<8x512xf32> to vector<8x128xf32>
    %429 = math.tanh %428 : vector<8x128xf32>
    %430 = vector.extract_strided_slice %390 {offsets = [0, 384], sizes = [8, 128], strides = [1, 1]} : vector<8x512xf32> to vector<8x128xf32>
    %431 = arith.negf %430 : vector<8x128xf32>
    %432 = math.exp %431 : vector<8x128xf32>
    %cst_113 = arith.constant 1.000000e+00 : f32
    %433 = vector.broadcast %cst_113 : f32 to vector<8x128xf32>
    %434 = arith.addf %433, %432 : vector<8x128xf32>
    %435 = arith.divf %433, %434 : vector<8x128xf32>
    %436 = arith.mulf %427, %378 : vector<8x128xf32>
    %437 = arith.mulf %421, %429 : vector<8x128xf32>
    %438 = arith.addf %436, %437 : vector<8x128xf32>
    %439 = math.tanh %438 : vector<8x128xf32>
    %440 = arith.mulf %435, %439 : vector<8x128xf32>
    %441 = arith.truncf %415 : vector<8x128xf32> to vector<8x128xbf16>
    %442 = arith.truncf %440 : vector<8x128xf32> to vector<8x128xbf16>
    %c48_114 = arith.constant 48 : index
    %c0_115 = arith.constant 0 : index
    %443 = vector.load %arg18[%c48_114, %c0_115] : memref<64x256xbf16, #tpu.memory_space<vmem>>, vector<8x128xbf16>
    tpu.vector_store %arg18[%c48_114, %c0_115], %441 {strides = array<i32>} : memref<64x256xbf16, #tpu.memory_space<vmem>>, vector<8x128xbf16>,
    %c8_116 = arith.constant 8 : index
    %c128_117 = arith.constant 128 : index
    %444 = vector.load %arg18[%c8_116, %c128_117] : memref<64x256xbf16, #tpu.memory_space<vmem>>, vector<8x128xbf16>
    tpu.vector_store %arg18[%c8_116, %c128_117], %442 {strides = array<i32>} : memref<64x256xbf16, #tpu.memory_space<vmem>>, vector<8x128xbf16>,
    %cst_118 = arith.constant dense<0.000000e+00> : vector<8x512xf32>
    %445 = tpu.matmul %441, %19, %cst_118 {dimension_numbers = #tpu.dot_dimension_numbers<[1], [0], [0], [1], [0, 0, 1, 1], [], []>} : vector<8x128xbf16>, vector<128x512xbf16>, vector<8x512xf32> -> vector<8x512xf32>
    %c56_119 = arith.constant 56 : index
    %c0_120 = arith.constant 0 : index
    %446 = vector.load %arg17[%c56_119, %c0_120] : memref<64x1024xf32, #tpu.memory_space<vmem>>, vector<8x512xf32>
    %447 = arith.addf %445, %446 : vector<8x512xf32>
    %cst_121 = arith.constant dense<0.000000e+00> : vector<8x512xf32>
    %448 = tpu.matmul %442, %20, %cst_121 {dimension_numbers = #tpu.dot_dimension_numbers<[1], [0], [0], [1], [0, 0, 1, 1], [], []>} : vector<8x128xbf16>, vector<128x512xbf16>, vector<8x512xf32> -> vector<8x512xf32>
    %c0_122 = arith.constant 0 : index
    %c512_123 = arith.constant 512 : index
    %449 = vector.load %arg17[%c0_122, %c512_123] : memref<64x1024xf32, #tpu.memory_space<vmem>>, vector<8x512xf32>
    %450 = arith.addf %448, %449 : vector<8x512xf32>
    %451 = vector.extract_strided_slice %447 {offsets = [0, 0], sizes = [8, 128], strides = [1, 1]} : vector<8x512xf32> to vector<8x128xf32>
    %452 = arith.negf %451 : vector<8x128xf32>
    %453 = math.exp %452 : vector<8x128xf32>
    %cst_124 = arith.constant 1.000000e+00 : f32
    %454 = vector.broadcast %cst_124 : f32 to vector<8x128xf32>
    %455 = arith.addf %454, %453 : vector<8x128xf32>
    %456 = arith.divf %454, %455 : vector<8x128xf32>
    %457 = vector.extract_strided_slice %447 {offsets = [0, 128], sizes = [8, 128], strides = [1, 1]} : vector<8x512xf32> to vector<8x128xf32>
    %458 = arith.negf %457 : vector<8x128xf32>
    %459 = math.exp %458 : vector<8x128xf32>
    %cst_125 = arith.constant 1.000000e+00 : f32
    %460 = vector.broadcast %cst_125 : f32 to vector<8x128xf32>
    %461 = arith.addf %460, %459 : vector<8x128xf32>
    %462 = arith.divf %460, %461 : vector<8x128xf32>
    %463 = vector.extract_strided_slice %447 {offsets = [0, 256], sizes = [8, 128], strides = [1, 1]} : vector<8x512xf32> to vector<8x128xf32>
    %464 = math.tanh %463 : vector<8x128xf32>
    %465 = vector.extract_strided_slice %447 {offsets = [0, 384], sizes = [8, 128], strides = [1, 1]} : vector<8x512xf32> to vector<8x128xf32>
    %466 = arith.negf %465 : vector<8x128xf32>
    %467 = math.exp %466 : vector<8x128xf32>
    %cst_126 = arith.constant 1.000000e+00 : f32
    %468 = vector.broadcast %cst_126 : f32 to vector<8x128xf32>
    %469 = arith.addf %468, %467 : vector<8x128xf32>
    %470 = arith.divf %468, %469 : vector<8x128xf32>
    %471 = arith.mulf %462, %413 : vector<8x128xf32>
    %472 = arith.mulf %456, %464 : vector<8x128xf32>
    %473 = arith.addf %471, %472 : vector<8x128xf32>
    %474 = math.tanh %473 : vector<8x128xf32>
    %475 = arith.mulf %470, %474 : vector<8x128xf32>
    %476 = vector.extract_strided_slice %450 {offsets = [0, 0], sizes = [8, 128], strides = [1, 1]} : vector<8x512xf32> to vector<8x128xf32>
    %477 = arith.negf %476 : vector<8x128xf32>
    %478 = math.exp %477 : vector<8x128xf32>
    %cst_127 = arith.constant 1.000000e+00 : f32
    %479 = vector.broadcast %cst_127 : f32 to vector<8x128xf32>
    %480 = arith.addf %479, %478 : vector<8x128xf32>
    %481 = arith.divf %479, %480 : vector<8x128xf32>
    %482 = vector.extract_strided_slice %450 {offsets = [0, 128], sizes = [8, 128], strides = [1, 1]} : vector<8x512xf32> to vector<8x128xf32>
    %483 = arith.negf %482 : vector<8x128xf32>
    %484 = math.exp %483 : vector<8x128xf32>
    %cst_128 = arith.constant 1.000000e+00 : f32
    %485 = vector.broadcast %cst_128 : f32 to vector<8x128xf32>
    %486 = arith.addf %485, %484 : vector<8x128xf32>
    %487 = arith.divf %485, %486 : vector<8x128xf32>
    %488 = vector.extract_strided_slice %450 {offsets = [0, 256], sizes = [8, 128], strides = [1, 1]} : vector<8x512xf32> to vector<8x128xf32>
    %489 = math.tanh %488 : vector<8x128xf32>
    %490 = vector.extract_strided_slice %450 {offsets = [0, 384], sizes = [8, 128], strides = [1, 1]} : vector<8x512xf32> to vector<8x128xf32>
    %491 = arith.negf %490 : vector<8x128xf32>
    %492 = math.exp %491 : vector<8x128xf32>
    %cst_129 = arith.constant 1.000000e+00 : f32
    %493 = vector.broadcast %cst_129 : f32 to vector<8x128xf32>
    %494 = arith.addf %493, %492 : vector<8x128xf32>
    %495 = arith.divf %493, %494 : vector<8x128xf32>
    %496 = arith.mulf %487, %438 : vector<8x128xf32>
    %497 = arith.mulf %481, %489 : vector<8x128xf32>
    %498 = arith.addf %496, %497 : vector<8x128xf32>
    %499 = math.tanh %498 : vector<8x128xf32>
    %500 = arith.mulf %495, %499 : vector<8x128xf32>
    %501 = arith.truncf %475 : vector<8x128xf32> to vector<8x128xbf16>
    %502 = arith.truncf %500 : vector<8x128xf32> to vector<8x128xbf16>
    %c56_130 = arith.constant 56 : index
    %c0_131 = arith.constant 0 : index
    %503 = vector.load %arg18[%c56_130, %c0_131] : memref<64x256xbf16, #tpu.memory_space<vmem>>, vector<8x128xbf16>
    tpu.vector_store %arg18[%c56_130, %c0_131], %501 {strides = array<i32>} : memref<64x256xbf16, #tpu.memory_space<vmem>>, vector<8x128xbf16>,
    %c0_132 = arith.constant 0 : index
    %c128_133 = arith.constant 128 : index
    %504 = vector.load %arg18[%c0_132, %c128_133] : memref<64x256xbf16, #tpu.memory_space<vmem>>, vector<8x128xbf16>
    tpu.vector_store %arg18[%c0_132, %c128_133], %502 {strides = array<i32>} : memref<64x256xbf16, #tpu.memory_space<vmem>>, vector<8x128xbf16>,
    %c0_i32_134 = arith.constant 0 : i32
    %505 = tpu.memref_slice %arg26[%c0_i32_134] : memref<6x!tpu.dma_semaphore, #tpu.memory_space<semaphore_mem>> -> memref<1x!tpu.dma_semaphore, #tpu.memory_space<semaphore_mem>>
    %506 = tpu.memref_squeeze %505 : memref<1x!tpu.dma_semaphore, #tpu.memory_space<semaphore_mem>> -> memref<!tpu.dma_semaphore, #tpu.memory_space<semaphore_mem>>
    tpu.wait_dma2 semaphore(%506 : memref<!tpu.dma_semaphore, #tpu.memory_space<semaphore_mem>>) src(%arg5 : memref<256x512xbf16, #tpu.memory_space<any>>) dst(%arg20 : memref<256x512xbf16, #tpu.memory_space<vmem>>)
    %c1_i32_135 = arith.constant 1 : i32
    %507 = tpu.memref_slice %arg26[%c1_i32_135] : memref<6x!tpu.dma_semaphore, #tpu.memory_space<semaphore_mem>> -> memref<1x!tpu.dma_semaphore, #tpu.memory_space<semaphore_mem>>
    %508 = tpu.memref_squeeze %507 : memref<1x!tpu.dma_semaphore, #tpu.memory_space<semaphore_mem>> -> memref<!tpu.dma_semaphore, #tpu.memory_space<semaphore_mem>>
    tpu.wait_dma2 semaphore(%508 : memref<!tpu.dma_semaphore, #tpu.memory_space<semaphore_mem>>) src(%arg7 : memref<128x512xbf16, #tpu.memory_space<any>>) dst(%arg21 : memref<128x512xbf16, #tpu.memory_space<vmem>>)
    %c2_i32_136 = arith.constant 2 : i32
    %509 = tpu.memref_slice %arg26[%c2_i32_136] : memref<6x!tpu.dma_semaphore, #tpu.memory_space<semaphore_mem>> -> memref<1x!tpu.dma_semaphore, #tpu.memory_space<semaphore_mem>>
    %510 = tpu.memref_squeeze %509 : memref<1x!tpu.dma_semaphore, #tpu.memory_space<semaphore_mem>> -> memref<!tpu.dma_semaphore, #tpu.memory_space<semaphore_mem>>
    tpu.wait_dma2 semaphore(%510 : memref<!tpu.dma_semaphore, #tpu.memory_space<semaphore_mem>>) src(%arg8 : memref<256x512xbf16, #tpu.memory_space<any>>) dst(%arg22 : memref<256x512xbf16, #tpu.memory_space<vmem>>)
    %c3_i32_137 = arith.constant 3 : i32
    %511 = tpu.memref_slice %arg26[%c3_i32_137] : memref<6x!tpu.dma_semaphore, #tpu.memory_space<semaphore_mem>> -> memref<1x!tpu.dma_semaphore, #tpu.memory_space<semaphore_mem>>
    %512 = tpu.memref_squeeze %511 : memref<1x!tpu.dma_semaphore, #tpu.memory_space<semaphore_mem>> -> memref<!tpu.dma_semaphore, #tpu.memory_space<semaphore_mem>>
    tpu.wait_dma2 semaphore(%512 : memref<!tpu.dma_semaphore, #tpu.memory_space<semaphore_mem>>) src(%arg10 : memref<256x256xbf16, #tpu.memory_space<any>>) dst(%arg23 : memref<256x256xbf16, #tpu.memory_space<vmem>>)
    %c4_i32_138 = arith.constant 4 : i32
    %513 = tpu.memref_slice %arg26[%c4_i32_138] : memref<6x!tpu.dma_semaphore, #tpu.memory_space<semaphore_mem>> -> memref<1x!tpu.dma_semaphore, #tpu.memory_space<semaphore_mem>>
    %514 = tpu.memref_squeeze %513 : memref<1x!tpu.dma_semaphore, #tpu.memory_space<semaphore_mem>> -> memref<!tpu.dma_semaphore, #tpu.memory_space<semaphore_mem>>
    tpu.wait_dma2 semaphore(%514 : memref<!tpu.dma_semaphore, #tpu.memory_space<semaphore_mem>>) src(%arg12 : memref<256x128xbf16, #tpu.memory_space<any>>) dst(%arg24 : memref<256x128xbf16, #tpu.memory_space<vmem>>)
    %c5_i32_139 = arith.constant 5 : i32
    %515 = tpu.memref_slice %arg26[%c5_i32_139] : memref<6x!tpu.dma_semaphore, #tpu.memory_space<semaphore_mem>> -> memref<1x!tpu.dma_semaphore, #tpu.memory_space<semaphore_mem>>
    %516 = tpu.memref_squeeze %515 : memref<1x!tpu.dma_semaphore, #tpu.memory_space<semaphore_mem>> -> memref<!tpu.dma_semaphore, #tpu.memory_space<semaphore_mem>>
    tpu.wait_dma2 semaphore(%516 : memref<!tpu.dma_semaphore, #tpu.memory_space<semaphore_mem>>) src(%arg14 : memref<128x128xbf16, #tpu.memory_space<any>>) dst(%arg25 : memref<128x128xbf16, #tpu.memory_space<vmem>>)
    %c0_140 = arith.constant 0 : index
    %c0_141 = arith.constant 0 : index
    %517 = vector.load %arg18[%c0_140, %c0_141] : memref<64x256xbf16, #tpu.memory_space<vmem>>, vector<64x256xbf16>
    %c0_142 = arith.constant 0 : index
    %c0_143 = arith.constant 0 : index
    %518 = vector.load %arg20[%c0_142, %c0_143] : memref<256x512xbf16, #tpu.memory_space<vmem>>, vector<256x512xbf16>
    %cst_144 = arith.constant dense<0.000000e+00> : vector<64x512xf32>
    %519 = tpu.matmul %517, %518, %cst_144 {dimension_numbers = #tpu.dot_dimension_numbers<[1], [0], [0], [1], [0, 0, 1, 1], [], []>} : vector<64x256xbf16>, vector<256x512xbf16>, vector<64x512xf32> -> vector<64x512xf32>
    %c0_145 = arith.constant 0 : index
    %c0_146 = arith.constant 0 : index
    %520 = vector.load %arg6[%c0_145, %c0_146] : memref<1x512xf32, #tpu.memory_space<vmem>>, vector<1x512xf32>
    %521 = vector.broadcast %520 : vector<1x512xf32> to vector<64x512xf32>
    %522 = arith.addf %519, %521 : vector<64x512xf32>
    %c0_147 = arith.constant 0 : index
    %c0_148 = arith.constant 0 : index
    %523 = vector.load %arg19[%c0_147, %c0_148] : memref<64x512xf32, #tpu.memory_space<vmem>>, vector<64x512xf32>
    tpu.vector_store %arg19[%c0_147, %c0_148], %522 {strides = array<i32>} : memref<64x512xf32, #tpu.memory_space<vmem>>, vector<64x512xf32>,
    %c56_149 = arith.constant 56 : index
    %c0_150 = arith.constant 0 : index
    %524 = vector.load %arg18[%c56_149, %c0_150] : memref<64x256xbf16, #tpu.memory_space<vmem>>, vector<8x256xbf16>
    %c0_151 = arith.constant 0 : index
    %c0_152 = arith.constant 0 : index
    %525 = vector.load %arg22[%c0_151, %c0_152] : memref<256x512xbf16, #tpu.memory_space<vmem>>, vector<256x512xbf16>
    %cst_153 = arith.constant dense<0.000000e+00> : vector<8x512xf32>
    %526 = tpu.matmul %524, %525, %cst_153 {dimension_numbers = #tpu.dot_dimension_numbers<[1], [0], [0], [1], [0, 0, 1, 1], [], []>} : vector<8x256xbf16>, vector<256x512xbf16>, vector<8x512xf32> -> vector<8x512xf32>
    %c0_154 = arith.constant 0 : index
    %c0_155 = arith.constant 0 : index
    %527 = vector.load %arg9[%c0_154, %c0_155] : memref<1x512xf32, #tpu.memory_space<vmem>>, vector<1x512xf32>
    %528 = vector.broadcast %527 : vector<1x512xf32> to vector<8x512xf32>
    %529 = arith.addf %526, %528 : vector<8x512xf32>
    %cst_156 = arith.constant 0.000000e+00 : f32
    %530 = vector.broadcast %cst_156 : f32 to vector<8x128xf32>
    %531 = vector.extract_strided_slice %529 {offsets = [0, 0], sizes = [8, 128], strides = [1, 1]} : vector<8x512xf32> to vector<8x128xf32>
    %532 = arith.negf %531 : vector<8x128xf32>
    %533 = math.exp %532 : vector<8x128xf32>
    %cst_157 = arith.constant 1.000000e+00 : f32
    %534 = vector.broadcast %cst_157 : f32 to vector<8x128xf32>
    %535 = arith.addf %534, %533 : vector<8x128xf32>
    %536 = arith.divf %534, %535 : vector<8x128xf32>
    %537 = vector.extract_strided_slice %529 {offsets = [0, 128], sizes = [8, 128], strides = [1, 1]} : vector<8x512xf32> to vector<8x128xf32>
    %538 = arith.negf %537 : vector<8x128xf32>
    %539 = math.exp %538 : vector<8x128xf32>
    %cst_158 = arith.constant 1.000000e+00 : f32
    %540 = vector.broadcast %cst_158 : f32 to vector<8x128xf32>
    %541 = arith.addf %540, %539 : vector<8x128xf32>
    %542 = arith.divf %540, %541 : vector<8x128xf32>
    %543 = vector.extract_strided_slice %529 {offsets = [0, 256], sizes = [8, 128], strides = [1, 1]} : vector<8x512xf32> to vector<8x128xf32>
    %544 = math.tanh %543 : vector<8x128xf32>
    %545 = vector.extract_strided_slice %529 {offsets = [0, 384], sizes = [8, 128], strides = [1, 1]} : vector<8x512xf32> to vector<8x128xf32>
    %546 = arith.negf %545 : vector<8x128xf32>
    %547 = math.exp %546 : vector<8x128xf32>
    %cst_159 = arith.constant 1.000000e+00 : f32
    %548 = vector.broadcast %cst_159 : f32 to vector<8x128xf32>
    %549 = arith.addf %548, %547 : vector<8x128xf32>
    %550 = arith.divf %548, %549 : vector<8x128xf32>
    %551 = arith.mulf %542, %530 : vector<8x128xf32>
    %552 = arith.mulf %536, %544 : vector<8x128xf32>
    %553 = arith.addf %551, %552 : vector<8x128xf32>
    %554 = math.tanh %553 : vector<8x128xf32>
    %555 = arith.mulf %550, %554 : vector<8x128xf32>
    %556 = arith.truncf %555 : vector<8x128xf32> to vector<8x128xbf16>
    %c128_160 = arith.constant 128 : index
    %c0_161 = arith.constant 0 : index
    %557 = vector.load %arg23[%c128_160, %c0_161] : memref<256x256xbf16, #tpu.memory_space<vmem>>, vector<128x256xbf16>
    %cst_162 = arith.constant dense<0.000000e+00> : vector<8x256xf32>
    %558 = tpu.matmul %556, %557, %cst_162 {dimension_numbers = #tpu.dot_dimension_numbers<[1], [0], [0], [1], [0, 0, 1, 1], [], []>} : vector<8x128xbf16>, vector<128x256xbf16>, vector<8x256xf32> -> vector<8x256xf32>
    %c0_163 = arith.constant 0 : index
    %c0_164 = arith.constant 0 : index
    %559 = vector.load %arg21[%c0_163, %c0_164] : memref<128x512xbf16, #tpu.memory_space<vmem>>, vector<128x512xbf16>
    %cst_165 = arith.constant 0.000000e+00 : bf16
    %560 = vector.broadcast %cst_165 : bf16 to vector<8x128xbf16>
    %cst_166 = arith.constant 0.000000e+00 : f32
    %561 = vector.broadcast %cst_166 : f32 to vector<8x128xf32>
    %cst_167 = arith.constant dense<0.000000e+00> : vector<8x512xf32>
    %562 = tpu.matmul %560, %559, %cst_167 {dimension_numbers = #tpu.dot_dimension_numbers<[1], [0], [0], [1], [0, 0, 1, 1], [], []>} : vector<8x128xbf16>, vector<128x512xbf16>, vector<8x512xf32> -> vector<8x512xf32>
    %c0_168 = arith.constant 0 : index
    %c0_169 = arith.constant 0 : index
    %563 = vector.load %arg19[%c0_168, %c0_169] : memref<64x512xf32, #tpu.memory_space<vmem>>, vector<8x512xf32>
    %564 = arith.addf %562, %563 : vector<8x512xf32>
    %565 = vector.extract_strided_slice %564 {offsets = [0, 0], sizes = [8, 128], strides = [1, 1]} : vector<8x512xf32> to vector<8x128xf32>
    %566 = arith.negf %565 : vector<8x128xf32>
    %567 = math.exp %566 : vector<8x128xf32>
    %cst_170 = arith.constant 1.000000e+00 : f32
    %568 = vector.broadcast %cst_170 : f32 to vector<8x128xf32>
    %569 = arith.addf %568, %567 : vector<8x128xf32>
    %570 = arith.divf %568, %569 : vector<8x128xf32>
    %571 = vector.extract_strided_slice %564 {offsets = [0, 128], sizes = [8, 128], strides = [1, 1]} : vector<8x512xf32> to vector<8x128xf32>
    %572 = arith.negf %571 : vector<8x128xf32>
    %573 = math.exp %572 : vector<8x128xf32>
    %cst_171 = arith.constant 1.000000e+00 : f32
    %574 = vector.broadcast %cst_171 : f32 to vector<8x128xf32>
    %575 = arith.addf %574, %573 : vector<8x128xf32>
    %576 = arith.divf %574, %575 : vector<8x128xf32>
    %577 = vector.extract_strided_slice %564 {offsets = [0, 256], sizes = [8, 128], strides = [1, 1]} : vector<8x512xf32> to vector<8x128xf32>
    %578 = math.tanh %577 : vector<8x128xf32>
    %579 = vector.extract_strided_slice %564 {offsets = [0, 384], sizes = [8, 128], strides = [1, 1]} : vector<8x512xf32> to vector<8x128xf32>
    %580 = arith.negf %579 : vector<8x128xf32>
    %581 = math.exp %580 : vector<8x128xf32>
    %cst_172 = arith.constant 1.000000e+00 : f32
    %582 = vector.broadcast %cst_172 : f32 to vector<8x128xf32>
    %583 = arith.addf %582, %581 : vector<8x128xf32>
    %584 = arith.divf %582, %583 : vector<8x128xf32>
    %585 = arith.mulf %576, %561 : vector<8x128xf32>
    %586 = arith.mulf %570, %578 : vector<8x128xf32>
    %587 = arith.addf %585, %586 : vector<8x128xf32>
    %588 = math.tanh %587 : vector<8x128xf32>
    %589 = arith.mulf %584, %588 : vector<8x128xf32>
    %590 = arith.truncf %589 : vector<8x128xf32> to vector<8x128xbf16>
    %cst_173 = arith.constant dense<0.000000e+00> : vector<8x512xf32>
    %591 = tpu.matmul %590, %559, %cst_173 {dimension_numbers = #tpu.dot_dimension_numbers<[1], [0], [0], [1], [0, 0, 1, 1], [], []>} : vector<8x128xbf16>, vector<128x512xbf16>, vector<8x512xf32> -> vector<8x512xf32>
    %c8_174 = arith.constant 8 : index
    %c0_175 = arith.constant 0 : index
    %592 = vector.load %arg19[%c8_174, %c0_175] : memref<64x512xf32, #tpu.memory_space<vmem>>, vector<8x512xf32>
    %593 = arith.addf %591, %592 : vector<8x512xf32>
    %594 = vector.extract_strided_slice %593 {offsets = [0, 0], sizes = [8, 128], strides = [1, 1]} : vector<8x512xf32> to vector<8x128xf32>
    %595 = arith.negf %594 : vector<8x128xf32>
    %596 = math.exp %595 : vector<8x128xf32>
    %cst_176 = arith.constant 1.000000e+00 : f32
    %597 = vector.broadcast %cst_176 : f32 to vector<8x128xf32>
    %598 = arith.addf %597, %596 : vector<8x128xf32>
    %599 = arith.divf %597, %598 : vector<8x128xf32>
    %600 = vector.extract_strided_slice %593 {offsets = [0, 128], sizes = [8, 128], strides = [1, 1]} : vector<8x512xf32> to vector<8x128xf32>
    %601 = arith.negf %600 : vector<8x128xf32>
    %602 = math.exp %601 : vector<8x128xf32>
    %cst_177 = arith.constant 1.000000e+00 : f32
    %603 = vector.broadcast %cst_177 : f32 to vector<8x128xf32>
    %604 = arith.addf %603, %602 : vector<8x128xf32>
    %605 = arith.divf %603, %604 : vector<8x128xf32>
    %606 = vector.extract_strided_slice %593 {offsets = [0, 256], sizes = [8, 128], strides = [1, 1]} : vector<8x512xf32> to vector<8x128xf32>
    %607 = math.tanh %606 : vector<8x128xf32>
    %608 = vector.extract_strided_slice %593 {offsets = [0, 384], sizes = [8, 128], strides = [1, 1]} : vector<8x512xf32> to vector<8x128xf32>
    %609 = arith.negf %608 : vector<8x128xf32>
    %610 = math.exp %609 : vector<8x128xf32>
    %cst_178 = arith.constant 1.000000e+00 : f32
    %611 = vector.broadcast %cst_178 : f32 to vector<8x128xf32>
    %612 = arith.addf %611, %610 : vector<8x128xf32>
    %613 = arith.divf %611, %612 : vector<8x128xf32>
    %614 = arith.mulf %605, %587 : vector<8x128xf32>
    %615 = arith.mulf %599, %607 : vector<8x128xf32>
    %616 = arith.addf %614, %615 : vector<8x128xf32>
    %617 = math.tanh %616 : vector<8x128xf32>
    %618 = arith.mulf %613, %617 : vector<8x128xf32>
    %619 = arith.truncf %618 : vector<8x128xf32> to vector<8x128xbf16>
    %cst_179 = arith.constant dense<0.000000e+00> : vector<8x512xf32>
    %620 = tpu.matmul %619, %559, %cst_179 {dimension_numbers = #tpu.dot_dimension_numbers<[1], [0], [0], [1], [0, 0, 1, 1], [], []>} : vector<8x128xbf16>, vector<128x512xbf16>, vector<8x512xf32> -> vector<8x512xf32>
    %c16_180 = arith.constant 16 : index
    %c0_181 = arith.constant 0 : index
    %621 = vector.load %arg19[%c16_180, %c0_181] : memref<64x512xf32, #tpu.memory_space<vmem>>, vector<8x512xf32>
    %622 = arith.addf %620, %621 : vector<8x512xf32>
    %623 = vector.extract_strided_slice %622 {offsets = [0, 0], sizes = [8, 128], strides = [1, 1]} : vector<8x512xf32> to vector<8x128xf32>
    %624 = arith.negf %623 : vector<8x128xf32>
    %625 = math.exp %624 : vector<8x128xf32>
    %cst_182 = arith.constant 1.000000e+00 : f32
    %626 = vector.broadcast %cst_182 : f32 to vector<8x128xf32>
    %627 = arith.addf %626, %625 : vector<8x128xf32>
    %628 = arith.divf %626, %627 : vector<8x128xf32>
    %629 = vector.extract_strided_slice %622 {offsets = [0, 128], sizes = [8, 128], strides = [1, 1]} : vector<8x512xf32> to vector<8x128xf32>
    %630 = arith.negf %629 : vector<8x128xf32>
    %631 = math.exp %630 : vector<8x128xf32>
    %cst_183 = arith.constant 1.000000e+00 : f32
    %632 = vector.broadcast %cst_183 : f32 to vector<8x128xf32>
    %633 = arith.addf %632, %631 : vector<8x128xf32>
    %634 = arith.divf %632, %633 : vector<8x128xf32>
    %635 = vector.extract_strided_slice %622 {offsets = [0, 256], sizes = [8, 128], strides = [1, 1]} : vector<8x512xf32> to vector<8x128xf32>
    %636 = math.tanh %635 : vector<8x128xf32>
    %637 = vector.extract_strided_slice %622 {offsets = [0, 384], sizes = [8, 128], strides = [1, 1]} : vector<8x512xf32> to vector<8x128xf32>
    %638 = arith.negf %637 : vector<8x128xf32>
    %639 = math.exp %638 : vector<8x128xf32>
    %cst_184 = arith.constant 1.000000e+00 : f32
    %640 = vector.broadcast %cst_184 : f32 to vector<8x128xf32>
    %641 = arith.addf %640, %639 : vector<8x128xf32>
    %642 = arith.divf %640, %641 : vector<8x128xf32>
    %643 = arith.mulf %634, %616 : vector<8x128xf32>
    %644 = arith.mulf %628, %636 : vector<8x128xf32>
    %645 = arith.addf %643, %644 : vector<8x128xf32>
    %646 = math.tanh %645 : vector<8x128xf32>
    %647 = arith.mulf %642, %646 : vector<8x128xf32>
    %648 = arith.truncf %647 : vector<8x128xf32> to vector<8x128xbf16>
    %cst_185 = arith.constant dense<0.000000e+00> : vector<8x512xf32>
    %649 = tpu.matmul %648, %559, %cst_185 {dimension_numbers = #tpu.dot_dimension_numbers<[1], [0], [0], [1], [0, 0, 1, 1], [], []>} : vector<8x128xbf16>, vector<128x512xbf16>, vector<8x512xf32> -> vector<8x512xf32>
    %c24_186 = arith.constant 24 : index
    %c0_187 = arith.constant 0 : index
    %650 = vector.load %arg19[%c24_186, %c0_187] : memref<64x512xf32, #tpu.memory_space<vmem>>, vector<8x512xf32>
    %651 = arith.addf %649, %650 : vector<8x512xf32>
    %652 = vector.extract_strided_slice %651 {offsets = [0, 0], sizes = [8, 128], strides = [1, 1]} : vector<8x512xf32> to vector<8x128xf32>
    %653 = arith.negf %652 : vector<8x128xf32>
    %654 = math.exp %653 : vector<8x128xf32>
    %cst_188 = arith.constant 1.000000e+00 : f32
    %655 = vector.broadcast %cst_188 : f32 to vector<8x128xf32>
    %656 = arith.addf %655, %654 : vector<8x128xf32>
    %657 = arith.divf %655, %656 : vector<8x128xf32>
    %658 = vector.extract_strided_slice %651 {offsets = [0, 128], sizes = [8, 128], strides = [1, 1]} : vector<8x512xf32> to vector<8x128xf32>
    %659 = arith.negf %658 : vector<8x128xf32>
    %660 = math.exp %659 : vector<8x128xf32>
    %cst_189 = arith.constant 1.000000e+00 : f32
    %661 = vector.broadcast %cst_189 : f32 to vector<8x128xf32>
    %662 = arith.addf %661, %660 : vector<8x128xf32>
    %663 = arith.divf %661, %662 : vector<8x128xf32>
    %664 = vector.extract_strided_slice %651 {offsets = [0, 256], sizes = [8, 128], strides = [1, 1]} : vector<8x512xf32> to vector<8x128xf32>
    %665 = math.tanh %664 : vector<8x128xf32>
    %666 = vector.extract_strided_slice %651 {offsets = [0, 384], sizes = [8, 128], strides = [1, 1]} : vector<8x512xf32> to vector<8x128xf32>
    %667 = arith.negf %666 : vector<8x128xf32>
    %668 = math.exp %667 : vector<8x128xf32>
    %cst_190 = arith.constant 1.000000e+00 : f32
    %669 = vector.broadcast %cst_190 : f32 to vector<8x128xf32>
    %670 = arith.addf %669, %668 : vector<8x128xf32>
    %671 = arith.divf %669, %670 : vector<8x128xf32>
    %672 = arith.mulf %663, %645 : vector<8x128xf32>
    %673 = arith.mulf %657, %665 : vector<8x128xf32>
    %674 = arith.addf %672, %673 : vector<8x128xf32>
    %675 = math.tanh %674 : vector<8x128xf32>
    %676 = arith.mulf %671, %675 : vector<8x128xf32>
    %677 = arith.truncf %676 : vector<8x128xf32> to vector<8x128xbf16>
    %cst_191 = arith.constant dense<0.000000e+00> : vector<8x512xf32>
    %678 = tpu.matmul %677, %559, %cst_191 {dimension_numbers = #tpu.dot_dimension_numbers<[1], [0], [0], [1], [0, 0, 1, 1], [], []>} : vector<8x128xbf16>, vector<128x512xbf16>, vector<8x512xf32> -> vector<8x512xf32>
    %c32_192 = arith.constant 32 : index
    %c0_193 = arith.constant 0 : index
    %679 = vector.load %arg19[%c32_192, %c0_193] : memref<64x512xf32, #tpu.memory_space<vmem>>, vector<8x512xf32>
    %680 = arith.addf %678, %679 : vector<8x512xf32>
    %681 = vector.extract_strided_slice %680 {offsets = [0, 0], sizes = [8, 128], strides = [1, 1]} : vector<8x512xf32> to vector<8x128xf32>
    %682 = arith.negf %681 : vector<8x128xf32>
    %683 = math.exp %682 : vector<8x128xf32>
    %cst_194 = arith.constant 1.000000e+00 : f32
    %684 = vector.broadcast %cst_194 : f32 to vector<8x128xf32>
    %685 = arith.addf %684, %683 : vector<8x128xf32>
    %686 = arith.divf %684, %685 : vector<8x128xf32>
    %687 = vector.extract_strided_slice %680 {offsets = [0, 128], sizes = [8, 128], strides = [1, 1]} : vector<8x512xf32> to vector<8x128xf32>
    %688 = arith.negf %687 : vector<8x128xf32>
    %689 = math.exp %688 : vector<8x128xf32>
    %cst_195 = arith.constant 1.000000e+00 : f32
    %690 = vector.broadcast %cst_195 : f32 to vector<8x128xf32>
    %691 = arith.addf %690, %689 : vector<8x128xf32>
    %692 = arith.divf %690, %691 : vector<8x128xf32>
    %693 = vector.extract_strided_slice %680 {offsets = [0, 256], sizes = [8, 128], strides = [1, 1]} : vector<8x512xf32> to vector<8x128xf32>
    %694 = math.tanh %693 : vector<8x128xf32>
    %695 = vector.extract_strided_slice %680 {offsets = [0, 384], sizes = [8, 128], strides = [1, 1]} : vector<8x512xf32> to vector<8x128xf32>
    %696 = arith.negf %695 : vector<8x128xf32>
    %697 = math.exp %696 : vector<8x128xf32>
    %cst_196 = arith.constant 1.000000e+00 : f32
    %698 = vector.broadcast %cst_196 : f32 to vector<8x128xf32>
    %699 = arith.addf %698, %697 : vector<8x128xf32>
    %700 = arith.divf %698, %699 : vector<8x128xf32>
    %701 = arith.mulf %692, %674 : vector<8x128xf32>
    %702 = arith.mulf %686, %694 : vector<8x128xf32>
    %703 = arith.addf %701, %702 : vector<8x128xf32>
    %704 = math.tanh %703 : vector<8x128xf32>
    %705 = arith.mulf %700, %704 : vector<8x128xf32>
    %706 = arith.truncf %705 : vector<8x128xf32> to vector<8x128xbf16>
    %cst_197 = arith.constant dense<0.000000e+00> : vector<8x512xf32>
    %707 = tpu.matmul %706, %559, %cst_197 {dimension_numbers = #tpu.dot_dimension_numbers<[1], [0], [0], [1], [0, 0, 1, 1], [], []>} : vector<8x128xbf16>, vector<128x512xbf16>, vector<8x512xf32> -> vector<8x512xf32>
    %c40_198 = arith.constant 40 : index
    %c0_199 = arith.constant 0 : index
    %708 = vector.load %arg19[%c40_198, %c0_199] : memref<64x512xf32, #tpu.memory_space<vmem>>, vector<8x512xf32>
    %709 = arith.addf %707, %708 : vector<8x512xf32>
    %710 = vector.extract_strided_slice %709 {offsets = [0, 0], sizes = [8, 128], strides = [1, 1]} : vector<8x512xf32> to vector<8x128xf32>
    %711 = arith.negf %710 : vector<8x128xf32>
    %712 = math.exp %711 : vector<8x128xf32>
    %cst_200 = arith.constant 1.000000e+00 : f32
    %713 = vector.broadcast %cst_200 : f32 to vector<8x128xf32>
    %714 = arith.addf %713, %712 : vector<8x128xf32>
    %715 = arith.divf %713, %714 : vector<8x128xf32>
    %716 = vector.extract_strided_slice %709 {offsets = [0, 128], sizes = [8, 128], strides = [1, 1]} : vector<8x512xf32> to vector<8x128xf32>
    %717 = arith.negf %716 : vector<8x128xf32>
    %718 = math.exp %717 : vector<8x128xf32>
    %cst_201 = arith.constant 1.000000e+00 : f32
    %719 = vector.broadcast %cst_201 : f32 to vector<8x128xf32>
    %720 = arith.addf %719, %718 : vector<8x128xf32>
    %721 = arith.divf %719, %720 : vector<8x128xf32>
    %722 = vector.extract_strided_slice %709 {offsets = [0, 256], sizes = [8, 128], strides = [1, 1]} : vector<8x512xf32> to vector<8x128xf32>
    %723 = math.tanh %722 : vector<8x128xf32>
    %724 = vector.extract_strided_slice %709 {offsets = [0, 384], sizes = [8, 128], strides = [1, 1]} : vector<8x512xf32> to vector<8x128xf32>
    %725 = arith.negf %724 : vector<8x128xf32>
    %726 = math.exp %725 : vector<8x128xf32>
    %cst_202 = arith.constant 1.000000e+00 : f32
    %727 = vector.broadcast %cst_202 : f32 to vector<8x128xf32>
    %728 = arith.addf %727, %726 : vector<8x128xf32>
    %729 = arith.divf %727, %728 : vector<8x128xf32>
    %730 = arith.mulf %721, %703 : vector<8x128xf32>
    %731 = arith.mulf %715, %723 : vector<8x128xf32>
    %732 = arith.addf %730, %731 : vector<8x128xf32>
    %733 = math.tanh %732 : vector<8x128xf32>
    %734 = arith.mulf %729, %733 : vector<8x128xf32>
    %735 = arith.truncf %734 : vector<8x128xf32> to vector<8x128xbf16>
    %cst_203 = arith.constant dense<0.000000e+00> : vector<8x512xf32>
    %736 = tpu.matmul %735, %559, %cst_203 {dimension_numbers = #tpu.dot_dimension_numbers<[1], [0], [0], [1], [0, 0, 1, 1], [], []>} : vector<8x128xbf16>, vector<128x512xbf16>, vector<8x512xf32> -> vector<8x512xf32>
    %c48_204 = arith.constant 48 : index
    %c0_205 = arith.constant 0 : index
    %737 = vector.load %arg19[%c48_204, %c0_205] : memref<64x512xf32, #tpu.memory_space<vmem>>, vector<8x512xf32>
    %738 = arith.addf %736, %737 : vector<8x512xf32>
    %739 = vector.extract_strided_slice %738 {offsets = [0, 0], sizes = [8, 128], strides = [1, 1]} : vector<8x512xf32> to vector<8x128xf32>
    %740 = arith.negf %739 : vector<8x128xf32>
    %741 = math.exp %740 : vector<8x128xf32>
    %cst_206 = arith.constant 1.000000e+00 : f32
    %742 = vector.broadcast %cst_206 : f32 to vector<8x128xf32>
    %743 = arith.addf %742, %741 : vector<8x128xf32>
    %744 = arith.divf %742, %743 : vector<8x128xf32>
    %745 = vector.extract_strided_slice %738 {offsets = [0, 128], sizes = [8, 128], strides = [1, 1]} : vector<8x512xf32> to vector<8x128xf32>
    %746 = arith.negf %745 : vector<8x128xf32>
    %747 = math.exp %746 : vector<8x128xf32>
    %cst_207 = arith.constant 1.000000e+00 : f32
    %748 = vector.broadcast %cst_207 : f32 to vector<8x128xf32>
    %749 = arith.addf %748, %747 : vector<8x128xf32>
    %750 = arith.divf %748, %749 : vector<8x128xf32>
    %751 = vector.extract_strided_slice %738 {offsets = [0, 256], sizes = [8, 128], strides = [1, 1]} : vector<8x512xf32> to vector<8x128xf32>
    %752 = math.tanh %751 : vector<8x128xf32>
    %753 = vector.extract_strided_slice %738 {offsets = [0, 384], sizes = [8, 128], strides = [1, 1]} : vector<8x512xf32> to vector<8x128xf32>
    %754 = arith.negf %753 : vector<8x128xf32>
    %755 = math.exp %754 : vector<8x128xf32>
    %cst_208 = arith.constant 1.000000e+00 : f32
    %756 = vector.broadcast %cst_208 : f32 to vector<8x128xf32>
    %757 = arith.addf %756, %755 : vector<8x128xf32>
    %758 = arith.divf %756, %757 : vector<8x128xf32>
    %759 = arith.mulf %750, %732 : vector<8x128xf32>
    %760 = arith.mulf %744, %752 : vector<8x128xf32>
    %761 = arith.addf %759, %760 : vector<8x128xf32>
    %762 = math.tanh %761 : vector<8x128xf32>
    %763 = arith.mulf %758, %762 : vector<8x128xf32>
    %764 = arith.truncf %763 : vector<8x128xf32> to vector<8x128xbf16>
    %cst_209 = arith.constant dense<0.000000e+00> : vector<8x512xf32>
    %765 = tpu.matmul %764, %559, %cst_209 {dimension_numbers = #tpu.dot_dimension_numbers<[1], [0], [0], [1], [0, 0, 1, 1], [], []>} : vector<8x128xbf16>, vector<128x512xbf16>, vector<8x512xf32> -> vector<8x512xf32>
    %c56_210 = arith.constant 56 : index
    %c0_211 = arith.constant 0 : index
    %766 = vector.load %arg19[%c56_210, %c0_211] : memref<64x512xf32, #tpu.memory_space<vmem>>, vector<8x512xf32>
    %767 = arith.addf %765, %766 : vector<8x512xf32>
    %768 = vector.extract_strided_slice %767 {offsets = [0, 0], sizes = [8, 128], strides = [1, 1]} : vector<8x512xf32> to vector<8x128xf32>
    %769 = arith.negf %768 : vector<8x128xf32>
    %770 = math.exp %769 : vector<8x128xf32>
    %cst_212 = arith.constant 1.000000e+00 : f32
    %771 = vector.broadcast %cst_212 : f32 to vector<8x128xf32>
    %772 = arith.addf %771, %770 : vector<8x128xf32>
    %773 = arith.divf %771, %772 : vector<8x128xf32>
    %774 = vector.extract_strided_slice %767 {offsets = [0, 128], sizes = [8, 128], strides = [1, 1]} : vector<8x512xf32> to vector<8x128xf32>
    %775 = arith.negf %774 : vector<8x128xf32>
    %776 = math.exp %775 : vector<8x128xf32>
    %cst_213 = arith.constant 1.000000e+00 : f32
    %777 = vector.broadcast %cst_213 : f32 to vector<8x128xf32>
    %778 = arith.addf %777, %776 : vector<8x128xf32>
    %779 = arith.divf %777, %778 : vector<8x128xf32>
    %780 = vector.extract_strided_slice %767 {offsets = [0, 256], sizes = [8, 128], strides = [1, 1]} : vector<8x512xf32> to vector<8x128xf32>
    %781 = math.tanh %780 : vector<8x128xf32>
    %782 = vector.extract_strided_slice %767 {offsets = [0, 384], sizes = [8, 128], strides = [1, 1]} : vector<8x512xf32> to vector<8x128xf32>
    %783 = arith.negf %782 : vector<8x128xf32>
    %784 = math.exp %783 : vector<8x128xf32>
    %cst_214 = arith.constant 1.000000e+00 : f32
    %785 = vector.broadcast %cst_214 : f32 to vector<8x128xf32>
    %786 = arith.addf %785, %784 : vector<8x128xf32>
    %787 = arith.divf %785, %786 : vector<8x128xf32>
    %788 = arith.mulf %779, %761 : vector<8x128xf32>
    %789 = arith.mulf %773, %781 : vector<8x128xf32>
    %790 = arith.addf %788, %789 : vector<8x128xf32>
    %791 = math.tanh %790 : vector<8x128xf32>
    %792 = arith.mulf %787, %791 : vector<8x128xf32>
    %793 = arith.truncf %792 : vector<8x128xf32> to vector<8x128xbf16>
    %c0_215 = arith.constant 0 : index
    %c0_216 = arith.constant 0 : index
    %794 = vector.load %arg23[%c0_215, %c0_216] : memref<256x256xbf16, #tpu.memory_space<vmem>>, vector<128x256xbf16>
    %cst_217 = arith.constant dense<0.000000e+00> : vector<8x256xf32>
    %795 = tpu.matmul %793, %794, %cst_217 {dimension_numbers = #tpu.dot_dimension_numbers<[1], [0], [0], [1], [0, 0, 1, 1], [], []>} : vector<8x128xbf16>, vector<128x256xbf16>, vector<8x256xf32> -> vector<8x256xf32>
    %796 = arith.addf %795, %558 : vector<8x256xf32>
    %c0_218 = arith.constant 0 : index
    %c0_219 = arith.constant 0 : index
    %797 = vector.load %arg11[%c0_218, %c0_219] : memref<1x256xf32, #tpu.memory_space<vmem>>, vector<1x256xf32>
    %798 = vector.broadcast %797 : vector<1x256xf32> to vector<8x256xf32>
    %799 = arith.addf %796, %798 : vector<8x256xf32>
    %cst_220 = arith.constant 0.000000e+00 : f32
    %800 = vector.broadcast %cst_220 : f32 to vector<8x256xf32>
    %801 = arith.maximumf %799, %800 : vector<8x256xf32>
    %802 = arith.truncf %801 : vector<8x256xf32> to vector<8x256xbf16>
    %c0_221 = arith.constant 0 : index
    %c0_222 = arith.constant 0 : index
    %803 = vector.load %arg24[%c0_221, %c0_222] : memref<256x128xbf16, #tpu.memory_space<vmem>>, vector<256x128xbf16>
    %cst_223 = arith.constant dense<0.000000e+00> : vector<8x128xf32>
    %804 = tpu.matmul %802, %803, %cst_223 {dimension_numbers = #tpu.dot_dimension_numbers<[1], [0], [0], [1], [0, 0, 1, 1], [], []>} : vector<8x256xbf16>, vector<256x128xbf16>, vector<8x128xf32> -> vector<8x128xf32>
    %c0_224 = arith.constant 0 : index
    %c0_225 = arith.constant 0 : index
    %805 = vector.load %arg13[%c0_224, %c0_225] : memref<1x128xf32, #tpu.memory_space<vmem>>, vector<1x128xf32>
    %806 = vector.broadcast %805 : vector<1x128xf32> to vector<8x128xf32>
    %807 = arith.addf %804, %806 : vector<8x128xf32>
    %cst_226 = arith.constant 0.000000e+00 : f32
    %808 = vector.broadcast %cst_226 : f32 to vector<8x128xf32>
    %809 = arith.maximumf %807, %808 : vector<8x128xf32>
    %810 = arith.truncf %809 : vector<8x128xf32> to vector<8x128xbf16>
    %c0_227 = arith.constant 0 : index
    %c0_228 = arith.constant 0 : index
    %811 = vector.load %arg25[%c0_227, %c0_228] : memref<128x128xbf16, #tpu.memory_space<vmem>>, vector<128x128xbf16>
    %cst_229 = arith.constant dense<0.000000e+00> : vector<8x128xf32>
    %812 = tpu.matmul %810, %811, %cst_229 {dimension_numbers = #tpu.dot_dimension_numbers<[1], [0], [0], [1], [0, 0, 1, 1], [], []>} : vector<8x128xbf16>, vector<128x128xbf16>, vector<8x128xf32> -> vector<8x128xf32>
    %c0_230 = arith.constant 0 : index
    %c0_231 = arith.constant 0 : index
    %813 = vector.load %arg15[%c0_230, %c0_231] : memref<1x128xf32, #tpu.memory_space<vmem>>, vector<1x128xf32>
    %814 = vector.broadcast %813 : vector<1x128xf32> to vector<8x128xf32>
    %815 = arith.addf %812, %814 : vector<8x128xf32>
    %c0_232 = arith.constant 0 : index
    %c0_233 = arith.constant 0 : index
    %816 = vector.load %arg16[%c0_232, %c0_233] : memref<8x128xf32, #tpu.memory_space<vmem>>, vector<8x128xf32>
    tpu.vector_store %arg16[%c0_232, %c0_233], %815 {strides = array<i32>} : memref<8x128xf32, #tpu.memory_space<vmem>>, vector<8x128xf32>,
    return
  }
}

</mosaic_0001>

<bundles_post_ra>
// kernel: emotion_forward.1
= control target key start
LH: loop header
LB: loop body
LE: loop exit
PB: predicated region body
PF: predicated region fallthrough
CT: control target
= control target key end

     0   :  { %s8125_s0 = inlined_call_operand.vmem [shape: bf16[64,128], index: 0, kind: input, shape index: {}]   ;;  %s8126_s1 = inlined_call_operand.hbm [shape: bf16[128,1024], index: 1, kind: input, shape index: {}]   ;;  %s8127_s2 = inlined_call_operand.vmem [shape: f32[1,1024], index: 2, kind: input, shape index: {}]   ;;  %s8128_s3 = inlined_call_operand.hbm [shape: bf16[128,512], index: 3, kind: input, shape index: {}]   ;;  %s8129_s4 = inlined_call_operand.hbm [shape: bf16[128,512], index: 4, kind: input, shape index: {}]   ;;  %s8130_s5 = inlined_call_operand.hbm [shape: bf16[256,512], index: 5, kind: input, shape index: {}]   ;;  %s8131_s6 = inlined_call_operand.vmem [shape: f32[1,512], index: 6, kind: input, shape index: {}]   ;;  %s8132_s7 = inlined_call_operand.hbm [shape: bf16[128,512], index: 7, kind: input, shape index: {}]   ;;  %s8133_s8 = inlined_call_operand.hbm [shape: bf16[256,512], index: 8, kind: input, shape index: {}]   ;;  %s8134_s9 = inlined_call_operand.vmem [shape: f32[1,512], index: 9, kind: input, shape index: {}]   ;;  %s8135_s10 = inlined_call_operand.hbm [shape: bf16[256,256], index: 10, kind: input, shape index: {}]   ;;  %s8136_s11 = inlined_call_operand.vmem [shape: f32[1,256], index: 11, kind: input, shape index: {}]   ;;  %s8137_s12 = inlined_call_operand.vmem [shape: bf16[256,128], index: 12, kind: input, shape index: {}]   ;;  %s8138_s13 = inlined_call_operand.vmem [shape: f32[1,128], index: 13, kind: input, shape index: {}]   ;;  %s8139_s14 = inlined_call_operand.hbm [shape: bf16[128,128], index: 14, kind: input, shape index: {}]   ;;  %s8140_s15 = inlined_call_operand.vmem [shape: f32[1,128], index: 15, kind: input, shape index: {}]   ;;  %s8141_s16 = inlined_call_operand.vmem [shape: f32[8,128], index: 16, kind: output, shape index: {}]  }
   0x1   :  { %8247 = sst [smem:[#allocation147_spill]] %s8125_s0 }
   0x2   :  { %21 = vsyncpa [#allocation13], 0 }
   0x3   :  { %22 = vsyncpa [#allocation15], 0  ;;  %s6092_s21 = smov [#allocation14]   ;;  %s5988_s25 = scalar_lea.hbm %s8128_s3, 4096 }
   0x4   :  { %s44_s22 = sshll.u32 %s6092_s21, 4  ;;  %p5989_p0 = scmp.ne.s32.totalorder %s8128_s3, %s5988_s25  ;;  %s45_s22 = int_to_ptr.vmem [resolvable:$true] %s44_s22 }
   0x5   :  { %p5992_p1 = scmp.lt.u32.totalorder %s5988_s25, %s8128_s3 }
   0x7   :  { %p5994_p2 = pnand %p5992_p1, %p5989_p0 }
   0x9   :  { %5997 = shalt.err (!%p5994_p2)
}
   0xa   :  { %s5998_s30 = scalar_lea.vmem %s45_s22, 4096  ;;  %p6003_p4 = scmp.lt.s32.totalorder %s45_s22, %s45_s22 }
   0xb   :  { %p5999_p3 = scmp.ne.s32.totalorder %s45_s22, %s5998_s30  ;;  %p6004_p5 = scmp.lt.s32.totalorder %s5998_s30, %s5998_s30 }
   0xd   :  { %p6005_p6 = por %p6004_p5, %p6003_p4 }
   0xf   :  { %p6006_p7 = pnand %p6005_p6, %p5999_p3 }
  0x11   :  { %6009 = shalt.err (!%p6006_p7)
}
  0x12   :  { %s8143_s0 = smov 256   ;;  %s6094_s17 = smov 16  }
  0x13   :  { %50 = dma.hbm_to_vmem [thread:$0]  %s8128_s3, 4096, %s45_s22, [#allocation15], %s8143_s0, %s8143_s0, %s6094_s17  }
  0x14   :  { %s6095_s20 = smov [#allocation12]   ;;  %s6010_s25 = scalar_lea.hbm %s8126_s1, 8192 }
  0x15   :  { %s30_s21 = sshll.u32 %s6095_s20, 4  ;;  %p6011_p8 = scmp.ne.s32.totalorder %s8126_s1, %s6010_s25  ;;  %s31_s21 = int_to_ptr.vmem [resolvable:$true] %s30_s21 }
  0x16   :  { %p6014_p9 = scmp.lt.u32.totalorder %s6010_s25, %s8126_s1 }
  0x18   :  { %p6016_p10 = pnand %p6014_p9, %p6011_p8 }
  0x1a   :  { %6019 = shalt.err (!%p6016_p10)
}
  0x1b   :  { %s6020_s30 = scalar_lea.vmem %s31_s21, 8192  ;;  %p6025_p12 = scmp.lt.s32.totalorder %s31_s21, %s31_s21 }
  0x1c   :  { %p6021_p11 = scmp.ne.s32.totalorder %s31_s21, %s6020_s30  ;;  %p6026_p13 = scmp.lt.s32.totalorder %s6020_s30, %s6020_s30 }
  0x1e   :  { %p6027_p0 = por %p6026_p13, %p6025_p12 }
  0x20   :  { %p6028_p1 = pnand %p6027_p0, %p6021_p11 }
  0x22   :  { %6031 = shalt.err (!%p6028_p1)
}
  0x23   :  { %s6096_s3 = smov 512   ;;  %s6097_s22 = smov 32  }
  0x24   :  { %36 = dma.hbm_to_vmem [thread:$0]  %s8126_s1, 8192, %s31_s21, [#allocation13], %s6096_s3, %s6096_s3, %s6097_s22  }
  0x25   :  { %s6098_s20 = smov [#allocation16]   ;;  %s6032_s26 = scalar_lea.hbm %s8129_s4, 4096 }
  0x26   :  { %s56_s23 = sshll.u32 %s6098_s20, 4  ;;  %p6033_p2 = scmp.ne.s32.totalorder %s8129_s4, %s6032_s26  ;;  %s57_s23 = int_to_ptr.vmem [resolvable:$true] %s56_s23 }
  0x27   :  { %p6036_p3 = scmp.lt.u32.totalorder %s6032_s26, %s8129_s4 }
  0x29   :  { %p6038_p4 = pnand %p6036_p3, %p6033_p2 }
  0x2b   :  { %6041 = shalt.err (!%p6038_p4)
}
  0x2c   :  { %s6042_s0 = scalar_lea.vmem %s57_s23, 4096  ;;  %p6047_p6 = scmp.lt.s32.totalorder %s57_s23, %s57_s23 }
  0x2d   :  { %p6043_p5 = scmp.ne.s32.totalorder %s57_s23, %s6042_s0  ;;  %p6048_p7 = scmp.lt.s32.totalorder %s6042_s0, %s6042_s0 }
  0x2f   :  { %p6049_p8 = por %p6048_p7, %p6047_p6 }
  0x31   :  { %p6050_p9 = pnand %p6049_p8, %p6043_p5 }
  0x33   :  { %6053 = shalt.err (!%p6050_p9)
}
  0x34   :  { %s8248_s1 = smov 256  }
  0x35   :  { %62 = dma.hbm_to_vmem [thread:$0]  %s8129_s4, 4096, %s57_s23, [#allocation15], %s8248_s1, %s8248_s1, %s6094_s17  }
  0x36   :  { %6076 = dma.done.wait [#allocation13], 8192  }
  0x37   :  { %6077 = vsyncadd [#allocation13], 4294959104 }
  0x38   :  { %6078 = dma.done.wait [#allocation15], 8192  }
  0x39   :  { %6079 = vsyncadd [#allocation15], 4294959104  ;;  %s87_s18 = sld [smem:[#allocation0]]   ;;  %99 = sst [smem:[#allocation18]] %s6096_s3  ;;  %v8145_v24 = vmov 0  }
  0x3a   :  { %101 = sst [smem:[#allocation18 + $0x1]] %s6096_s3  ;;  %s6099_s0 = smov 4   ;;  %798 = vmatprep.mubr.bf16.mxu0 %v8145_v24  ;;  %871 = vmatprep.mubr.bf16.mxu1 %v8145_v24 }
  0x3b   :  { %103 = sst [smem:[#allocation18 + $0x2]] %s6099_s0  ;;  %s6100_s19 = smov 64  }
  0x3c   :  { %105 = sst [smem:[#allocation18 + $0x3]] %s6100_s19  ;;  %s6101_s20 = smov 128  }
  0x3d   :  { %107 = sst [smem:[#allocation18 + $0x4]] %s6101_s20  ;;  %s6102_s24 = smov [#allocation5]  }
  0x3e   :  { %s95_s4 = sshll.u32 %s6102_s24, 4  ;;  %s6103_s17 = smov 2   ;;  %s96_s4 = int_to_ptr.vmem [resolvable:$true] %s95_s4 }
  0x3f   :  { %109 = sst [smem:[#allocation18 + $0x5]] %s6103_s17  ;;  %s5042_s23 = sshll.u32 %s87_s18, 26 }
  0x40   :  { %111 = sst [smem:[#allocation18 + $0x6]] %s8248_s1  ;;  %s6255_s25 = sadd.s32 134217728, %s5042_s23 }
  0x41   :  { %113 = sst [smem:[#allocation18 + $0x7]] %s6100_s19  ;;  %s6104_s26 = smov [#allocation11]  }
  0x42   :  { %115 = sst [smem:[#allocation18 + $0x8]] %s6099_s0  ;;  %s6105_s27 = smov [#allocation17]  }
  0x43   :  { %117 = dma.general %s8130_s5, 8192, %s96_s4, %s6104_s26, %s6105_s27, [#allocation18], %s6255_s25, 0  }
  0x44   :  { %134 = sst [smem:[#allocation20]] %s6096_s3  ;;  %s6106_s30 = smov [#allocation6]  }
  0x45   :  { %136 = sst [smem:[#allocation20 + $0x1]] %s6096_s3  ;;  %s130_s21 = sshll.u32 %s6106_s30, 4  ;;  %s131_s21 = int_to_ptr.vmem [resolvable:$true] %s130_s21 }
  0x46   :  { %138 = sst [smem:[#allocation20 + $0x2]] %s6099_s0  ;;  %s6107_s5 = smov [#allocation11 + $0x1]  }
  0x47   :  { %140 = sst [smem:[#allocation20 + $0x3]] %s6100_s19  ;;  %s6108_s22 = smov [#allocation19]  }
  0x48   :  { %142 = sst [smem:[#allocation20 + $0x4]] %s6101_s20  ;;  %s6109_s4 = smov [#allocation7]  }
  0x49   :  { %144 = sst [smem:[#allocation20 + $0x5]] %s6103_s17  ;;  %s165_s23 = sshll.u32 %s6109_s4, 4  ;;  %s166_s23 = int_to_ptr.vmem [resolvable:$true] %s165_s23 }
  0x4a   :  { %146 = sst [smem:[#allocation20 + $0x6]] %s8248_s1  ;;  %s6111_s26 = smov [#allocation21]  }
  0x4b   :  { %148 = sst [smem:[#allocation20 + $0x7]] %s6100_s19  ;;  %s6112_s28 = smov [#allocation8]  }
  0x4c   :  { %150 = sst [smem:[#allocation20 + $0x8]] %s6099_s0  ;;  %s200_s29 = sshll.u32 %s6112_s28, 4  ;;  %s201_s29 = int_to_ptr.vmem [resolvable:$true] %s200_s29 }
  0x4d   :  { %152 = dma.general %s8132_s7, 4096, %s131_s21, %s6107_s5, %s6108_s22, [#allocation20], %s6255_s25, 0  }
  0x4e   :  { %169 = sst [smem:[#allocation22]] %s6096_s3  ;;  %s6110_s7 = smov [#allocation11 + $0x2]  }
  0x4f   :  { %171 = sst [smem:[#allocation22 + $0x1]] %s6096_s3  ;;  %s6114_s30 = smov [#allocation23]  }
  0x50   :  { %173 = sst [smem:[#allocation22 + $0x2]] %s6099_s0 }
  0x51   :  { %175 = sst [smem:[#allocation22 + $0x3]] %s6100_s19 }
  0x52   :  { %177 = sst [smem:[#allocation22 + $0x4]] %s6101_s20 }
  0x53   :  { %179 = sst [smem:[#allocation22 + $0x5]] %s6103_s17 }
  0x54   :  { %181 = sst [smem:[#allocation22 + $0x6]] %s8248_s1 }
  0x55   :  { %183 = sst [smem:[#allocation22 + $0x7]] %s6100_s19 }
  0x56   :  { %185 = sst [smem:[#allocation22 + $0x8]] %s6099_s0 }
  0x57   :  { %187 = dma.general %s8133_s8, 8192, %s166_s23, %s6110_s7, %s6111_s26, [#allocation22], %s6255_s25, 0  }
  0x58   :  { %204 = sst [smem:[#allocation24]] %s8248_s1  ;;  %s6113_s8 = smov [#allocation11 + $0x3]  }
  0x59   :  { %206 = sst [smem:[#allocation24 + $0x1]] %s8248_s1 }
  0x5a   :  { %208 = sst [smem:[#allocation24 + $0x2]] %s6103_s17 }
  0x5b   :  { %210 = sst [smem:[#allocation24 + $0x3]] %s6100_s19 }
  0x5c   :  { %212 = sst [smem:[#allocation24 + $0x4]] %s6101_s20 }
  0x5d   :  { %214 = sst [smem:[#allocation24 + $0x5]] %s6103_s17 }
  0x5e   :  { %216 = sst [smem:[#allocation24 + $0x6]] %s6101_s20 }
  0x5f   :  { %218 = sst [smem:[#allocation24 + $0x7]] %s6100_s19 }
  0x60   :  { %220 = sst [smem:[#allocation24 + $0x8]] %s6099_s0 }
  0x61   :  { %222 = dma.general %s8135_s10, 4096, %s201_s29, %s6113_s8, %s6114_s30, [#allocation24], %s6255_s25, 0  }
  0x62   :  { %v6305_v0 = vld [vmem:[%s8137_s12] sm:$0xff]  ;;  %v6310_v1 = vld [vmem:[%s8137_s12 + $0x8] sm:$0xff]  ;;  %v6315_v2 = vld [vmem:[%s8137_s12 + $0x10] sm:$0xff]  ;;  %s8265_s23 = sld [smem:[#allocation147_spill]] }
  0x63   :  { %8249 = vst [vmem:[#allocation38_spill] sm:$0xff] %v6305_v0  ;;  %8250 = vst [vmem:[#allocation39_spill] sm:$0xff] %v6310_v1  ;;  %v6320_v3 = vld [vmem:[%s8137_s12 + $0x18] sm:$0xff]  ;;  %v6325_v4 = vld [vmem:[%s8137_s12 + $0x20] sm:$0xff] }
  0x64   :  { %8251 = vst [vmem:[#allocation40_spill] sm:$0xff] %v6315_v2  ;;  %8252 = vst [vmem:[#allocation41_spill] sm:$0xff] %v6320_v3  ;;  %v6330_v5 = vld [vmem:[%s8137_s12 + $0x28] sm:$0xff]  ;;  %v6335_v6 = vld [vmem:[%s8137_s12 + $0x30] sm:$0xff] }
  0x65   :  { %8253 = vst [vmem:[#allocation42_spill] sm:$0xff] %v6325_v4  ;;  %8254 = vst [vmem:[#allocation43_spill] sm:$0xff] %v6330_v5  ;;  %v6340_v7 = vld [vmem:[%s8137_s12 + $0x38] sm:$0xff]  ;;  %v6345_v8 = vld [vmem:[%s8137_s12 + $0x40] sm:$0xff] }
  0x66   :  { %8255 = vst [vmem:[#allocation44_spill] sm:$0xff] %v6335_v6  ;;  %8256 = vst [vmem:[#allocation45_spill] sm:$0xff] %v6340_v7  ;;  %v6350_v9 = vld [vmem:[%s8137_s12 + $0x48] sm:$0xff]  ;;  %v6355_v10 = vld [vmem:[%s8137_s12 + $0x50] sm:$0xff] }
  0x67   :  { %8257 = vst [vmem:[#allocation46_spill] sm:$0xff] %v6345_v8  ;;  %8258 = vst [vmem:[#allocation47_spill] sm:$0xff] %v6350_v9  ;;  %v6360_v11 = vld [vmem:[%s8137_s12 + $0x58] sm:$0xff]  ;;  %v6365_v12 = vld [vmem:[%s8137_s12 + $0x60] sm:$0xff] }
  0x68   :  { %8259 = vst [vmem:[#allocation48_spill] sm:$0xff] %v6355_v10  ;;  %8260 = vst [vmem:[#allocation49_spill] sm:$0xff] %v6360_v11  ;;  %v6370_v13 = vld [vmem:[%s8137_s12 + $0x68] sm:$0xff]  ;;  %v6375_v14 = vld [vmem:[%s8137_s12 + $0x70] sm:$0xff] }
  0x69   :  { %8261 = vst [vmem:[#allocation50_spill] sm:$0xff] %v6365_v12  ;;  %8262 = vst [vmem:[#allocation51_spill] sm:$0xff] %v6370_v13  ;;  %v6380_v15 = vld [vmem:[%s8137_s12 + $0x78] sm:$0xff]  ;;  %v316_v16 = vld [vmem:[#allocation12] sm:$0xff] }
  0x6a   :  { %8263 = vst [vmem:[#allocation52_spill] sm:$0xff] %v6375_v14  ;;  %8264 = vst [vmem:[#allocation53_spill] sm:$0xff] %v6380_v15  ;;  %v320_v17 = vld [vmem:[#allocation12 + $0x20] sm:$0xff]  ;;  %v317_v18 = vld [vmem:[#allocation12 + $0x8] sm:$0xff] }
  0x6b   :  { %v5055_v19 = vcombine.high %v316_v16, %v320_v17  ;;  %v321_v20 = vld [vmem:[#allocation12 + $0x28] sm:$0xff]  ;;  %v5054_v21 = vcombine.low %v316_v16, %v320_v17  ;;  %v324_v22 = vld [vmem:[#allocation12 + $0x40] sm:$0xff] }
  0x6c   :  { %v328_v23 = vld [vmem:[#allocation12 + $0x60] sm:$0xff]  ;;  %v5057_v25 = vcombine.high %v317_v18, %v321_v20  ;;  %v5056_v26 = vcombine.low %v317_v18, %v321_v20  ;;  %v325_v28 = vld [vmem:[#allocation12 + $0x48] sm:$0xff] }
  0x6d   :  { %v5063_v27 = vcombine.high %v324_v22, %v328_v23  ;;  %v329_v29 = vld [vmem:[#allocation12 + $0x68] sm:$0xff]  ;;  %v332_v30 = vld [vmem:[#allocation12 + $0x80] sm:$0xff]  ;;  %766 = vmatprep.subr.bf16.mxu0 %v5055_v19  ;;  %v5062_v35 = vcombine.low %v324_v22, %v328_v23 }
  0x6e   :  { %v5065_v31 = vcombine.high %v325_v28, %v329_v29  ;;  %v336_v32 = vld [vmem:[#allocation12 + $0xa0] sm:$0xff]  ;;  %v333_v33 = vld [vmem:[#allocation12 + $0x88] sm:$0xff]  ;;  %839 = vmatprep.subr.bf16.mxu1 %v5057_v25  ;;  %767 = vmatpush1.bf16.msra.mxu0 %v5054_v21  ;;  %v5064_v36 = vcombine.low %v325_v28, %v329_v29 }
  0x6f   :  { %v337_v34 = vld [vmem:[#allocation12 + $0xa8] sm:$0xff]  ;;  %840 = vmatpush1.bf16.msra.mxu1 %v5056_v26  ;;  %768 = vmatprep.subr.bf16.mxu0 %v5063_v27  ;;  %v5071_v37 = vcombine.high %v332_v30, %v336_v32  ;;  %v340_v39 = vld [vmem:[#allocation12 + $0xc0] sm:$0xff]  ;;  %v5070_v43 = vcombine.low %v332_v30, %v336_v32 }
  0x70   :  { %841 = vmatprep.subr.bf16.mxu1 %v5065_v31  ;;  %v5073_v38 = vcombine.high %v333_v33, %v337_v34  ;;  %v344_v40 = vld [vmem:[#allocation12 + $0xe0] sm:$0xff]  ;;  %v341_v41 = vld [vmem:[#allocation12 + $0xc8] sm:$0xff]  ;;  %v5072_v44 = vcombine.low %v333_v33, %v337_v34  ;;  %v318_v31 = vld [vmem:[#allocation12 + $0x10] sm:$0xff] }
  0x71   :  { %v345_v42 = vld [vmem:[#allocation12 + $0xe8] sm:$0xff]  ;;  %v5079_v45 = vcombine.high %v340_v39, %v344_v40  ;;  %v348_v47 = vld [vmem:[#allocation12 + $0x100] sm:$0xff]  ;;  %v5078_v51 = vcombine.low %v340_v39, %v344_v40  ;;  %v322_v33 = vld [vmem:[#allocation12 + $0x30] sm:$0xff] }
  0x72   :  { %769 = vmatpush1.bf16.msra.mxu0 %v5062_v35  ;;  %v5081_v46 = vcombine.high %v341_v41, %v345_v42  ;;  %v352_v48 = vld [vmem:[#allocation12 + $0x120] sm:$0xff]  ;;  %v349_v49 = vld [vmem:[#allocation12 + $0x108] sm:$0xff]  ;;  %v5080_v52 = vcombine.low %v341_v41, %v345_v42  ;;  %v319_v34 = vld [vmem:[#allocation12 + $0x18] sm:$0xff]  ;;  %v5059_v39 = vcombine.high %v318_v31, %v322_v33 }
  0x73   :  { %842 = vmatpush1.bf16.msra.mxu1 %v5064_v36  ;;  %770 = vmatprep.subr.bf16.mxu0 %v5071_v37  ;;  %v353_v50 = vld [vmem:[#allocation12 + $0x128] sm:$0xff]  ;;  %v5087_v53 = vcombine.high %v348_v47, %v352_v48  ;;  %v356_v54 = vld [vmem:[#allocation12 + $0x140] sm:$0xff]  ;;  %v5086_v59 = vcombine.low %v348_v47, %v352_v48  ;;  %v323_v35 = vld [vmem:[#allocation12 + $0x38] sm:$0xff] }
  0x74   :  { %843 = vmatprep.subr.bf16.mxu1 %v5073_v38  ;;  %v5089_v55 = vcombine.high %v349_v49, %v353_v50  ;;  %v360_v56 = vld [vmem:[#allocation12 + $0x160] sm:$0xff]  ;;  %v357_v57 = vld [vmem:[#allocation12 + $0x148] sm:$0xff]  ;;  %v5088_v60 = vcombine.low %v349_v49, %v353_v50  ;;  %v326_v40 = vld [vmem:[#allocation12 + $0x50] sm:$0xff]  ;;  %v5061_v41 = vcombine.high %v319_v34, %v323_v35 }
  0x75   :  { %v361_v58 = vld [vmem:[#allocation12 + $0x168] sm:$0xff]  ;;  %v5095_v61 = vcombine.high %v356_v54, %v360_v56  ;;  %v364_v62 = vld [vmem:[#allocation12 + $0x180] sm:$0xff]  ;;  %v5094_v19 = vcombine.low %v356_v54, %v360_v56  ;;  %v330_v42 = vld [vmem:[#allocation12 + $0x70] sm:$0xff] }
  0x76   :  { %771 = vmatpush1.bf16.msra.mxu0 %v5070_v43  ;;  %v5097_v63 = vcombine.high %v357_v57, %v361_v58  ;;  %v368_v16 = vld [vmem:[#allocation12 + $0x1a0] sm:$0xff]  ;;  %v365_v17 = vld [vmem:[#allocation12 + $0x188] sm:$0xff]  ;;  %v5096_v20 = vcombine.low %v357_v57, %v361_v58  ;;  %v327_v43 = vld [vmem:[#allocation12 + $0x58] sm:$0xff]  ;;  %v5067_v47 = vcombine.high %v326_v40, %v330_v42 }
  0x77   :  { %844 = vmatpush1.bf16.msra.mxu1 %v5072_v44  ;;  %772 = vmatprep.subr.bf16.mxu0 %v5079_v45  ;;  %v369_v18 = vld [vmem:[#allocation12 + $0x1a8] sm:$0xff]  ;;  %v5103_v21 = vcombine.high %v364_v62, %v368_v16  ;;  %v372_v23 = vld [vmem:[#allocation12 + $0x1c0] sm:$0xff]  ;;  %v5102_v28 = vcombine.low %v364_v62, %v368_v16  ;;  %v331_v44 = vld [vmem:[#allocation12 + $0x78] sm:$0xff]  ;;  %v5058_v45 = vcombine.low %v318_v31, %v322_v33 }
  0x78   :  { %845 = vmatprep.subr.bf16.mxu1 %v5081_v46  ;;  %v5105_v22 = vcombine.high %v365_v17, %v369_v18  ;;  %v376_v25 = vld [vmem:[#allocation12 + $0x1e0] sm:$0xff]  ;;  %v373_v26 = vld [vmem:[#allocation12 + $0x1c8] sm:$0xff]  ;;  %v5104_v29 = vcombine.low %v365_v17, %v369_v18  ;;  %v5060_v46 = vcombine.low %v319_v34, %v323_v35  ;;  %v334_v48 = vld [vmem:[#allocation12 + $0x90] sm:$0xff]  ;;  %v5069_v49 = vcombine.high %v327_v43, %v331_v44 }
  0x79   :  { %v377_v27 = vld [vmem:[#allocation12 + $0x1e8] sm:$0xff]  ;;  %v5111_v30 = vcombine.high %v372_v23, %v376_v25  ;;  %v5110_v36 = vcombine.low %v372_v23, %v376_v25  ;;  %v6387_v38 = vld [vmem:[%s8265_s23] sm:$0xff]   ;;  %v338_v50 = vld [vmem:[#allocation12 + $0xb0] sm:$0xff]  ;;  %v5068_v54 = vcombine.low %v327_v43, %v331_v44 }
  0x7a   :  { %773 = vmatpush1.bf16.msra.mxu0 %v5078_v51  ;;  %v5113_v32 = vcombine.high %v373_v26, %v377_v27  ;;  %v5112_v37 = vcombine.low %v373_v26, %v377_v27  ;;  %v335_v51 = vld [vmem:[#allocation12 + $0x98] sm:$0xff]  ;;  %v5075_v56 = vcombine.high %v334_v48, %v338_v50  ;;  %v342_v57 = vld [vmem:[#allocation12 + $0xd0] sm:$0xff]  ;;  %v5074_v62 = vcombine.low %v334_v48, %v338_v50 }
  0x7b   :  { %846 = vmatpush1.bf16.msra.mxu1 %v5080_v52  ;;  %774 = vmatprep.subr.bf16.mxu0 %v5087_v53  ;;  %v339_v52 = vld [vmem:[#allocation12 + $0xb8] sm:$0xff]  ;;  %v5066_v53 = vcombine.low %v326_v40, %v330_v42  ;;  %v350_v17 = vld [vmem:[#allocation12 + $0x110] sm:$0xff] }
  0x7c   :  { %847 = vmatprep.subr.bf16.mxu1 %v5089_v55  ;;  %v6394_v55 = vld [vmem:[%s8265_s23 + $0x8] sm:$0xff]   ;;  %v5077_v58 = vcombine.high %v335_v51, %v339_v52  ;;  %v6403_v25 = vld [vmem:[%s8265_s23 + $0x10] sm:$0xff]   ;;  %v363_v31 = vld [vmem:[#allocation12 + $0x178] sm:$0xff] }
  0x7d   :  { %v358_v27 = vld [vmem:[#allocation12 + $0x150] sm:$0xff]  ;;  %v371_v40 = vld [vmem:[#allocation12 + $0x1b8] sm:$0xff] }
  0x7e   :  { %775 = vmatpush1.bf16.msra.mxu0 %v5086_v59  ;;  %v346_v59 = vld [vmem:[#allocation12 + $0xf0] sm:$0xff]  ;;  %v6412_v43 = vld [vmem:[%s8265_s23 + $0x18] sm:$0xff]  }
  0x7f   :  { %848 = vmatpush1.bf16.msra.mxu1 %v5088_v60  ;;  %776 = vmatprep.subr.bf16.mxu0 %v5095_v61  ;;  %v343_v60 = vld [vmem:[#allocation12 + $0xd8] sm:$0xff]  ;;  %v5083_v16 = vcombine.high %v342_v57, %v346_v59  ;;  %v366_v35 = vld [vmem:[#allocation12 + $0x190] sm:$0xff] }
  0x80   :  { %849 = vmatprep.subr.bf16.mxu1 %v5097_v63  ;;  %v347_v61 = vld [vmem:[#allocation12 + $0xf8] sm:$0xff]  ;;  %v5076_v63 = vcombine.low %v335_v51, %v339_v52 }
  0x81   :  { %v5085_v18 = vcombine.high %v343_v60, %v347_v61  ;;  %v5084_v23 = vcombine.low %v343_v60, %v347_v61  ;;  %v375_v48 = vld [vmem:[#allocation12 + $0x1d8] sm:$0xff]  ;;  %v6429_v61 = vld [vmem:[#allocation14 + $0x24] ss:$16 sps:$4 sm:$0xff]  }
  0x82   :  { %777 = vmatpush1.bf16.msra.mxu0 %v5094_v19  ;;  %v354_v19 = vld [vmem:[#allocation12 + $0x130] sm:$0xff]  ;;  %v6426_v60 = vld [vmem:[#allocation14 + $0x8] ss:$16 sps:$4 sm:$0xff]   ;;  %8268 = vst [vmem:[#allocation56_spill] sm:$0xff] %v6429_v61 }
  0x83   :  { %850 = vmatpush1.bf16.msra.mxu1 %v5096_v20  ;;  %778 = vmatprep.subr.bf16.mxu0 %v5103_v21  ;;  %v351_v20 = vld [vmem:[#allocation12 + $0x118] sm:$0xff]  ;;  %v5091_v26 = vcombine.high %v350_v17, %v354_v19  ;;  %8267 = vst [vmem:[#allocation55_spill] sm:$0xff] %v6426_v60 }
  0x84   :  { %851 = vmatprep.subr.bf16.mxu1 %v5105_v22  ;;  %v355_v21 = vld [vmem:[#allocation12 + $0x138] sm:$0xff]  ;;  %v5082_v22 = vcombine.low %v342_v57, %v346_v59  ;;  %v6418_v57 = vld [vmem:[#allocation14 + $0x4] ss:$16 sps:$4 sm:$0xff]   ;;  %v6424_v59 = vld [vmem:[#allocation14] ss:$16 sps:$4 sm:$0xff]  }
  0x85   :  { %v5092_v33 = vcombine.low %v351_v20, %v355_v21  ;;  %8266 = vst [vmem:[#allocation54_spill] sm:$0xff] %v6424_v59 }
  0x86   :  { %779 = vmatpush1.bf16.msra.mxu0 %v5102_v28  ;;  %v5093_v28 = vcombine.high %v351_v20, %v355_v21 }
  0x87   :  { %852 = vmatpush1.bf16.msra.mxu1 %v5104_v29  ;;  %780 = vmatprep.subr.bf16.mxu0 %v5111_v30  ;;  %v362_v29 = vld [vmem:[#allocation12 + $0x170] sm:$0xff]  ;;  %v359_v30 = vld [vmem:[#allocation12 + $0x158] sm:$0xff] }
  0x88   :  { %853 = vmatprep.subr.bf16.mxu1 %v5113_v32  ;;  %v5090_v32 = vcombine.low %v350_v17, %v354_v19  ;;  %v5099_v34 = vcombine.high %v358_v27, %v362_v29  ;;  %v5100_v42 = vcombine.low %v359_v30, %v363_v31 }
  0x8a   :  { %781 = vmatpush1.bf16.msra.mxu0 %v5110_v36  ;;  %v5101_v36 = vcombine.high %v359_v30, %v363_v31 }
  0x8b   :  { %854 = vmatpush1.bf16.msra.mxu1 %v5112_v37  ;;  %912 = vmatprep.subr.bf16.mxu0 %v5059_v39  ;;  %v370_v37 = vld [vmem:[#allocation12 + $0x1b0] sm:$0xff]  ;;  %v367_v39 = vld [vmem:[#allocation12 + $0x198] sm:$0xff] }
  0x8c   :  { %985 = vmatprep.subr.bf16.mxu1 %v5061_v41  ;;  %v5098_v41 = vcombine.low %v358_v27, %v362_v29  ;;  %v5107_v44 = vcombine.high %v366_v35, %v370_v37  ;;  %v5106_v50 = vcombine.low %v366_v35, %v370_v37  ;;  %v5108_v51 = vcombine.low %v367_v39, %v371_v40 }
  0x8d   :  { %799 = vmatmul.mubr.bf16.vlgmr.msra.gmra.mrb[0].mxu0 %v6387_v38 }
  0x8e   :  { %872 = vmatmul.mubr.bf16.vlgmr.msra.gmra.mrb[0].mxu1 %v6387_v38  ;;  %913 = vmatpush1.bf16.msra.mxu0 %v5058_v45  ;;  %v374_v45 = vld [vmem:[#allocation12 + $0x1d0] sm:$0xff] }
  0x8f   :  { %986 = vmatpush1.bf16.msra.mxu1 %v5060_v46  ;;  %914 = vmatprep.subr.bf16.mxu0 %v5067_v47  ;;  %v5109_v46 = vcombine.high %v367_v39, %v371_v40  ;;  %v378_v47 = vld [vmem:[#allocation12 + $0x1f0] sm:$0xff] }
  0x90   :  { %987 = vmatprep.subr.bf16.mxu1 %v5069_v49  ;;  %808 = vmatprep.mubr.bf16.mxu0 %v8145_v24  ;;  %v379_v49 = vld [vmem:[#allocation12 + $0x1f8] sm:$0xff]  ;;  %v5115_v52 = vcombine.high %v374_v45, %v378_v47 }
  0x91   :  { %881 = vmatprep.mubr.bf16.mxu1 %v8145_v24 }
  0x92   :  { %915 = vmatpush1.bf16.msra.mxu0 %v5066_v53  ;;  %v5117_v53 = vcombine.high %v375_v48, %v379_v49 }
  0x93   :  { %988 = vmatpush1.bf16.msra.mxu1 %v5068_v54  ;;  %916 = vmatprep.subr.bf16.mxu0 %v5075_v56  ;;  %v5114_v54 = vcombine.low %v374_v45, %v378_v47  ;;  %v5116_v56 = vcombine.low %v375_v48, %v379_v49 }
  0x94   :  { %989 = vmatprep.subr.bf16.mxu1 %v5077_v58  ;;  %v6421_v58 = vld [vmem:[#allocation14 + $0xc] ss:$16 sps:$4 sm:$0xff]  }
  0x95   :  { %809 = vmatmul.mubr.bf16.gmra.mrb[4].mxu0 %v6394_v55 }
  0x96   :  { %882 = vmatmul.mubr.bf16.gmra.mrb[4].mxu1 %v6394_v55  ;;  %917 = vmatpush1.bf16.msra.mxu0 %v5074_v62  ;;  %v6432_v62 = vld [vmem:[#allocation14 + $0x2c] ss:$16 sps:$4 sm:$0xff]  }
  0x97   :  { %990 = vmatpush1.bf16.msra.mxu1 %v5076_v63  ;;  %918 = vmatprep.subr.bf16.mxu0 %v5083_v16  ;;  %8269 = vst [vmem:[#allocation57_spill] sm:$0xff] %v6432_v62  ;;  %v6437_v63 = vld [vmem:[#allocation14 + $0x20] ss:$16 sps:$4 sm:$0xff]  }
  0x98   :  { %991 = vmatprep.subr.bf16.mxu1 %v5085_v18  ;;  %818 = vmatprep.mubr.bf16.mxu0 %v8145_v24  ;;  %8270 = vst [vmem:[#allocation58_spill] sm:$0xff] %v6437_v63 }
  0x99   :  { %891 = vmatprep.mubr.bf16.mxu1 %v8145_v24 }
  0x9a   :  { %919 = vmatpush1.bf16.msra.mxu0 %v5082_v22 }
  0x9b   :  { %992 = vmatpush1.bf16.msra.mxu1 %v5084_v23  ;;  %920 = vmatprep.subr.bf16.mxu0 %v5091_v26 }
  0x9c   :  { %993 = vmatprep.subr.bf16.mxu1 %v5093_v28 }
  0x9d   :  { %819 = vmatmul.mubr.bf16.gmra.mrb[8].mxu0 %v6403_v25 }
  0x9e   :  { %892 = vmatmul.mubr.bf16.gmra.mrb[8].mxu1 %v6403_v25  ;;  %921 = vmatpush1.bf16.msra.mxu0 %v5090_v32 }
  0x9f   :  { %994 = vmatpush1.bf16.msra.mxu1 %v5092_v33  ;;  %922 = vmatprep.subr.bf16.mxu0 %v5099_v34 }
  0xa0   :  { %995 = vmatprep.subr.bf16.mxu1 %v5101_v36  ;;  %828 = vmatprep.mubr.bf16.mxu0 %v8145_v24 }
  0xa1   :  { %901 = vmatprep.mubr.bf16.mxu1 %v8145_v24 }
  0xa2   :  { %923 = vmatpush1.bf16.msra.mxu0 %v5098_v41 }
  0xa3   :  { %996 = vmatpush1.bf16.msra.mxu1 %v5100_v42  ;;  %924 = vmatprep.subr.bf16.mxu0 %v5107_v44 }
  0xa4   :  { %997 = vmatprep.subr.bf16.mxu1 %v5109_v46 }
  0xa5   :  { %829 = vmatmul.mubr.bf16.gmra.mrb[12].mxu0 %v6412_v43 }
  0xa6   :  { %902 = vmatmul.mubr.bf16.gmra.mrb[12].mxu1 %v6412_v43  ;;  %925 = vmatpush1.bf16.msra.mxu0 %v5106_v50 }
  0xa7   :  { %998 = vmatpush1.bf16.msra.mxu1 %v5108_v51  ;;  %926 = vmatprep.subr.bf16.mxu0 %v5115_v52 }
  0xa8   :  { %999 = vmatprep.subr.bf16.mxu1 %v5117_v53  ;;  %944 = vmatprep.mubr.bf16.mxu0 %v8145_v24 }
  0xa9   :  { %1017 = vmatprep.mubr.bf16.mxu1 %v8145_v24 }
  0xaa   :  { %927 = vmatpush1.bf16.msra.mxu0 %v5114_v54 }
  0xab   :  { %1000 = vmatpush1.bf16.msra.mxu1 %v5116_v56  ;;  %1350 = vmatprep.subr.bf16.mxu0 %v6418_v57 }
  0xac   :  { %1391 = vmatprep.subr.bf16.mxu1 %v6421_v58 }
  0xad   :  { %945 = vmatmul.mubr.bf16.vlgmr.msra.gmra.mrb[16].mxu0 %v6387_v38 }
  0xae   :  { %1018 = vmatmul.mubr.bf16.vlgmr.msra.gmra.mrb[16].mxu1 %v6387_v38  ;;  %1351 = vmatpush1.bf16.msra.mxu0 %v6424_v59 }
  0xaf   :  { %295 = vsyncadd [#allocation11 + $0x4], 2048  ;;  %1392 = vmatpush1.bf16.msra.mxu1 %v6426_v60  ;;  %1352 = vmatprep.subr.bf16.mxu0 %v6429_v61  ;;  %v6441_v16 = vld [vmem:[#allocation14 + $0x28] ss:$16 sps:$4 sm:$0xff]   ;;  %v6443_v17 = vld [vmem:[#allocation14 + $0x44] ss:$16 sps:$4 sm:$0xff]  }
  0xb0   :  { %8271 = vst [vmem:[#allocation59_spill] sm:$0xff] %v6441_v16  ;;  %8272 = vst [vmem:[#allocation60_spill] sm:$0xff] %v6443_v17  ;;  %1393 = vmatprep.subr.bf16.mxu1 %v6432_v62  ;;  %954 = vmatprep.mubr.bf16.mxu0 %v8145_v24  ;;  %v6447_v18 = vld [vmem:[#allocation14 + $0x4c] ss:$16 sps:$4 sm:$0xff]   ;;  %v6451_v38 = vld [vmem:[#allocation14 + $0x40] ss:$16 sps:$4 sm:$0xff]  }
  0xb1   :  { %8273 = vst [vmem:[#allocation61_spill] sm:$0xff] %v6447_v18  ;;  %1027 = vmatprep.mubr.bf16.mxu1 %v8145_v24  ;;  %8274 = vst [vmem:[#allocation62_spill] sm:$0xff] %v6451_v38  ;;  %v6455_v19 = vld [vmem:[#allocation14 + $0x48] ss:$16 sps:$4 sm:$0xff]   ;;  %v6457_v20 = vld [vmem:[#allocation14 + $0x64] ss:$16 sps:$4 sm:$0xff]  }
  0xb2   :  { %1353 = vmatpush1.bf16.msra.mxu0 %v6437_v63  ;;  %8275 = vst [vmem:[#allocation63_spill] sm:$0xff] %v6455_v19  ;;  %8276 = vst [vmem:[#allocation64_spill] sm:$0xff] %v6457_v20  ;;  %v6460_v21 = vld [vmem:[#allocation14 + $0x6c] ss:$16 sps:$4 sm:$0xff]   ;;  %v6465_v22 = vld [vmem:[#allocation14 + $0x60] ss:$16 sps:$4 sm:$0xff]  }
  0xb3   :  { %1394 = vmatpush1.bf16.msra.mxu1 %v6441_v16  ;;  %1354 = vmatprep.subr.bf16.mxu0 %v6443_v17  ;;  %8277 = vst [vmem:[#allocation65_spill] sm:$0xff] %v6460_v21  ;;  %8278 = vst [vmem:[#allocation66_spill] sm:$0xff] %v6465_v22  ;;  %v6469_v23 = vld [vmem:[#allocation14 + $0x68] ss:$16 sps:$4 sm:$0xff]   ;;  %v6471_v26 = vld [vmem:[#allocation14 + $0x84] ss:$16 sps:$4 sm:$0xff]  }
  0xb4   :  { %1395 = vmatprep.subr.bf16.mxu1 %v6447_v18  ;;  %8279 = vst [vmem:[#allocation67_spill] sm:$0xff] %v6469_v23  ;;  %8280 = vst [vmem:[#allocation68_spill] sm:$0xff] %v6471_v26  ;;  %v6475_v27 = vld [vmem:[#allocation14 + $0x8c] ss:$16 sps:$4 sm:$0xff]   ;;  %v6483_v28 = vld [vmem:[#allocation14 + $0x88] ss:$16 sps:$4 sm:$0xff]  }
  0xb5   :  { %955 = vmatmul.mubr.bf16.gmra.mrb[20].mxu0 %v6394_v55  ;;  %8281 = vst [vmem:[#allocation69_spill] sm:$0xff] %v6475_v27  ;;  %8283 = vst [vmem:[#allocation71_spill] sm:$0xff] %v6483_v28  ;;  %v6485_v29 = vld [vmem:[#allocation14 + $0xa4] ss:$16 sps:$4 sm:$0xff]   ;;  %v6488_v30 = vld [vmem:[#allocation14 + $0xac] ss:$16 sps:$4 sm:$0xff]  }
  0xb6   :  { %1028 = vmatmul.mubr.bf16.gmra.mrb[20].mxu1 %v6394_v55  ;;  %1355 = vmatpush1.bf16.msra.mxu0 %v6451_v38  ;;  %v6479_v55 = vld [vmem:[#allocation14 + $0x80] ss:$16 sps:$4 sm:$0xff]   ;;  %8284 = vst [vmem:[#allocation72_spill] sm:$0xff] %v6485_v29  ;;  %8285 = vst [vmem:[#allocation73_spill] sm:$0xff] %v6488_v30  ;;  %v6497_v32 = vld [vmem:[#allocation14 + $0xa8] ss:$16 sps:$4 sm:$0xff]  }
  0xb7   :  { %1396 = vmatpush1.bf16.msra.mxu1 %v6455_v19  ;;  %1356 = vmatprep.subr.bf16.mxu0 %v6457_v20  ;;  %8282 = vst [vmem:[#allocation70_spill] sm:$0xff] %v6479_v55  ;;  %v6493_v31 = vld [vmem:[#allocation14 + $0xa0] ss:$16 sps:$4 sm:$0xff]   ;;  %8287 = vst [vmem:[#allocation75_spill] sm:$0xff] %v6497_v32  ;;  %v6499_v33 = vld [vmem:[#allocation14 + $0xc4] ss:$16 sps:$4 sm:$0xff]  }
  0xb8   :  { %1397 = vmatprep.subr.bf16.mxu1 %v6460_v21  ;;  %964 = vmatprep.mubr.bf16.mxu0 %v8145_v24  ;;  %8286 = vst [vmem:[#allocation74_spill] sm:$0xff] %v6493_v31  ;;  %8288 = vst [vmem:[#allocation76_spill] sm:$0xff] %v6499_v33  ;;  %v6503_v34 = vld [vmem:[#allocation14 + $0xcc] ss:$16 sps:$4 sm:$0xff]   ;;  %v6511_v35 = vld [vmem:[#allocation14 + $0xc8] ss:$16 sps:$4 sm:$0xff]  }
  0xb9   :  { %1037 = vmatprep.mubr.bf16.mxu1 %v8145_v24  ;;  %8289 = vst [vmem:[#allocation77_spill] sm:$0xff] %v6503_v34  ;;  %8291 = vst [vmem:[#allocation79_spill] sm:$0xff] %v6511_v35  ;;  %v6513_v36 = vld [vmem:[#allocation14 + $0xe4] ss:$16 sps:$4 sm:$0xff]   ;;  %v6516_v37 = vld [vmem:[#allocation14 + $0xec] ss:$16 sps:$4 sm:$0xff]  }
  0xba   :  { %1357 = vmatpush1.bf16.msra.mxu0 %v6465_v22  ;;  %8292 = vst [vmem:[#allocation80_spill] sm:$0xff] %v6513_v36  ;;  %8293 = vst [vmem:[#allocation81_spill] sm:$0xff] %v6516_v37  ;;  %v6521_v39 = vld [vmem:[#allocation14 + $0xe0] ss:$16 sps:$4 sm:$0xff]   ;;  %v6525_v40 = vld [vmem:[#allocation14 + $0xe8] ss:$16 sps:$4 sm:$0xff]  }
  0xbb   :  { %1398 = vmatpush1.bf16.msra.mxu1 %v6469_v23  ;;  %1358 = vmatprep.subr.bf16.mxu0 %v6471_v26  ;;  %8294 = vst [vmem:[#allocation82_spill] sm:$0xff] %v6521_v39  ;;  %8295 = vst [vmem:[#allocation83_spill] sm:$0xff] %v6525_v40  ;;  %v6527_v41 = vld [vmem:[#allocation16 + $0x4] ss:$16 sps:$4 sm:$0xff]   ;;  %v6531_v42 = vld [vmem:[#allocation16 + $0xc] ss:$16 sps:$4 sm:$0xff]  }
  0xbc   :  { %1399 = vmatprep.subr.bf16.mxu1 %v6475_v27  ;;  %8296 = vst [vmem:[#allocation84_spill] sm:$0xff] %v6527_v41  ;;  %8297 = vst [vmem:[#allocation85_spill] sm:$0xff] %v6531_v42  ;;  %v6539_v44 = vld [vmem:[#allocation16 + $0x8] ss:$16 sps:$4 sm:$0xff]   ;;  %v6541_v45 = vld [vmem:[#allocation16 + $0x24] ss:$16 sps:$4 sm:$0xff]  }
  0xbd   :  { %965 = vmatmul.mubr.bf16.gmra.mrb[24].mxu0 %v6403_v25  ;;  %v6544_v46 = vld [vmem:[#allocation16 + $0x2c] ss:$16 sps:$4 sm:$0xff]   ;;  %v6549_v47 = vld [vmem:[#allocation16 + $0x20] ss:$16 sps:$4 sm:$0xff]   ;;  %v6553_v48 = vld [vmem:[#allocation16 + $0x28] ss:$16 sps:$4 sm:$0xff]  }
  0xbe   :  { %1038 = vmatmul.mubr.bf16.gmra.mrb[24].mxu1 %v6403_v25  ;;  %1359 = vmatpush1.bf16.msra.mxu0 %v6479_v55  ;;  %v6507_v25 = vld [vmem:[#allocation14 + $0xc0] ss:$16 sps:$4 sm:$0xff]   ;;  %v6555_v49 = vld [vmem:[#allocation16 + $0x44] ss:$16 sps:$4 sm:$0xff]   ;;  %v6558_v50 = vld [vmem:[#allocation16 + $0x4c] ss:$16 sps:$4 sm:$0xff]  }
  0xbf   :  { %1400 = vmatpush1.bf16.msra.mxu1 %v6483_v28  ;;  %1360 = vmatprep.subr.bf16.mxu0 %v6485_v29  ;;  %8290 = vst [vmem:[#allocation78_spill] sm:$0xff] %v6507_v25  ;;  %v6563_v51 = vld [vmem:[#allocation16 + $0x40] ss:$16 sps:$4 sm:$0xff]   ;;  %v6567_v52 = vld [vmem:[#allocation16 + $0x48] ss:$16 sps:$4 sm:$0xff]   ;;  %s6054_s22 = scalar_lea.hbm %s8139_s14, 1024 }
  0xc0   :  { %1401 = vmatprep.subr.bf16.mxu1 %v6488_v30  ;;  %974 = vmatprep.mubr.bf16.mxu0 %v8145_v24  ;;  %v6569_v53 = vld [vmem:[#allocation16 + $0x64] ss:$16 sps:$4 sm:$0xff]   ;;  %v6572_v54 = vld [vmem:[#allocation16 + $0x6c] ss:$16 sps:$4 sm:$0xff]   ;;  %v6575_v56 = vld [vmem:[#allocation16 + $0x60] ss:$16 sps:$4 sm:$0xff]   ;;  %p6055_p10 = scmp.ne.s32.totalorder %s8139_s14, %s6054_s22  ;;  %p6058_p11 = scmp.lt.u32.totalorder %s6054_s22, %s8139_s14 }
  0xc1   :  { %1047 = vmatprep.mubr.bf16.mxu1 %v8145_v24  ;;  %v6581_v7 = vld [vmem:[#allocation16 + $0x84] ss:$16 sps:$4 sm:$0xff]   ;;  %v6584_v15 = vld [vmem:[#allocation16 + $0x8c] ss:$16 sps:$4 sm:$0xff]   ;;  %v6587_v6 = vld [vmem:[#allocation16 + $0x80] ss:$16 sps:$4 sm:$0xff]  }
  0xc2   :  { %1361 = vmatpush1.bf16.msra.mxu0 %v6493_v31  ;;  %v6591_v14 = vld [vmem:[#allocation16 + $0x88] ss:$16 sps:$4 sm:$0xff]   ;;  %v6593_v5 = vld [vmem:[#allocation16 + $0xa4] ss:$16 sps:$4 sm:$0xff]   ;;  %v6596_v13 = vld [vmem:[#allocation16 + $0xac] ss:$16 sps:$4 sm:$0xff]   ;;  %p6060_p12 = pnand %p6058_p11, %p6055_p10 }
  0xc3   :  { %1402 = vmatpush1.bf16.msra.mxu1 %v6497_v32  ;;  %1362 = vmatprep.subr.bf16.mxu0 %v6499_v33  ;;  %v6599_v4 = vld [vmem:[#allocation16 + $0xa0] ss:$16 sps:$4 sm:$0xff]   ;;  %v6603_v12 = vld [vmem:[#allocation16 + $0xa8] ss:$16 sps:$4 sm:$0xff]   ;;  %v6605_v3 = vld [vmem:[#allocation16 + $0xc4] ss:$16 sps:$4 sm:$0xff]  }
  0xc4   :  { %1403 = vmatprep.subr.bf16.mxu1 %v6503_v34  ;;  %v6608_v11 = vld [vmem:[#allocation16 + $0xcc] ss:$16 sps:$4 sm:$0xff]   ;;  %v6611_v2 = vld [vmem:[#allocation16 + $0xc0] ss:$16 sps:$4 sm:$0xff]   ;;  %v6615_v10 = vld [vmem:[#allocation16 + $0xc8] ss:$16 sps:$4 sm:$0xff]  }
  0xc5   :  { %975 = vmatmul.mubr.bf16.gmra.mrb[28].mxu0 %v6412_v43  ;;  %8298 = vst [vmem:[#allocation86_spill] sm:$0xff] %v6608_v11  ;;  %v6617_v1 = vld [vmem:[#allocation16 + $0xe4] ss:$16 sps:$4 sm:$0xff]   ;;  %v6620_v9 = vld [vmem:[#allocation16 + $0xec] ss:$16 sps:$4 sm:$0xff]  }
  0xc6   :  { %1048 = vmatmul.mubr.bf16.gmra.mrb[28].mxu1 %v6412_v43  ;;  %1363 = vmatpush1.bf16.msra.mxu0 %v6507_v25  ;;  %v6535_v43 = vld [vmem:[#allocation16] ss:$16 sps:$4 sm:$0xff]   ;;  %v6627_v8 = vld [vmem:[#allocation16 + $0xe8] ss:$16 sps:$4 sm:$0xff]  }
  0xc7   :  { %1404 = vmatpush1.bf16.msra.mxu1 %v6511_v35  ;;  %1364 = vmatprep.subr.bf16.mxu0 %v6513_v36  ;;  %v6623_v0 = vld [vmem:[#allocation16 + $0xe0] ss:$16 sps:$4 sm:$0xff]  }
  0xc8   :  { %1405 = vmatprep.subr.bf16.mxu1 %v6516_v37  ;;  %1382 = vmatprep.mubr.bf16.mxu0 %v8145_v24 }
  0xc9   :  { %1423 = vmatprep.mubr.bf16.mxu1 %v8145_v24 }
  0xca   :  { %1365 = vmatpush1.bf16.msra.mxu0 %v6521_v39 }
  0xcb   :  { %1406 = vmatpush1.bf16.msra.mxu1 %v6525_v40  ;;  %1596 = vmatprep.subr.bf16.mxu0 %v6527_v41 }
  0xcc   :  { %1637 = vmatprep.subr.bf16.mxu1 %v6531_v42 }
  0xcd   :  { %1383 = vmatmul.mubr.bf16.vlgmr.msra.gmra.mrb[32].mxu0 %v8145_v24 }
  0xce   :  { %1424 = vmatmul.mubr.bf16.vlgmr.msra.gmra.mrb[32].mxu1 %v8145_v24  ;;  %1597 = vmatpush1.bf16.msra.mxu0 %v6535_v43 }
  0xcf   :  { %1638 = vmatpush1.bf16.msra.mxu1 %v6539_v44  ;;  %1598 = vmatprep.subr.bf16.mxu0 %v6541_v45 }
  0xd0   :  { %1639 = vmatprep.subr.bf16.mxu1 %v6544_v46  ;;  %1628 = vmatprep.mubr.bf16.mxu0 %v8145_v24 }
  0xd1   :  { %1669 = vmatprep.mubr.bf16.mxu1 %v8145_v24  ;;  %v6579_v24 = vld [vmem:[#allocation16 + $0x68] ss:$16 sps:$4 sm:$0xff]  }
  0xd2   :  { %1599 = vmatpush1.bf16.msra.mxu0 %v6549_v47 }
  0xd3   :  { %1640 = vmatpush1.bf16.msra.mxu1 %v6553_v48  ;;  %1600 = vmatprep.subr.bf16.mxu0 %v6555_v49 }
  0xd4   :  { %1641 = vmatprep.subr.bf16.mxu1 %v6558_v50 }
  0xd6   :  { %1601 = vmatpush1.bf16.msra.mxu0 %v6563_v51 }
  0xd7   :  { %1642 = vmatpush1.bf16.msra.mxu1 %v6567_v52  ;;  %1602 = vmatprep.subr.bf16.mxu0 %v6569_v53 }
  0xd8   :  { %1643 = vmatprep.subr.bf16.mxu1 %v6572_v54 }
  0xda   :  { %1603 = vmatpush1.bf16.msra.mxu0 %v6575_v56 }
  0xdb   :  { %1644 = vmatpush1.bf16.msra.mxu1 %v6579_v24  ;;  %1604 = vmatprep.subr.bf16.mxu0 %v6581_v7 }
  0xdc   :  { %1645 = vmatprep.subr.bf16.mxu1 %v6584_v15 }
  0xde   :  { %1605 = vmatpush1.bf16.msra.mxu0 %v6587_v6 }
  0xdf   :  { %1646 = vmatpush1.bf16.msra.mxu1 %v6591_v14  ;;  %1606 = vmatprep.subr.bf16.mxu0 %v6593_v5 }
  0xe0   :  { %1647 = vmatprep.subr.bf16.mxu1 %v6596_v13 }
  0xe2   :  { %1607 = vmatpush1.bf16.msra.mxu0 %v6599_v4 }
  0xe3   :  { %1648 = vmatpush1.bf16.msra.mxu1 %v6603_v12  ;;  %1608 = vmatprep.subr.bf16.mxu0 %v6605_v3 }
  0xe4   :  { %1649 = vmatprep.subr.bf16.mxu1 %v6608_v11  ;;  %v8299_v11 = vmov 0  }
  0xe6   :  { %1609 = vmatpush1.bf16.msra.mxu0 %v6611_v2 }
  0xe7   :  { %1650 = vmatpush1.bf16.msra.mxu1 %v6615_v10  ;;  %1610 = vmatprep.subr.bf16.mxu0 %v6617_v1 }
  0xe8   :  { %1651 = vmatprep.subr.bf16.mxu1 %v6620_v9 }
  0xea   :  { %1611 = vmatpush1.bf16.msra.mxu0 %v6623_v0 }
  0xeb   :  { %1652 = vmatpush1.bf16.msra.mxu1 %v6627_v8  ;;  %1737 = vmatprep.subr.bf16.mxu0 %v6418_v57 }
  0xec   :  { %1778 = vmatprep.subr.bf16.mxu1 %v6421_v58 }
  0xed   :  { %1629 = vmatmul.mubr.bf16.vlgmr.msra.gmra.mrb[36].mxu0 %v8299_v11 }
  0xee   :  { %1670 = vmatmul.mubr.bf16.vlgmr.msra.gmra.mrb[36].mxu1 %v8299_v11  ;;  %1738 = vmatpush1.bf16.msra.mxu0 %v6424_v59 }
  0xef   :  { %1779 = vmatpush1.bf16.msra.mxu1 %v6426_v60  ;;  %1739 = vmatprep.subr.bf16.mxu0 %v6429_v61 }
  0xf0   :  { %1780 = vmatprep.subr.bf16.mxu1 %v6432_v62  ;;  %1769 = vmatprep.mubr.bf16.mxu0 %v8299_v11 }
  0xf1   :  { %1810 = vmatprep.mubr.bf16.mxu1 %v8299_v11 }
  0xf2   :  { %1740 = vmatpush1.bf16.msra.mxu0 %v6437_v63 }
  0xf3   :  { %1781 = vmatpush1.bf16.msra.mxu1 %v6441_v16  ;;  %1741 = vmatprep.subr.bf16.mxu0 %v6443_v17 }
  0xf4   :  { %1782 = vmatprep.subr.bf16.mxu1 %v6447_v18 }
  0xf6   :  { %1742 = vmatpush1.bf16.msra.mxu0 %v6451_v38 }
  0xf7   :  { %1783 = vmatpush1.bf16.msra.mxu1 %v6455_v19  ;;  %1743 = vmatprep.subr.bf16.mxu0 %v6457_v20 }
  0xf8   :  { %1784 = vmatprep.subr.bf16.mxu1 %v6460_v21 }
  0xfa   :  { %1744 = vmatpush1.bf16.msra.mxu0 %v6465_v22 }
  0xfb   :  { %1785 = vmatpush1.bf16.msra.mxu1 %v6469_v23  ;;  %1745 = vmatprep.subr.bf16.mxu0 %v6471_v26 }
  0xfc   :  { %1786 = vmatprep.subr.bf16.mxu1 %v6475_v27 }
  0xfe   :  { %1746 = vmatpush1.bf16.msra.mxu0 %v6479_v55 }
  0xff   :  { %1787 = vmatpush1.bf16.msra.mxu1 %v6483_v28  ;;  %1747 = vmatprep.subr.bf16.mxu0 %v6485_v29 }
 0x100   :  { %1788 = vmatprep.subr.bf16.mxu1 %v6488_v30 }
 0x102   :  { %1748 = vmatpush1.bf16.msra.mxu0 %v6493_v31 }
 0x103   :  { %1789 = vmatpush1.bf16.msra.mxu1 %v6497_v32  ;;  %1749 = vmatprep.subr.bf16.mxu0 %v6499_v33  ;;  %v382_v32 = vlaneseq }
 0x104   :  { %1790 = vmatprep.subr.bf16.mxu1 %v6503_v34 }
 0x105   :  { %v6670_v33 = vshrl.u32 %v382_v32, 7 }
 0x106   :  { %1750 = vmatpush1.bf16.msra.mxu0 %v6507_v25 }
 0x107   :  { %1791 = vmatpush1.bf16.msra.mxu1 %v6511_v35  ;;  %1751 = vmatprep.subr.bf16.mxu0 %v6513_v36  ;;  %v6673_v34 = vsub.s32 0, %v6670_v33  ;;  %v6678_v36 = vld [vmem:[%s8127_s2] sm:$0xff]  ;;  %s6116_s2 = smov [#allocation10]  }
 0x108   :  { %1792 = vmatprep.subr.bf16.mxu1 %v6516_v37  ;;  %v6681_v37 = vsub.s32 2, %v6670_v33  ;;  %s304_s1 = sshll.u32 %s6116_s2, 4  ;;  %s305_s1 = int_to_ptr.vmem [resolvable:$true] %s304_s1 }
 0x109   :  { %8300 = vst [vmem:[#allocation87_spill] sm:$0xff] %v6673_v34  ;;  %v6691_v32 = vrot.slane %v6678_v36, %v6673_v34 }
 0x10a   :  { %1752 = vmatpush1.bf16.msra.mxu0 %v6521_v39  ;;  %8301 = vst [vmem:[#allocation88_spill] sm:$0xff] %v6681_v37  ;;  %v6697_v39 = vrot.slane %v6678_v36, %v6681_v37 }
 0x10b   :  { %1793 = vmatpush1.bf16.msra.mxu1 %v6525_v40  ;;  %1823 = vmatprep.subr.bf16.mxu0 %v6527_v41  ;;  %v6684_v40 = vsub.s32 3, %v6670_v33  ;;  %v6687_v41 = vsub.s32 1, %v6670_v33 }
 0x10c   :  { %1864 = vmatprep.subr.bf16.mxu1 %v6531_v42 }
 0x10d   :  { %8302 = vst [vmem:[#allocation89_spill] sm:$0xff] %v6684_v40  ;;  %8303 = vst [vmem:[#allocation90_spill] sm:$0xff] %v6687_v41  ;;  %v6705_v31 = vrot.slane %v6678_v36, %v6684_v40  ;;  %v6709_v30 = vrot.slane %v6678_v36, %v6687_v41 }
 0x160   :  { %v6693_v42 = vpop.f32.mrb[0].mxu0 }
 0x161   :  { %v6699_v35 = vpop.f32.mrb[1].mxu0  ;;  %v6701_v25 = vpop.f32.mrb[0].mxu1 }
 0x162   :  { %v804_v34 = vpop.f32.mrb[2].mxu0  ;;  %v6711_v29 = vpop.f32.mrb[1].mxu1 }
 0x163   :  { %v6714_v28 = vadd.f32 %v804_v34, %v6691_v32  ;;  %v806_v37 = vpop.f32.mrb[3].mxu0  ;;  %v877_v55 = vpop.f32.mrb[2].mxu1 }
 0x164   :  { %v6717_v27 = vadd.f32 %v806_v37, %v6709_v30  ;;  %v6720_v26 = vadd.f32 %v877_v55, %v6697_v39  ;;  %v879_v40 = vpop.f32.mrb[3].mxu1 }
 0x165   :  { %8304 = vst [vmem:[#allocation91_spill] sm:$0xff] %v6714_v28  ;;  %v6723_v23 = vadd.f32 %v879_v40, %v6705_v31 }
 0x166   :  { %8305 = vst [vmem:[#allocation92_spill] sm:$0xff] %v6717_v27  ;;  %8306 = vst [vmem:[#allocation93_spill] sm:$0xff] %v6720_v26 }
 0x167   :  { %8307 = vst [vmem:[#allocation94_spill] sm:$0xff] %v6723_v23 }
 0x168   :  { %v810_v41 = vpop.f32.mrb[4].mxu0 }
 0x169   :  { %v6726_v22 = vadd.f32 %v810_v41, %v6691_v32  ;;  %v812_v21 = vpop.f32.mrb[5].mxu0  ;;  %v883_v20 = vpop.f32.mrb[4].mxu1 }
 0x16a   :  { %v6729_v34 = vadd.f32 %v812_v21, %v6709_v30  ;;  %v814_v28 = vpop.f32.mrb[6].mxu0  ;;  %v6732_v37 = vadd.f32 %v883_v20, %v6697_v39  ;;  %v885_v27 = vpop.f32.mrb[5].mxu1 }
 0x16b   :  { %8308 = vst [vmem:[#allocation95_spill] sm:$0xff] %v6726_v22  ;;  %v6735_v55 = vadd.f32 %v814_v28, %v6691_v32  ;;  %v816_v26 = vpop.f32.mrb[7].mxu0  ;;  %v6738_v40 = vadd.f32 %v885_v27, %v6705_v31  ;;  %v887_v23 = vpop.f32.mrb[6].mxu1 }
 0x16c   :  { %8309 = vst [vmem:[#allocation96_spill] sm:$0xff] %v6729_v34  ;;  %8310 = vst [vmem:[#allocation97_spill] sm:$0xff] %v6732_v37  ;;  %v6741_v41 = vadd.f32 %v816_v26, %v6709_v30  ;;  %v6744_v22 = vadd.f32 %v887_v23, %v6697_v39  ;;  %v889_v21 = vpop.f32.mrb[7].mxu1 }
 0x16d   :  { %8311 = vst [vmem:[#allocation98_spill] sm:$0xff] %v6735_v55  ;;  %8312 = vst [vmem:[#allocation99_spill] sm:$0xff] %v6738_v40  ;;  %v6747_v34 = vadd.f32 %v889_v21, %v6705_v31 }
 0x16e   :  { %8313 = vst [vmem:[#allocation100_spill] sm:$0xff] %v6741_v41  ;;  %8314 = vst [vmem:[#allocation101_spill] sm:$0xff] %v6744_v22 }
 0x16f   :  { %8315 = vst [vmem:[#allocation102_spill] sm:$0xff] %v6747_v34 }
 0x170   :  { %v820_v20 = vpop.f32.mrb[8].mxu0 }
 0x171   :  { %v6750_v37 = vadd.f32 %v820_v20, %v6691_v32  ;;  %v822_v28 = vpop.f32.mrb[9].mxu0  ;;  %v893_v55 = vpop.f32.mrb[8].mxu1 }
 0x172   :  { %v6753_v27 = vadd.f32 %v822_v28, %v6709_v30  ;;  %v824_v40 = vpop.f32.mrb[10].mxu0  ;;  %v6756_v26 = vadd.f32 %v893_v55, %v6697_v39  ;;  %v895_v41 = vpop.f32.mrb[9].mxu1 }
 0x173   :  { %8316 = vst [vmem:[#allocation103_spill] sm:$0xff] %v6750_v37  ;;  %v6759_v23 = vadd.f32 %v824_v40, %v6691_v32  ;;  %v826_v22 = vpop.f32.mrb[11].mxu0  ;;  %v6762_v21 = vadd.f32 %v895_v41, %v6705_v31  ;;  %v897_v34 = vpop.f32.mrb[10].mxu1 }
 0x174   :  { %8317 = vst [vmem:[#allocation104_spill] sm:$0xff] %v6753_v27  ;;  %8318 = vst [vmem:[#allocation105_spill] sm:$0xff] %v6756_v26  ;;  %v6765_v20 = vadd.f32 %v826_v22, %v6709_v30  ;;  %v6768_v37 = vadd.f32 %v897_v34, %v6697_v39  ;;  %v899_v28 = vpop.f32.mrb[11].mxu1 }
 0x175   :  { %8319 = vst [vmem:[#allocation106_spill] sm:$0xff] %v6759_v23  ;;  %8320 = vst [vmem:[#allocation107_spill] sm:$0xff] %v6762_v21  ;;  %v6771_v27 = vadd.f32 %v899_v28, %v6705_v31  ;;  %v400_v23 = vsub.s32 4, %v6670_v33  ;;  %v408_v28 = vsub.s32 6, %v6670_v33 }
 0x176   :  { %8321 = vst [vmem:[#allocation108_spill] sm:$0xff] %v6765_v20  ;;  %8322 = vst [vmem:[#allocation109_spill] sm:$0xff] %v6768_v37  ;;  %v404_v20 = vsub.s32 5, %v6670_v33 }
 0x177   :  { %8323 = vst [vmem:[#allocation110_spill] sm:$0xff] %v6771_v27 }
 0x178   :  { %v830_v55 = vpop.f32.mrb[12].mxu0 }
 0x179   :  { %v6774_v26 = vadd.f32 %v830_v55, %v6691_v32  ;;  %v832_v40 = vpop.f32.mrb[13].mxu0  ;;  %v903_v41 = vpop.f32.mrb[12].mxu1 }
 0x17a   :  { %v6778_v21 = vadd.f32 %v832_v40, %v6709_v30  ;;  %v834_v22 = vpop.f32.mrb[14].mxu0  ;;  %v6782_v34 = vadd.f32 %v903_v41, %v6697_v39  ;;  %v905_v37 = vpop.f32.mrb[13].mxu1  ;;  %v412_v40 = vsub.s32 7, %v6670_v33 }
 0x17b   :  { %8324 = vst [vmem:[#allocation111_spill] sm:$0xff] %v6774_v26  ;;  %v6786_v27 = vadd.f32 %v834_v22, %v6691_v32  ;;  %v836_v55 = vpop.f32.mrb[15].mxu0  ;;  %v6789_v26 = vadd.f32 %v905_v37, %v6705_v31  ;;  %v907_v19 = vpop.f32.mrb[14].mxu1  ;;  %v6808_v37 = vrot.slane %v6678_v36, %v408_v28 }
 0x17c   :  { %8325 = vst [vmem:[#allocation112_spill] sm:$0xff] %v6778_v21  ;;  %8326 = vst [vmem:[#allocation113_spill] sm:$0xff] %v6782_v34  ;;  %v6793_v21 = vadd.f32 %v836_v55, %v6709_v30  ;;  %v6796_v38 = vadd.f32 %v907_v19, %v6697_v39  ;;  %v909_v41 = vpop.f32.mrb[15].mxu1  ;;  %v6799_v34 = vrot.slane %v6678_v36, %v400_v23 }
 0x17d   :  { %8327 = vst [vmem:[#allocation114_spill] sm:$0xff] %v6786_v27  ;;  %8328 = vst [vmem:[#allocation115_spill] sm:$0xff] %v6789_v26  ;;  %v6802_v22 = vadd.f32 %v909_v41, %v6705_v31  ;;  %v6805_v27 = vrot.slane %v6678_v36, %v404_v20  ;;  %v6811_v33 = vrot.slane %v6678_v36, %v412_v40 }
 0x17e   :  { %8329 = vst [vmem:[#allocation116_spill] sm:$0xff] %v6793_v21  ;;  %8330 = vst [vmem:[#allocation117_spill] sm:$0xff] %v6796_v38 }
 0x17f   :  { %8331 = vst [vmem:[#allocation118_spill] sm:$0xff] %v6802_v22 }
 0x180   :  { %v946_v55 = vpop.f32.mrb[16].mxu0 }
 0x181   :  { %v6814_v19 = vadd.f32 %v946_v55, %v6799_v34  ;;  %v948_v21 = vpop.f32.mrb[17].mxu0  ;;  %v1019_v38 = vpop.f32.mrb[16].mxu1 }
 0x182   :  { %v6817_v23 = vadd.f32 %v948_v21, %v6805_v27  ;;  %v950_v41 = vpop.f32.mrb[18].mxu0  ;;  %v6820_v22 = vadd.f32 %v1019_v38, %v6808_v37  ;;  %v1021_v20 = vpop.f32.mrb[17].mxu1 }
 0x183   :  { %8332 = vst [vmem:[#allocation119_spill] sm:$0xff] %v6814_v19  ;;  %v6823_v28 = vadd.f32 %v950_v41, %v6799_v34  ;;  %v952_v26 = vpop.f32.mrb[19].mxu0  ;;  %v6826_v36 = vadd.f32 %v1021_v20, %v6811_v33  ;;  %v1023_v40 = vpop.f32.mrb[18].mxu1 }
 0x184   :  { %8333 = vst [vmem:[#allocation120_spill] sm:$0xff] %v6817_v23  ;;  %8334 = vst [vmem:[#allocation121_spill] sm:$0xff] %v6820_v22  ;;  %v6829_v55 = vadd.f32 %v952_v26, %v6805_v27  ;;  %v6832_v19 = vadd.f32 %v1023_v40, %v6808_v37  ;;  %v1025_v21 = vpop.f32.mrb[19].mxu1 }
 0x185   :  { %8335 = vst [vmem:[#allocation122_spill] sm:$0xff] %v6823_v28  ;;  %8336 = vst [vmem:[#allocation123_spill] sm:$0xff] %v6826_v36  ;;  %v6835_v23 = vadd.f32 %v1025_v21, %v6811_v33 }
 0x186   :  { %8337 = vst [vmem:[#allocation124_spill] sm:$0xff] %v6829_v55  ;;  %8338 = vst [vmem:[#allocation125_spill] sm:$0xff] %v6832_v19 }
 0x187   :  { %8339 = vst [vmem:[#allocation126_spill] sm:$0xff] %v6835_v23 }
 0x188   :  { %v956_v38 = vpop.f32.mrb[20].mxu0 }
 0x189   :  { %v6838_v22 = vadd.f32 %v956_v38, %v6799_v34  ;;  %v958_v41 = vpop.f32.mrb[21].mxu0  ;;  %v1029_v28 = vpop.f32.mrb[20].mxu1 }
 0x18a   :  { %v6841_v20 = vadd.f32 %v958_v41, %v6805_v27  ;;  %v960_v36 = vpop.f32.mrb[22].mxu0  ;;  %v6844_v26 = vadd.f32 %v1029_v28, %v6808_v37  ;;  %v1031_v55 = vpop.f32.mrb[21].mxu1 }
 0x18b   :  { %8340 = vst [vmem:[#allocation127_spill] sm:$0xff] %v6838_v22  ;;  %v6847_v40 = vadd.f32 %v960_v36, %v6799_v34  ;;  %v962_v19 = vpop.f32.mrb[23].mxu0  ;;  %v6850_v21 = vadd.f32 %v1031_v55, %v6811_v33  ;;  %v1033_v23 = vpop.f32.mrb[22].mxu1 }
 0x18c   :  { %8341 = vst [vmem:[#allocation128_spill] sm:$0xff] %v6841_v20  ;;  %8342 = vst [vmem:[#allocation129_spill] sm:$0xff] %v6844_v26  ;;  %v6853_v38 = vadd.f32 %v962_v19, %v6805_v27  ;;  %v6856_v22 = vadd.f32 %v1033_v23, %v6808_v37  ;;  %v1035_v41 = vpop.f32.mrb[23].mxu1 }
 0x18d   :  { %8343 = vst [vmem:[#allocation130_spill] sm:$0xff] %v6847_v40  ;;  %8344 = vst [vmem:[#allocation131_spill] sm:$0xff] %v6850_v21  ;;  %v6859_v20 = vadd.f32 %v1035_v41, %v6811_v33 }
 0x18e   :  { %8345 = vst [vmem:[#allocation132_spill] sm:$0xff] %v6853_v38  ;;  %8346 = vst [vmem:[#allocation133_spill] sm:$0xff] %v6856_v22 }
 0x18f   :  { %8347 = vst [vmem:[#allocation134_spill] sm:$0xff] %v6859_v20 }
 0x190   :  { %v966_v28 = vpop.f32.mrb[24].mxu0 }
 0x191   :  { %v6862_v26 = vadd.f32 %v966_v28, %v6799_v34  ;;  %v968_v36 = vpop.f32.mrb[25].mxu0  ;;  %v1039_v40 = vpop.f32.mrb[24].mxu1 }
 0x192   :  { %v6865_v55 = vadd.f32 %v968_v36, %v6805_v27  ;;  %v970_v21 = vpop.f32.mrb[26].mxu0  ;;  %v6868_v19 = vadd.f32 %v1039_v40, %v6808_v37  ;;  %v1041_v38 = vpop.f32.mrb[25].mxu1 }
 0x193   :  { %8348 = vst [vmem:[#allocation135_spill] sm:$0xff] %v6862_v26  ;;  %v6871_v23 = vadd.f32 %v970_v21, %v6799_v34  ;;  %v972_v22 = vpop.f32.mrb[27].mxu0  ;;  %v6874_v41 = vadd.f32 %v1041_v38, %v6811_v33  ;;  %v1043_v20 = vpop.f32.mrb[26].mxu1 }
 0x194   :  { %8349 = vst [vmem:[#allocation136_spill] sm:$0xff] %v6865_v55  ;;  %8350 = vst [vmem:[#allocation137_spill] sm:$0xff] %v6868_v19  ;;  %v6877_v28 = vadd.f32 %v972_v22, %v6805_v27  ;;  %v6880_v26 = vadd.f32 %v1043_v20, %v6808_v37  ;;  %v1045_v36 = vpop.f32.mrb[27].mxu1 }
 0x195   :  { %8351 = vst [vmem:[#allocation138_spill] sm:$0xff] %v6871_v23  ;;  %8352 = vst [vmem:[#allocation139_spill] sm:$0xff] %v6874_v41  ;;  %v6883_v55 = vadd.f32 %v1045_v36, %v6811_v33 }
 0x196   :  { %8353 = vst [vmem:[#allocation140_spill] sm:$0xff] %v6877_v28  ;;  %8354 = vst [vmem:[#allocation141_spill] sm:$0xff] %v6880_v26 }
 0x197   :  { %8355 = vst [vmem:[#allocation142_spill] sm:$0xff] %v6883_v55 }
 0x198   :  { %v976_v40 = vpop.f32.mrb[28].mxu0 }
 0x199   :  { %v6886_v19 = vadd.f32 %v976_v40, %v6799_v34  ;;  %v978_v21 = vpop.f32.mrb[29].mxu0  ;;  %v1049_v23 = vpop.f32.mrb[28].mxu1  ;;  %v801_v40 = vadd.f32 %v6693_v42, %v6691_v32 }
 0x19a   :  { %v6889_v38 = vadd.f32 %v978_v21, %v6805_v27  ;;  %v980_v41 = vpop.f32.mrb[30].mxu0  ;;  %v6892_v22 = vadd.f32 %v1049_v23, %v6808_v37  ;;  %v1051_v28 = vpop.f32.mrb[29].mxu1  ;;  %v874_v21 = vadd.f32 %v6701_v25, %v6697_v39  ;;  %v876_v23 = vadd.f32 %v6711_v29, %v6705_v31 }
 0x19b   :  { %8356 = vst [vmem:[#allocation143_spill] sm:$0xff] %v6886_v19  ;;  %v982_v20 = vpop.f32.mrb[31].mxu0  ;;  %v6895_v26 = vadd.f32 %v1051_v28, %v6811_v33  ;;  %v1053_v36 = vpop.f32.mrb[30].mxu1  ;;  %v803_v19 = vadd.f32 %v6699_v35, %v6709_v30 }
 0x19c   :  { %8357 = vst [vmem:[#allocation144_spill] sm:$0xff] %v6889_v38  ;;  %8358 = vst [vmem:[#allocation145_spill] sm:$0xff] %v6892_v22  ;;  %v1055_v55 = vpop.f32.mrb[31].mxu1 }
 0x19d   :  { %8359 = vst [vmem:[#allocation146_spill] sm:$0xff] %v6895_v26 }
 0x1a0   :  { %v1384_v38 = vpop.f32.mrb[32].mxu0 }
 0x1a1   :  { %v1385_v22 = vadd.f32 %v1384_v38, %v801_v40  ;;  %v1425_v18 = vpop.f32.mrb[32].mxu1  ;;  %v1386_v17 = vpop.f32.mrb[33].mxu0  ;;  %v1056_v40 = vadd.f32 %v1055_v55, %v6811_v33 }
 0x1a2   :  { %v1426_v28 = vadd.f32 %v1425_v18, %v874_v21  ;;  %v1387_v26 = vadd.f32 %v1386_v17, %v803_v19  ;;  %v1427_v16 = vpop.f32.mrb[33].mxu1  ;;  %v1388_v63 = vpop.f32.mrb[34].mxu0 }
 0x1a3   :  { %v5182_v62 = vmul.f32 -1.442695, %v1385_v22  ;;  %v1428_v61 = vadd.f32 %v1427_v16, %v876_v23  ;;  %v1389_v42 = vpop.f32.mrb[35].mxu0  ;;  %v1429_v32 = vpop.f32.mrb[34].mxu1 }
 0x1a4   :  { %v5183_v60 = vmul.f32 -1.442695, %v1387_v26  ;;  %v1430_v30 = vpop.f32.mrb[35].mxu1  ;;  %v981_v26 = vadd.f32 %v980_v41, %v6799_v34 }
 0x1a5   :  { %5443 = vpow2.f32 %v5182_v62  ;;  %v5184_v25 = vmul.f32 -1.442695, %v1428_v61  ;;  %v1054_v61 = vadd.f32 %v1053_v36, %v6808_v37 }
 0x1a6   :  { %5445 = vpow2.f32 %v5183_v60  ;;  %v983_v60 = vadd.f32 %v982_v20, %v6805_v27 }
 0x1a7   :  { %5447 = vpow2.f32 %v5184_v25 }
 0x1a8   :  { %5449 = vtanh.f32 %v1426_v28 }
 0x1af   :  { %v5444_v35 = vpop.eup %5443 }
 0x1b0   :  { %v5446_v39 = vpop.eup %5445  ;;  %v1681_v59 = vadd.f32 1.0, %v5444_v35 }
 0x1b1   :  { %v1687_v29 = vadd.f32 1.0, %v5446_v39  ;;  %v5448_v17 = vpop.eup %5447 }
 0x1b2   :  { %5451 = vrcp.f32 %v1681_v59  ;;  %v5450_v18 = vpop.eup %5449  ;;  %v1694_v19 = vadd.f32 1.0, %v5448_v17 }
 0x1b3   :  { %5453 = vrcp.f32 %v1687_v29 }
 0x1b4   :  { %5455 = vrcp.f32 %v1694_v19 }
 0x1bc   :  { %v5452_v63 = vpop.eup %5451 }
 0x1bd   :  { %v5454_v31 = vpop.eup %5453  ;;  %v1698_v16 = vmul.f32 %v5452_v63, %v5450_v18 }
 0x1be   :  { %v1697_v38 = vmul.f32 0.0, %v5454_v31  ;;  %v5456_v25 = vpop.eup %5455 }
 0x1c0   :  { %v6908_v62 = vadd.f32 %v1698_v16, %v1697_v38  ;;  %v1630_v22 = vpop.f32.mrb[36].mxu0 }
 0x1c1   :  { %v1631_v59 = vadd.f32 %v1630_v22, %v981_v26  ;;  %v1671_v21 = vpop.f32.mrb[36].mxu1  ;;  %v1632_v23 = vpop.f32.mrb[37].mxu0 }
 0x1c2   :  { %5457 = vtanh.f32 %v6908_v62  ;;  %v1672_v28 = vadd.f32 %v1671_v21, %v1054_v61  ;;  %v1633_v42 = vadd.f32 %v1632_v23, %v983_v60  ;;  %v1673_v32 = vpop.f32.mrb[37].mxu1  ;;  %v1634_v30 = vpop.f32.mrb[38].mxu0 }
 0x1c3   :  { %v5185_v34 = vmul.f32 -1.442695, %v1631_v59  ;;  %v1674_v41 = vadd.f32 %v1673_v32, %v1056_v40  ;;  %v1635_v27 = vpop.f32.mrb[39].mxu0  ;;  %v1675_v20 = vpop.f32.mrb[38].mxu1  ;;  %v8360_v40 = vld [vmem:[#allocation86_spill] sm:$0xff]  ;;  %v8362_v30 = vld [vmem:[#allocation55_spill] sm:$0xff] }
 0x1c4   :  { %v5186_v37 = vmul.f32 -1.442695, %v1633_v42  ;;  %v1676_v36 = vpop.f32.mrb[39].mxu1  ;;  %v8361_v32 = vld [vmem:[#allocation54_spill] sm:$0xff]  ;;  %v8368_v20 = vld [vmem:[#allocation61_spill] sm:$0xff] }
 0x1c5   :  { %5459 = vpow2.f32 %v5185_v34  ;;  %v5187_v55 = vmul.f32 -1.442695, %v1674_v41  ;;  %v8363_v34 = vld [vmem:[#allocation56_spill] sm:$0xff]  ;;  %v8364_v41 = vld [vmem:[#allocation57_spill] sm:$0xff]  ;;  %v8365_v27 = vld [vmem:[#allocation58_spill] sm:$0xff] }
 0x1c6   :  { %5461 = vpow2.f32 %v5186_v37  ;;  %v8369_v37 = vld [vmem:[#allocation62_spill] sm:$0xff]  ;;  %v8370_v36 = vld [vmem:[#allocation63_spill] sm:$0xff] }
 0x1c7   :  { %5463 = vpow2.f32 %v5187_v55  ;;  %v8373_v55 = vld [vmem:[#allocation66_spill] sm:$0xff] }
 0x1c8   :  { %5465 = vtanh.f32 %v1672_v28 }
 0x1cc   :  { %v5458_v33 = vpop.eup %5457 }
 0x1cd   :  { %v1701_v35 = vmul.f32 %v5458_v33, %v5456_v25  ;;  %v8371_v25 = vld [vmem:[#allocation64_spill] sm:$0xff]  ;;  %v8372_v33 = vld [vmem:[#allocation65_spill] sm:$0xff] }
 0x1cf   :  { %v5460_v39 = vpop.eup %5459  ;;  %v1726_v29 = vpack.c.bf16 %v1701_v35, %v1701_v35  ;;  %v8374_v35 = vld [vmem:[#allocation67_spill] sm:$0xff] }
 0x1d0   :  { %v5462_v17 = vpop.eup %5461  ;;  %v1705_v18 = vadd.f32 1.0, %v5460_v39  ;;  %v8375_v39 = vld [vmem:[#allocation68_spill] sm:$0xff] }
 0x1d1   :  { %v1711_v63 = vadd.f32 1.0, %v5462_v17  ;;  %1728 = vst [vmem:[#allocation3] sm:$0xf] %v1726_v29  ;;  %1770 = vmatmul.mubr.bf16.vlgmr.msra.gmra.mrb[40].mxu0 %v1726_v29  ;;  %1811 = vmatmul.mubr.bf16.vlgmr.msra.gmra.mrb[40].mxu1 %v1726_v29  ;;  %v5464_v31 = vpop.eup %5463  ;;  %v8376_v29 = vld [vmem:[#allocation69_spill] sm:$0xff]  ;;  %v8377_v17 = vld [vmem:[#allocation70_spill] sm:$0xff] }
 0x1d2   :  { %5467 = vrcp.f32 %v1705_v18  ;;  %1824 = vmatpush1.bf16.msra.mxu0 %v6535_v43  ;;  %1865 = vmatpush1.bf16.msra.mxu1 %v6539_v44  ;;  %v5466_v16 = vpop.eup %5465  ;;  %v1718_v60 = vadd.f32 1.0, %v5464_v31  ;;  %v8378_v18 = vld [vmem:[#allocation71_spill] sm:$0xff]  ;;  %v8380_v31 = vld [vmem:[#allocation73_spill] sm:$0xff] }
 0x1d3   :  { %5469 = vrcp.f32 %v1711_v63  ;;  %1825 = vmatprep.subr.bf16.mxu0 %v6541_v45  ;;  %1866 = vmatprep.subr.bf16.mxu1 %v6544_v46  ;;  %v8379_v63 = vld [vmem:[#allocation72_spill] sm:$0xff] }
 0x1d4   :  { %1855 = vmatprep.mubr.bf16.mxu0 %v8299_v11  ;;  %1896 = vmatprep.mubr.bf16.mxu1 %v8299_v11  ;;  %5471 = vrcp.f32 %v1718_v60  ;;  %v8385_v60 = vld [vmem:[#allocation78_spill] sm:$0xff] }
 0x1d6   :  { %1826 = vmatpush1.bf16.msra.mxu0 %v6549_v47  ;;  %1867 = vmatpush1.bf16.msra.mxu1 %v6553_v48 }
 0x1d7   :  { %1827 = vmatprep.subr.bf16.mxu0 %v6555_v49  ;;  %1868 = vmatprep.subr.bf16.mxu1 %v6558_v50 }
 0x1da   :  { %1828 = vmatpush1.bf16.msra.mxu0 %v6563_v51  ;;  %1869 = vmatpush1.bf16.msra.mxu1 %v6567_v52 }
 0x1db   :  { %1829 = vmatprep.subr.bf16.mxu0 %v6569_v53  ;;  %1870 = vmatprep.subr.bf16.mxu1 %v6572_v54 }
 0x1dc   :  { %v5468_v19 = vpop.eup %5467 }
 0x1dd   :  { %v5470_v38 = vpop.eup %5469  ;;  %v1722_v26 = vmul.f32 %v5468_v19, %v5466_v16  ;;  %v8381_v16 = vld [vmem:[#allocation74_spill] sm:$0xff]  ;;  %v8382_v19 = vld [vmem:[#allocation75_spill] sm:$0xff] }
 0x1de   :  { %v1721_v61 = vmul.f32 0.0, %v5470_v38  ;;  %1830 = vmatpush1.bf16.msra.mxu0 %v6575_v56  ;;  %1871 = vmatpush1.bf16.msra.mxu1 %v6579_v24  ;;  %v5472_v59 = vpop.eup %5471  ;;  %v8383_v38 = vld [vmem:[#allocation76_spill] sm:$0xff] }
 0x1df   :  { %1831 = vmatprep.subr.bf16.mxu0 %v6581_v7  ;;  %1872 = vmatprep.subr.bf16.mxu1 %v6584_v15 }
 0x1e0   :  { %v6930_v22 = vadd.f32 %v1722_v26, %v1721_v61  ;;  %v8384_v26 = vld [vmem:[#allocation77_spill] sm:$0xff]  ;;  %v8386_v61 = vld [vmem:[#allocation79_spill] sm:$0xff] }
 0x1e2   :  { %5473 = vtanh.f32 %v6930_v22  ;;  %1832 = vmatpush1.bf16.msra.mxu0 %v6587_v6  ;;  %1873 = vmatpush1.bf16.msra.mxu1 %v6591_v14 }
 0x1e3   :  { %1833 = vmatprep.subr.bf16.mxu0 %v6593_v5  ;;  %1874 = vmatprep.subr.bf16.mxu1 %v6596_v13 }
 0x1e6   :  { %1834 = vmatpush1.bf16.msra.mxu0 %v6599_v4  ;;  %1875 = vmatpush1.bf16.msra.mxu1 %v6603_v12 }
 0x1e7   :  { %1835 = vmatprep.subr.bf16.mxu0 %v6605_v3  ;;  %1876 = vmatprep.subr.bf16.mxu1 %v8360_v40 }
 0x1ea   :  { %1836 = vmatpush1.bf16.msra.mxu0 %v6611_v2  ;;  %1877 = vmatpush1.bf16.msra.mxu1 %v6615_v10 }
 0x1eb   :  { %1837 = vmatprep.subr.bf16.mxu0 %v6617_v1  ;;  %1878 = vmatprep.subr.bf16.mxu1 %v6620_v9 }
 0x1ec   :  { %v5474_v21 = vpop.eup %5473 }
 0x1ed   :  { %v1725_v23 = vmul.f32 %v5474_v21, %v5472_v59  ;;  %v8387_v59 = vld [vmem:[#allocation80_spill] sm:$0xff]  ;;  %v8388_v21 = vld [vmem:[#allocation81_spill] sm:$0xff] }
 0x1ee   :  { %1838 = vmatpush1.bf16.msra.mxu0 %v6623_v0  ;;  %1879 = vmatpush1.bf16.msra.mxu1 %v6627_v8 }
 0x1ef   :  { %v1727_v28 = vpack.c.bf16 %v1725_v23, %v1725_v23  ;;  %1964 = vmatprep.subr.bf16.mxu0 %v6418_v57  ;;  %2005 = vmatprep.subr.bf16.mxu1 %v6421_v58  ;;  %v8366_v57 = vld [vmem:[#allocation59_spill] sm:$0xff]  ;;  %v8367_v58 = vld [vmem:[#allocation60_spill] sm:$0xff]  ;;  %v8389_v23 = vld [vmem:[#allocation82_spill] sm:$0xff] }
 0x1f1   :  { %v1730_v42 = vrot.slane %v1727_v28, 4  ;;  %1856 = vmatmul.mubr.bf16.vlgmr.msra.gmra.mrb[44].mxu0 %v1727_v28  ;;  %1897 = vmatmul.mubr.bf16.vlgmr.msra.gmra.mrb[44].mxu1 %v1727_v28  ;;  %v8390_v28 = vld [vmem:[#allocation83_spill] sm:$0xff] }
 0x1f2   :  { %1965 = vmatpush1.bf16.msra.mxu0 %v8361_v32  ;;  %2006 = vmatpush1.bf16.msra.mxu1 %v8362_v30  ;;  %v8392_v32 = vld [vmem:[#allocation85_spill] sm:$0xff] }
 0x1f3   :  { %1732 = vst [vmem:[#allocation3 + $0x38] sm:$0xf0] %v1730_v42  ;;  %1966 = vmatprep.subr.bf16.mxu0 %v8363_v34  ;;  %2007 = vmatprep.subr.bf16.mxu1 %v8364_v41  ;;  %v8391_v42 = vld [vmem:[#allocation84_spill] sm:$0xff]  ;;  %v8393_v41 = vld [vmem:[#allocation91_spill] sm:$0xff] }
 0x1f4   :  { %1996 = vmatprep.mubr.bf16.mxu0 %v8299_v11  ;;  %2037 = vmatprep.mubr.bf16.mxu1 %v8299_v11 }
 0x1f6   :  { %1967 = vmatpush1.bf16.msra.mxu0 %v8365_v27  ;;  %2008 = vmatpush1.bf16.msra.mxu1 %v8366_v57  ;;  %v8394_v57 = vld [vmem:[#allocation93_spill] sm:$0xff] }
 0x1f7   :  { %1968 = vmatprep.subr.bf16.mxu0 %v8367_v58  ;;  %2009 = vmatprep.subr.bf16.mxu1 %v8368_v20 }
 0x1fa   :  { %1969 = vmatpush1.bf16.msra.mxu0 %v8369_v37  ;;  %2010 = vmatpush1.bf16.msra.mxu1 %v8370_v36  ;;  %v8395_v36 = vld [vmem:[#allocation92_spill] sm:$0xff] }
 0x1fb   :  { %1970 = vmatprep.subr.bf16.mxu0 %v8371_v25  ;;  %2011 = vmatprep.subr.bf16.mxu1 %v8372_v33  ;;  %v8396_v33 = vld [vmem:[#allocation94_spill] sm:$0xff] }
 0x1fe   :  { %1971 = vmatpush1.bf16.msra.mxu0 %v8373_v55  ;;  %2012 = vmatpush1.bf16.msra.mxu1 %v8374_v35 }
 0x1ff   :  { %1972 = vmatprep.subr.bf16.mxu0 %v8375_v39  ;;  %2013 = vmatprep.subr.bf16.mxu1 %v8376_v29 }
 0x202   :  { %1973 = vmatpush1.bf16.msra.mxu0 %v8377_v17  ;;  %2014 = vmatpush1.bf16.msra.mxu1 %v8378_v18 }
 0x203   :  { %1974 = vmatprep.subr.bf16.mxu0 %v8379_v63  ;;  %2015 = vmatprep.subr.bf16.mxu1 %v8380_v31 }
 0x206   :  { %1975 = vmatpush1.bf16.msra.mxu0 %v8381_v16  ;;  %2016 = vmatpush1.bf16.msra.mxu1 %v8382_v19 }
 0x207   :  { %1976 = vmatprep.subr.bf16.mxu0 %v8383_v38  ;;  %2017 = vmatprep.subr.bf16.mxu1 %v8384_v26 }
 0x20a   :  { %1977 = vmatpush1.bf16.msra.mxu0 %v8385_v60  ;;  %2018 = vmatpush1.bf16.msra.mxu1 %v8386_v61 }
 0x20b   :  { %1978 = vmatprep.subr.bf16.mxu0 %v8387_v59  ;;  %2019 = vmatprep.subr.bf16.mxu1 %v8388_v21 }
 0x20e   :  { %1979 = vmatpush1.bf16.msra.mxu0 %v8389_v23  ;;  %2020 = vmatpush1.bf16.msra.mxu1 %v8390_v28 }
 0x20f   :  { %2050 = vmatprep.subr.bf16.mxu0 %v8391_v42  ;;  %2091 = vmatprep.subr.bf16.mxu1 %v8392_v32 }
 0x2a4   :  { %v1771_v30 = vpop.f32.mrb[40].mxu0  ;;  %v1812_v34 = vpop.f32.mrb[40].mxu1 }
 0x2a5   :  { %v1772_v27 = vadd.f32 %v1771_v30, %v8393_v41  ;;  %v1813_v58 = vadd.f32 %v1812_v34, %v8394_v57  ;;  %v1773_v20 = vpop.f32.mrb[41].mxu0  ;;  %v1814_v37 = vpop.f32.mrb[41].mxu1  ;;  %v8397_v41 = vld [vmem:[#allocation143_spill] sm:$0xff]  ;;  %v8398_v57 = vld [vmem:[#allocation145_spill] sm:$0xff] }
 0x2a6   :  { %v1774_v25 = vadd.f32 %v1773_v20, %v8395_v36  ;;  %v1815_v55 = vadd.f32 %v1814_v37, %v8396_v33  ;;  %v1775_v35 = vpop.f32.mrb[42].mxu0  ;;  %v1816_v39 = vpop.f32.mrb[42].mxu1  ;;  %v8399_v36 = vld [vmem:[#allocation144_spill] sm:$0xff]  ;;  %v8400_v33 = vld [vmem:[#allocation146_spill] sm:$0xff] }
 0x2a7   :  { %v5188_v29 = vmul.f32 -1.442695, %v1772_v27  ;;  %v1776_v17 = vpop.f32.mrb[43].mxu0  ;;  %v1817_v18 = vpop.f32.mrb[43].mxu1 }
 0x2a8   :  { %v5189_v63 = vmul.f32 -1.442695, %v1774_v25  ;;  %v5190_v31 = vmul.f32 -1.442695, %v1815_v55 }
 0x2a9   :  { %5475 = vpow2.f32 %v5188_v29 }
 0x2aa   :  { %5477 = vpow2.f32 %v5189_v63 }
 0x2ab   :  { %5479 = vpow2.f32 %v5190_v31 }
 0x2ac   :  { %5481 = vtanh.f32 %v1813_v58 }
 0x2b3   :  { %v5476_v16 = vpop.eup %5475 }
 0x2b4   :  { %v5478_v19 = vpop.eup %5477  ;;  %v1908_v38 = vadd.f32 1.0, %v5476_v16 }
 0x2b5   :  { %v1914_v26 = vadd.f32 1.0, %v5478_v19  ;;  %v5480_v60 = vpop.eup %5479 }
 0x2b6   :  { %5483 = vrcp.f32 %v1908_v38  ;;  %v5482_v61 = vpop.eup %5481  ;;  %v1921_v28 = vadd.f32 1.0, %v5480_v60 }
 0x2b7   :  { %5485 = vrcp.f32 %v1914_v26 }
 0x2b8   :  { %5487 = vrcp.f32 %v1921_v28  ;;  %v7093_v28 = vld [vmem:[#allocation14 + $0xa4] ss:$16 sps:$4 sm:$0xff]  }
 0x2b9   :  { %8411 = vst [vmem:[#allocation63_spill] sm:$0xff] %v7093_v28 }
 0x2c0   :  { %v5484_v59 = vpop.eup %5483 }
 0x2c1   :  { %v5486_v21 = vpop.eup %5485  ;;  %v1925_v23 = vmul.f32 %v5484_v59, %v5482_v61 }
 0x2c2   :  { %v1924_v42 = vmul.f32 %v5486_v21, %v6908_v62  ;;  %v5488_v63 = vpop.eup %5487 }
 0x2c4   :  { %v6988_v32 = vadd.f32 %v1925_v23, %v1924_v42  ;;  %v1857_v30 = vpop.f32.mrb[44].mxu0  ;;  %v1898_v34 = vpop.f32.mrb[44].mxu1  ;;  %v7096_v42 = vld [vmem:[#allocation14 + $0xac] ss:$16 sps:$4 sm:$0xff]  }
 0x2c5   :  { %v1858_v27 = vadd.f32 %v1857_v30, %v8397_v41  ;;  %v1899_v58 = vadd.f32 %v1898_v34, %v8398_v57  ;;  %v1859_v20 = vpop.f32.mrb[45].mxu0  ;;  %v1900_v37 = vpop.f32.mrb[45].mxu1  ;;  %8412 = vst [vmem:[#allocation64_spill] sm:$0xff] %v7096_v42  ;;  %v7099_v30 = vld [vmem:[#allocation14 + $0xa0] ss:$16 sps:$4 sm:$0xff]  }
 0x2c6   :  { %v1860_v25 = vadd.f32 %v1859_v20, %v8399_v36  ;;  %v1901_v55 = vadd.f32 %v1900_v37, %v8400_v33  ;;  %v1861_v35 = vpop.f32.mrb[46].mxu0  ;;  %v1902_v39 = vpop.f32.mrb[46].mxu1  ;;  %5489 = vtanh.f32 %v6988_v32  ;;  %8413 = vst [vmem:[#allocation65_spill] sm:$0xff] %v7099_v30  ;;  %v7102_v34 = vld [vmem:[#allocation14 + $0xa8] ss:$16 sps:$4 sm:$0xff]  }
 0x2c7   :  { %v5191_v62 = vmul.f32 -1.442695, %v1858_v27  ;;  %v1862_v29 = vpop.f32.mrb[47].mxu0  ;;  %v1903_v17 = vpop.f32.mrb[47].mxu1  ;;  %8414 = vst [vmem:[#allocation66_spill] sm:$0xff] %v7102_v34 }
 0x2c8   :  { %v5192_v18 = vmul.f32 -1.442695, %v1860_v25  ;;  %v5193_v16 = vmul.f32 -1.442695, %v1901_v55  ;;  %v7105_v41 = vld [vmem:[#allocation14 + $0xc4] ss:$16 sps:$4 sm:$0xff]  }
 0x2c9   :  { %5491 = vpow2.f32 %v5191_v62  ;;  %8415 = vst [vmem:[#allocation67_spill] sm:$0xff] %v7105_v41  ;;  %v7108_v27 = vld [vmem:[#allocation14 + $0xcc] ss:$16 sps:$4 sm:$0xff]   ;;  %v7111_v57 = vld [vmem:[#allocation14 + $0xc0] ss:$16 sps:$4 sm:$0xff]  }
 0x2ca   :  { %5493 = vpow2.f32 %v5192_v18  ;;  %8416 = vst [vmem:[#allocation68_spill] sm:$0xff] %v7108_v27  ;;  %8417 = vst [vmem:[#allocation69_spill] sm:$0xff] %v7111_v57  ;;  %v7117_v20 = vld [vmem:[#allocation14 + $0xe4] ss:$16 sps:$4 sm:$0xff]   ;;  %v7120_v37 = vld [vmem:[#allocation14 + $0xec] ss:$16 sps:$4 sm:$0xff]  }
 0x2cb   :  { %5495 = vpow2.f32 %v5193_v16  ;;  %8419 = vst [vmem:[#allocation71_spill] sm:$0xff] %v7117_v20  ;;  %8420 = vst [vmem:[#allocation72_spill] sm:$0xff] %v7120_v37  ;;  %v7123_v36 = vld [vmem:[#allocation14 + $0xe0] ss:$16 sps:$4 sm:$0xff]   ;;  %v7126_v25 = vld [vmem:[#allocation14 + $0xe8] ss:$16 sps:$4 sm:$0xff]  }
 0x2cc   :  { %5497 = vtanh.f32 %v1899_v58  ;;  %v7114_v58 = vld [vmem:[#allocation14 + $0xc8] ss:$16 sps:$4 sm:$0xff]   ;;  %8421 = vst [vmem:[#allocation73_spill] sm:$0xff] %v7123_v36  ;;  %8422 = vst [vmem:[#allocation74_spill] sm:$0xff] %v7126_v25  ;;  %v7129_v33 = vld [vmem:[#allocation16 + $0x4] ss:$16 sps:$4 sm:$0xff]  }
 0x2cd   :  { %8418 = vst [vmem:[#allocation70_spill] sm:$0xff] %v7114_v58  ;;  %8423 = vst [vmem:[#allocation75_spill] sm:$0xff] %v7129_v33  ;;  %v7132_v55 = vld [vmem:[#allocation16 + $0xc] ss:$16 sps:$4 sm:$0xff]   ;;  %v8427_v16 = vld [vmem:[#allocation96_spill] sm:$0xff] }
 0x2ce   :  { %8424 = vst [vmem:[#allocation76_spill] sm:$0xff] %v7132_v55  ;;  %v8425_v62 = vld [vmem:[#allocation95_spill] sm:$0xff]  ;;  %v8426_v17 = vld [vmem:[#allocation97_spill] sm:$0xff] }
 0x2d0   :  { %v5490_v31 = vpop.eup %5489 }
 0x2d1   :  { %v1928_v19 = vmul.f32 %v5490_v31, %v5488_v63 }
 0x2d3   :  { %v5492_v38 = vpop.eup %5491  ;;  %v1953_v26 = vpack.c.bf16 %v1928_v19, %v1928_v19 }
 0x2d4   :  { %v5494_v60 = vpop.eup %5493  ;;  %v1932_v61 = vadd.f32 1.0, %v5492_v38  ;;  %v8428_v38 = vld [vmem:[#allocation99_spill] sm:$0xff] }
 0x2d5   :  { %v1938_v59 = vadd.f32 1.0, %v5494_v60  ;;  %v1956_v21 = vrot.slane %v1953_v26, 4  ;;  %1997 = vmatmul.mubr.bf16.vlgmr.msra.gmra.mrb[48].mxu0 %v1953_v26  ;;  %2038 = vmatmul.mubr.bf16.vlgmr.msra.gmra.mrb[48].mxu1 %v1953_v26 }
 0x2d6   :  { %5499 = vrcp.f32 %v1932_v61  ;;  %2051 = vmatpush1.bf16.msra.mxu0 %v6535_v43  ;;  %2092 = vmatpush1.bf16.msra.mxu1 %v6539_v44  ;;  %v5496_v43 = vpop.eup %5495 }
 0x2d7   :  { %5501 = vrcp.f32 %v1938_v59  ;;  %1958 = vst [vmem:[#allocation3] sm:$0xf0] %v1956_v21  ;;  %2052 = vmatprep.subr.bf16.mxu0 %v6541_v45  ;;  %2093 = vmatprep.subr.bf16.mxu1 %v6544_v46  ;;  %v5498_v44 = vpop.eup %5497 }
 0x2d8   :  { %2082 = vmatprep.mubr.bf16.mxu0 %v8299_v11  ;;  %2123 = vmatprep.mubr.bf16.mxu1 %v8299_v11 }
 0x2da   :  { %2053 = vmatpush1.bf16.msra.mxu0 %v6549_v47  ;;  %2094 = vmatpush1.bf16.msra.mxu1 %v6553_v48  ;;  %v1945_v47 = vadd.f32 1.0, %v5496_v43 }
 0x2db   :  { %2054 = vmatprep.subr.bf16.mxu0 %v6555_v49  ;;  %2095 = vmatprep.subr.bf16.mxu1 %v6558_v50  ;;  %v7069_v50 = vld [vmem:[#allocation14 + $0x64] ss:$16 sps:$4 sm:$0xff]  }
 0x2dc   :  { %5503 = vrcp.f32 %v1945_v47  ;;  %8403 = vst [vmem:[#allocation55_spill] sm:$0xff] %v7069_v50 }
 0x2de   :  { %2055 = vmatpush1.bf16.msra.mxu0 %v6563_v51  ;;  %2096 = vmatpush1.bf16.msra.mxu1 %v6567_v52  ;;  %v7072_v51 = vld [vmem:[#allocation14 + $0x6c] ss:$16 sps:$4 sm:$0xff]   ;;  %v7075_v52 = vld [vmem:[#allocation14 + $0x60] ss:$16 sps:$4 sm:$0xff]  }
 0x2df   :  { %2056 = vmatprep.subr.bf16.mxu0 %v6569_v53  ;;  %2097 = vmatprep.subr.bf16.mxu1 %v6572_v54  ;;  %8404 = vst [vmem:[#allocation56_spill] sm:$0xff] %v7072_v51  ;;  %8405 = vst [vmem:[#allocation57_spill] sm:$0xff] %v7075_v52  ;;  %v7078_v53 = vld [vmem:[#allocation14 + $0x68] ss:$16 sps:$4 sm:$0xff]   ;;  %v7081_v54 = vld [vmem:[#allocation14 + $0x84] ss:$16 sps:$4 sm:$0xff]  }
 0x2e0   :  { %v5500_v45 = vpop.eup %5499  ;;  %8406 = vst [vmem:[#allocation58_spill] sm:$0xff] %v7078_v53  ;;  %8407 = vst [vmem:[#allocation59_spill] sm:$0xff] %v7081_v54 }
 0x2e1   :  { %v5502_v46 = vpop.eup %5501  ;;  %v1949_v23 = vmul.f32 %v5500_v45, %v5498_v44 }
 0x2e2   :  { %v1948_v48 = vmul.f32 %v5502_v46, %v6930_v22  ;;  %2057 = vmatpush1.bf16.msra.mxu0 %v6575_v56  ;;  %2098 = vmatpush1.bf16.msra.mxu1 %v6579_v24  ;;  %v7066_v24 = vld [vmem:[#allocation14 + $0x48] ss:$16 sps:$4 sm:$0xff]   ;;  %v7084_v56 = vld [vmem:[#allocation14 + $0x8c] ss:$16 sps:$4 sm:$0xff]   ;;  %v7087_v22 = vld [vmem:[#allocation14 + $0x80] ss:$16 sps:$4 sm:$0xff]  }
 0x2e3   :  { %2058 = vmatprep.subr.bf16.mxu0 %v6581_v7  ;;  %2099 = vmatprep.subr.bf16.mxu1 %v6584_v15  ;;  %v7063_v15 = vld [vmem:[#allocation14 + $0x40] ss:$16 sps:$4 sm:$0xff]   ;;  %8402 = vst [vmem:[#allocation54_spill] sm:$0xff] %v7066_v24  ;;  %8408 = vst [vmem:[#allocation60_spill] sm:$0xff] %v7084_v56 }
 0x2e4   :  { %v7014_v49 = vadd.f32 %v1949_v23, %v1948_v48  ;;  %8401 = vst [vmem:[#allocation86_spill] sm:$0xff] %v7063_v15  ;;  %8409 = vst [vmem:[#allocation61_spill] sm:$0xff] %v7087_v22 }
 0x2e6   :  { %2059 = vmatpush1.bf16.msra.mxu0 %v6587_v6  ;;  %2100 = vmatpush1.bf16.msra.mxu1 %v6591_v14  ;;  %5505 = vtanh.f32 %v7014_v49  ;;  %v5504_v6 = vpop.eup %5503  ;;  %v7060_v14 = vld [vmem:[#allocation14 + $0x4c] ss:$16 sps:$4 sm:$0xff]  }
 0x2e7   :  { %2060 = vmatprep.subr.bf16.mxu0 %v6593_v5  ;;  %2101 = vmatprep.subr.bf16.mxu1 %v6596_v13  ;;  %v7057_v13 = vld [vmem:[#allocation14 + $0x44] ss:$16 sps:$4 sm:$0xff]  }
 0x2ea   :  { %2061 = vmatpush1.bf16.msra.mxu0 %v6599_v4  ;;  %2102 = vmatpush1.bf16.msra.mxu1 %v6603_v12  ;;  %v7031_v12 = vld [vmem:[#allocation14 + $0x4] ss:$16 sps:$4 sm:$0xff]  }
 0x2eb   :  { %2062 = vmatprep.subr.bf16.mxu0 %v6605_v3  ;;  %2103 = vmatprep.subr.bf16.mxu1 %v8360_v40  ;;  %v7034_v3 = vld [vmem:[#allocation14 + $0xc] ss:$16 sps:$4 sm:$0xff]   ;;  %v7090_v40 = vld [vmem:[#allocation14 + $0x88] ss:$16 sps:$4 sm:$0xff]  }
 0x2ec   :  { %8410 = vst [vmem:[#allocation62_spill] sm:$0xff] %v7090_v40 }
 0x2ee   :  { %2063 = vmatpush1.bf16.msra.mxu0 %v6611_v2  ;;  %2104 = vmatpush1.bf16.msra.mxu1 %v6615_v10  ;;  %v7040_v2 = vld [vmem:[#allocation14 + $0x8] ss:$16 sps:$4 sm:$0xff]  }
 0x2ef   :  { %2064 = vmatprep.subr.bf16.mxu0 %v6617_v1  ;;  %2105 = vmatprep.subr.bf16.mxu1 %v6620_v9  ;;  %v7037_v1 = vld [vmem:[#allocation14] ss:$16 sps:$4 sm:$0xff]   ;;  %v7054_v10 = vld [vmem:[#allocation14 + $0x28] ss:$16 sps:$4 sm:$0xff]  }
 0x2f0   :  { %v5506_v5 = vpop.eup %5505  ;;  %v7051_v9 = vld [vmem:[#allocation14 + $0x20] ss:$16 sps:$4 sm:$0xff]  }
 0x2f1   :  { %v1952_v7 = vmul.f32 %v5506_v5, %v5504_v6 }
 0x2f2   :  { %2065 = vmatpush1.bf16.msra.mxu0 %v6623_v0  ;;  %2106 = vmatpush1.bf16.msra.mxu1 %v6627_v8  ;;  %v7043_v0 = vld [vmem:[#allocation14 + $0x24] ss:$16 sps:$4 sm:$0xff]   ;;  %v7046_v8 = vld [vmem:[#allocation14 + $0x2c] ss:$16 sps:$4 sm:$0xff]  }
 0x2f3   :  { %v1954_v4 = vpack.c.bf16 %v1952_v7, %v1952_v7  ;;  %2191 = vmatprep.subr.bf16.mxu0 %v7031_v12  ;;  %2232 = vmatprep.subr.bf16.mxu1 %v7034_v3 }
 0x2f5   :  { %1959 = vst [vmem:[#allocation3 + $0x38] sm:$0xf] %v1954_v4  ;;  %2083 = vmatmul.mubr.bf16.vlgmr.msra.gmra.mrb[52].mxu0 %v1954_v4  ;;  %2124 = vmatmul.mubr.bf16.vlgmr.msra.gmra.mrb[52].mxu1 %v1954_v4 }
 0x2f6   :  { %2192 = vmatpush1.bf16.msra.mxu0 %v7037_v1  ;;  %2233 = vmatpush1.bf16.msra.mxu1 %v7040_v2 }
 0x2f7   :  { %2193 = vmatprep.subr.bf16.mxu0 %v7043_v0  ;;  %2234 = vmatprep.subr.bf16.mxu1 %v7046_v8 }
 0x2f8   :  { %2223 = vmatprep.mubr.bf16.mxu0 %v8299_v11  ;;  %2264 = vmatprep.mubr.bf16.mxu1 %v8299_v11 }
 0x2fa   :  { %2194 = vmatpush1.bf16.msra.mxu0 %v7051_v9  ;;  %2235 = vmatpush1.bf16.msra.mxu1 %v7054_v10 }
 0x2fb   :  { %2195 = vmatprep.subr.bf16.mxu0 %v7057_v13  ;;  %2236 = vmatprep.subr.bf16.mxu1 %v7060_v14 }
 0x2fe   :  { %2196 = vmatpush1.bf16.msra.mxu0 %v7063_v15  ;;  %2237 = vmatpush1.bf16.msra.mxu1 %v7066_v24 }
 0x2ff   :  { %2197 = vmatprep.subr.bf16.mxu0 %v7069_v50  ;;  %2238 = vmatprep.subr.bf16.mxu1 %v7072_v51 }
 0x302   :  { %2198 = vmatpush1.bf16.msra.mxu0 %v7075_v52  ;;  %2239 = vmatpush1.bf16.msra.mxu1 %v7078_v53 }
 0x303   :  { %2199 = vmatprep.subr.bf16.mxu0 %v7081_v54  ;;  %2240 = vmatprep.subr.bf16.mxu1 %v7084_v56 }
 0x306   :  { %2200 = vmatpush1.bf16.msra.mxu0 %v7087_v22  ;;  %2241 = vmatpush1.bf16.msra.mxu1 %v7090_v40 }
 0x307   :  { %2201 = vmatprep.subr.bf16.mxu0 %v7093_v28  ;;  %2242 = vmatprep.subr.bf16.mxu1 %v7096_v42 }
 0x30a   :  { %2202 = vmatpush1.bf16.msra.mxu0 %v7099_v30  ;;  %2243 = vmatpush1.bf16.msra.mxu1 %v7102_v34 }
 0x30b   :  { %2203 = vmatprep.subr.bf16.mxu0 %v7105_v41  ;;  %2244 = vmatprep.subr.bf16.mxu1 %v7108_v27 }
 0x30e   :  { %2204 = vmatpush1.bf16.msra.mxu0 %v7111_v57  ;;  %2245 = vmatpush1.bf16.msra.mxu1 %v7114_v58 }
 0x30f   :  { %2205 = vmatprep.subr.bf16.mxu0 %v7117_v20  ;;  %2246 = vmatprep.subr.bf16.mxu1 %v7120_v37 }
 0x312   :  { %2206 = vmatpush1.bf16.msra.mxu0 %v7123_v36  ;;  %2247 = vmatpush1.bf16.msra.mxu1 %v7126_v25 }
 0x313   :  { %2277 = vmatprep.subr.bf16.mxu0 %v7129_v33  ;;  %2318 = vmatprep.subr.bf16.mxu1 %v7132_v55 }
 0x3a8   :  { %v1998_v35 = vpop.f32.mrb[48].mxu0  ;;  %v2039_v39 = vpop.f32.mrb[48].mxu1 }
 0x3a9   :  { %v1999_v29 = vadd.f32 %v1998_v35, %v8425_v62  ;;  %v2040_v18 = vadd.f32 %v2039_v39, %v8426_v17  ;;  %v2000_v63 = vpop.f32.mrb[49].mxu0  ;;  %v2041_v31 = vpop.f32.mrb[49].mxu1 }
 0x3aa   :  { %v2001_v19 = vadd.f32 %v2000_v63, %v8427_v16  ;;  %v2042_v26 = vadd.f32 %v2041_v31, %v8428_v38  ;;  %v2002_v60 = vpop.f32.mrb[50].mxu0  ;;  %v2043_v61 = vpop.f32.mrb[50].mxu1  ;;  %v8429_v31 = vld [vmem:[#allocation138_spill] sm:$0xff] }
 0x3ab   :  { %v5194_v59 = vmul.f32 -1.442695, %v1999_v29  ;;  %v2003_v21 = vpop.f32.mrb[51].mxu0  ;;  %v2044_v43 = vpop.f32.mrb[51].mxu1  ;;  %v8431_v60 = vld [vmem:[#allocation140_spill] sm:$0xff] }
 0x3ac   :  { %v5195_v44 = vmul.f32 -1.442695, %v2001_v19  ;;  %v5196_v45 = vmul.f32 -1.442695, %v2042_v26  ;;  %v8430_v19 = vld [vmem:[#allocation141_spill] sm:$0xff] }
 0x3ad   :  { %5507 = vpow2.f32 %v5194_v59  ;;  %v8432_v59 = vld [vmem:[#allocation142_spill] sm:$0xff] }
 0x3ae   :  { %5509 = vpow2.f32 %v5195_v44 }
 0x3af   :  { %5511 = vpow2.f32 %v5196_v45 }
 0x3b0   :  { %5513 = vtanh.f32 %v2040_v18 }
 0x3b7   :  { %v5508_v46 = vpop.eup %5507 }
 0x3b8   :  { %v5510_v23 = vpop.eup %5509  ;;  %v2135_v47 = vadd.f32 1.0, %v5508_v46 }
 0x3b9   :  { %v2141_v48 = vadd.f32 1.0, %v5510_v23  ;;  %v5512_v6 = vpop.eup %5511 }
 0x3ba   :  { %5515 = vrcp.f32 %v2135_v47  ;;  %v5514_v5 = vpop.eup %5513  ;;  %v2148_v39 = vadd.f32 1.0, %v5512_v6 }
 0x3bb   :  { %5517 = vrcp.f32 %v2141_v48 }
 0x3bc   :  { %5519 = vrcp.f32 %v2148_v39 }
 0x3c4   :  { %v5516_v7 = vpop.eup %5515 }
 0x3c5   :  { %v5518_v4 = vpop.eup %5517  ;;  %v2152_v35 = vmul.f32 %v5516_v7, %v5514_v5 }
 0x3c6   :  { %v2151_v62 = vmul.f32 %v5518_v4, %v6988_v32  ;;  %v5520_v47 = vpop.eup %5519 }
 0x3c8   :  { %v7140_v29 = vadd.f32 %v2152_v35, %v2151_v62  ;;  %v2084_v17 = vpop.f32.mrb[52].mxu0  ;;  %v2125_v63 = vpop.f32.mrb[52].mxu1 }
 0x3c9   :  { %v2085_v16 = vadd.f32 %v2084_v17, %v8429_v31  ;;  %v2126_v18 = vadd.f32 %v2125_v63, %v8430_v19  ;;  %v2086_v38 = vpop.f32.mrb[53].mxu0  ;;  %v2127_v26 = vpop.f32.mrb[53].mxu1  ;;  %v7147_v17 = vld [vmem:[#allocation16] ss:$16 sps:$4 sm:$0xff]   ;;  %v7150_v63 = vld [vmem:[#allocation16 + $0x8] ss:$16 sps:$4 sm:$0xff]  }
 0x3ca   :  { %v2087_v61 = vadd.f32 %v2086_v38, %v8431_v60  ;;  %v2128_v21 = vadd.f32 %v2127_v26, %v8432_v59  ;;  %v2088_v43 = vpop.f32.mrb[54].mxu0  ;;  %v2129_v44 = vpop.f32.mrb[54].mxu1  ;;  %5521 = vtanh.f32 %v7140_v29  ;;  %v7153_v31 = vld [vmem:[#allocation16 + $0x24] ss:$16 sps:$4 sm:$0xff]   ;;  %v7161_v19 = vld [vmem:[#allocation16 + $0x20] ss:$16 sps:$4 sm:$0xff]  }
 0x3cb   :  { %v5197_v32 = vmul.f32 -1.442695, %v2085_v16  ;;  %v2089_v45 = vpop.f32.mrb[55].mxu0  ;;  %v2130_v46 = vpop.f32.mrb[55].mxu1  ;;  %v7156_v16 = vld [vmem:[#allocation16 + $0x2c] ss:$16 sps:$4 sm:$0xff]  }
 0x3cc   :  { %v5198_v23 = vmul.f32 -1.442695, %v2087_v61  ;;  %v5199_v6 = vmul.f32 -1.442695, %v2128_v21  ;;  %v7167_v38 = vld [vmem:[#allocation16 + $0x44] ss:$16 sps:$4 sm:$0xff]  }
 0x3cd   :  { %5523 = vpow2.f32 %v5197_v32  ;;  %v7170_v26 = vld [vmem:[#allocation16 + $0x4c] ss:$16 sps:$4 sm:$0xff]   ;;  %v7173_v61 = vld [vmem:[#allocation16 + $0x40] ss:$16 sps:$4 sm:$0xff]   ;;  %v7176_v59 = vld [vmem:[#allocation16 + $0x48] ss:$16 sps:$4 sm:$0xff]  }
 0x3ce   :  { %5525 = vpow2.f32 %v5198_v23  ;;  %v7179_v43 = vld [vmem:[#allocation16 + $0x64] ss:$16 sps:$4 sm:$0xff]   ;;  %v7182_v44 = vld [vmem:[#allocation16 + $0x6c] ss:$16 sps:$4 sm:$0xff]  }
 0x3cf   :  { %5527 = vpow2.f32 %v5199_v6  ;;  %v7189_v6 = vld [vmem:[#allocation16 + $0x68] ss:$16 sps:$4 sm:$0xff]  }
 0x3d0   :  { %5529 = vtanh.f32 %v2126_v18  ;;  %v7164_v18 = vld [vmem:[#allocation16 + $0x28] ss:$16 sps:$4 sm:$0xff]  }
 0x3d4   :  { %v5522_v48 = vpop.eup %5521 }
 0x3d5   :  { %v2155_v5 = vmul.f32 %v5522_v48, %v5520_v47  ;;  %v7186_v48 = vld [vmem:[#allocation16 + $0x60] ss:$16 sps:$4 sm:$0xff]  }
 0x3d7   :  { %v5524_v7 = vpop.eup %5523  ;;  %v2180_v4 = vpack.c.bf16 %v2155_v5, %v2155_v5  ;;  %v7192_v5 = vld [vmem:[#allocation16 + $0x84] ss:$16 sps:$4 sm:$0xff]  }
 0x3d8   :  { %v5526_v35 = vpop.eup %5525  ;;  %v2159_v39 = vadd.f32 1.0, %v5524_v7  ;;  %v7195_v7 = vld [vmem:[#allocation16 + $0x8c] ss:$16 sps:$4 sm:$0xff]  }
 0x3d9   :  { %v2165_v62 = vadd.f32 1.0, %v5526_v35  ;;  %2182 = vst [vmem:[#allocation3 + $0x10] sm:$0xf] %v2180_v4  ;;  %2224 = vmatmul.mubr.bf16.vlgmr.msra.gmra.mrb[56].mxu0 %v2180_v4  ;;  %2265 = vmatmul.mubr.bf16.vlgmr.msra.gmra.mrb[56].mxu1 %v2180_v4  ;;  %v5528_v60 = vpop.eup %5527  ;;  %v7203_v35 = vld [vmem:[#allocation16 + $0x88] ss:$16 sps:$4 sm:$0xff]  }
 0x3da   :  { %5531 = vrcp.f32 %v2159_v39  ;;  %2278 = vmatpush1.bf16.msra.mxu0 %v7147_v17  ;;  %2319 = vmatpush1.bf16.msra.mxu1 %v7150_v63  ;;  %v5530_v21 = vpop.eup %5529  ;;  %v2172_v23 = vadd.f32 1.0, %v5528_v60  ;;  %v7207_v39 = vld [vmem:[#allocation16 + $0xa4] ss:$16 sps:$4 sm:$0xff]   ;;  %v7213_v60 = vld [vmem:[#allocation16 + $0xa0] ss:$16 sps:$4 sm:$0xff]  }
 0x3db   :  { %5533 = vrcp.f32 %v2165_v62  ;;  %2279 = vmatprep.subr.bf16.mxu0 %v7153_v31  ;;  %2320 = vmatprep.subr.bf16.mxu1 %v7156_v16  ;;  %v7210_v62 = vld [vmem:[#allocation16 + $0xac] ss:$16 sps:$4 sm:$0xff]   ;;  %8434 = vst [vmem:[#allocation78_spill] sm:$0xff] %v7213_v60 }
 0x3dc   :  { %2309 = vmatprep.mubr.bf16.mxu0 %v8299_v11  ;;  %2350 = vmatprep.mubr.bf16.mxu1 %v8299_v11  ;;  %5535 = vrcp.f32 %v2172_v23  ;;  %8433 = vst [vmem:[#allocation77_spill] sm:$0xff] %v7210_v62  ;;  %v7228_v23 = vld [vmem:[#allocation16 + $0xc8] ss:$16 sps:$4 sm:$0xff]  }
 0x3dd   :  { %8439 = vst [vmem:[#allocation83_spill] sm:$0xff] %v7228_v23 }
 0x3de   :  { %2280 = vmatpush1.bf16.msra.mxu0 %v7161_v19  ;;  %2321 = vmatpush1.bf16.msra.mxu1 %v7164_v18 }
 0x3df   :  { %2281 = vmatprep.subr.bf16.mxu0 %v7167_v38  ;;  %2322 = vmatprep.subr.bf16.mxu1 %v7170_v26 }
 0x3e2   :  { %2282 = vmatpush1.bf16.msra.mxu0 %v7173_v61  ;;  %2323 = vmatpush1.bf16.msra.mxu1 %v7176_v59 }
 0x3e3   :  { %2283 = vmatprep.subr.bf16.mxu0 %v7179_v43  ;;  %2324 = vmatprep.subr.bf16.mxu1 %v7182_v44 }
 0x3e4   :  { %v5532_v32 = vpop.eup %5531 }
 0x3e5   :  { %v5534_v45 = vpop.eup %5533  ;;  %v2176_v46 = vmul.f32 %v5532_v32, %v5530_v21  ;;  %v7216_v21 = vld [vmem:[#allocation16 + $0xa8] ss:$16 sps:$4 sm:$0xff]   ;;  %v7219_v32 = vld [vmem:[#allocation16 + $0xc4] ss:$16 sps:$4 sm:$0xff]  }
 0x3e6   :  { %v2175_v47 = vmul.f32 %v5534_v45, %v7014_v49  ;;  %2284 = vmatpush1.bf16.msra.mxu0 %v7186_v48  ;;  %2325 = vmatpush1.bf16.msra.mxu1 %v7189_v6  ;;  %v7200_v49 = vld [vmem:[#allocation16 + $0x80] ss:$16 sps:$4 sm:$0xff]   ;;  %8435 = vst [vmem:[#allocation79_spill] sm:$0xff] %v7216_v21  ;;  %8436 = vst [vmem:[#allocation80_spill] sm:$0xff] %v7219_v32  ;;  %v7222_v45 = vld [vmem:[#allocation16 + $0xcc] ss:$16 sps:$4 sm:$0xff]  }
 0x3e7   :  { %2285 = vmatprep.subr.bf16.mxu0 %v7192_v5  ;;  %2326 = vmatprep.subr.bf16.mxu1 %v7195_v7  ;;  %8437 = vst [vmem:[#allocation81_spill] sm:$0xff] %v7222_v45 }
 0x3e8   :  { %v7198_v4 = vadd.f32 %v2176_v46, %v2175_v47  ;;  %v7225_v46 = vld [vmem:[#allocation16 + $0xc0] ss:$16 sps:$4 sm:$0xff]   ;;  %v5536_v47 = vpop.eup %5535 }
 0x3e9   :  { %8438 = vst [vmem:[#allocation82_spill] sm:$0xff] %v7225_v46 }
 0x3ea   :  { %2286 = vmatpush1.bf16.msra.mxu0 %v7200_v49  ;;  %2327 = vmatpush1.bf16.msra.mxu1 %v7203_v35  ;;  %5537 = vtanh.f32 %v7198_v4 }
 0x3eb   :  { %2287 = vmatprep.subr.bf16.mxu0 %v7207_v39  ;;  %2328 = vmatprep.subr.bf16.mxu1 %v7210_v62 }
 0x3ee   :  { %2288 = vmatpush1.bf16.msra.mxu0 %v7213_v60  ;;  %2329 = vmatpush1.bf16.msra.mxu1 %v7216_v21  ;;  %v7231_v60 = vld [vmem:[#allocation16 + $0xe4] ss:$16 sps:$4 sm:$0xff]   ;;  %v7234_v21 = vld [vmem:[#allocation16 + $0xec] ss:$16 sps:$4 sm:$0xff]  }
 0x3ef   :  { %2289 = vmatprep.subr.bf16.mxu0 %v7219_v32  ;;  %2330 = vmatprep.subr.bf16.mxu1 %v7222_v45  ;;  %8440 = vst [vmem:[#allocation84_spill] sm:$0xff] %v7231_v60  ;;  %v7237_v45 = vld [vmem:[#allocation16 + $0xe0] ss:$16 sps:$4 sm:$0xff]  }
 0x3f2   :  { %2290 = vmatpush1.bf16.msra.mxu0 %v7225_v46  ;;  %2331 = vmatpush1.bf16.msra.mxu1 %v7228_v23  ;;  %v7240_v46 = vld [vmem:[#allocation16 + $0xe8] ss:$16 sps:$4 sm:$0xff]  }
 0x3f3   :  { %2291 = vmatprep.subr.bf16.mxu0 %v7231_v60  ;;  %2332 = vmatprep.subr.bf16.mxu1 %v7234_v21 }
 0x3f4   :  { %v5538_v32 = vpop.eup %5537 }
 0x3f5   :  { %v2179_v62 = vmul.f32 %v5538_v32, %v5536_v47  ;;  %v8441_v32 = vld [vmem:[#allocation98_spill] sm:$0xff]  ;;  %v8442_v47 = vld [vmem:[#allocation101_spill] sm:$0xff] }
 0x3f6   :  { %2292 = vmatpush1.bf16.msra.mxu0 %v7237_v45  ;;  %2333 = vmatpush1.bf16.msra.mxu1 %v7240_v46 }
 0x3f7   :  { %v2181_v23 = vpack.c.bf16 %v2179_v62, %v2179_v62  ;;  %2418 = vmatprep.subr.bf16.mxu0 %v7031_v12  ;;  %2459 = vmatprep.subr.bf16.mxu1 %v7034_v3 }
 0x3f9   :  { %v2184_v60 = vrot.slane %v2181_v23, 4  ;;  %2310 = vmatmul.mubr.bf16.vlgmr.msra.gmra.mrb[60].mxu0 %v2181_v23  ;;  %2351 = vmatmul.mubr.bf16.vlgmr.msra.gmra.mrb[60].mxu1 %v2181_v23 }
 0x3fa   :  { %2419 = vmatpush1.bf16.msra.mxu0 %v7037_v1  ;;  %2460 = vmatpush1.bf16.msra.mxu1 %v7040_v2 }
 0x3fb   :  { %2186 = vst [vmem:[#allocation3 + $0x28] sm:$0xf0] %v2184_v60  ;;  %2420 = vmatprep.subr.bf16.mxu0 %v7043_v0  ;;  %2461 = vmatprep.subr.bf16.mxu1 %v7046_v8 }
 0x3fc   :  { %2450 = vmatprep.mubr.bf16.mxu0 %v8299_v11  ;;  %2491 = vmatprep.mubr.bf16.mxu1 %v8299_v11 }
 0x3fe   :  { %2421 = vmatpush1.bf16.msra.mxu0 %v7051_v9  ;;  %2462 = vmatpush1.bf16.msra.mxu1 %v7054_v10 }
 0x3ff   :  { %2422 = vmatprep.subr.bf16.mxu0 %v7057_v13  ;;  %2463 = vmatprep.subr.bf16.mxu1 %v7060_v14 }
 0x402   :  { %2423 = vmatpush1.bf16.msra.mxu0 %v7063_v15  ;;  %2464 = vmatpush1.bf16.msra.mxu1 %v7066_v24 }
 0x403   :  { %2424 = vmatprep.subr.bf16.mxu0 %v7069_v50  ;;  %2465 = vmatprep.subr.bf16.mxu1 %v7072_v51 }
 0x406   :  { %2425 = vmatpush1.bf16.msra.mxu0 %v7075_v52  ;;  %2466 = vmatpush1.bf16.msra.mxu1 %v7078_v53 }
 0x407   :  { %2426 = vmatprep.subr.bf16.mxu0 %v7081_v54  ;;  %2467 = vmatprep.subr.bf16.mxu1 %v7084_v56 }
 0x40a   :  { %2427 = vmatpush1.bf16.msra.mxu0 %v7087_v22  ;;  %2468 = vmatpush1.bf16.msra.mxu1 %v7090_v40 }
 0x40b   :  { %2428 = vmatprep.subr.bf16.mxu0 %v7093_v28  ;;  %2469 = vmatprep.subr.bf16.mxu1 %v7096_v42 }
 0x40e   :  { %2429 = vmatpush1.bf16.msra.mxu0 %v7099_v30  ;;  %2470 = vmatpush1.bf16.msra.mxu1 %v7102_v34  ;;  %v8444_v34 = vld [vmem:[#allocation102_spill] sm:$0xff] }
 0x40f   :  { %2430 = vmatprep.subr.bf16.mxu0 %v7105_v41  ;;  %2471 = vmatprep.subr.bf16.mxu1 %v7108_v27  ;;  %v8443_v41 = vld [vmem:[#allocation100_spill] sm:$0xff] }
 0x412   :  { %2431 = vmatpush1.bf16.msra.mxu0 %v7111_v57  ;;  %2472 = vmatpush1.bf16.msra.mxu1 %v7114_v58 }
 0x413   :  { %2432 = vmatprep.subr.bf16.mxu0 %v7117_v20  ;;  %2473 = vmatprep.subr.bf16.mxu1 %v7120_v37 }
 0x416   :  { %2433 = vmatpush1.bf16.msra.mxu0 %v7123_v36  ;;  %2474 = vmatpush1.bf16.msra.mxu1 %v7126_v25 }
 0x417   :  { %2504 = vmatprep.subr.bf16.mxu0 %v7129_v33  ;;  %2545 = vmatprep.subr.bf16.mxu1 %v7132_v55 }
 0x4ac   :  { %v2225_v62 = vpop.f32.mrb[56].mxu0  ;;  %v2266_v60 = vpop.f32.mrb[56].mxu1 }
 0x4ad   :  { %v2226_v23 = vadd.f32 %v2225_v62, %v8441_v32  ;;  %v2267_v57 = vadd.f32 %v2266_v60, %v8442_v47  ;;  %v2227_v27 = vpop.f32.mrb[57].mxu0  ;;  %v2268_v58 = vpop.f32.mrb[57].mxu1  ;;  %v8447_v32 = vld [vmem:[#allocation136_spill] sm:$0xff]  ;;  %v8448_v47 = vld [vmem:[#allocation139_spill] sm:$0xff] }
 0x4ae   :  { %v2228_v20 = vadd.f32 %v2227_v27, %v8443_v41  ;;  %v2269_v37 = vadd.f32 %v2268_v58, %v8444_v34  ;;  %v2229_v30 = vpop.f32.mrb[58].mxu0  ;;  %v2270_v36 = vpop.f32.mrb[58].mxu1 }
 0x4af   :  { %v5200_v42 = vmul.f32 -1.442695, %v2226_v23  ;;  %v2230_v25 = vpop.f32.mrb[59].mxu0  ;;  %v2271_v28 = vpop.f32.mrb[59].mxu1 }
 0x4b0   :  { %v5201_v33 = vmul.f32 -1.442695, %v2228_v20  ;;  %v5202_v55 = vmul.f32 -1.442695, %v2269_v37  ;;  %v8445_v25 = vld [vmem:[#allocation135_spill] sm:$0xff] }
 0x4b1   :  { %5539 = vpow2.f32 %v5200_v42 }
 0x4b2   :  { %5541 = vpow2.f32 %v5201_v33  ;;  %v8446_v33 = vld [vmem:[#allocation137_spill] sm:$0xff] }
 0x4b3   :  { %5543 = vpow2.f32 %v5202_v55 }
 0x4b4   :  { %5545 = vtanh.f32 %v2267_v57 }
 0x4bb   :  { %v5540_v40 = vpop.eup %5539 }
 0x4bc   :  { %v5542_v22 = vpop.eup %5541  ;;  %v2362_v62 = vadd.f32 1.0, %v5540_v40 }
 0x4bd   :  { %v2368_v60 = vadd.f32 1.0, %v5542_v22  ;;  %v5544_v41 = vpop.eup %5543 }
 0x4be   :  { %5547 = vrcp.f32 %v2362_v62  ;;  %v5546_v27 = vpop.eup %5545  ;;  %v2375_v36 = vadd.f32 1.0, %v5544_v41 }
 0x4bf   :  { %5549 = vrcp.f32 %v2368_v60 }
 0x4c0   :  { %5551 = vrcp.f32 %v2375_v36 }
 0x4c8   :  { %v5548_v34 = vpop.eup %5547 }
 0x4c9   :  { %v5550_v30 = vpop.eup %5549  ;;  %v2379_v58 = vmul.f32 %v5548_v34, %v5546_v27 }
 0x4ca   :  { %v2378_v28 = vmul.f32 %v5550_v30, %v7140_v29 }
 0x4cc   :  { %v7284_v20 = vadd.f32 %v2379_v58, %v2378_v28  ;;  %v2311_v42 = vpop.f32.mrb[60].mxu0  ;;  %v2352_v37 = vpop.f32.mrb[60].mxu1 }
 0x4cd   :  { %v2312_v40 = vadd.f32 %v2311_v42, %v8445_v25  ;;  %v2353_v57 = vadd.f32 %v2352_v37, %v8446_v33  ;;  %v2313_v22 = vpop.f32.mrb[61].mxu0  ;;  %v2354_v55 = vpop.f32.mrb[61].mxu1 }
 0x4ce   :  { %v2314_v23 = vadd.f32 %v2313_v22, %v8447_v32  ;;  %v2355_v62 = vadd.f32 %v2354_v55, %v8448_v47  ;;  %v2315_v60 = vpop.f32.mrb[62].mxu0  ;;  %v2356_v27 = vpop.f32.mrb[62].mxu1  ;;  %5553 = vtanh.f32 %v7284_v20 }
 0x4cf   :  { %v5203_v29 = vmul.f32 -1.442695, %v2312_v40  ;;  %v2316_v41 = vpop.f32.mrb[63].mxu0  ;;  %v2357_v34 = vpop.f32.mrb[63].mxu1 }
 0x4d0   :  { %v5204_v30 = vmul.f32 -1.442695, %v2314_v23  ;;  %v5552_v58 = vpop.eup %5551  ;;  %v5205_v28 = vmul.f32 -1.442695, %v2355_v62  ;;  %v8450_v41 = vld [vmem:[#allocation78_spill] sm:$0xff]  ;;  %v8451_v34 = vld [vmem:[#allocation79_spill] sm:$0xff] }
 0x4d1   :  { %5555 = vpow2.f32 %v5203_v29 }
 0x4d2   :  { %5557 = vpow2.f32 %v5204_v30  ;;  %v8452_v30 = vld [vmem:[#allocation80_spill] sm:$0xff] }
 0x4d3   :  { %5559 = vpow2.f32 %v5205_v28  ;;  %v8455_v28 = vld [vmem:[#allocation83_spill] sm:$0xff] }
 0x4d4   :  { %5561 = vtanh.f32 %v2353_v57 }
 0x4d8   :  { %v5554_v36 = vpop.eup %5553 }
 0x4d9   :  { %v2382_v42 = vmul.f32 %v5554_v36, %v5552_v58  ;;  %v8453_v58 = vld [vmem:[#allocation81_spill] sm:$0xff]  ;;  %v8454_v36 = vld [vmem:[#allocation82_spill] sm:$0xff] }
 0x4db   :  { %v5556_v37 = vpop.eup %5555  ;;  %v2407_v25 = vpack.c.bf16 %v2382_v42, %v2382_v42 }
 0x4dc   :  { %v5558_v33 = vpop.eup %5557  ;;  %v2386_v22 = vadd.f32 1.0, %v5556_v37  ;;  %v8456_v37 = vld [vmem:[#allocation84_spill] sm:$0xff] }
 0x4dd   :  { %v2392_v55 = vadd.f32 1.0, %v5558_v33  ;;  %v2410_v32 = vrot.slane %v2407_v25, 4  ;;  %2451 = vmatmul.mubr.bf16.vlgmr.msra.gmra.mrb[64].mxu0 %v2407_v25  ;;  %2492 = vmatmul.mubr.bf16.vlgmr.msra.gmra.mrb[64].mxu1 %v2407_v25  ;;  %v5560_v40 = vpop.eup %5559 }
 0x4de   :  { %5563 = vrcp.f32 %v2386_v22  ;;  %2505 = vmatpush1.bf16.msra.mxu0 %v7147_v17  ;;  %2546 = vmatpush1.bf16.msra.mxu1 %v7150_v63  ;;  %v5562_v57 = vpop.eup %5561  ;;  %v2399_v60 = vadd.f32 1.0, %v5560_v40  ;;  %v8459_v40 = vld [vmem:[#allocation63_spill] sm:$0xff] }
 0x4df   :  { %5565 = vrcp.f32 %v2392_v55  ;;  %2412 = vst [vmem:[#allocation3 + $0x10] sm:$0xf0] %v2410_v32  ;;  %2506 = vmatprep.subr.bf16.mxu0 %v7153_v31  ;;  %2547 = vmatprep.subr.bf16.mxu1 %v7156_v16  ;;  %v8457_v55 = vld [vmem:[#allocation61_spill] sm:$0xff]  ;;  %v8458_v32 = vld [vmem:[#allocation62_spill] sm:$0xff] }
 0x4e0   :  { %2536 = vmatprep.mubr.bf16.mxu0 %v8299_v11  ;;  %2577 = vmatprep.mubr.bf16.mxu1 %v8299_v11  ;;  %5567 = vrcp.f32 %v2399_v60  ;;  %v8464_v60 = vld [vmem:[#allocation68_spill] sm:$0xff] }
 0x4e2   :  { %2507 = vmatpush1.bf16.msra.mxu0 %v7161_v19  ;;  %2548 = vmatpush1.bf16.msra.mxu1 %v7164_v18 }
 0x4e3   :  { %2508 = vmatprep.subr.bf16.mxu0 %v7167_v38  ;;  %2549 = vmatprep.subr.bf16.mxu1 %v7170_v26 }
 0x4e6   :  { %2509 = vmatpush1.bf16.msra.mxu0 %v7173_v61  ;;  %2550 = vmatpush1.bf16.msra.mxu1 %v7176_v59 }
 0x4e7   :  { %2510 = vmatprep.subr.bf16.mxu0 %v7179_v43  ;;  %2551 = vmatprep.subr.bf16.mxu1 %v7182_v44 }
 0x4e8   :  { %v5564_v23 = vpop.eup %5563 }
 0x4e9   :  { %v5566_v47 = vpop.eup %5565  ;;  %v2403_v62 = vmul.f32 %v5564_v23, %v5562_v57  ;;  %v8460_v57 = vld [vmem:[#allocation64_spill] sm:$0xff]  ;;  %v8461_v23 = vld [vmem:[#allocation65_spill] sm:$0xff] }
 0x4ea   :  { %v2402_v27 = vmul.f32 %v5566_v47, %v7198_v4  ;;  %2511 = vmatpush1.bf16.msra.mxu0 %v7186_v48  ;;  %2552 = vmatpush1.bf16.msra.mxu1 %v7189_v6  ;;  %v8449_v4 = vld [vmem:[#allocation77_spill] sm:$0xff]  ;;  %v5568_v42 = vpop.eup %5567  ;;  %v8462_v47 = vld [vmem:[#allocation66_spill] sm:$0xff] }
 0x4eb   :  { %2512 = vmatprep.subr.bf16.mxu0 %v7192_v5  ;;  %2553 = vmatprep.subr.bf16.mxu1 %v7195_v7 }
 0x4ec   :  { %v7310_v29 = vadd.f32 %v2403_v62, %v2402_v27  ;;  %v8463_v62 = vld [vmem:[#allocation67_spill] sm:$0xff]  ;;  %v8465_v27 = vld [vmem:[#allocation69_spill] sm:$0xff] }
 0x4ee   :  { %2513 = vmatpush1.bf16.msra.mxu0 %v7200_v49  ;;  %2554 = vmatpush1.bf16.msra.mxu1 %v7203_v35  ;;  %5569 = vtanh.f32 %v7310_v29 }
 0x4ef   :  { %2514 = vmatprep.subr.bf16.mxu0 %v7207_v39  ;;  %2555 = vmatprep.subr.bf16.mxu1 %v8449_v4 }
 0x4f2   :  { %2515 = vmatpush1.bf16.msra.mxu0 %v8450_v41  ;;  %2556 = vmatpush1.bf16.msra.mxu1 %v8451_v34 }
 0x4f3   :  { %2516 = vmatprep.subr.bf16.mxu0 %v8452_v30  ;;  %2557 = vmatprep.subr.bf16.mxu1 %v8453_v58 }
 0x4f6   :  { %2517 = vmatpush1.bf16.msra.mxu0 %v8454_v36  ;;  %2558 = vmatpush1.bf16.msra.mxu1 %v8455_v28 }
 0x4f7   :  { %2518 = vmatprep.subr.bf16.mxu0 %v8456_v37  ;;  %2559 = vmatprep.subr.bf16.mxu1 %v7234_v21 }
 0x4f8   :  { %v5570_v25 = vpop.eup %5569 }
 0x4f9   :  { %v2406_v33 = vmul.f32 %v5570_v25, %v5568_v42  ;;  %v8466_v42 = vld [vmem:[#allocation70_spill] sm:$0xff]  ;;  %v8467_v25 = vld [vmem:[#allocation71_spill] sm:$0xff] }
 0x4fa   :  { %2519 = vmatpush1.bf16.msra.mxu0 %v7237_v45  ;;  %2560 = vmatpush1.bf16.msra.mxu1 %v7240_v46 }
 0x4fb   :  { %v2408_v22 = vpack.c.bf16 %v2406_v33, %v2406_v33  ;;  %2645 = vmatprep.subr.bf16.mxu0 %v7031_v12  ;;  %2686 = vmatprep.subr.bf16.mxu1 %v7034_v3  ;;  %v8468_v33 = vld [vmem:[#allocation72_spill] sm:$0xff] }
 0x4fd   :  { %2413 = vst [vmem:[#allocation3 + $0x28] sm:$0xf] %v2408_v22  ;;  %2537 = vmatmul.mubr.bf16.vlgmr.msra.gmra.mrb[68].mxu0 %v2408_v22  ;;  %2578 = vmatmul.mubr.bf16.vlgmr.msra.gmra.mrb[68].mxu1 %v2408_v22  ;;  %v8469_v22 = vld [vmem:[#allocation73_spill] sm:$0xff] }
 0x4fe   :  { %2646 = vmatpush1.bf16.msra.mxu0 %v7037_v1  ;;  %2687 = vmatpush1.bf16.msra.mxu1 %v7040_v2 }
 0x4ff   :  { %2647 = vmatprep.subr.bf16.mxu0 %v7043_v0  ;;  %2688 = vmatprep.subr.bf16.mxu1 %v7046_v8 }
 0x500   :  { %2677 = vmatprep.mubr.bf16.mxu0 %v8299_v11  ;;  %2718 = vmatprep.mubr.bf16.mxu1 %v8299_v11 }
 0x502   :  { %2648 = vmatpush1.bf16.msra.mxu0 %v7051_v9  ;;  %2689 = vmatpush1.bf16.msra.mxu1 %v7054_v10 }
 0x503   :  { %2649 = vmatprep.subr.bf16.mxu0 %v7057_v13  ;;  %2690 = vmatprep.subr.bf16.mxu1 %v7060_v14 }
 0x506   :  { %2650 = vmatpush1.bf16.msra.mxu0 %v7063_v15  ;;  %2691 = vmatpush1.bf16.msra.mxu1 %v7066_v24 }
 0x507   :  { %2651 = vmatprep.subr.bf16.mxu0 %v7069_v50  ;;  %2692 = vmatprep.subr.bf16.mxu1 %v7072_v51 }
 0x50a   :  { %2652 = vmatpush1.bf16.msra.mxu0 %v7075_v52  ;;  %2693 = vmatpush1.bf16.msra.mxu1 %v7078_v53  ;;  %v8476_v53 = vld [vmem:[#allocation107_spill] sm:$0xff] }
 0x50b   :  { %2653 = vmatprep.subr.bf16.mxu0 %v7081_v54  ;;  %2694 = vmatprep.subr.bf16.mxu1 %v7084_v56  ;;  %v8475_v54 = vld [vmem:[#allocation104_spill] sm:$0xff] }
 0x50e   :  { %2654 = vmatpush1.bf16.msra.mxu0 %v8457_v55  ;;  %2695 = vmatpush1.bf16.msra.mxu1 %v8458_v32  ;;  %v8473_v32 = vld [vmem:[#allocation103_spill] sm:$0xff]  ;;  %v8474_v55 = vld [vmem:[#allocation105_spill] sm:$0xff] }
 0x50f   :  { %2655 = vmatprep.subr.bf16.mxu0 %v8459_v40  ;;  %2696 = vmatprep.subr.bf16.mxu1 %v8460_v57  ;;  %v8470_v40 = vld [vmem:[#allocation74_spill] sm:$0xff]  ;;  %v8471_v57 = vld [vmem:[#allocation75_spill] sm:$0xff] }
 0x512   :  { %2656 = vmatpush1.bf16.msra.mxu0 %v8461_v23  ;;  %2697 = vmatpush1.bf16.msra.mxu1 %v8462_v47  ;;  %v8472_v23 = vld [vmem:[#allocation76_spill] sm:$0xff] }
 0x513   :  { %2657 = vmatprep.subr.bf16.mxu0 %v8463_v62  ;;  %2698 = vmatprep.subr.bf16.mxu1 %v8464_v60 }
 0x516   :  { %2658 = vmatpush1.bf16.msra.mxu0 %v8465_v27  ;;  %2699 = vmatpush1.bf16.msra.mxu1 %v8466_v42 }
 0x517   :  { %2659 = vmatprep.subr.bf16.mxu0 %v8467_v25  ;;  %2700 = vmatprep.subr.bf16.mxu1 %v8468_v33 }
 0x51a   :  { %2660 = vmatpush1.bf16.msra.mxu0 %v8469_v22  ;;  %2701 = vmatpush1.bf16.msra.mxu1 %v8470_v40 }
 0x51b   :  { %2731 = vmatprep.subr.bf16.mxu0 %v8471_v57  ;;  %2772 = vmatprep.subr.bf16.mxu1 %v8472_v23 }
 0x5b0   :  { %v2452_v47 = vpop.f32.mrb[64].mxu0  ;;  %v2493_v62 = vpop.f32.mrb[64].mxu1 }
 0x5b1   :  { %v2453_v60 = vadd.f32 %v2452_v47, %v8473_v32  ;;  %v2494_v27 = vadd.f32 %v2493_v62, %v8474_v55  ;;  %v2454_v56 = vpop.f32.mrb[65].mxu0  ;;  %v2495_v42 = vpop.f32.mrb[65].mxu1 }
 0x5b2   :  { %v2455_v25 = vadd.f32 %v2454_v56, %v8475_v54  ;;  %v2496_v33 = vadd.f32 %v2495_v42, %v8476_v53  ;;  %v2456_v52 = vpop.f32.mrb[66].mxu0  ;;  %v2497_v22 = vpop.f32.mrb[66].mxu1 }
 0x5b3   :  { %v5206_v51 = vmul.f32 -1.442695, %v2453_v60  ;;  %v2457_v40 = vpop.f32.mrb[67].mxu0  ;;  %v2498_v50 = vpop.f32.mrb[67].mxu1  ;;  %v8477_v60 = vld [vmem:[#allocation130_spill] sm:$0xff] }
 0x5b4   :  { %v5207_v57 = vmul.f32 -1.442695, %v2455_v25  ;;  %v5208_v23 = vmul.f32 -1.442695, %v2496_v33  ;;  %v8479_v25 = vld [vmem:[#allocation132_spill] sm:$0xff]  ;;  %v8480_v22 = vld [vmem:[#allocation134_spill] sm:$0xff] }
 0x5b5   :  { %5571 = vpow2.f32 %v5206_v51 }
 0x5b6   :  { %5573 = vpow2.f32 %v5207_v57 }
 0x5b7   :  { %5575 = vpow2.f32 %v5208_v23  ;;  %v8478_v23 = vld [vmem:[#allocation133_spill] sm:$0xff] }
 0x5b8   :  { %5577 = vtanh.f32 %v2494_v27 }
 0x5bf   :  { %v5572_v24 = vpop.eup %5571 }
 0x5c0   :  { %v5574_v15 = vpop.eup %5573  ;;  %v2589_v32 = vadd.f32 1.0, %v5572_v24 }
 0x5c1   :  { %v2595_v55 = vadd.f32 1.0, %v5574_v15  ;;  %v5576_v54 = vpop.eup %5575 }
 0x5c2   :  { %5579 = vrcp.f32 %v2589_v32  ;;  %v5578_v56 = vpop.eup %5577  ;;  %v2602_v62 = vadd.f32 1.0, %v5576_v54 }
 0x5c3   :  { %5581 = vrcp.f32 %v2595_v55 }
 0x5c4   :  { %5583 = vrcp.f32 %v2602_v62 }
 0x5cc   :  { %v5580_v53 = vpop.eup %5579 }
 0x5cd   :  { %v5582_v52 = vpop.eup %5581  ;;  %v2606_v47 = vmul.f32 %v5580_v53, %v5578_v56 }
 0x5ce   :  { %v2605_v50 = vmul.f32 %v5582_v52, %v7284_v20 }
 0x5d0   :  { %v7368_v40 = vadd.f32 %v2606_v47, %v2605_v50  ;;  %v2538_v51 = vpop.f32.mrb[68].mxu0  ;;  %v2579_v57 = vpop.f32.mrb[68].mxu1 }
 0x5d1   :  { %v2539_v24 = vadd.f32 %v2538_v51, %v8477_v60  ;;  %v2580_v27 = vadd.f32 %v2579_v57, %v8478_v23  ;;  %v2540_v15 = vpop.f32.mrb[69].mxu0  ;;  %v2581_v42 = vpop.f32.mrb[69].mxu1 }
 0x5d2   :  { %v2541_v33 = vadd.f32 %v2540_v15, %v8479_v25  ;;  %v2582_v32 = vadd.f32 %v2581_v42, %v8480_v22  ;;  %v2542_v55 = vpop.f32.mrb[70].mxu0  ;;  %v2583_v56 = vpop.f32.mrb[70].mxu1  ;;  %5585 = vtanh.f32 %v7368_v40 }
 0x5d3   :  { %v5209_v20 = vmul.f32 -1.442695, %v2539_v24  ;;  %v2543_v54 = vpop.f32.mrb[71].mxu0  ;;  %v2584_v53 = vpop.f32.mrb[71].mxu1 }
 0x5d4   :  { %v5210_v52 = vmul.f32 -1.442695, %v2541_v33  ;;  %v5584_v47 = vpop.eup %5583  ;;  %v5211_v50 = vmul.f32 -1.442695, %v2582_v32 }
 0x5d5   :  { %5587 = vpow2.f32 %v5209_v20 }
 0x5d6   :  { %5589 = vpow2.f32 %v5210_v52 }
 0x5d7   :  { %5591 = vpow2.f32 %v5211_v50  ;;  %v8493_v50 = vld [vmem:[#allocation65_spill] sm:$0xff] }
 0x5d8   :  { %5593 = vtanh.f32 %v2580_v27 }
 0x5dc   :  { %v5586_v62 = vpop.eup %5585 }
 0x5dd   :  { %v2609_v51 = vmul.f32 %v5586_v62, %v5584_v47  ;;  %v8487_v47 = vld [vmem:[#allocation59_spill] sm:$0xff]  ;;  %v8492_v62 = vld [vmem:[#allocation64_spill] sm:$0xff] }
 0x5df   :  { %v5588_v57 = vpop.eup %5587  ;;  %v2634_v60 = vpack.c.bf16 %v2609_v51, %v2609_v51  ;;  %v8494_v51 = vld [vmem:[#allocation66_spill] sm:$0xff] }
 0x5e0   :  { %v5590_v23 = vpop.eup %5589  ;;  %v2613_v15 = vadd.f32 1.0, %v5588_v57  ;;  %v8495_v57 = vld [vmem:[#allocation67_spill] sm:$0xff] }
 0x5e1   :  { %v2619_v42 = vadd.f32 1.0, %v5590_v23  ;;  %2636 = vst [vmem:[#allocation3 + $0x20] sm:$0xf] %v2634_v60  ;;  %2678 = vmatmul.mubr.bf16.vlgmr.msra.gmra.mrb[72].mxu0 %v2634_v60  ;;  %2719 = vmatmul.mubr.bf16.vlgmr.msra.gmra.mrb[72].mxu1 %v2634_v60  ;;  %v5592_v24 = vpop.eup %5591  ;;  %v8496_v60 = vld [vmem:[#allocation68_spill] sm:$0xff]  ;;  %v8497_v23 = vld [vmem:[#allocation69_spill] sm:$0xff] }
 0x5e2   :  { %5595 = vrcp.f32 %v2613_v15  ;;  %2732 = vmatpush1.bf16.msra.mxu0 %v7147_v17  ;;  %2773 = vmatpush1.bf16.msra.mxu1 %v7150_v63  ;;  %v5594_v27 = vpop.eup %5593  ;;  %v2626_v32 = vadd.f32 1.0, %v5592_v24  ;;  %v8498_v15 = vld [vmem:[#allocation70_spill] sm:$0xff]  ;;  %v8500_v24 = vld [vmem:[#allocation72_spill] sm:$0xff] }
 0x5e3   :  { %5597 = vrcp.f32 %v2619_v42  ;;  %2733 = vmatprep.subr.bf16.mxu0 %v7153_v31  ;;  %2774 = vmatprep.subr.bf16.mxu1 %v7156_v16  ;;  %v8499_v42 = vld [vmem:[#allocation71_spill] sm:$0xff] }
 0x5e4   :  { %2763 = vmatprep.mubr.bf16.mxu0 %v8299_v11  ;;  %2804 = vmatprep.mubr.bf16.mxu1 %v8299_v11  ;;  %5599 = vrcp.f32 %v2626_v32 }
 0x5e6   :  { %2734 = vmatpush1.bf16.msra.mxu0 %v7161_v19  ;;  %2775 = vmatpush1.bf16.msra.mxu1 %v7164_v18 }
 0x5e7   :  { %2735 = vmatprep.subr.bf16.mxu0 %v7167_v38  ;;  %2776 = vmatprep.subr.bf16.mxu1 %v7170_v26 }
 0x5ea   :  { %2736 = vmatpush1.bf16.msra.mxu0 %v7173_v61  ;;  %2777 = vmatpush1.bf16.msra.mxu1 %v7176_v59 }
 0x5eb   :  { %2737 = vmatprep.subr.bf16.mxu0 %v7179_v43  ;;  %2778 = vmatprep.subr.bf16.mxu1 %v7182_v44 }
 0x5ec   :  { %v5596_v25 = vpop.eup %5595 }
 0x5ed   :  { %v5598_v33 = vpop.eup %5597  ;;  %v2630_v22 = vmul.f32 %v5596_v25, %v5594_v27  ;;  %v8501_v27 = vld [vmem:[#allocation73_spill] sm:$0xff]  ;;  %v8502_v25 = vld [vmem:[#allocation74_spill] sm:$0xff] }
 0x5ee   :  { %v2629_v55 = vmul.f32 %v5598_v33, %v7310_v29  ;;  %2738 = vmatpush1.bf16.msra.mxu0 %v7186_v48  ;;  %2779 = vmatpush1.bf16.msra.mxu1 %v7189_v6  ;;  %v5600_v29 = vpop.eup %5599  ;;  %v8503_v33 = vld [vmem:[#allocation75_spill] sm:$0xff] }
 0x5ef   :  { %2739 = vmatprep.subr.bf16.mxu0 %v7192_v5  ;;  %2780 = vmatprep.subr.bf16.mxu1 %v7195_v7 }
 0x5f0   :  { %v7394_v56 = vadd.f32 %v2630_v22, %v2629_v55  ;;  %v8504_v22 = vld [vmem:[#allocation76_spill] sm:$0xff] }
 0x5f2   :  { %2740 = vmatpush1.bf16.msra.mxu0 %v7200_v49  ;;  %2781 = vmatpush1.bf16.msra.mxu1 %v7203_v35  ;;  %5601 = vtanh.f32 %v7394_v56 }
 0x5f3   :  { %2741 = vmatprep.subr.bf16.mxu0 %v7207_v39  ;;  %2782 = vmatprep.subr.bf16.mxu1 %v8449_v4 }
 0x5f6   :  { %2742 = vmatpush1.bf16.msra.mxu0 %v8450_v41  ;;  %2783 = vmatpush1.bf16.msra.mxu1 %v8451_v34 }
 0x5f7   :  { %2743 = vmatprep.subr.bf16.mxu0 %v8452_v30  ;;  %2784 = vmatprep.subr.bf16.mxu1 %v8453_v58 }
 0x5fa   :  { %2744 = vmatpush1.bf16.msra.mxu0 %v8454_v36  ;;  %2785 = vmatpush1.bf16.msra.mxu1 %v8455_v28 }
 0x5fb   :  { %2745 = vmatprep.subr.bf16.mxu0 %v8456_v37  ;;  %2786 = vmatprep.subr.bf16.mxu1 %v7234_v21 }
 0x5fc   :  { %v5602_v20 = vpop.eup %5601 }
 0x5fd   :  { %v2633_v54 = vmul.f32 %v5602_v20, %v5600_v29  ;;  %v8505_v29 = vld [vmem:[#allocation106_spill] sm:$0xff] }
 0x5fe   :  { %2746 = vmatpush1.bf16.msra.mxu0 %v7237_v45  ;;  %2787 = vmatpush1.bf16.msra.mxu1 %v7240_v46 }
 0x5ff   :  { %v2635_v53 = vpack.c.bf16 %v2633_v54, %v2633_v54  ;;  %2872 = vmatprep.subr.bf16.mxu0 %v7031_v12  ;;  %2913 = vmatprep.subr.bf16.mxu1 %v7034_v3  ;;  %v8481_v12 = vld [vmem:[#allocation86_spill] sm:$0xff]  ;;  %v8506_v54 = vld [vmem:[#allocation109_spill] sm:$0xff] }
 0x600   :  { %v8482_v3 = vld [vmem:[#allocation54_spill] sm:$0xff] }
 0x601   :  { %v2638_v52 = vrot.slane %v2635_v53, 4  ;;  %2764 = vmatmul.mubr.bf16.vlgmr.msra.gmra.mrb[76].mxu0 %v2635_v53  ;;  %2805 = vmatmul.mubr.bf16.vlgmr.msra.gmra.mrb[76].mxu1 %v2635_v53 }
 0x602   :  { %2873 = vmatpush1.bf16.msra.mxu0 %v7037_v1  ;;  %2914 = vmatpush1.bf16.msra.mxu1 %v7040_v2  ;;  %v8483_v1 = vld [vmem:[#allocation55_spill] sm:$0xff]  ;;  %v8484_v2 = vld [vmem:[#allocation56_spill] sm:$0xff] }
 0x603   :  { %2640 = vst [vmem:[#allocation3 + $0x18] sm:$0xf0] %v2638_v52  ;;  %2874 = vmatprep.subr.bf16.mxu0 %v7043_v0  ;;  %2915 = vmatprep.subr.bf16.mxu1 %v7046_v8  ;;  %v8485_v0 = vld [vmem:[#allocation57_spill] sm:$0xff]  ;;  %v8486_v8 = vld [vmem:[#allocation58_spill] sm:$0xff] }
 0x604   :  { %2904 = vmatprep.mubr.bf16.mxu0 %v8299_v11  ;;  %2945 = vmatprep.mubr.bf16.mxu1 %v8299_v11 }
 0x606   :  { %2875 = vmatpush1.bf16.msra.mxu0 %v7051_v9  ;;  %2916 = vmatpush1.bf16.msra.mxu1 %v7054_v10  ;;  %v8488_v9 = vld [vmem:[#allocation60_spill] sm:$0xff]  ;;  %v8489_v10 = vld [vmem:[#allocation61_spill] sm:$0xff] }
 0x607   :  { %2876 = vmatprep.subr.bf16.mxu0 %v7057_v13  ;;  %2917 = vmatprep.subr.bf16.mxu1 %v7060_v14  ;;  %v8490_v13 = vld [vmem:[#allocation62_spill] sm:$0xff]  ;;  %v8491_v14 = vld [vmem:[#allocation63_spill] sm:$0xff] }
 0x60a   :  { %2877 = vmatpush1.bf16.msra.mxu0 %v8481_v12  ;;  %2918 = vmatpush1.bf16.msra.mxu1 %v8482_v3  ;;  %v8507_v3 = vld [vmem:[#allocation108_spill] sm:$0xff] }
 0x60b   :  { %2878 = vmatprep.subr.bf16.mxu0 %v8483_v1  ;;  %2919 = vmatprep.subr.bf16.mxu1 %v8484_v2  ;;  %v8508_v2 = vld [vmem:[#allocation110_spill] sm:$0xff] }
 0x60e   :  { %2879 = vmatpush1.bf16.msra.mxu0 %v8485_v0  ;;  %2920 = vmatpush1.bf16.msra.mxu1 %v8486_v8 }
 0x60f   :  { %2880 = vmatprep.subr.bf16.mxu0 %v8487_v47  ;;  %2921 = vmatprep.subr.bf16.mxu1 %v8488_v9 }
 0x612   :  { %2881 = vmatpush1.bf16.msra.mxu0 %v8489_v10  ;;  %2922 = vmatpush1.bf16.msra.mxu1 %v8490_v13 }
 0x613   :  { %2882 = vmatprep.subr.bf16.mxu0 %v8491_v14  ;;  %2923 = vmatprep.subr.bf16.mxu1 %v8492_v62 }
 0x616   :  { %2883 = vmatpush1.bf16.msra.mxu0 %v8493_v50  ;;  %2924 = vmatpush1.bf16.msra.mxu1 %v8494_v51 }
 0x617   :  { %2884 = vmatprep.subr.bf16.mxu0 %v8495_v57  ;;  %2925 = vmatprep.subr.bf16.mxu1 %v8496_v60 }
 0x61a   :  { %2885 = vmatpush1.bf16.msra.mxu0 %v8497_v23  ;;  %2926 = vmatpush1.bf16.msra.mxu1 %v8498_v15 }
 0x61b   :  { %2886 = vmatprep.subr.bf16.mxu0 %v8499_v42  ;;  %2927 = vmatprep.subr.bf16.mxu1 %v8500_v24 }
 0x61e   :  { %2887 = vmatpush1.bf16.msra.mxu0 %v8501_v27  ;;  %2928 = vmatpush1.bf16.msra.mxu1 %v8502_v25 }
 0x61f   :  { %2958 = vmatprep.subr.bf16.mxu0 %v8503_v33  ;;  %2999 = vmatprep.subr.bf16.mxu1 %v8504_v22 }
 0x6b4   :  { %v2679_v32 = vpop.f32.mrb[72].mxu0  ;;  %v2720_v55 = vpop.f32.mrb[72].mxu1 }
 0x6b5   :  { %v2680_v20 = vadd.f32 %v2679_v32, %v8505_v29  ;;  %v2721_v53 = vadd.f32 %v2720_v55, %v8506_v54  ;;  %v2681_v52 = vpop.f32.mrb[73].mxu0  ;;  %v2722_v12 = vpop.f32.mrb[73].mxu1  ;;  %v8509_v29 = vld [vmem:[#allocation127_spill] sm:$0xff]  ;;  %v8510_v54 = vld [vmem:[#allocation129_spill] sm:$0xff] }
 0x6b6   :  { %v2682_v1 = vadd.f32 %v2681_v52, %v8507_v3  ;;  %v2723_v0 = vadd.f32 %v2722_v12, %v8508_v2  ;;  %v2683_v8 = vpop.f32.mrb[74].mxu0  ;;  %v2724_v47 = vpop.f32.mrb[74].mxu1  ;;  %v8511_v3 = vld [vmem:[#allocation128_spill] sm:$0xff]  ;;  %v8512_v2 = vld [vmem:[#allocation131_spill] sm:$0xff] }
 0x6b7   :  { %v5212_v9 = vmul.f32 -1.442695, %v2680_v20  ;;  %v2684_v10 = vpop.f32.mrb[75].mxu0  ;;  %v2725_v13 = vpop.f32.mrb[75].mxu1 }
 0x6b8   :  { %v5213_v14 = vmul.f32 -1.442695, %v2682_v1  ;;  %v5214_v62 = vmul.f32 -1.442695, %v2723_v0 }
 0x6b9   :  { %5603 = vpow2.f32 %v5212_v9 }
 0x6ba   :  { %5605 = vpow2.f32 %v5213_v14 }
 0x6bb   :  { %5607 = vpow2.f32 %v5214_v62 }
 0x6bc   :  { %5609 = vtanh.f32 %v2721_v53 }
 0x6c3   :  { %v5604_v50 = vpop.eup %5603 }
 0x6c4   :  { %v5606_v51 = vpop.eup %5605  ;;  %v2816_v57 = vadd.f32 1.0, %v5604_v50 }
 0x6c5   :  { %v2822_v60 = vadd.f32 1.0, %v5606_v51  ;;  %v5608_v23 = vpop.eup %5607 }
 0x6c6   :  { %5611 = vrcp.f32 %v2816_v57  ;;  %v5610_v15 = vpop.eup %5609  ;;  %v2829_v25 = vadd.f32 1.0, %v5608_v23 }
 0x6c7   :  { %5613 = vrcp.f32 %v2822_v60 }
 0x6c8   :  { %5615 = vrcp.f32 %v2829_v25  ;;  %v5783_v25 = vld [vmem:[#allocation14 + $0xa4] ss:$16 sps:$4 sm:$0xff]  }
 0x6d0   :  { %v5612_v42 = vpop.eup %5611 }
 0x6d1   :  { %v5614_v24 = vpop.eup %5613  ;;  %v2833_v27 = vmul.f32 %v5612_v42, %v5610_v15 }
 0x6d2   :  { %v2832_v33 = vmul.f32 %v5614_v24, %v7368_v40  ;;  %v5616_v14 = vpop.eup %5615 }
 0x6d4   :  { %v7452_v22 = vadd.f32 %v2833_v27, %v2832_v33  ;;  %v2765_v32 = vpop.f32.mrb[76].mxu0  ;;  %v2806_v55 = vpop.f32.mrb[76].mxu1  ;;  %v5784_v33 = vld [vmem:[#allocation14 + $0xac] ss:$16 sps:$4 sm:$0xff]  }
 0x6d5   :  { %v2766_v20 = vadd.f32 %v2765_v32, %v8509_v29  ;;  %v2807_v53 = vadd.f32 %v2806_v55, %v8510_v54  ;;  %v2767_v52 = vpop.f32.mrb[77].mxu0  ;;  %v2808_v12 = vpop.f32.mrb[77].mxu1  ;;  %v5785_v32 = vld [vmem:[#allocation14 + $0xa0] ss:$16 sps:$4 sm:$0xff]   ;;  %v5786_v55 = vld [vmem:[#allocation14 + $0xa8] ss:$16 sps:$4 sm:$0xff]  }
 0x6d6   :  { %v2768_v1 = vadd.f32 %v2767_v52, %v8511_v3  ;;  %v2809_v0 = vadd.f32 %v2808_v12, %v8512_v2  ;;  %v2769_v8 = vpop.f32.mrb[78].mxu0  ;;  %v2810_v47 = vpop.f32.mrb[78].mxu1  ;;  %5617 = vtanh.f32 %v7452_v22  ;;  %v5787_v29 = vld [vmem:[#allocation14 + $0xc4] ss:$16 sps:$4 sm:$0xff]   ;;  %v5789_v54 = vld [vmem:[#allocation14 + $0xc0] ss:$16 sps:$4 sm:$0xff]  }
 0x6d7   :  { %v5215_v40 = vmul.f32 -1.442695, %v2766_v20  ;;  %v2770_v9 = vpop.f32.mrb[79].mxu0  ;;  %v2811_v10 = vpop.f32.mrb[79].mxu1  ;;  %v5788_v20 = vld [vmem:[#allocation14 + $0xcc] ss:$16 sps:$4 sm:$0xff]  }
 0x6d8   :  { %v5216_v13 = vmul.f32 -1.442695, %v2768_v1  ;;  %v5217_v50 = vmul.f32 -1.442695, %v2809_v0  ;;  %v5791_v52 = vld [vmem:[#allocation14 + $0xe4] ss:$16 sps:$4 sm:$0xff]  }
 0x6d9   :  { %5619 = vpow2.f32 %v5215_v40  ;;  %v5792_v12 = vld [vmem:[#allocation14 + $0xec] ss:$16 sps:$4 sm:$0xff]   ;;  %v5793_v3 = vld [vmem:[#allocation14 + $0xe0] ss:$16 sps:$4 sm:$0xff]   ;;  %v5794_v1 = vld [vmem:[#allocation14 + $0xe8] ss:$16 sps:$4 sm:$0xff]  }
 0x6da   :  { %5621 = vpow2.f32 %v5216_v13  ;;  %v5795_v2 = vld [vmem:[#allocation16 + $0x4] ss:$16 sps:$4 sm:$0xff]   ;;  %v5796_v0 = vld [vmem:[#allocation16 + $0xc] ss:$16 sps:$4 sm:$0xff]  }
 0x6db   :  { %5623 = vpow2.f32 %v5217_v50  ;;  %v8513_v40 = vld [vmem:[#allocation111_spill] sm:$0xff]  ;;  %v8514_v10 = vld [vmem:[#allocation113_spill] sm:$0xff]  ;;  %v8515_v50 = vld [vmem:[#allocation112_spill] sm:$0xff] }
 0x6dc   :  { %5625 = vtanh.f32 %v2807_v53  ;;  %v5790_v53 = vld [vmem:[#allocation14 + $0xc8] ss:$16 sps:$4 sm:$0xff]  }
 0x6e0   :  { %v5618_v62 = vpop.eup %5617 }
 0x6e1   :  { %v2836_v51 = vmul.f32 %v5618_v62, %v5616_v14 }
 0x6e3   :  { %v5620_v57 = vpop.eup %5619  ;;  %v2861_v60 = vpack.c.bf16 %v2836_v51, %v2836_v51 }
 0x6e4   :  { %v5622_v23 = vpop.eup %5621  ;;  %v2840_v15 = vadd.f32 1.0, %v5620_v57  ;;  %v8516_v57 = vld [vmem:[#allocation115_spill] sm:$0xff] }
 0x6e5   :  { %v2846_v42 = vadd.f32 1.0, %v5622_v23  ;;  %v2864_v24 = vrot.slane %v2861_v60, 4  ;;  %2905 = vmatmul.mubr.bf16.vlgmr.msra.gmra.mrb[80].mxu0 %v2861_v60  ;;  %2946 = vmatmul.mubr.bf16.vlgmr.msra.gmra.mrb[80].mxu1 %v2861_v60 }
 0x6e6   :  { %5627 = vrcp.f32 %v2840_v15  ;;  %2959 = vmatpush1.bf16.msra.mxu0 %v7147_v17  ;;  %3000 = vmatpush1.bf16.msra.mxu1 %v7150_v63  ;;  %v5624_v17 = vpop.eup %5623 }
 0x6e7   :  { %5629 = vrcp.f32 %v2846_v42  ;;  %2866 = vst [vmem:[#allocation3 + $0x20] sm:$0xf0] %v2864_v24  ;;  %2960 = vmatprep.subr.bf16.mxu0 %v7153_v31  ;;  %3001 = vmatprep.subr.bf16.mxu1 %v7156_v16  ;;  %v5626_v63 = vpop.eup %5625 }
 0x6e8   :  { %2990 = vmatprep.mubr.bf16.mxu0 %v8299_v11  ;;  %3031 = vmatprep.mubr.bf16.mxu1 %v8299_v11 }
 0x6ea   :  { %2961 = vmatpush1.bf16.msra.mxu0 %v7161_v19  ;;  %3002 = vmatpush1.bf16.msra.mxu1 %v7164_v18  ;;  %v2853_v19 = vadd.f32 1.0, %v5624_v17 }
 0x6eb   :  { %2962 = vmatprep.subr.bf16.mxu0 %v7167_v38  ;;  %3003 = vmatprep.subr.bf16.mxu1 %v7170_v26 }
 0x6ec   :  { %5631 = vrcp.f32 %v2853_v19 }
 0x6ee   :  { %2963 = vmatpush1.bf16.msra.mxu0 %v7173_v61  ;;  %3004 = vmatpush1.bf16.msra.mxu1 %v7176_v59 }
 0x6ef   :  { %2964 = vmatprep.subr.bf16.mxu0 %v7179_v43  ;;  %3005 = vmatprep.subr.bf16.mxu1 %v7182_v44  ;;  %v5763_v44 = vld [vmem:[#allocation14 + $0x4] ss:$16 sps:$4 sm:$0xff]  }
 0x6f0   :  { %v5628_v31 = vpop.eup %5627 }
 0x6f1   :  { %v5630_v16 = vpop.eup %5629  ;;  %v2857_v27 = vmul.f32 %v5628_v31, %v5626_v63 }
 0x6f2   :  { %v2856_v18 = vmul.f32 %v5630_v16, %v7394_v56  ;;  %2965 = vmatpush1.bf16.msra.mxu0 %v7186_v48  ;;  %3006 = vmatpush1.bf16.msra.mxu1 %v7189_v6  ;;  %v5764_v48 = vld [vmem:[#allocation14 + $0xc] ss:$16 sps:$4 sm:$0xff]   ;;  %v5765_v6 = vld [vmem:[#allocation14] ss:$16 sps:$4 sm:$0xff]   ;;  %v5782_v56 = vld [vmem:[#allocation14 + $0x88] ss:$16 sps:$4 sm:$0xff]  }
 0x6f3   :  { %2966 = vmatprep.subr.bf16.mxu0 %v7192_v5  ;;  %3007 = vmatprep.subr.bf16.mxu1 %v7195_v7  ;;  %v5766_v5 = vld [vmem:[#allocation14 + $0x8] ss:$16 sps:$4 sm:$0xff]   ;;  %v5767_v7 = vld [vmem:[#allocation14 + $0x24] ss:$16 sps:$4 sm:$0xff]  }
 0x6f4   :  { %v7478_v38 = vadd.f32 %v2857_v27, %v2856_v18 }
 0x6f6   :  { %2967 = vmatpush1.bf16.msra.mxu0 %v7200_v49  ;;  %3008 = vmatpush1.bf16.msra.mxu1 %v7203_v35  ;;  %5633 = vtanh.f32 %v7478_v38  ;;  %v5632_v26 = vpop.eup %5631  ;;  %v5768_v49 = vld [vmem:[#allocation14 + $0x2c] ss:$16 sps:$4 sm:$0xff]   ;;  %v5769_v35 = vld [vmem:[#allocation14 + $0x20] ss:$16 sps:$4 sm:$0xff]  }
 0x6f7   :  { %2968 = vmatprep.subr.bf16.mxu0 %v7207_v39  ;;  %3009 = vmatprep.subr.bf16.mxu1 %v8449_v4  ;;  %v5770_v39 = vld [vmem:[#allocation14 + $0x28] ss:$16 sps:$4 sm:$0xff]  }
 0x6f8   :  { %v5774_v4 = vld [vmem:[#allocation14 + $0x48] ss:$16 sps:$4 sm:$0xff]  }
 0x6fa   :  { %2969 = vmatpush1.bf16.msra.mxu0 %v8450_v41  ;;  %3010 = vmatpush1.bf16.msra.mxu1 %v8451_v34  ;;  %v5775_v41 = vld [vmem:[#allocation14 + $0x64] ss:$16 sps:$4 sm:$0xff]   ;;  %v5776_v34 = vld [vmem:[#allocation14 + $0x6c] ss:$16 sps:$4 sm:$0xff]  }
 0x6fb   :  { %2970 = vmatprep.subr.bf16.mxu0 %v8452_v30  ;;  %3011 = vmatprep.subr.bf16.mxu1 %v8453_v58  ;;  %v5777_v30 = vld [vmem:[#allocation14 + $0x60] ss:$16 sps:$4 sm:$0xff]   ;;  %v5778_v58 = vld [vmem:[#allocation14 + $0x68] ss:$16 sps:$4 sm:$0xff]  }
 0x6fe   :  { %2971 = vmatpush1.bf16.msra.mxu0 %v8454_v36  ;;  %3012 = vmatpush1.bf16.msra.mxu1 %v8455_v28  ;;  %v5779_v36 = vld [vmem:[#allocation14 + $0x84] ss:$16 sps:$4 sm:$0xff]   ;;  %v5780_v28 = vld [vmem:[#allocation14 + $0x8c] ss:$16 sps:$4 sm:$0xff]  }
 0x6ff   :  { %2972 = vmatprep.subr.bf16.mxu0 %v8456_v37  ;;  %3013 = vmatprep.subr.bf16.mxu1 %v7234_v21  ;;  %v5771_v21 = vld [vmem:[#allocation14 + $0x44] ss:$16 sps:$4 sm:$0xff]   ;;  %v5781_v37 = vld [vmem:[#allocation14 + $0x80] ss:$16 sps:$4 sm:$0xff]  }
 0x700   :  { %v5634_v61 = vpop.eup %5633 }
 0x701   :  { %v2860_v59 = vmul.f32 %v5634_v61, %v5632_v26 }
 0x702   :  { %2973 = vmatpush1.bf16.msra.mxu0 %v7237_v45  ;;  %3014 = vmatpush1.bf16.msra.mxu1 %v7240_v46  ;;  %v5772_v45 = vld [vmem:[#allocation14 + $0x4c] ss:$16 sps:$4 sm:$0xff]   ;;  %v5773_v46 = vld [vmem:[#allocation14 + $0x40] ss:$16 sps:$4 sm:$0xff]  }
 0x703   :  { %v2862_v43 = vpack.c.bf16 %v2860_v59, %v2860_v59  ;;  %3099 = vmatprep.subr.bf16.mxu0 %v5763_v44  ;;  %3140 = vmatprep.subr.bf16.mxu1 %v5764_v48 }
 0x705   :  { %2867 = vst [vmem:[#allocation3 + $0x18] sm:$0xf] %v2862_v43  ;;  %2991 = vmatmul.mubr.bf16.vlgmr.msra.gmra.mrb[84].mxu0 %v2862_v43  ;;  %3032 = vmatmul.mubr.bf16.vlgmr.msra.gmra.mrb[84].mxu1 %v2862_v43 }
 0x706   :  { %3100 = vmatpush1.bf16.msra.mxu0 %v5765_v6  ;;  %3141 = vmatpush1.bf16.msra.mxu1 %v5766_v5 }
 0x707   :  { %3101 = vmatprep.subr.bf16.mxu0 %v5767_v7  ;;  %3142 = vmatprep.subr.bf16.mxu1 %v5768_v49 }
 0x708   :  { %3131 = vmatprep.mubr.bf16.mxu0 %v8299_v11  ;;  %3172 = vmatprep.mubr.bf16.mxu1 %v8299_v11 }
 0x70a   :  { %3102 = vmatpush1.bf16.msra.mxu0 %v5769_v35  ;;  %3143 = vmatpush1.bf16.msra.mxu1 %v5770_v39  ;;  %v8517_v35 = vld [vmem:[#allocation122_spill] sm:$0xff] }
 0x70b   :  { %3103 = vmatprep.subr.bf16.mxu0 %v5771_v21  ;;  %3144 = vmatprep.subr.bf16.mxu1 %v5772_v45  ;;  %v8518_v21 = vld [vmem:[#allocation125_spill] sm:$0xff] }
 0x70e   :  { %3104 = vmatpush1.bf16.msra.mxu0 %v5773_v46  ;;  %3145 = vmatpush1.bf16.msra.mxu1 %v5774_v4 }
 0x70f   :  { %3105 = vmatprep.subr.bf16.mxu0 %v5775_v41  ;;  %3146 = vmatprep.subr.bf16.mxu1 %v5776_v34  ;;  %v8519_v41 = vld [vmem:[#allocation124_spill] sm:$0xff] }
 0x712   :  { %3106 = vmatpush1.bf16.msra.mxu0 %v5777_v30  ;;  %3147 = vmatpush1.bf16.msra.mxu1 %v5778_v58  ;;  %v8520_v30 = vld [vmem:[#allocation126_spill] sm:$0xff] }
 0x713   :  { %3107 = vmatprep.subr.bf16.mxu0 %v5779_v36  ;;  %3148 = vmatprep.subr.bf16.mxu1 %v5780_v28 }
 0x716   :  { %3108 = vmatpush1.bf16.msra.mxu0 %v5781_v37  ;;  %3149 = vmatpush1.bf16.msra.mxu1 %v5782_v56 }
 0x717   :  { %3109 = vmatprep.subr.bf16.mxu0 %v5783_v25  ;;  %3150 = vmatprep.subr.bf16.mxu1 %v5784_v33 }
 0x71a   :  { %3110 = vmatpush1.bf16.msra.mxu0 %v5785_v32  ;;  %3151 = vmatpush1.bf16.msra.mxu1 %v5786_v55 }
 0x71b   :  { %3111 = vmatprep.subr.bf16.mxu0 %v5787_v29  ;;  %3152 = vmatprep.subr.bf16.mxu1 %v5788_v20 }
 0x71e   :  { %3112 = vmatpush1.bf16.msra.mxu0 %v5789_v54  ;;  %3153 = vmatpush1.bf16.msra.mxu1 %v5790_v53 }
 0x71f   :  { %3113 = vmatprep.subr.bf16.mxu0 %v5791_v52  ;;  %3154 = vmatprep.subr.bf16.mxu1 %v5792_v12 }
 0x722   :  { %3114 = vmatpush1.bf16.msra.mxu0 %v5793_v3  ;;  %3155 = vmatpush1.bf16.msra.mxu1 %v5794_v1  ;;  %v5797_v3 = vld [vmem:[#allocation16] ss:$16 sps:$4 sm:$0xff]   ;;  %v5798_v1 = vld [vmem:[#allocation16 + $0x8] ss:$16 sps:$4 sm:$0xff]  }
 0x723   :  { %3185 = vmatprep.subr.bf16.mxu0 %v5795_v2  ;;  %3226 = vmatprep.subr.bf16.mxu1 %v5796_v0  ;;  %v5799_v2 = vld [vmem:[#allocation16 + $0x24] ss:$16 sps:$4 sm:$0xff]   ;;  %v5800_v0 = vld [vmem:[#allocation16 + $0x2c] ss:$16 sps:$4 sm:$0xff]  }
 0x7b8   :  { %v2906_v8 = vpop.f32.mrb[80].mxu0  ;;  %v2947_v47 = vpop.f32.mrb[80].mxu1 }
 0x7b9   :  { %v2907_v9 = vadd.f32 %v2906_v8, %v8513_v40  ;;  %v2948_v13 = vadd.f32 %v2947_v47, %v8514_v10  ;;  %v2908_v14 = vpop.f32.mrb[81].mxu0  ;;  %v2949_v62 = vpop.f32.mrb[81].mxu1  ;;  %v5801_v8 = vld [vmem:[#allocation16 + $0x20] ss:$16 sps:$4 sm:$0xff]   ;;  %v5802_v47 = vld [vmem:[#allocation16 + $0x28] ss:$16 sps:$4 sm:$0xff]  }
 0x7ba   :  { %v2909_v51 = vadd.f32 %v2908_v14, %v8515_v50  ;;  %v2950_v60 = vadd.f32 %v2949_v62, %v8516_v57  ;;  %v2910_v23 = vpop.f32.mrb[82].mxu0  ;;  %v2951_v15 = vpop.f32.mrb[82].mxu1  ;;  %v5803_v40 = vld [vmem:[#allocation16 + $0x44] ss:$16 sps:$4 sm:$0xff]   ;;  %v5806_v14 = vld [vmem:[#allocation16 + $0x48] ss:$16 sps:$4 sm:$0xff]  }
 0x7bb   :  { %v5218_v42 = vmul.f32 -1.442695, %v2907_v9  ;;  %v2911_v24 = vpop.f32.mrb[83].mxu0  ;;  %v2952_v17 = vpop.f32.mrb[83].mxu1  ;;  %v5804_v9 = vld [vmem:[#allocation16 + $0x4c] ss:$16 sps:$4 sm:$0xff]  }
 0x7bc   :  { %v5219_v63 = vmul.f32 -1.442695, %v2909_v51  ;;  %v5220_v31 = vmul.f32 -1.442695, %v2950_v60  ;;  %v5807_v50 = vld [vmem:[#allocation16 + $0x64] ss:$16 sps:$4 sm:$0xff]  }
 0x7bd   :  { %5635 = vpow2.f32 %v5218_v42  ;;  %v5808_v51 = vld [vmem:[#allocation16 + $0x6c] ss:$16 sps:$4 sm:$0xff]   ;;  %v5809_v24 = vld [vmem:[#allocation16 + $0x60] ss:$16 sps:$4 sm:$0xff]   ;;  %v5810_v17 = vld [vmem:[#allocation16 + $0x68] ss:$16 sps:$4 sm:$0xff]  }
 0x7be   :  { %5637 = vpow2.f32 %v5219_v63  ;;  %v5811_v63 = vld [vmem:[#allocation16 + $0x84] ss:$16 sps:$4 sm:$0xff]  }
 0x7bf   :  { %5639 = vpow2.f32 %v5220_v31  ;;  %v5812_v31 = vld [vmem:[#allocation16 + $0x8c] ss:$16 sps:$4 sm:$0xff]  }
 0x7c0   :  { %5641 = vtanh.f32 %v2948_v13  ;;  %v5805_v13 = vld [vmem:[#allocation16 + $0x40] ss:$16 sps:$4 sm:$0xff]  }
 0x7c7   :  { %v5636_v16 = vpop.eup %5635 }
 0x7c8   :  { %v5638_v27 = vpop.eup %5637  ;;  %v3043_v19 = vadd.f32 1.0, %v5636_v16 }
 0x7c9   :  { %v3049_v18 = vadd.f32 1.0, %v5638_v27  ;;  %v5640_v26 = vpop.eup %5639  ;;  %v5813_v27 = vld [vmem:[#allocation16 + $0x80] ss:$16 sps:$4 sm:$0xff]  }
 0x7ca   :  { %5643 = vrcp.f32 %v3043_v19  ;;  %v5642_v61 = vpop.eup %5641  ;;  %v3056_v48 = vadd.f32 1.0, %v5640_v26  ;;  %v5814_v19 = vld [vmem:[#allocation16 + $0x88] ss:$16 sps:$4 sm:$0xff]   ;;  %v5817_v26 = vld [vmem:[#allocation16 + $0xa0] ss:$16 sps:$4 sm:$0xff]  }
 0x7cb   :  { %5645 = vrcp.f32 %v3049_v18  ;;  %v5815_v18 = vld [vmem:[#allocation16 + $0xa4] ss:$16 sps:$4 sm:$0xff]  }
 0x7cc   :  { %5647 = vrcp.f32 %v3056_v48  ;;  %v5822_v48 = vld [vmem:[#allocation16 + $0xc8] ss:$16 sps:$4 sm:$0xff]  }
 0x7d4   :  { %v5644_v59 = vpop.eup %5643 }
 0x7d5   :  { %v5646_v43 = vpop.eup %5645  ;;  %v3060_v44 = vmul.f32 %v5644_v59, %v5642_v61  ;;  %v5818_v61 = vld [vmem:[#allocation16 + $0xa8] ss:$16 sps:$4 sm:$0xff]   ;;  %v5819_v59 = vld [vmem:[#allocation16 + $0xc4] ss:$16 sps:$4 sm:$0xff]  }
 0x7d6   :  { %v3059_v6 = vmul.f32 %v5646_v43, %v7452_v22  ;;  %v5648_v33 = vpop.eup %5647  ;;  %v5820_v43 = vld [vmem:[#allocation16 + $0xcc] ss:$16 sps:$4 sm:$0xff]  }
 0x7d8   :  { %v7502_v5 = vadd.f32 %v3060_v44, %v3059_v6  ;;  %v2992_v7 = vpop.f32.mrb[84].mxu0  ;;  %v3033_v49 = vpop.f32.mrb[84].mxu1  ;;  %v5821_v44 = vld [vmem:[#allocation16 + $0xc0] ss:$16 sps:$4 sm:$0xff]  }
 0x7d9   :  { %v2993_v39 = vadd.f32 %v2992_v7, %v8517_v35  ;;  %v3034_v45 = vadd.f32 %v3033_v49, %v8518_v21  ;;  %v2994_v46 = vpop.f32.mrb[85].mxu0  ;;  %v3035_v4 = vpop.f32.mrb[85].mxu1  ;;  %v5823_v7 = vld [vmem:[#allocation16 + $0xe4] ss:$16 sps:$4 sm:$0xff]   ;;  %v5824_v49 = vld [vmem:[#allocation16 + $0xec] ss:$16 sps:$4 sm:$0xff]  }
 0x7da   :  { %v2995_v34 = vadd.f32 %v2994_v46, %v8519_v41  ;;  %v3036_v58 = vadd.f32 %v3035_v4, %v8520_v30  ;;  %v2996_v36 = vpop.f32.mrb[86].mxu0  ;;  %v3037_v28 = vpop.f32.mrb[86].mxu1  ;;  %5649 = vtanh.f32 %v7502_v5  ;;  %v5825_v21 = vld [vmem:[#allocation16 + $0xe0] ss:$16 sps:$4 sm:$0xff]  }
 0x7db   :  { %v5221_v22 = vmul.f32 -1.442695, %v2993_v39  ;;  %v2997_v37 = vpop.f32.mrb[87].mxu0  ;;  %v3038_v56 = vpop.f32.mrb[87].mxu1 }
 0x7dc   :  { %v5222_v25 = vmul.f32 -1.442695, %v2995_v34  ;;  %v5223_v55 = vmul.f32 -1.442695, %v3036_v58 }
 0x7dd   :  { %5651 = vpow2.f32 %v5221_v22 }
 0x7de   :  { %5653 = vpow2.f32 %v5222_v25 }
 0x7df   :  { %5655 = vpow2.f32 %v5223_v55 }
 0x7e0   :  { %5657 = vtanh.f32 %v3034_v45  ;;  %v5826_v45 = vld [vmem:[#allocation16 + $0xe8] ss:$16 sps:$4 sm:$0xff]  }
 0x7e4   :  { %v5650_v32 = vpop.eup %5649 }
 0x7e5   :  { %v3063_v29 = vmul.f32 %v5650_v32, %v5648_v33 }
 0x7e7   :  { %v5652_v20 = vpop.eup %5651  ;;  %v3088_v54 = vpack.c.bf16 %v3063_v29, %v3063_v29 }
 0x7e8   :  { %v5654_v53 = vpop.eup %5653  ;;  %v3067_v52 = vadd.f32 1.0, %v5652_v20 }
 0x7e9   :  { %v3073_v12 = vadd.f32 1.0, %v5654_v53  ;;  %3090 = vst [vmem:[#allocation3 + $0x30] sm:$0xf] %v3088_v54  ;;  %3132 = vmatmul.mubr.bf16.vlgmr.msra.gmra.mrb[88].mxu0 %v3088_v54  ;;  %3173 = vmatmul.mubr.bf16.vlgmr.msra.gmra.mrb[88].mxu1 %v3088_v54  ;;  %v5656_v10 = vpop.eup %5655 }
 0x7ea   :  { %5659 = vrcp.f32 %v3067_v52  ;;  %3186 = vmatpush1.bf16.msra.mxu0 %v5797_v3  ;;  %3227 = vmatpush1.bf16.msra.mxu1 %v5798_v1  ;;  %v5658_v62 = vpop.eup %5657  ;;  %v3080_v15 = vadd.f32 1.0, %v5656_v10 }
 0x7eb   :  { %5661 = vrcp.f32 %v3073_v12  ;;  %3187 = vmatprep.subr.bf16.mxu0 %v5799_v2  ;;  %3228 = vmatprep.subr.bf16.mxu1 %v5800_v0 }
 0x7ec   :  { %3217 = vmatprep.mubr.bf16.mxu0 %v8299_v11  ;;  %3258 = vmatprep.mubr.bf16.mxu1 %v8299_v11  ;;  %5663 = vrcp.f32 %v3080_v15 }
 0x7ee   :  { %3188 = vmatpush1.bf16.msra.mxu0 %v5801_v8  ;;  %3229 = vmatpush1.bf16.msra.mxu1 %v5802_v47 }
 0x7ef   :  { %3189 = vmatprep.subr.bf16.mxu0 %v5803_v40  ;;  %3230 = vmatprep.subr.bf16.mxu1 %v5804_v9 }
 0x7f2   :  { %3190 = vmatpush1.bf16.msra.mxu0 %v5805_v13  ;;  %3231 = vmatpush1.bf16.msra.mxu1 %v5806_v14 }
 0x7f3   :  { %3191 = vmatprep.subr.bf16.mxu0 %v5807_v50  ;;  %3232 = vmatprep.subr.bf16.mxu1 %v5808_v51 }
 0x7f4   :  { %v5660_v57 = vpop.eup %5659 }
 0x7f5   :  { %v5662_v60 = vpop.eup %5661  ;;  %v3084_v23 = vmul.f32 %v5660_v57, %v5658_v62 }
 0x7f6   :  { %v3083_v42 = vmul.f32 %v5662_v60, %v7478_v38  ;;  %3192 = vmatpush1.bf16.msra.mxu0 %v5809_v24  ;;  %3233 = vmatpush1.bf16.msra.mxu1 %v5810_v17  ;;  %v5816_v38 = vld [vmem:[#allocation16 + $0xac] ss:$16 sps:$4 sm:$0xff]   ;;  %v5664_v6 = vpop.eup %5663 }
 0x7f7   :  { %3193 = vmatprep.subr.bf16.mxu0 %v5811_v63  ;;  %3234 = vmatprep.subr.bf16.mxu1 %v5812_v31 }
 0x7f8   :  { %v7512_v16 = vadd.f32 %v3084_v23, %v3083_v42 }
 0x7fa   :  { %3194 = vmatpush1.bf16.msra.mxu0 %v5813_v27  ;;  %3235 = vmatpush1.bf16.msra.mxu1 %v5814_v19  ;;  %5665 = vtanh.f32 %v7512_v16 }
 0x7fb   :  { %3195 = vmatprep.subr.bf16.mxu0 %v5815_v18  ;;  %3236 = vmatprep.subr.bf16.mxu1 %v5816_v38 }
 0x7fe   :  { %3196 = vmatpush1.bf16.msra.mxu0 %v5817_v26  ;;  %3237 = vmatpush1.bf16.msra.mxu1 %v5818_v61 }
 0x7ff   :  { %3197 = vmatprep.subr.bf16.mxu0 %v5819_v59  ;;  %3238 = vmatprep.subr.bf16.mxu1 %v5820_v43 }
 0x802   :  { %3198 = vmatpush1.bf16.msra.mxu0 %v5821_v44  ;;  %3239 = vmatpush1.bf16.msra.mxu1 %v5822_v48 }
 0x803   :  { %3199 = vmatprep.subr.bf16.mxu0 %v5823_v7  ;;  %3240 = vmatprep.subr.bf16.mxu1 %v5824_v49 }
 0x804   :  { %v5666_v35 = vpop.eup %5665 }
 0x805   :  { %v3087_v39 = vmul.f32 %v5666_v35, %v5664_v6 }
 0x806   :  { %3200 = vmatpush1.bf16.msra.mxu0 %v5825_v21  ;;  %3241 = vmatpush1.bf16.msra.mxu1 %v5826_v45 }
 0x807   :  { %v3089_v46 = vpack.c.bf16 %v3087_v39, %v3087_v39 }
 0x809   :  { %v3092_v4 = vrot.slane %v3089_v46, 4  ;;  %3218 = vmatmul.mubr.bf16.vlgmr.msra.gmra.mrb[92].mxu0 %v3089_v46  ;;  %3259 = vmatmul.mubr.bf16.vlgmr.msra.gmra.mrb[92].mxu1 %v3089_v46 }
 0x80b   :  { %3094 = vst [vmem:[#allocation3 + $0x8] sm:$0xf0] %v3092_v4 }
 0x80c   :  { %6063 = shalt.err (!%p6060_p12)  }
 0x80d   :  { %s6064_s0 = scalar_lea.vmem %s305_s1, 1024  ;;  %p6069_p0 = scmp.lt.s32.totalorder %s305_s1, %s305_s1 }
 0x80e   :  { %p6065_p13 = scmp.ne.s32.totalorder %s305_s1, %s6064_s0  ;;  %p6070_p1 = scmp.lt.s32.totalorder %s6064_s0, %s6064_s0 }
 0x810   :  { %p6071_p2 = por %p6070_p1, %p6069_p0 }
 0x812   :  { %p6072_p3 = pnand %p6071_p2, %p6065_p13 }
 0x814   :  { %6075 = shalt.err (!%p6072_p3)  }
 0x815   :  { %307 = dma.hbm_to_vmem [thread:$0]  %s8139_s14, 1024, %s305_s1, [#allocation11 + $0x5]  ;;  %v8521_v30 = vld [vmem:[#allocation114_spill] sm:$0xff]  ;;  %v8522_v36 = vld [vmem:[#allocation117_spill] sm:$0xff]  ;;  %v8523_v56 = vld [vmem:[#allocation116_spill] sm:$0xff] }
 0x816   :  { %v8524_v33 = vld [vmem:[#allocation118_spill] sm:$0xff]  ;;  %v8525_v57 = vld [vmem:[#allocation119_spill] sm:$0xff]  ;;  %v8526_v23 = vld [vmem:[#allocation121_spill] sm:$0xff] }
 0x817   :  { %v8527_v17 = vld [vmem:[#allocation120_spill] sm:$0xff]  ;;  %v8528_v31 = vld [vmem:[#allocation123_spill] sm:$0xff] }
 0x8bc   :  { %v3133_v41 = vpop.f32.mrb[88].mxu0  ;;  %v3174_v34 = vpop.f32.mrb[88].mxu1 }
 0x8bd   :  { %v3134_v58 = vadd.f32 %v3133_v41, %v8521_v30  ;;  %v3175_v28 = vadd.f32 %v3174_v34, %v8522_v36  ;;  %v3135_v22 = vpop.f32.mrb[89].mxu0  ;;  %v3176_v37 = vpop.f32.mrb[89].mxu1 }
 0x8be   :  { %v3136_v25 = vadd.f32 %v3135_v22, %v8523_v56  ;;  %v3177_v32 = vadd.f32 %v3176_v37, %v8524_v33  ;;  %v3137_v55 = vpop.f32.mrb[90].mxu0  ;;  %v3178_v29 = vpop.f32.mrb[90].mxu1 }
 0x8bf   :  { %v5224_v20 = vmul.f32 -1.442695, %v3134_v58  ;;  %v3138_v54 = vpop.f32.mrb[91].mxu0  ;;  %v3179_v53 = vpop.f32.mrb[91].mxu1 }
 0x8c0   :  { %v5225_v52 = vmul.f32 -1.442695, %v3136_v25  ;;  %v5226_v12 = vmul.f32 -1.442695, %v3177_v32 }
 0x8c1   :  { %5667 = vpow2.f32 %v5224_v20 }
 0x8c2   :  { %5669 = vpow2.f32 %v5225_v52 }
 0x8c3   :  { %5671 = vpow2.f32 %v5226_v12 }
 0x8c4   :  { %5673 = vtanh.f32 %v3175_v28 }
 0x8cb   :  { %v5668_v3 = vpop.eup %5667 }
 0x8cc   :  { %v5670_v1 = vpop.eup %5669  ;;  %v3270_v2 = vadd.f32 1.0, %v5668_v3 }
 0x8cd   :  { %v3276_v0 = vadd.f32 1.0, %v5670_v1  ;;  %v5672_v8 = vpop.eup %5671 }
 0x8ce   :  { %5675 = vrcp.f32 %v3270_v2  ;;  %v5674_v47 = vpop.eup %5673  ;;  %v3283_v13 = vadd.f32 1.0, %v5672_v8 }
 0x8cf   :  { %5677 = vrcp.f32 %v3276_v0 }
 0x8d0   :  { %5679 = vrcp.f32 %v3283_v13 }
 0x8d8   :  { %v5676_v40 = vpop.eup %5675 }
 0x8d9   :  { %v5678_v9 = vpop.eup %5677  ;;  %v3287_v10 = vmul.f32 %v5676_v40, %v5674_v47 }
 0x8da   :  { %v3286_v14 = vmul.f32 %v5678_v9, %v7502_v5  ;;  %v5680_v59 = vpop.eup %5679 }
 0x8dc   :  { %v3288_v62 = vadd.f32 %v3287_v10, %v3286_v14  ;;  %v3219_v50 = vpop.f32.mrb[92].mxu0  ;;  %v3260_v51 = vpop.f32.mrb[92].mxu1 }
 0x8dd   :  { %v3220_v60 = vadd.f32 %v3219_v50, %v8525_v57  ;;  %v3261_v15 = vadd.f32 %v3260_v51, %v8526_v23  ;;  %v3221_v42 = vpop.f32.mrb[93].mxu0  ;;  %v3262_v24 = vpop.f32.mrb[93].mxu1 }
 0x8de   :  { %5681 = vtanh.f32 %v3288_v62  ;;  %v3222_v63 = vadd.f32 %v3221_v42, %v8527_v17  ;;  %v3263_v27 = vadd.f32 %v3262_v24, %v8528_v31  ;;  %v3223_v19 = vpop.f32.mrb[94].mxu0  ;;  %v3264_v18 = vpop.f32.mrb[94].mxu1 }
 0x8df   :  { %v5227_v38 = vmul.f32 -1.442695, %v3220_v60  ;;  %v3224_v26 = vpop.f32.mrb[95].mxu0  ;;  %v3265_v5 = vpop.f32.mrb[95].mxu1 }
 0x8e0   :  { %v5228_v61 = vmul.f32 -1.442695, %v3222_v63  ;;  %v5229_v44 = vmul.f32 -1.442695, %v3263_v27 }
 0x8e1   :  { %5683 = vpow2.f32 %v5227_v38 }
 0x8e2   :  { %5685 = vpow2.f32 %v5228_v61 }
 0x8e3   :  { %5687 = vpow2.f32 %v5229_v44 }
 0x8e4   :  { %5689 = vtanh.f32 %v3261_v15 }
 0x8e8   :  { %v5682_v43 = vpop.eup %5681 }
 0x8e9   :  { %v3290_v48 = vmul.f32 %v5682_v43, %v5680_v59 }
 0x8eb   :  { %v5684_v6 = vpop.eup %5683  ;;  %v3315_v7 = vpack.c.bf16 %v3290_v48, %v3290_v48 }
 0x8ec   :  { %v5686_v49 = vpop.eup %5685  ;;  %v3294_v35 = vadd.f32 1.0, %v5684_v6 }
 0x8ed   :  { %v3318_v39 = vrot.slane %v3315_v7, 4  ;;  %v3300_v21 = vadd.f32 1.0, %v5686_v49  ;;  %v5688_v45 = vpop.eup %5687 }
 0x8ee   :  { %5691 = vrcp.f32 %v3294_v35  ;;  %v5690_v46 = vpop.eup %5689  ;;  %v3307_v30 = vadd.f32 1.0, %v5688_v45 }
 0x8ef   :  { %3320 = vst [vmem:[#allocation3 + $0x30] sm:$0xf0] %v3318_v39  ;;  %5693 = vrcp.f32 %v3300_v21 }
 0x8f0   :  { %5695 = vrcp.f32 %v3307_v30 }
 0x8f8   :  { %v5692_v4 = vpop.eup %5691 }
 0x8f9   :  { %v5694_v41 = vpop.eup %5693  ;;  %v3311_v34 = vmul.f32 %v5692_v4, %v5690_v46 }
 0x8fa   :  { %v3310_v58 = vmul.f32 %v5694_v41, %v7512_v16  ;;  %v5696_v28 = vpop.eup %5695 }
 0x8fc   :  { %v3312_v36 = vadd.f32 %v3311_v34, %v3310_v58 }
 0x8fe   :  { %5697 = vtanh.f32 %v3312_v36 }
 0x908   :  { %v5698_v22 = vpop.eup %5697 }
 0x909   :  { %v3314_v37 = vmul.f32 %v5698_v22, %v5696_v28 }
 0x90b   :  { %v3316_v56 = vpack.c.bf16 %v3314_v37, %v3314_v37 }
 0x90d   :  { %3321 = vst [vmem:[#allocation3 + $0x8] sm:$0xf] %v3316_v56 }
 0x90e   :  { %6080 = dma.done.wait [#allocation11], 8192 }
 0x90f   :  { %6081 = vsyncadd [#allocation11], 4294959104 }
 0x910   :  { %6082 = dma.done.wait [#allocation11 + $0x1], 4096 }
 0x911   :  { %6083 = vsyncadd [#allocation11 + $0x1], 4294963200 }
 0x912   :  { %6084 = dma.done.wait [#allocation11 + $0x2], 8192 }
 0x913   :  { %6085 = vsyncadd [#allocation11 + $0x2], 4294959104 }
 0x914   :  { %6086 = dma.done.wait [#allocation11 + $0x3], 4096 }
 0x915   :  { %6087 = vsyncadd [#allocation11 + $0x3], 4294963200 }
 0x916   :  { %6088 = dma.done.wait [#allocation11 + $0x4], 2048 }
 0x917   :  { %6089 = vsyncadd [#allocation11 + $0x4], 4294965248 }
 0x918   :  { %6090 = dma.done.wait [#allocation11 + $0x5], 1024 }
 0x919   :  { %6091 = vsyncadd [#allocation11 + $0x5], 4294966272  ;;  %v3350_v16 = vld [vmem:[#allocation5 + $0x8] sm:$0xff]  ;;  %v3352_v25 = vld [vmem:[#allocation5 + $0x18] sm:$0xff]  ;;  %vm6118_vm0 = vmmov 0  }
 0x91a   :  { %v3349_v33 = vld [vmem:[#allocation5] sm:$0xff]  ;;  %3435 = vmatprep.subr.bf16.mxu0 %v3350_v16  ;;  %3508 = vmatprep.subr.bf16.mxu1 %v3352_v25  ;;  %v3351_v32 = vld [vmem:[#allocation5 + $0x10] sm:$0xff]  ;;  %v3354_v55 = vld [vmem:[#allocation5 + $0x28] sm:$0xff] }
 0x91b   :  { %v3356_v29 = vld [vmem:[#allocation5 + $0x38] sm:$0xff]  ;;  %3436 = vmatpush1.bf16.msra.mxu0 %v3349_v33  ;;  %3509 = vmatpush1.bf16.msra.mxu1 %v3351_v32  ;;  %v3353_v20 = vld [vmem:[#allocation5 + $0x20] sm:$0xff]  ;;  %v3355_v54 = vld [vmem:[#allocation5 + $0x30] sm:$0xff] }
 0x91c   :  { %3437 = vmatprep.subr.bf16.mxu0 %v3354_v55  ;;  %3510 = vmatprep.subr.bf16.mxu1 %v3356_v29  ;;  %v3358_v53 = vld [vmem:[#allocation5 + $0x48] sm:$0xff]  ;;  %v3360_v52 = vld [vmem:[#allocation5 + $0x58] sm:$0xff]  ;;  %v3357_v12 = vld [vmem:[#allocation5 + $0x40] sm:$0xff] }
 0x91d   :  { %v3359_v3 = vld [vmem:[#allocation5 + $0x50] sm:$0xff]  ;;  %v3362_v1 = vld [vmem:[#allocation5 + $0x68] sm:$0xff]  ;;  %v3364_v2 = vld [vmem:[#allocation5 + $0x78] sm:$0xff] }
 0x91e   :  { %v3361_v0 = vld [vmem:[#allocation5 + $0x60] sm:$0xff]  ;;  %v3363_v8 = vld [vmem:[#allocation5 + $0x70] sm:$0xff]  ;;  %v3366_v47 = vld [vmem:[#allocation5 + $0x88] sm:$0xff] }
 0x91f   :  { %3438 = vmatpush1.bf16.msra.mxu0 %v3353_v20  ;;  %3511 = vmatpush1.bf16.msra.mxu1 %v3355_v54  ;;  %v3368_v40 = vld [vmem:[#allocation5 + $0x98] sm:$0xff]  ;;  %v3365_v9 = vld [vmem:[#allocation5 + $0x80] sm:$0xff]  ;;  %v3367_v10 = vld [vmem:[#allocation5 + $0x90] sm:$0xff] }
 0x920   :  { %3439 = vmatprep.subr.bf16.mxu0 %v3358_v53  ;;  %3512 = vmatprep.subr.bf16.mxu1 %v3360_v52  ;;  %v3370_v13 = vld [vmem:[#allocation5 + $0xa8] sm:$0xff]  ;;  %v3372_v14 = vld [vmem:[#allocation5 + $0xb8] sm:$0xff]  ;;  %v3369_v62 = vld [vmem:[#allocation5 + $0xa0] sm:$0xff] }
 0x921   :  { %v3371_v50 = vld [vmem:[#allocation5 + $0xb0] sm:$0xff]  ;;  %v3374_v51 = vld [vmem:[#allocation5 + $0xc8] sm:$0xff]  ;;  %v3376_v57 = vld [vmem:[#allocation5 + $0xd8] sm:$0xff] }
 0x922   :  { %v3342_v60 = vld [vmem:[#allocation3 + $0x8] sm:$0xff]  ;;  %v3373_v23 = vld [vmem:[#allocation5 + $0xc0] sm:$0xff]  ;;  %v3375_v15 = vld [vmem:[#allocation5 + $0xd0] sm:$0xff] }
 0x923   :  { %3440 = vmatpush1.bf16.msra.mxu0 %v3357_v12  ;;  %3513 = vmatpush1.bf16.msra.mxu1 %v3359_v3  ;;  %v3378_v42 = vld [vmem:[#allocation5 + $0xe8] sm:$0xff]  ;;  %v3380_v24 = vld [vmem:[#allocation5 + $0xf8] sm:$0xff]  ;;  %v3377_v17 = vld [vmem:[#allocation5 + $0xe0] sm:$0xff] }
 0x924   :  { %3441 = vmatprep.subr.bf16.mxu0 %v3362_v1  ;;  %3514 = vmatprep.subr.bf16.mxu1 %v3364_v2  ;;  %v3379_v63 = vld [vmem:[#allocation5 + $0xf0] sm:$0xff]  ;;  %v3382_v31 = vld [vmem:[#allocation5 + $0x108] sm:$0xff]  ;;  %v3384_v27 = vld [vmem:[#allocation5 + $0x118] sm:$0xff] }
 0x925   :  { %3467 = vmatprep.mubr.bf16.mxu0 %v3342_v60  ;;  %3540 = vmatprep.mubr.bf16.mxu1 %v3342_v60  ;;  %v3381_v19 = vld [vmem:[#allocation5 + $0x100] sm:$0xff]  ;;  %v3383_v18 = vld [vmem:[#allocation5 + $0x110] sm:$0xff]  ;;  %v3386_v38 = vld [vmem:[#allocation5 + $0x128] sm:$0xff] }
 0x926   :  { %v3388_v26 = vld [vmem:[#allocation5 + $0x138] sm:$0xff]  ;;  %v3385_v5 = vld [vmem:[#allocation5 + $0x120] sm:$0xff]  ;;  %v3387_v61 = vld [vmem:[#allocation5 + $0x130] sm:$0xff] }
 0x927   :  { %3442 = vmatpush1.bf16.msra.mxu0 %v3361_v0  ;;  %3515 = vmatpush1.bf16.msra.mxu1 %v3363_v8  ;;  %v3390_v59 = vld [vmem:[#allocation5 + $0x148] sm:$0xff]  ;;  %v3392_v43 = vld [vmem:[#allocation5 + $0x158] sm:$0xff]  ;;  %v3389_v44 = vld [vmem:[#allocation5 + $0x140] sm:$0xff] }
 0x928   :  { %3443 = vmatprep.subr.bf16.mxu0 %v3366_v47  ;;  %3516 = vmatprep.subr.bf16.mxu1 %v3368_v40  ;;  %v3391_v48 = vld [vmem:[#allocation5 + $0x150] sm:$0xff]  ;;  %v3394_v6 = vld [vmem:[#allocation5 + $0x168] sm:$0xff]  ;;  %v3396_v7 = vld [vmem:[#allocation5 + $0x178] sm:$0xff] }
 0x929   :  { %v3393_v49 = vld [vmem:[#allocation5 + $0x160] sm:$0xff]  ;;  %v3395_v35 = vld [vmem:[#allocation5 + $0x170] sm:$0xff]  ;;  %v3398_v39 = vld [vmem:[#allocation5 + $0x188] sm:$0xff] }
 0x92a   :  { %v3400_v21 = vld [vmem:[#allocation5 + $0x198] sm:$0xff]  ;;  %v3397_v45 = vld [vmem:[#allocation5 + $0x180] sm:$0xff]  ;;  %v3399_v46 = vld [vmem:[#allocation5 + $0x190] sm:$0xff] }
 0x92b   :  { %3444 = vmatpush1.bf16.msra.mxu0 %v3365_v9  ;;  %3517 = vmatpush1.bf16.msra.mxu1 %v3367_v10  ;;  %v3402_v4 = vld [vmem:[#allocation5 + $0x1a8] sm:$0xff]  ;;  %v3404_v41 = vld [vmem:[#allocation5 + $0x1b8] sm:$0xff]  ;;  %v3401_v34 = vld [vmem:[#allocation5 + $0x1a0] sm:$0xff] }
 0x92c   :  { %3445 = vmatprep.subr.bf16.mxu0 %v3370_v13  ;;  %3518 = vmatprep.subr.bf16.mxu1 %v3372_v14  ;;  %v3403_v30 = vld [vmem:[#allocation5 + $0x1b0] sm:$0xff]  ;;  %v3406_v58 = vld [vmem:[#allocation5 + $0x1c8] sm:$0xff]  ;;  %v3408_v36 = vld [vmem:[#allocation5 + $0x1d8] sm:$0xff] }
 0x92d   :  { %v3405_v28 = vld [vmem:[#allocation5 + $0x1c0] sm:$0xff]  ;;  %v3407_v22 = vld [vmem:[#allocation5 + $0x1d0] sm:$0xff]  ;;  %v3410_v37 = vld [vmem:[#allocation5 + $0x1e8] sm:$0xff] }
 0x92e   :  { %v3412_v56 = vld [vmem:[#allocation5 + $0x1f8] sm:$0xff]  ;;  %v3409_v16 = vld [vmem:[#allocation5 + $0x1e0] sm:$0xff]  ;;  %v3411_v25 = vld [vmem:[#allocation5 + $0x1f0] sm:$0xff] }
 0x92f   :  { %3446 = vmatpush1.bf16.msra.mxu0 %v3369_v62  ;;  %3519 = vmatpush1.bf16.msra.mxu1 %v3371_v50  ;;  %v3616_v33 = vld [vmem:[#allocation7 + $0x8] sm:$0xff]  ;;  %v3618_v32 = vld [vmem:[#allocation7 + $0x18] sm:$0xff]  ;;  %v3341_v55 = vld [vmem:[#allocation3] sm:$0xff] }
 0x930   :  { %3447 = vmatprep.subr.bf16.mxu0 %v3374_v51  ;;  %3520 = vmatprep.subr.bf16.mxu1 %v3376_v57  ;;  %v3615_v29 = vld [vmem:[#allocation7] sm:$0xff]  ;;  %v3617_v20 = vld [vmem:[#allocation7 + $0x10] sm:$0xff]  ;;  %v3620_v54 = vld [vmem:[#allocation7 + $0x28] sm:$0xff] }
 0x931   :  { %v3622_v53 = vld [vmem:[#allocation7 + $0x38] sm:$0xff]  ;;  %v3619_v12 = vld [vmem:[#allocation7 + $0x20] sm:$0xff]  ;;  %v3621_v3 = vld [vmem:[#allocation7 + $0x30] sm:$0xff] }
 0x932   :  { %v3344_v52 = vld [vmem:[#allocation3 + $0x18] sm:$0xff]  ;;  %v3624_v1 = vld [vmem:[#allocation7 + $0x48] sm:$0xff]  ;;  %v3343_v0 = vld [vmem:[#allocation3 + $0x10] sm:$0xff] }
 0x933   :  { %3448 = vmatpush1.bf16.msra.mxu0 %v3373_v23  ;;  %3521 = vmatpush1.bf16.msra.mxu1 %v3375_v15  ;;  %v3626_v2 = vld [vmem:[#allocation7 + $0x58] sm:$0xff]  ;;  %v3623_v8 = vld [vmem:[#allocation7 + $0x40] sm:$0xff]  ;;  %v3625_v47 = vld [vmem:[#allocation7 + $0x50] sm:$0xff] }
 0x934   :  { %3449 = vmatprep.subr.bf16.mxu0 %v3378_v42  ;;  %3522 = vmatprep.subr.bf16.mxu1 %v3380_v24  ;;  %v3628_v40 = vld [vmem:[#allocation7 + $0x68] sm:$0xff]  ;;  %v3630_v9 = vld [vmem:[#allocation7 + $0x78] sm:$0xff]  ;;  %v3627_v13 = vld [vmem:[#allocation7 + $0x60] sm:$0xff] }
 0x935   :  { %v3346_v10 = vld [vmem:[#allocation3 + $0x28] sm:$0xff]  ;;  %v3629_v14 = vld [vmem:[#allocation7 + $0x70] sm:$0xff]  ;;  %v3634_v50 = vld [vmem:[#allocation7 + $0x98] sm:$0xff] }
 0x936   :  { %v3632_v62 = vld [vmem:[#allocation7 + $0x88] sm:$0xff]  ;;  %v3345_v51 = vld [vmem:[#allocation3 + $0x20] sm:$0xff]  ;;  %v3633_v60 = vld [vmem:[#allocation7 + $0x90] sm:$0xff] }
 0x937   :  { %3450 = vmatpush1.bf16.msra.mxu0 %v3377_v17  ;;  %3523 = vmatpush1.bf16.msra.mxu1 %v3379_v63  ;;  %v3631_v57 = vld [vmem:[#allocation7 + $0x80] sm:$0xff]  ;;  %v3636_v23 = vld [vmem:[#allocation7 + $0xa8] sm:$0xff]  ;;  %v3638_v15 = vld [vmem:[#allocation7 + $0xb8] sm:$0xff] }
 0x938   :  { %3451 = vmatprep.subr.bf16.mxu0 %v3382_v31  ;;  %3524 = vmatprep.subr.bf16.mxu1 %v3384_v27  ;;  %v3348_v42 = vld [vmem:[#allocation3 + $0x38] sm:$0xff]  ;;  %v3635_v24 = vld [vmem:[#allocation7 + $0xa0] sm:$0xff]  ;;  %v3637_v17 = vld [vmem:[#allocation7 + $0xb0] sm:$0xff] }
 0x939   :  { %v3640_v63 = vld [vmem:[#allocation7 + $0xc8] sm:$0xff]  ;;  %v3642_v31 = vld [vmem:[#allocation7 + $0xd8] sm:$0xff] }
 0x93a   :  { %v3614_v27 = vld [vmem:[#allocation3 + $0x38] sm:$0xf0] }
 0x93b   :  { %3452 = vmatpush1.bf16.msra.mxu0 %v3381_v19  ;;  %3525 = vmatpush1.bf16.msra.mxu1 %v3383_v18  ;;  %v3347_v19 = vld [vmem:[#allocation3 + $0x30] sm:$0xff]  ;;  %v3639_v18 = vld [vmem:[#allocation7 + $0xc0] sm:$0xff] }
 0x93c   :  { %3453 = vmatprep.subr.bf16.mxu0 %v3386_v38  ;;  %3526 = vmatprep.subr.bf16.mxu1 %v3388_v26  ;;  %v3641_v38 = vld [vmem:[#allocation7 + $0xd0] sm:$0xff]  ;;  %v3644_v26 = vld [vmem:[#allocation7 + $0xe8] sm:$0xff] }
 0x93f   :  { %3454 = vmatpush1.bf16.msra.mxu0 %v3385_v5  ;;  %3527 = vmatpush1.bf16.msra.mxu1 %v3387_v61  ;;  %v3646_v5 = vld [vmem:[#allocation7 + $0xf8] sm:$0xff]  ;;  %v3704_v61 = vrot.slane %v3614_v27, 4  ;;  %v3819_v27 = vld [vmem:[#allocation8 + $0xa8] sm:$0xff] }
 0x940   :  { %3455 = vmatprep.subr.bf16.mxu0 %v3390_v59  ;;  %3528 = vmatprep.subr.bf16.mxu1 %v3392_v43  ;;  %v3643_v59 = vld [vmem:[#allocation7 + $0xe0] sm:$0xff]  ;;  %v3645_v43 = vld [vmem:[#allocation7 + $0xf0] sm:$0xff] }
 0x943   :  { %3456 = vmatpush1.bf16.msra.mxu0 %v3389_v44  ;;  %3529 = vmatpush1.bf16.msra.mxu1 %v3391_v48  ;;  %v3648_v44 = vld [vmem:[#allocation7 + $0x108] sm:$0xff]  ;;  %v3650_v48 = vld [vmem:[#allocation7 + $0x118] sm:$0xff] }
 0x944   :  { %3457 = vmatprep.subr.bf16.mxu0 %v3394_v6  ;;  %3530 = vmatprep.subr.bf16.mxu1 %v3396_v7  ;;  %v3647_v6 = vld [vmem:[#allocation7 + $0x100] sm:$0xff]  ;;  %v3649_v7 = vld [vmem:[#allocation7 + $0x110] sm:$0xff] }
 0x947   :  { %3458 = vmatpush1.bf16.msra.mxu0 %v3393_v49  ;;  %3531 = vmatpush1.bf16.msra.mxu1 %v3395_v35  ;;  %v3652_v49 = vld [vmem:[#allocation7 + $0x128] sm:$0xff]  ;;  %v3654_v35 = vld [vmem:[#allocation7 + $0x138] sm:$0xff] }
 0x948   :  { %3459 = vmatprep.subr.bf16.mxu0 %v3398_v39  ;;  %3532 = vmatprep.subr.bf16.mxu1 %v3400_v21  ;;  %v3651_v39 = vld [vmem:[#allocation7 + $0x120] sm:$0xff]  ;;  %v3653_v21 = vld [vmem:[#allocation7 + $0x130] sm:$0xff] }
 0x94b   :  { %3460 = vmatpush1.bf16.msra.mxu0 %v3397_v45  ;;  %3533 = vmatpush1.bf16.msra.mxu1 %v3399_v46  ;;  %v3656_v45 = vld [vmem:[#allocation7 + $0x148] sm:$0xff]  ;;  %v3658_v46 = vld [vmem:[#allocation7 + $0x158] sm:$0xff] }
 0x94c   :  { %3461 = vmatprep.subr.bf16.mxu0 %v3402_v4  ;;  %3534 = vmatprep.subr.bf16.mxu1 %v3404_v41  ;;  %v3655_v4 = vld [vmem:[#allocation7 + $0x140] sm:$0xff]  ;;  %v3657_v41 = vld [vmem:[#allocation7 + $0x150] sm:$0xff] }
 0x94f   :  { %3462 = vmatpush1.bf16.msra.mxu0 %v3401_v34  ;;  %3535 = vmatpush1.bf16.msra.mxu1 %v3403_v30  ;;  %v3660_v34 = vld [vmem:[#allocation7 + $0x168] sm:$0xff]  ;;  %v3662_v30 = vld [vmem:[#allocation7 + $0x178] sm:$0xff] }
 0x950   :  { %3463 = vmatprep.subr.bf16.mxu0 %v3406_v58  ;;  %3536 = vmatprep.subr.bf16.mxu1 %v3408_v36  ;;  %v3659_v58 = vld [vmem:[#allocation7 + $0x160] sm:$0xff]  ;;  %v3661_v36 = vld [vmem:[#allocation7 + $0x170] sm:$0xff] }
 0x953   :  { %3464 = vmatpush1.bf16.msra.mxu0 %v3405_v28  ;;  %3537 = vmatpush1.bf16.msra.mxu1 %v3407_v22  ;;  %v3664_v28 = vld [vmem:[#allocation7 + $0x188] sm:$0xff]  ;;  %v3666_v22 = vld [vmem:[#allocation7 + $0x198] sm:$0xff] }
 0x954   :  { %3465 = vmatprep.subr.bf16.mxu0 %v3410_v37  ;;  %3538 = vmatprep.subr.bf16.mxu1 %v3412_v56  ;;  %v3663_v37 = vld [vmem:[#allocation7 + $0x180] sm:$0xff]  ;;  %v3665_v56 = vld [vmem:[#allocation7 + $0x190] sm:$0xff] }
 0x957   :  { %3466 = vmatpush1.bf16.msra.mxu0 %v3409_v16  ;;  %3539 = vmatpush1.bf16.msra.mxu1 %v3411_v25  ;;  %v3668_v16 = vld [vmem:[#allocation7 + $0x1a8] sm:$0xff]  ;;  %v3670_v25 = vld [vmem:[#allocation7 + $0x1b8] sm:$0xff] }
 0x958   :  { %3707 = vmatprep.subr.bf16.mxu0 %v3616_v33  ;;  %3748 = vmatprep.subr.bf16.mxu1 %v3618_v32  ;;  %v3667_v33 = vld [vmem:[#allocation7 + $0x1a0] sm:$0xff]  ;;  %v3669_v32 = vld [vmem:[#allocation7 + $0x1b0] sm:$0xff] }
 0x95a   :  { %3468 = vmatmul.mubr.bf16.vlgmr.msra.gmra.mrb[96].mxu0 %v3341_v55  ;;  %3541 = vmatmul.mubr.bf16.vlgmr.msra.gmra.mrb[96].mxu1 %v3341_v55  ;;  %v3672_v55 = vld [vmem:[#allocation7 + $0x1c8] sm:$0xff] }
 0x95b   :  { %3708 = vmatpush1.bf16.msra.mxu0 %v3615_v29  ;;  %3749 = vmatpush1.bf16.msra.mxu1 %v3617_v20  ;;  %v3674_v29 = vld [vmem:[#allocation7 + $0x1d8] sm:$0xff]  ;;  %v3671_v20 = vld [vmem:[#allocation7 + $0x1c0] sm:$0xff] }
 0x95c   :  { %3709 = vmatprep.subr.bf16.mxu0 %v3620_v54  ;;  %3750 = vmatprep.subr.bf16.mxu1 %v3622_v53  ;;  %v3673_v54 = vld [vmem:[#allocation7 + $0x1d0] sm:$0xff]  ;;  %v3676_v53 = vld [vmem:[#allocation7 + $0x1e8] sm:$0xff] }
 0x95d   :  { %3477 = vmatprep.mubr.bf16.mxu0 %v3344_v52  ;;  %3550 = vmatprep.mubr.bf16.mxu1 %v3344_v52  ;;  %v3678_v52 = vld [vmem:[#allocation7 + $0x1f8] sm:$0xff] }
 0x95f   :  { %3710 = vmatpush1.bf16.msra.mxu0 %v3619_v12  ;;  %3751 = vmatpush1.bf16.msra.mxu1 %v3621_v3  ;;  %v3613_v12 = vld [vmem:[#allocation3 + $0x30] sm:$0xf0]  ;;  %v3675_v3 = vld [vmem:[#allocation7 + $0x1e0] sm:$0xff] }
 0x960   :  { %3711 = vmatprep.subr.bf16.mxu0 %v3624_v1  ;;  %3752 = vmatprep.subr.bf16.mxu1 %v3626_v2  ;;  %v3677_v1 = vld [vmem:[#allocation7 + $0x1f0] sm:$0xff]  ;;  %v7537_v2 = vld [vmem:[#allocation6 + $0x8] sm:$0xff] }
 0x962   :  { %3478 = vmatmul.mubr.bf16.gmra.mrb[100].mxu0 %v3343_v0  ;;  %3551 = vmatmul.mubr.bf16.gmra.mrb[100].mxu1 %v3343_v0  ;;  %v3703_v0 = vrot.slane %v3613_v12, 4 }
 0x963   :  { %3712 = vmatpush1.bf16.msra.mxu0 %v3623_v8  ;;  %3753 = vmatpush1.bf16.msra.mxu1 %v3625_v47  ;;  %v7540_v8 = vld [vmem:[#allocation6] sm:$0xff]  ;;  %v7542_v47 = vld [vmem:[#allocation6 + $0x28] sm:$0xff] }
 0x964   :  { %3713 = vmatprep.subr.bf16.mxu0 %v3628_v40  ;;  %3754 = vmatprep.subr.bf16.mxu1 %v3630_v9  ;;  %v7547_v40 = vld [vmem:[#allocation6 + $0x20] sm:$0xff]  ;;  %v7550_v9 = vld [vmem:[#allocation6 + $0x48] sm:$0xff] }
 0x965   :  { %3487 = vmatprep.mubr.bf16.mxu0 %v3346_v10  ;;  %3560 = vmatprep.mubr.bf16.mxu1 %v3346_v10  ;;  %v7554_v10 = vld [vmem:[#allocation6 + $0x40] sm:$0xff] }
 0x967   :  { %3714 = vmatpush1.bf16.msra.mxu0 %v3627_v13  ;;  %3755 = vmatpush1.bf16.msra.mxu1 %v3629_v14  ;;  %v7556_v13 = vld [vmem:[#allocation6 + $0x68] sm:$0xff]  ;;  %v7560_v14 = vld [vmem:[#allocation6 + $0x60] sm:$0xff] }
 0x968   :  { %3715 = vmatprep.subr.bf16.mxu0 %v3632_v62  ;;  %3756 = vmatprep.subr.bf16.mxu1 %v3634_v50  ;;  %v7562_v62 = vld [vmem:[#allocation6 + $0x88] sm:$0xff]  ;;  %v7566_v50 = vld [vmem:[#allocation6 + $0x80] sm:$0xff] }
 0x96a   :  { %3488 = vmatmul.mubr.bf16.gmra.mrb[104].mxu0 %v3345_v51  ;;  %3561 = vmatmul.mubr.bf16.gmra.mrb[104].mxu1 %v3345_v51  ;;  %v7568_v51 = vld [vmem:[#allocation6 + $0xa8] sm:$0xff] }
 0x96b   :  { %3716 = vmatpush1.bf16.msra.mxu0 %v3631_v57  ;;  %3757 = vmatpush1.bf16.msra.mxu1 %v3633_v60  ;;  %v7572_v57 = vld [vmem:[#allocation6 + $0xa0] sm:$0xff]  ;;  %v7574_v60 = vld [vmem:[#allocation6 + $0xc8] sm:$0xff] }
 0x96c   :  { %3717 = vmatprep.subr.bf16.mxu0 %v3636_v23  ;;  %3758 = vmatprep.subr.bf16.mxu1 %v3638_v15  ;;  %v7578_v23 = vld [vmem:[#allocation6 + $0xc0] sm:$0xff]  ;;  %v7580_v15 = vld [vmem:[#allocation6 + $0xe8] sm:$0xff] }
 0x96d   :  { %3497 = vmatprep.mubr.bf16.mxu0 %v3348_v42  ;;  %3570 = vmatprep.mubr.bf16.mxu1 %v3348_v42  ;;  %v7584_v42 = vld [vmem:[#allocation6 + $0xe0] sm:$0xff] }
 0x96f   :  { %3718 = vmatpush1.bf16.msra.mxu0 %v3635_v24  ;;  %3759 = vmatpush1.bf16.msra.mxu1 %v3637_v17  ;;  %v3815_v24 = vld [vmem:[#allocation8 + $0x88] sm:$0xff]  ;;  %v3814_v17 = vld [vmem:[#allocation8 + $0x80] sm:$0xff] }
 0x970   :  { %3719 = vmatprep.subr.bf16.mxu0 %v3640_v63  ;;  %3760 = vmatprep.subr.bf16.mxu1 %v3642_v31  ;;  %v3817_v63 = vld [vmem:[#allocation8 + $0x98] sm:$0xff]  ;;  %v3816_v31 = vld [vmem:[#allocation8 + $0x90] sm:$0xff] }
 0x972   :  { %3498 = vmatmul.mubr.bf16.gmra.mrb[108].mxu0 %v3347_v19  ;;  %3571 = vmatmul.mubr.bf16.gmra.mrb[108].mxu1 %v3347_v19  ;;  %v3818_v19 = vld [vmem:[#allocation8 + $0xa0] sm:$0xff] }
 0x973   :  { %3720 = vmatpush1.bf16.msra.mxu0 %v3639_v18  ;;  %3761 = vmatpush1.bf16.msra.mxu1 %v3641_v38  ;;  %v3821_v18 = vld [vmem:[#allocation8 + $0xb8] sm:$0xff]  ;;  %v3820_v38 = vld [vmem:[#allocation8 + $0xb0] sm:$0xff] }
 0x974   :  { %3721 = vmatprep.subr.bf16.mxu0 %v3644_v26  ;;  %3762 = vmatprep.subr.bf16.mxu1 %v3646_v5  ;;  %v3823_v26 = vld [vmem:[#allocation8 + $0xc8] sm:$0xff]  ;;  %v3822_v5 = vld [vmem:[#allocation8 + $0xc0] sm:$0xff] }
 0x975   :  { %3739 = vmatprep.mubr.bf16.mxu0 %v3704_v61  ;;  %3780 = vmatprep.mubr.bf16.mxu1 %v3704_v61  ;;  %v3825_v61 = vld [vmem:[#allocation8 + $0xd8] sm:$0xff] }
 0x977   :  { %3722 = vmatpush1.bf16.msra.mxu0 %v3643_v59  ;;  %3763 = vmatpush1.bf16.msra.mxu1 %v3645_v43  ;;  %v3824_v59 = vld [vmem:[#allocation8 + $0xd0] sm:$0xff]  ;;  %v3827_v43 = vld [vmem:[#allocation8 + $0xe8] sm:$0xff] }
 0x978   :  { %3723 = vmatprep.subr.bf16.mxu0 %v3648_v44  ;;  %3764 = vmatprep.subr.bf16.mxu1 %v3650_v48  ;;  %v3826_v44 = vld [vmem:[#allocation8 + $0xe0] sm:$0xff]  ;;  %v3829_v48 = vld [vmem:[#allocation8 + $0xf8] sm:$0xff] }
 0x97b   :  { %3724 = vmatpush1.bf16.msra.mxu0 %v3647_v6  ;;  %3765 = vmatpush1.bf16.msra.mxu1 %v3649_v7  ;;  %v3828_v6 = vld [vmem:[#allocation8 + $0xf0] sm:$0xff]  ;;  %v7606_v7 = vld [vmem:[#allocation6 + $0x18] sm:$0xff] }
 0x97c   :  { %3725 = vmatprep.subr.bf16.mxu0 %v3652_v49  ;;  %3766 = vmatprep.subr.bf16.mxu1 %v3654_v35  ;;  %v3413_v49 = vld [vmem:[%s8131_s6] sm:$0xf]  ;;  %v8529_v35 = vld [vmem:[#allocation87_spill] sm:$0xff] }
 0x97f   :  { %3726 = vmatpush1.bf16.msra.mxu0 %v3651_v39  ;;  %3767 = vmatpush1.bf16.msra.mxu1 %v3653_v21  ;;  %v7613_v39 = vrot.slane %v3413_v49, %v8529_v35  ;;  %v8530_v21 = vld [vmem:[#allocation88_spill] sm:$0xff] }
 0x980   :  { %3727 = vmatprep.subr.bf16.mxu0 %v3656_v45  ;;  %3768 = vmatprep.subr.bf16.mxu1 %v3658_v46  ;;  %v7616_v45 = vrot.slane %v3413_v49, %v8530_v21 }
 0x983   :  { %3728 = vmatpush1.bf16.msra.mxu0 %v3655_v4  ;;  %3769 = vmatpush1.bf16.msra.mxu1 %v3657_v41  ;;  %v8531_v41 = vld [vmem:[#allocation89_spill] sm:$0xff] }
 0x984   :  { %3729 = vmatprep.subr.bf16.mxu0 %v3660_v34  ;;  %3770 = vmatprep.subr.bf16.mxu1 %v3662_v30  ;;  %v7623_v34 = vrot.slane %v3413_v49, %v8531_v41 }
 0x987   :  { %3730 = vmatpush1.bf16.msra.mxu0 %v3659_v58  ;;  %3771 = vmatpush1.bf16.msra.mxu1 %v3661_v36  ;;  %v8532_v36 = vld [vmem:[#allocation90_spill] sm:$0xff] }
 0x988   :  { %3731 = vmatprep.subr.bf16.mxu0 %v3664_v28  ;;  %3772 = vmatprep.subr.bf16.mxu1 %v3666_v22  ;;  %v7630_v28 = vrot.slane %v3413_v49, %v8532_v36 }
 0x98b   :  { %3732 = vmatpush1.bf16.msra.mxu0 %v3663_v37  ;;  %3773 = vmatpush1.bf16.msra.mxu1 %v3665_v56 }
 0x98c   :  { %3733 = vmatprep.subr.bf16.mxu0 %v3668_v16  ;;  %3774 = vmatprep.subr.bf16.mxu1 %v3670_v25 }
 0x98f   :  { %3734 = vmatpush1.bf16.msra.mxu0 %v3667_v33  ;;  %3775 = vmatpush1.bf16.msra.mxu1 %v3669_v32 }
 0x990   :  { %3735 = vmatprep.subr.bf16.mxu0 %v3672_v55  ;;  %3776 = vmatprep.subr.bf16.mxu1 %v3674_v29 }
 0x993   :  { %3736 = vmatpush1.bf16.msra.mxu0 %v3671_v20  ;;  %3777 = vmatpush1.bf16.msra.mxu1 %v3673_v54 }
 0x994   :  { %3737 = vmatprep.subr.bf16.mxu0 %v3676_v53  ;;  %3778 = vmatprep.subr.bf16.mxu1 %v3678_v52 }
 0x997   :  { %3738 = vmatpush1.bf16.msra.mxu0 %v3675_v3  ;;  %3779 = vmatpush1.bf16.msra.mxu1 %v3677_v1 }
 0x998   :  { %3907 = vmatprep.subr.bf16.mxu1 %v7537_v2  ;;  %3830 = vmatprep.subr.bf16.mxu0 %v3815_v24 }
 0x99a   :  { %3740 = vmatmul.mubr.bf16.vlgmr.msra.gmra.mrb[112].mxu0 %v3703_v0  ;;  %3781 = vmatmul.mubr.bf16.vlgmr.msra.gmra.mrb[112].mxu1 %v3703_v0 }
 0x99b   :  { %3908 = vmatpush1.bf16.msra.mxu1 %v7540_v8  ;;  %3939 = vmatprep.mubr.bf16.mxu1 %v8299_v11 }
 0x99c   :  { %3909 = vmatprep.subr.bf16.mxu1 %v7542_v47  ;;  %3862 = vmatprep.mubr.bf16.mxu0 %v8299_v11 }
 0x99d   :  { %3831 = vmatpush1.bf16.msra.mxu0 %v3814_v17 }
 0x99e   :  { %3832 = vmatprep.subr.bf16.mxu0 %v3817_v63 }
 0x99f   :  { %3910 = vmatpush1.bf16.msra.mxu1 %v7547_v40 }
 0x9a0   :  { %3911 = vmatprep.subr.bf16.mxu1 %v7550_v9 }
 0x9a1   :  { %3833 = vmatpush1.bf16.msra.mxu0 %v3816_v31 }
 0x9a2   :  { %3834 = vmatprep.subr.bf16.mxu0 %v3819_v27 }
 0x9a3   :  { %3912 = vmatpush1.bf16.msra.mxu1 %v7554_v10 }
 0x9a4   :  { %3913 = vmatprep.subr.bf16.mxu1 %v7556_v13 }
 0x9a5   :  { %3835 = vmatpush1.bf16.msra.mxu0 %v3818_v19 }
 0x9a6   :  { %3836 = vmatprep.subr.bf16.mxu0 %v3821_v18 }
 0x9a7   :  { %3914 = vmatpush1.bf16.msra.mxu1 %v7560_v14 }
 0x9a8   :  { %3915 = vmatprep.subr.bf16.mxu1 %v7562_v62 }
 0x9a9   :  { %3837 = vmatpush1.bf16.msra.mxu0 %v3820_v38 }
 0x9aa   :  { %3838 = vmatprep.subr.bf16.mxu0 %v3823_v26 }
 0x9ab   :  { %3916 = vmatpush1.bf16.msra.mxu1 %v7566_v50 }
 0x9ac   :  { %3917 = vmatprep.subr.bf16.mxu1 %v7568_v51 }
 0x9ad   :  { %3839 = vmatpush1.bf16.msra.mxu0 %v3822_v5 }
 0x9ae   :  { %3840 = vmatprep.subr.bf16.mxu0 %v3825_v61 }
 0x9af   :  { %3918 = vmatpush1.bf16.msra.mxu1 %v7572_v57 }
 0x9b0   :  { %3919 = vmatprep.subr.bf16.mxu1 %v7574_v60 }
 0x9b1   :  { %3841 = vmatpush1.bf16.msra.mxu0 %v3824_v59 }
 0x9b2   :  { %3842 = vmatprep.subr.bf16.mxu0 %v3827_v43 }
 0x9b3   :  { %3920 = vmatpush1.bf16.msra.mxu1 %v7578_v23 }
 0x9b4   :  { %3921 = vmatprep.subr.bf16.mxu1 %v7580_v15 }
 0x9b5   :  { %3843 = vmatpush1.bf16.msra.mxu0 %v3826_v44 }
 0x9b6   :  { %3844 = vmatprep.subr.bf16.mxu0 %v3829_v48 }
 0x9b7   :  { %3922 = vmatpush1.bf16.msra.mxu1 %v7584_v42 }
 0x9b8   :  { %4018 = vmatprep.subr.bf16.mxu1 %v7537_v2 }
 0x9b9   :  { %3845 = vmatpush1.bf16.msra.mxu0 %v3828_v6 }
 0x9ba   :  { %3940 = vmatmul.mubr.bf16.vlgmr.msra.gmra.mrb[116].mxu1 %v8299_v11  ;;  %3948 = vmatprep.subr.bf16.mxu0 %v7606_v7 }
 0x9bb   :  { %4019 = vmatpush1.bf16.msra.mxu1 %v7540_v8  ;;  %4050 = vmatprep.mubr.bf16.mxu1 %v8299_v11 }
 0x9bc   :  { %4020 = vmatprep.subr.bf16.mxu1 %v7542_v47 }
 0x9bf   :  { %4021 = vmatpush1.bf16.msra.mxu1 %v7547_v40 }
 0x9c0   :  { %4022 = vmatprep.subr.bf16.mxu1 %v7550_v9 }
 0x9c3   :  { %4023 = vmatpush1.bf16.msra.mxu1 %v7554_v10 }
 0x9c4   :  { %4024 = vmatprep.subr.bf16.mxu1 %v7556_v13 }
 0x9c7   :  { %4025 = vmatpush1.bf16.msra.mxu1 %v7560_v14 }
 0x9c8   :  { %4026 = vmatprep.subr.bf16.mxu1 %v7562_v62 }
 0x9cb   :  { %4027 = vmatpush1.bf16.msra.mxu1 %v7566_v50 }
 0x9cc   :  { %4028 = vmatprep.subr.bf16.mxu1 %v7568_v51 }
 0x9cf   :  { %4029 = vmatpush1.bf16.msra.mxu1 %v7572_v57 }
 0x9d0   :  { %4030 = vmatprep.subr.bf16.mxu1 %v7574_v60 }
 0x9d3   :  { %4031 = vmatpush1.bf16.msra.mxu1 %v7578_v23 }
 0x9d4   :  { %4032 = vmatprep.subr.bf16.mxu1 %v7580_v15 }
 0x9d7   :  { %4033 = vmatpush1.bf16.msra.mxu1 %v7584_v42 }
 0x9d8   :  { %4129 = vmatprep.subr.bf16.mxu1 %v7537_v2 }
 0xa2d   :  { %v7618_v46 = vpop.f32.mrb[96].mxu0  ;;  %v7620_v4 = vpop.f32.mrb[96].mxu1 }
 0xa2e   :  { %v7625_v30 = vpop.f32.mrb[97].mxu0  ;;  %v7627_v58 = vpop.f32.mrb[97].mxu1 }
 0xa2f   :  { %v3473_v22 = vpop.f32.mrb[98].mxu0  ;;  %v3546_v37 = vpop.f32.mrb[98].mxu1 }
 0xa30   :  { %v7633_v56 = vadd.f32 %v3473_v22, %v7613_v39  ;;  %v3475_v16 = vpop.f32.mrb[99].mxu0  ;;  %v7636_v25 = vadd.f32 %v3546_v37, %v7616_v45  ;;  %v3548_v33 = vpop.f32.mrb[99].mxu1 }
 0xa31   :  { %v7639_v32 = vadd.f32 %v3475_v16, %v7630_v28  ;;  %v7642_v55 = vadd.f32 %v3548_v33, %v7623_v34 }
 0xa35   :  { %v3479_v29 = vpop.f32.mrb[100].mxu0  ;;  %v3552_v20 = vpop.f32.mrb[100].mxu1 }
 0xa36   :  { %v7645_v54 = vadd.f32 %v3479_v29, %v7613_v39  ;;  %v3481_v53 = vpop.f32.mrb[101].mxu0  ;;  %v7648_v52 = vadd.f32 %v3552_v20, %v7616_v45  ;;  %v3554_v12 = vpop.f32.mrb[101].mxu1 }
 0xa37   :  { %v7651_v3 = vadd.f32 %v3481_v53, %v7630_v28  ;;  %v3483_v1 = vpop.f32.mrb[102].mxu0  ;;  %v7654_v0 = vadd.f32 %v3554_v12, %v7623_v34  ;;  %v3556_v24 = vpop.f32.mrb[102].mxu1 }
 0xa38   :  { %v7657_v17 = vadd.f32 %v3483_v1, %v7613_v39  ;;  %v3485_v63 = vpop.f32.mrb[103].mxu0  ;;  %v7660_v31 = vadd.f32 %v3556_v24, %v7616_v45  ;;  %v3558_v27 = vpop.f32.mrb[103].mxu1 }
 0xa39   :  { %v7663_v19 = vadd.f32 %v3485_v63, %v7630_v28  ;;  %v7666_v18 = vadd.f32 %v3558_v27, %v7623_v34 }
 0xa3b   :  { %8533 = vst [vmem:[#allocation85_spill] sm:$0xff] %v7666_v18 }
 0xa3d   :  { %v3489_v38 = vpop.f32.mrb[104].mxu0  ;;  %v3562_v26 = vpop.f32.mrb[104].mxu1 }
 0xa3e   :  { %v7669_v5 = vadd.f32 %v3489_v38, %v7613_v39  ;;  %v3491_v61 = vpop.f32.mrb[105].mxu0  ;;  %v7672_v59 = vadd.f32 %v3562_v26, %v7616_v45  ;;  %v3564_v43 = vpop.f32.mrb[105].mxu1 }
 0xa3f   :  { %v7675_v44 = vadd.f32 %v3491_v61, %v7630_v28  ;;  %v3493_v48 = vpop.f32.mrb[106].mxu0  ;;  %v7678_v6 = vadd.f32 %v3564_v43, %v7623_v34  ;;  %v3566_v49 = vpop.f32.mrb[106].mxu1 }
 0xa40   :  { %8534 = vst [vmem:[#allocation91_spill] sm:$0xff] %v7669_v5  ;;  %8535 = vst [vmem:[#allocation93_spill] sm:$0xff] %v7672_v59  ;;  %v7681_v22 = vadd.f32 %v3493_v48, %v7613_v39  ;;  %v3495_v37 = vpop.f32.mrb[107].mxu0  ;;  %v7684_v16 = vadd.f32 %v3566_v49, %v7616_v45  ;;  %v3568_v33 = vpop.f32.mrb[107].mxu1  ;;  %v3545_v59 = vadd.f32 %v7627_v58, %v7623_v34 }
 0xa41   :  { %8536 = vst [vmem:[#allocation92_spill] sm:$0xff] %v7675_v44  ;;  %8537 = vst [vmem:[#allocation94_spill] sm:$0xff] %v7678_v6  ;;  %v7687_v29 = vadd.f32 %v3495_v37, %v7630_v28  ;;  %v7690_v20 = vadd.f32 %v3568_v33, %v7623_v34  ;;  %v3543_v44 = vadd.f32 %v7620_v4, %v7616_v45 }
 0xa42   :  { %8538 = vst [vmem:[#allocation143_spill] sm:$0xff] %v7681_v22  ;;  %8539 = vst [vmem:[#allocation145_spill] sm:$0xff] %v7684_v16 }
 0xa43   :  { %8540 = vst [vmem:[#allocation144_spill] sm:$0xff] %v7687_v29  ;;  %8541 = vst [vmem:[#allocation146_spill] sm:$0xff] %v7690_v20 }
 0xa45   :  { %v3499_v53 = vpop.f32.mrb[108].mxu0  ;;  %v3572_v12 = vpop.f32.mrb[108].mxu1 }
 0xa46   :  { %v7693_v1 = vadd.f32 %v3499_v53, %v7613_v39  ;;  %v3501_v24 = vpop.f32.mrb[109].mxu0  ;;  %v7696_v63 = vadd.f32 %v3572_v12, %v7616_v45  ;;  %v3574_v27 = vpop.f32.mrb[109].mxu1 }
 0xa47   :  { %v7699_v38 = vadd.f32 %v3501_v24, %v7630_v28  ;;  %v3503_v26 = vpop.f32.mrb[110].mxu0  ;;  %v7702_v61 = vadd.f32 %v3574_v27, %v7623_v34  ;;  %v3576_v43 = vpop.f32.mrb[110].mxu1  ;;  %v3679_v24 = vld [vmem:[%s8134_s9] sm:$0xf] }
 0xa48   :  { %8542 = vst [vmem:[#allocation95_spill] sm:$0xff] %v7693_v1  ;;  %8543 = vst [vmem:[#allocation97_spill] sm:$0xff] %v7696_v63  ;;  %v7705_v48 = vadd.f32 %v3503_v26, %v7613_v39  ;;  %v3505_v49 = vpop.f32.mrb[111].mxu0  ;;  %v7708_v37 = vadd.f32 %v3576_v43, %v7616_v45  ;;  %v3578_v33 = vpop.f32.mrb[111].mxu1  ;;  %v3684_v27 = vrot.slane %v3679_v24, %v8529_v35 }
 0xa49   :  { %8544 = vst [vmem:[#allocation96_spill] sm:$0xff] %v7699_v38  ;;  %8545 = vst [vmem:[#allocation99_spill] sm:$0xff] %v7702_v61  ;;  %v7711_v53 = vadd.f32 %v3505_v49, %v7630_v28  ;;  %v7714_v12 = vadd.f32 %v3578_v33, %v7623_v34  ;;  %v3688_v26 = vrot.slane %v3679_v24, %v8532_v36 }
 0xa4a   :  { %8546 = vst [vmem:[#allocation138_spill] sm:$0xff] %v7705_v48  ;;  %8547 = vst [vmem:[#allocation141_spill] sm:$0xff] %v7708_v37  ;;  %v3696_v33 = vrot.slane %v3679_v24, %v8531_v41  ;;  %v3692_v35 = vrot.slane %v3679_v24, %v8530_v21  ;;  %v3470_v21 = vadd.f32 %v7618_v46, %v7613_v39  ;;  %v7731_v39 = vld [vmem:[#allocation6 + $0x38] sm:$0xff]  ;;  %v7736_v46 = vld [vmem:[#allocation6 + $0x30] sm:$0xff] }
 0xa4b   :  { %8548 = vst [vmem:[#allocation140_spill] sm:$0xff] %v7711_v53  ;;  %8549 = vst [vmem:[#allocation142_spill] sm:$0xff] %v7714_v12 }
 0xa6d   :  { %v3741_v48 = vpop.f32.mrb[112].mxu0  ;;  %v3782_v61 = vpop.f32.mrb[112].mxu1 }
 0xa6e   :  { %v3742_v38 = vadd.f32 %v3741_v48, %v3684_v27  ;;  %v3743_v43 = vpop.f32.mrb[113].mxu0  ;;  %v3784_v37 = vpop.f32.mrb[113].mxu1  ;;  %v3783_v22 = vadd.f32 %v3782_v61, %v3692_v35  ;;  %v3472_v35 = vadd.f32 %v7625_v30, %v7630_v28  ;;  %v7738_v30 = vld [vmem:[#allocation6 + $0x58] sm:$0xff]  ;;  %v7742_v28 = vld [vmem:[#allocation6 + $0x50] sm:$0xff] }
 0xa6f   :  { %v3744_v63 = vadd.f32 %v3743_v43, %v3688_v26  ;;  %v3745_v1 = vpop.f32.mrb[114].mxu0  ;;  %v3786_v49 = vpop.f32.mrb[114].mxu1  ;;  %v3785_v16 = vadd.f32 %v3784_v37, %v3696_v33 }
 0xa70   :  { %v5230_v53 = vmul.f32 -1.442695, %v3742_v38  ;;  %v3746_v20 = vpop.f32.mrb[115].mxu0  ;;  %v3787_v12 = vpop.f32.mrb[115].mxu1 }
 0xa71   :  { %v5231_v29 = vmul.f32 -1.442695, %v3744_v63  ;;  %v5232_v36 = vmul.f32 -1.442695, %v3785_v16 }
 0xa72   :  { %5827 = vpow2.f32 %v5230_v53 }
 0xa73   :  { %5829 = vpow2.f32 %v5231_v29 }
 0xa74   :  { %5831 = vpow2.f32 %v5232_v36 }
 0xa75   :  { %5833 = vtanh.f32 %v3783_v22 }
 0xa7c   :  { %v5828_v6 = vpop.eup %5827 }
 0xa7d   :  { %v5830_v48 = vpop.eup %5829  ;;  %v3792_v27 = vadd.f32 1.0, %v5828_v6 }
 0xa7e   :  { %v3798_v1 = vadd.f32 1.0, %v5830_v48  ;;  %v5832_v20 = vpop.eup %5831  ;;  %v7729_v48 = vld [vmem:[#allocation6 + $0x10] sm:$0xff] }
 0xa7f   :  { %5835 = vrcp.f32 %v3792_v27  ;;  %v5834_v38 = vpop.eup %5833  ;;  %v3805_v12 = vadd.f32 1.0, %v5832_v20  ;;  %v7744_v27 = vld [vmem:[#allocation6 + $0x78] sm:$0xff] }
 0xa80   :  { %5837 = vrcp.f32 %v3798_v1  ;;  %v7748_v1 = vld [vmem:[#allocation6 + $0x70] sm:$0xff]  ;;  %v7750_v20 = vld [vmem:[#allocation6 + $0x98] sm:$0xff] }
 0xa81   :  { %5839 = vrcp.f32 %v3805_v12  ;;  %v7760_v12 = vld [vmem:[#allocation6 + $0xb0] sm:$0xff] }
 0xa89   :  { %v5836_v41 = vpop.eup %5835 }
 0xa8a   :  { %v5838_v63 = vpop.eup %5837  ;;  %v3809_v53 = vmul.f32 %v5836_v41, %v5834_v38  ;;  %v7754_v38 = vld [vmem:[#allocation6 + $0x90] sm:$0xff]  ;;  %v7756_v41 = vld [vmem:[#allocation6 + $0xb8] sm:$0xff] }
 0xa8b   :  { %v3808_v29 = vmul.f32 0.0, %v5838_v63  ;;  %v5840_v26 = vpop.eup %5839  ;;  %v7762_v63 = vld [vmem:[#allocation6 + $0xd8] sm:$0xff] }
 0xa8d   :  { %v3810_v36 = vadd.f32 %v3809_v53, %v3808_v29  ;;  %v3941_v6 = vpop.f32.mrb[116].mxu1  ;;  %v7766_v53 = vld [vmem:[#allocation6 + $0xd0] sm:$0xff]  ;;  %v7768_v29 = vld [vmem:[#allocation6 + $0xf8] sm:$0xff] }
 0xa8e   :  { %v7727_v22 = vadd.f32 %v3941_v6, %v3470_v21  ;;  %v3943_v16 = vpop.f32.mrb[117].mxu1  ;;  %v7772_v21 = vld [vmem:[#allocation6 + $0xf0] sm:$0xff] }
 0xa8f   :  { %5841 = vtanh.f32 %v3810_v36  ;;  %v3944_v61 = vadd.f32 %v3943_v16, %v3472_v35  ;;  %v3945_v37 = vpop.f32.mrb[118].mxu1 }
 0xa90   :  { %v3946_v24 = vpop.f32.mrb[119].mxu1 }
 0xa91   :  { %v5234_v37 = vmul.f32 -1.442695, %v3944_v61  ;;  %v5233_v24 = vmul.f32 -1.442695, %v7727_v22 }
 0xa93   :  { %5843 = vpow2.f32 %v5234_v37 }
 0xa94   :  { %5845 = vpow2.f32 %v5233_v24 }
 0xa99   :  { %v5842_v43 = vpop.eup %5841 }
 0xa9a   :  { %v3812_v49 = vmul.f32 %v5842_v43, %v5840_v26 }
 0xa9c   :  { %v3813_v33 = vpack.c.bf16 %v3812_v49, %v3812_v49 }
 0xa9d   :  { %v5844_v26 = vpop.eup %5843 }
 0xa9e   :  { %3863 = vmatmul.mubr.bf16.vlgmr.msra.gmra.mrb[116].mxu0 %v3813_v33  ;;  %v5846_v43 = vpop.eup %5845  ;;  %v3998_v49 = vadd.f32 1.0, %v5844_v26 }
 0xa9f   :  { %3949 = vmatpush1.bf16.msra.mxu0 %v7729_v48  ;;  %3980 = vmatprep.mubr.bf16.mxu0 %v8299_v11  ;;  %v3992_v33 = vadd.f32 1.0, %v5846_v43 }
 0xaa0   :  { %3950 = vmatprep.subr.bf16.mxu0 %v7731_v39  ;;  %5847 = vrcp.f32 %v3998_v49 }
 0xaa1   :  { %5849 = vrcp.f32 %v3992_v33 }
 0xaa3   :  { %3951 = vmatpush1.bf16.msra.mxu0 %v7736_v46 }
 0xaa4   :  { %3952 = vmatprep.subr.bf16.mxu0 %v7738_v30 }
 0xaa7   :  { %3953 = vmatpush1.bf16.msra.mxu0 %v7742_v28 }
 0xaa8   :  { %3954 = vmatprep.subr.bf16.mxu0 %v7744_v27 }
 0xaaa   :  { %v5848_v24 = vpop.eup %5847 }
 0xaab   :  { %3955 = vmatpush1.bf16.msra.mxu0 %v7748_v1  ;;  %v5850_v26 = vpop.eup %5849  ;;  %v4008_v5 = vmul.f32 0.0, %v5848_v24 }
 0xaac   :  { %3956 = vmatprep.subr.bf16.mxu0 %v7750_v20 }
 0xaaf   :  { %3957 = vmatpush1.bf16.msra.mxu0 %v7754_v38 }
 0xab0   :  { %3958 = vmatprep.subr.bf16.mxu0 %v7756_v41 }
 0xab3   :  { %3959 = vmatpush1.bf16.msra.mxu0 %v7760_v12 }
 0xab4   :  { %3960 = vmatprep.subr.bf16.mxu0 %v7762_v63 }
 0xab7   :  { %3961 = vmatpush1.bf16.msra.mxu0 %v7766_v53 }
 0xab8   :  { %3962 = vmatprep.subr.bf16.mxu0 %v7768_v29 }
 0xabb   :  { %3963 = vmatpush1.bf16.msra.mxu0 %v7772_v21 }
 0xabc   :  { %4059 = vmatprep.subr.bf16.mxu0 %v7606_v7 }
 0xabe   :  { %3981 = vmatmul.mubr.bf16.vlgmr.msra.gmra.mrb[120].mxu0 %v8299_v11 }
 0xabf   :  { %4060 = vmatpush1.bf16.msra.mxu0 %v7729_v48  ;;  %4091 = vmatprep.mubr.bf16.mxu0 %v8299_v11 }
 0xac0   :  { %4061 = vmatprep.subr.bf16.mxu0 %v7731_v39 }
 0xac3   :  { %4062 = vmatpush1.bf16.msra.mxu0 %v7736_v46 }
 0xac4   :  { %4063 = vmatprep.subr.bf16.mxu0 %v7738_v30 }
 0xac7   :  { %4064 = vmatpush1.bf16.msra.mxu0 %v7742_v28 }
 0xac8   :  { %4065 = vmatprep.subr.bf16.mxu0 %v7744_v27 }
 0xacb   :  { %4066 = vmatpush1.bf16.msra.mxu0 %v7748_v1 }
 0xacc   :  { %4067 = vmatprep.subr.bf16.mxu0 %v7750_v20 }
 0xacf   :  { %4068 = vmatpush1.bf16.msra.mxu0 %v7754_v38 }
 0xad0   :  { %4069 = vmatprep.subr.bf16.mxu0 %v7756_v41 }
 0xad3   :  { %4070 = vmatpush1.bf16.msra.mxu0 %v7760_v12 }
 0xad4   :  { %4071 = vmatprep.subr.bf16.mxu0 %v7762_v63 }
 0xad7   :  { %4072 = vmatpush1.bf16.msra.mxu0 %v7766_v53 }
 0xad8   :  { %4073 = vmatprep.subr.bf16.mxu0 %v7768_v29 }
 0xadb   :  { %4074 = vmatpush1.bf16.msra.mxu0 %v7772_v21 }
 0xadc   :  { %4170 = vmatprep.subr.bf16.mxu0 %v7606_v7 }
 0xb71   :  { %v7794_v35 = vpop.f32.mrb[116].mxu0 }
 0xb72   :  { %8550 = vst [vmem:[#allocation98_spill] sm:$0xff] %v7794_v35  ;;  %v7796_v36 = vpop.f32.mrb[117].mxu0 }
 0xb73   :  { %8551 = vst [vmem:[#allocation101_spill] sm:$0xff] %v7796_v36  ;;  %v3868_v6 = vpop.f32.mrb[118].mxu0 }
 0xb74   :  { %v3869_v16 = vpop.f32.mrb[119].mxu0 }
 0xb91   :  { %v3982_v35 = vpop.f32.mrb[120].mxu0 }
 0xb92   :  { %v3983_v36 = vadd.f32 %v3982_v35, %v3543_v44  ;;  %v3984_v6 = vpop.f32.mrb[121].mxu0 }
 0xb93   :  { %v3985_v61 = vadd.f32 %v3984_v6, %v3545_v59  ;;  %v3986_v16 = vpop.f32.mrb[122].mxu0 }
 0xb94   :  { %5851 = vtanh.f32 %v3983_v36  ;;  %v3987_v22 = vpop.f32.mrb[123].mxu0 }
 0xb95   :  { %v5235_v37 = vmul.f32 -1.442695, %v3985_v61 }
 0xb97   :  { %5853 = vpow2.f32 %v5235_v37 }
 0xb9e   :  { %v5852_v43 = vpop.eup %5851 }
 0xb9f   :  { %v4009_v18 = vmul.f32 %v5852_v43, %v5850_v26 }
 0xba1   :  { %v5854_v45 = vpop.eup %5853  ;;  %v7803_v4 = vadd.f32 %v4009_v18, %v4008_v5 }
 0xba2   :  { %v4005_v34 = vadd.f32 1.0, %v5854_v45 }
 0xba3   :  { %5855 = vtanh.f32 %v7803_v4 }
 0xba4   :  { %5857 = vrcp.f32 %v4005_v34 }
 0xbad   :  { %v5856_v58 = vpop.eup %5855 }
 0xbae   :  { %v5858_v44 = vpop.eup %5857 }
 0xbaf   :  { %v4012_v59 = vmul.f32 %v5858_v44, %v5856_v58 }
 0xbb1   :  { %v4013_v35 = vpack.c.bf16 %v4012_v59, %v4012_v59 }
 0xbb3   :  { %4051 = vmatmul.mubr.bf16.vlgmr.msra.gmra.mrb[120].mxu1 %v4013_v35  ;;  %4092 = vmatmul.mubr.bf16.vlgmr.msra.gmra.mrb[124].mxu0 %v4013_v35 }
 0xbb4   :  { %4130 = vmatpush1.bf16.msra.mxu1 %v7540_v8  ;;  %4171 = vmatpush1.bf16.msra.mxu0 %v7729_v48 }
 0xbb5   :  { %4131 = vmatprep.subr.bf16.mxu1 %v7542_v47  ;;  %4172 = vmatprep.subr.bf16.mxu0 %v7731_v39 }
 0xbb6   :  { %4161 = vmatprep.mubr.bf16.mxu1 %v8299_v11  ;;  %4202 = vmatprep.mubr.bf16.mxu0 %v8299_v11 }
 0xbb8   :  { %4132 = vmatpush1.bf16.msra.mxu1 %v7547_v40  ;;  %4173 = vmatpush1.bf16.msra.mxu0 %v7736_v46 }
 0xbb9   :  { %4133 = vmatprep.subr.bf16.mxu1 %v7550_v9  ;;  %4174 = vmatprep.subr.bf16.mxu0 %v7738_v30 }
 0xbbc   :  { %4134 = vmatpush1.bf16.msra.mxu1 %v7554_v10  ;;  %4175 = vmatpush1.bf16.msra.mxu0 %v7742_v28 }
 0xbbd   :  { %4135 = vmatprep.subr.bf16.mxu1 %v7556_v13  ;;  %4176 = vmatprep.subr.bf16.mxu0 %v7744_v27 }
 0xbc0   :  { %4136 = vmatpush1.bf16.msra.mxu1 %v7560_v14  ;;  %4177 = vmatpush1.bf16.msra.mxu0 %v7748_v1 }
 0xbc1   :  { %4137 = vmatprep.subr.bf16.mxu1 %v7562_v62  ;;  %4178 = vmatprep.subr.bf16.mxu0 %v7750_v20 }
 0xbc4   :  { %4138 = vmatpush1.bf16.msra.mxu1 %v7566_v50  ;;  %4179 = vmatpush1.bf16.msra.mxu0 %v7754_v38 }
 0xbc5   :  { %4139 = vmatprep.subr.bf16.mxu1 %v7568_v51  ;;  %4180 = vmatprep.subr.bf16.mxu0 %v7756_v41 }
 0xbc8   :  { %4140 = vmatpush1.bf16.msra.mxu1 %v7572_v57  ;;  %4181 = vmatpush1.bf16.msra.mxu0 %v7760_v12 }
 0xbc9   :  { %4141 = vmatprep.subr.bf16.mxu1 %v7574_v60  ;;  %4182 = vmatprep.subr.bf16.mxu0 %v7762_v63 }
 0xbcc   :  { %4142 = vmatpush1.bf16.msra.mxu1 %v7578_v23  ;;  %4183 = vmatpush1.bf16.msra.mxu0 %v7766_v53 }
 0xbcd   :  { %4143 = vmatprep.subr.bf16.mxu1 %v7580_v15  ;;  %4184 = vmatprep.subr.bf16.mxu0 %v7768_v29 }
 0xbd0   :  { %4144 = vmatpush1.bf16.msra.mxu1 %v7584_v42  ;;  %4185 = vmatpush1.bf16.msra.mxu0 %v7772_v21 }
 0xbd1   :  { %4240 = vmatprep.subr.bf16.mxu1 %v7537_v2  ;;  %4281 = vmatprep.subr.bf16.mxu0 %v7606_v7 }
 0xc86   :  { %v4052_v18 = vpop.f32.mrb[120].mxu1  ;;  %v4093_v5 = vpop.f32.mrb[124].mxu0 }
 0xc87   :  { %v4053_v36 = vadd.f32 %v4052_v18, %v7633_v56  ;;  %v4094_v49 = vadd.f32 %v4093_v5, %v7636_v25  ;;  %v4054_v33 = vpop.f32.mrb[121].mxu1  ;;  %v4095_v6 = vpop.f32.mrb[125].mxu0 }
 0xc88   :  { %v4055_v61 = vadd.f32 %v4054_v33, %v7639_v32  ;;  %v4096_v16 = vadd.f32 %v4095_v6, %v7642_v55  ;;  %v4056_v22 = vpop.f32.mrb[122].mxu1  ;;  %v4097_v37 = vpop.f32.mrb[126].mxu0 }
 0xc89   :  { %v5236_v24 = vmul.f32 -1.442695, %v4053_v36  ;;  %v4057_v26 = vpop.f32.mrb[123].mxu1  ;;  %v4098_v43 = vpop.f32.mrb[127].mxu0 }
 0xc8a   :  { %v5237_v45 = vmul.f32 -1.442695, %v4055_v61  ;;  %v5238_v34 = vmul.f32 -1.442695, %v4096_v16 }
 0xc8b   :  { %5859 = vpow2.f32 %v5236_v24 }
 0xc8c   :  { %5861 = vpow2.f32 %v5237_v45 }
 0xc8d   :  { %5863 = vpow2.f32 %v5238_v34 }
 0xc8e   :  { %5865 = vtanh.f32 %v4094_v49 }
 0xc95   :  { %v5860_v58 = vpop.eup %5859 }
 0xc96   :  { %v5862_v44 = vpop.eup %5861  ;;  %v4103_v56 = vadd.f32 1.0, %v5860_v58 }
 0xc97   :  { %v4109_v25 = vadd.f32 1.0, %v5862_v44  ;;  %v5864_v32 = vpop.eup %5863 }
 0xc98   :  { %5867 = vrcp.f32 %v4103_v56  ;;  %v5866_v59 = vpop.eup %5865  ;;  %v4116_v5 = vadd.f32 1.0, %v5864_v32 }
 0xc99   :  { %5869 = vrcp.f32 %v4109_v25 }
 0xc9a   :  { %5871 = vrcp.f32 %v4116_v5 }
 0xca2   :  { %v5868_v55 = vpop.eup %5867 }
 0xca3   :  { %v5870_v35 = vpop.eup %5869  ;;  %v4120_v18 = vmul.f32 %v5868_v55, %v5866_v59 }
 0xca4   :  { %v4119_v36 = vmul.f32 %v5870_v35, %v7803_v4  ;;  %v5872_v6 = vpop.eup %5871 }
 0xca6   :  { %v7845_v33 = vadd.f32 %v4120_v18, %v4119_v36 }
 0xca8   :  { %5873 = vtanh.f32 %v7845_v33 }
 0xcb2   :  { %v5874_v61 = vpop.eup %5873 }
 0xcb3   :  { %v4123_v16 = vmul.f32 %v5874_v61, %v5872_v6 }
 0xcb5   :  { %v4124_v49 = vpack.c.bf16 %v4123_v16, %v4123_v16 }
 0xcb7   :  { %4162 = vmatmul.mubr.bf16.vlgmr.msra.gmra.mrb[124].mxu1 %v4124_v49  ;;  %4203 = vmatmul.mubr.bf16.vlgmr.msra.gmra.mrb[128].mxu0 %v4124_v49 }
 0xcb8   :  { %4241 = vmatpush1.bf16.msra.mxu1 %v7540_v8  ;;  %4282 = vmatpush1.bf16.msra.mxu0 %v7729_v48 }
 0xcb9   :  { %4242 = vmatprep.subr.bf16.mxu1 %v7542_v47  ;;  %4283 = vmatprep.subr.bf16.mxu0 %v7731_v39 }
 0xcba   :  { %4272 = vmatprep.mubr.bf16.mxu1 %v8299_v11  ;;  %4313 = vmatprep.mubr.bf16.mxu0 %v8299_v11 }
 0xcbc   :  { %4243 = vmatpush1.bf16.msra.mxu1 %v7547_v40  ;;  %4284 = vmatpush1.bf16.msra.mxu0 %v7736_v46 }
 0xcbd   :  { %4244 = vmatprep.subr.bf16.mxu1 %v7550_v9  ;;  %4285 = vmatprep.subr.bf16.mxu0 %v7738_v30 }
 0xcc0   :  { %4245 = vmatpush1.bf16.msra.mxu1 %v7554_v10  ;;  %4286 = vmatpush1.bf16.msra.mxu0 %v7742_v28 }
 0xcc1   :  { %4246 = vmatprep.subr.bf16.mxu1 %v7556_v13  ;;  %4287 = vmatprep.subr.bf16.mxu0 %v7744_v27 }
 0xcc4   :  { %4247 = vmatpush1.bf16.msra.mxu1 %v7560_v14  ;;  %4288 = vmatpush1.bf16.msra.mxu0 %v7748_v1 }
 0xcc5   :  { %4248 = vmatprep.subr.bf16.mxu1 %v7562_v62  ;;  %4289 = vmatprep.subr.bf16.mxu0 %v7750_v20 }
 0xcc8   :  { %4249 = vmatpush1.bf16.msra.mxu1 %v7566_v50  ;;  %4290 = vmatpush1.bf16.msra.mxu0 %v7754_v38 }
 0xcc9   :  { %4250 = vmatprep.subr.bf16.mxu1 %v7568_v51  ;;  %4291 = vmatprep.subr.bf16.mxu0 %v7756_v41 }
 0xccc   :  { %4251 = vmatpush1.bf16.msra.mxu1 %v7572_v57  ;;  %4292 = vmatpush1.bf16.msra.mxu0 %v7760_v12 }
 0xccd   :  { %4252 = vmatprep.subr.bf16.mxu1 %v7574_v60  ;;  %4293 = vmatprep.subr.bf16.mxu0 %v7762_v63 }
 0xcd0   :  { %4253 = vmatpush1.bf16.msra.mxu1 %v7578_v23  ;;  %4294 = vmatpush1.bf16.msra.mxu0 %v7766_v53 }
 0xcd1   :  { %4254 = vmatprep.subr.bf16.mxu1 %v7580_v15  ;;  %4295 = vmatprep.subr.bf16.mxu0 %v7768_v29 }
 0xcd4   :  { %4255 = vmatpush1.bf16.msra.mxu1 %v7584_v42  ;;  %4296 = vmatpush1.bf16.msra.mxu0 %v7772_v21 }
 0xcd5   :  { %4351 = vmatprep.subr.bf16.mxu1 %v7537_v2  ;;  %4392 = vmatprep.subr.bf16.mxu0 %v7606_v7 }
 0xd8a   :  { %v4163_v4 = vpop.f32.mrb[124].mxu1  ;;  %v4204_v22 = vpop.f32.mrb[128].mxu0 }
 0xd8b   :  { %v4164_v37 = vadd.f32 %v4163_v4, %v7645_v54  ;;  %v4205_v24 = vadd.f32 %v4204_v22, %v7648_v52  ;;  %v4165_v26 = vpop.f32.mrb[125].mxu1  ;;  %v4206_v43 = vpop.f32.mrb[129].mxu0 }
 0xd8c   :  { %v4166_v45 = vadd.f32 %v4165_v26, %v7651_v3  ;;  %v4207_v34 = vadd.f32 %v4206_v43, %v7654_v0  ;;  %v4167_v58 = vpop.f32.mrb[126].mxu1  ;;  %v4208_v44 = vpop.f32.mrb[130].mxu0 }
 0xd8d   :  { %v5239_v56 = vmul.f32 -1.442695, %v4164_v37  ;;  %v4168_v25 = vpop.f32.mrb[127].mxu1  ;;  %v4209_v32 = vpop.f32.mrb[131].mxu0 }
 0xd8e   :  { %v5240_v59 = vmul.f32 -1.442695, %v4166_v45  ;;  %v5241_v55 = vmul.f32 -1.442695, %v4207_v34 }
 0xd8f   :  { %5875 = vpow2.f32 %v5239_v56 }
 0xd90   :  { %5877 = vpow2.f32 %v5240_v59 }
 0xd91   :  { %5879 = vpow2.f32 %v5241_v55 }
 0xd92   :  { %5881 = vtanh.f32 %v4205_v24 }
 0xd99   :  { %v5876_v35 = vpop.eup %5875 }
 0xd9a   :  { %v5878_v18 = vpop.eup %5877  ;;  %v4214_v54 = vadd.f32 1.0, %v5876_v35 }
 0xd9b   :  { %v4220_v52 = vadd.f32 1.0, %v5878_v18  ;;  %v5880_v3 = vpop.eup %5879  ;;  %v7932_v18 = vld [vmem:[#allocation6] sm:$0xff] }
 0xd9c   :  { %5883 = vrcp.f32 %v4214_v54  ;;  %v5882_v5 = vpop.eup %5881  ;;  %v4227_v61 = vadd.f32 1.0, %v5880_v3  ;;  %v7936_v54 = vld [vmem:[#allocation6 + $0x28] sm:$0xff] }
 0xd9d   :  { %5885 = vrcp.f32 %v4220_v52  ;;  %v7942_v52 = vld [vmem:[#allocation6 + $0x20] sm:$0xff]  ;;  %v7946_v3 = vld [vmem:[#allocation6 + $0x48] sm:$0xff] }
 0xd9e   :  { %5887 = vrcp.f32 %v4227_v61  ;;  %v7966_v61 = vld [vmem:[#allocation6 + $0x80] sm:$0xff] }
 0xda6   :  { %v5884_v0 = vpop.eup %5883 }
 0xda7   :  { %v5886_v36 = vpop.eup %5885  ;;  %v4231_v6 = vmul.f32 %v5884_v0, %v5882_v5  ;;  %v7950_v5 = vld [vmem:[#allocation6 + $0x40] sm:$0xff]  ;;  %v7954_v0 = vld [vmem:[#allocation6 + $0x68] sm:$0xff] }
 0xda8   :  { %v4230_v16 = vmul.f32 %v5886_v36, %v7845_v33  ;;  %v5888_v4 = vpop.eup %5887  ;;  %v7958_v36 = vld [vmem:[#allocation6 + $0x60] sm:$0xff] }
 0xdaa   :  { %v7887_v49 = vadd.f32 %v4231_v6, %v4230_v16  ;;  %v7962_v6 = vld [vmem:[#allocation6 + $0x88] sm:$0xff] }
 0xdab   :  { %v7970_v16 = vld [vmem:[#allocation6 + $0xa8] sm:$0xff] }
 0xdac   :  { %5889 = vtanh.f32 %v7887_v49 }
 0xdb6   :  { %v5890_v22 = vpop.eup %5889 }
 0xdb7   :  { %v4234_v37 = vmul.f32 %v5890_v22, %v5888_v4  ;;  %v7978_v4 = vld [vmem:[#allocation6 + $0xc8] sm:$0xff]  ;;  %v7982_v22 = vld [vmem:[#allocation6 + $0xc0] sm:$0xff] }
 0xdb9   :  { %v4235_v24 = vpack.c.bf16 %v4234_v37, %v4234_v37  ;;  %v7986_v37 = vld [vmem:[#allocation6 + $0xe8] sm:$0xff] }
 0xdbb   :  { %4273 = vmatmul.mubr.bf16.vlgmr.msra.gmra.mrb[128].mxu1 %v4235_v24  ;;  %4314 = vmatmul.mubr.bf16.vlgmr.msra.gmra.mrb[132].mxu0 %v4235_v24  ;;  %v7990_v24 = vld [vmem:[#allocation6 + $0xe0] sm:$0xff] }
 0xdbc   :  { %4352 = vmatpush1.bf16.msra.mxu1 %v7540_v8  ;;  %4393 = vmatpush1.bf16.msra.mxu0 %v7729_v48 }
 0xdbd   :  { %4353 = vmatprep.subr.bf16.mxu1 %v7542_v47  ;;  %4394 = vmatprep.subr.bf16.mxu0 %v7731_v39 }
 0xdbe   :  { %4383 = vmatprep.mubr.bf16.mxu1 %v8299_v11  ;;  %4424 = vmatprep.mubr.bf16.mxu0 %v8299_v11 }
 0xdc0   :  { %4354 = vmatpush1.bf16.msra.mxu1 %v7547_v40  ;;  %4395 = vmatpush1.bf16.msra.mxu0 %v7736_v46 }
 0xdc1   :  { %4355 = vmatprep.subr.bf16.mxu1 %v7550_v9  ;;  %4396 = vmatprep.subr.bf16.mxu0 %v7738_v30 }
 0xdc4   :  { %4356 = vmatpush1.bf16.msra.mxu1 %v7554_v10  ;;  %4397 = vmatpush1.bf16.msra.mxu0 %v7742_v28 }
 0xdc5   :  { %4357 = vmatprep.subr.bf16.mxu1 %v7556_v13  ;;  %4398 = vmatprep.subr.bf16.mxu0 %v7744_v27 }
 0xdc8   :  { %4358 = vmatpush1.bf16.msra.mxu1 %v7560_v14  ;;  %4399 = vmatpush1.bf16.msra.mxu0 %v7748_v1 }
 0xdc9   :  { %4359 = vmatprep.subr.bf16.mxu1 %v7562_v62  ;;  %4400 = vmatprep.subr.bf16.mxu0 %v7750_v20  ;;  %v8552_v62 = vld [vmem:[#allocation85_spill] sm:$0xff] }
 0xdcc   :  { %4360 = vmatpush1.bf16.msra.mxu1 %v7566_v50  ;;  %4401 = vmatpush1.bf16.msra.mxu0 %v7754_v38 }
 0xdcd   :  { %4361 = vmatprep.subr.bf16.mxu1 %v7568_v51  ;;  %4402 = vmatprep.subr.bf16.mxu0 %v7756_v41 }
 0xdd0   :  { %4362 = vmatpush1.bf16.msra.mxu1 %v7572_v57  ;;  %4403 = vmatpush1.bf16.msra.mxu0 %v7760_v12 }
 0xdd1   :  { %4363 = vmatprep.subr.bf16.mxu1 %v7574_v60  ;;  %4404 = vmatprep.subr.bf16.mxu0 %v7762_v63 }
 0xdd4   :  { %4364 = vmatpush1.bf16.msra.mxu1 %v7578_v23  ;;  %4405 = vmatpush1.bf16.msra.mxu0 %v7766_v53 }
 0xdd5   :  { %4365 = vmatprep.subr.bf16.mxu1 %v7580_v15  ;;  %4406 = vmatprep.subr.bf16.mxu0 %v7768_v29 }
 0xdd8   :  { %4366 = vmatpush1.bf16.msra.mxu1 %v7584_v42  ;;  %4407 = vmatpush1.bf16.msra.mxu0 %v7772_v21 }
 0xdd9   :  { %4462 = vmatprep.subr.bf16.mxu1 %v7537_v2  ;;  %4503 = vmatprep.subr.bf16.mxu0 %v7606_v7 }
 0xe8e   :  { %v4274_v8 = vpop.f32.mrb[128].mxu1  ;;  %v4315_v47 = vpop.f32.mrb[132].mxu0 }
 0xe8f   :  { %v4275_v40 = vadd.f32 %v4274_v8, %v7657_v17  ;;  %v4316_v9 = vadd.f32 %v4315_v47, %v7660_v31  ;;  %v4276_v10 = vpop.f32.mrb[129].mxu1  ;;  %v4317_v13 = vpop.f32.mrb[133].mxu0  ;;  %v7994_v8 = vld [vmem:[#allocation6 + $0x8] sm:$0xff] }
 0xe90   :  { %v4277_v14 = vadd.f32 %v4276_v10, %v7663_v19  ;;  %v4318_v50 = vadd.f32 %v4317_v13, %v8552_v62  ;;  %v4278_v51 = vpop.f32.mrb[130].mxu1  ;;  %v4319_v57 = vpop.f32.mrb[134].mxu0  ;;  %v8554_v13 = vld [vmem:[#allocation93_spill] sm:$0xff] }
 0xe91   :  { %v5242_v60 = vmul.f32 -1.442695, %v4275_v40  ;;  %v4279_v23 = vpop.f32.mrb[131].mxu1  ;;  %v4320_v15 = vpop.f32.mrb[135].mxu0  ;;  %v8555_v51 = vld [vmem:[#allocation92_spill] sm:$0xff] }
 0xe92   :  { %v5243_v2 = vmul.f32 -1.442695, %v4277_v14  ;;  %v5244_v42 = vmul.f32 -1.442695, %v4318_v50 }
 0xe93   :  { %5891 = vpow2.f32 %v5242_v60  ;;  %v8556_v60 = vld [vmem:[#allocation94_spill] sm:$0xff] }
 0xe94   :  { %5893 = vpow2.f32 %v5243_v2 }
 0xe95   :  { %5895 = vpow2.f32 %v5244_v42 }
 0xe96   :  { %5897 = vtanh.f32 %v4316_v9  ;;  %v8553_v9 = vld [vmem:[#allocation91_spill] sm:$0xff] }
 0xe9d   :  { %v5892_v33 = vpop.eup %5891 }
 0xe9e   :  { %v5894_v26 = vpop.eup %5893  ;;  %v4325_v17 = vadd.f32 1.0, %v5892_v33 }
 0xe9f   :  { %v4331_v31 = vadd.f32 1.0, %v5894_v26  ;;  %v5896_v19 = vpop.eup %5895 }
 0xea0   :  { %5899 = vrcp.f32 %v4325_v17  ;;  %v5898_v43 = vpop.eup %5897  ;;  %v4338_v44 = vadd.f32 1.0, %v5896_v19 }
 0xea1   :  { %5901 = vrcp.f32 %v4331_v31 }
 0xea2   :  { %5903 = vrcp.f32 %v4338_v44 }
 0xeaa   :  { %v5900_v45 = vpop.eup %5899 }
 0xeab   :  { %v5902_v34 = vpop.eup %5901  ;;  %v4342_v58 = vmul.f32 %v5900_v45, %v5898_v43 }
 0xeac   :  { %v4341_v56 = vmul.f32 %v5902_v34, %v7887_v49  ;;  %v5904_v32 = vpop.eup %5903  ;;  %v7974_v49 = vld [vmem:[#allocation6 + $0xa0] sm:$0xff] }
 0xeae   :  { %v7929_v25 = vadd.f32 %v4342_v58, %v4341_v56 }
 0xeb0   :  { %5905 = vtanh.f32 %v7929_v25 }
 0xeba   :  { %v5906_v59 = vpop.eup %5905 }
 0xebb   :  { %v4345_v55 = vmul.f32 %v5906_v59, %v5904_v32 }
 0xebd   :  { %v4346_v35 = vpack.c.bf16 %v4345_v55, %v4345_v55 }
 0xebf   :  { %4384 = vmatmul.mubr.bf16.vlgmr.msra.gmra.mrb[132].mxu1 %v4346_v35  ;;  %4425 = vmatmul.mubr.bf16.vlgmr.msra.gmra.mrb[136].mxu0 %v4346_v35 }
 0xec0   :  { %4463 = vmatpush1.bf16.msra.mxu1 %v7932_v18  ;;  %4504 = vmatpush1.bf16.msra.mxu0 %v7729_v48 }
 0xec1   :  { %4464 = vmatprep.subr.bf16.mxu1 %v7936_v54  ;;  %4505 = vmatprep.subr.bf16.mxu0 %v7731_v39 }
 0xec2   :  { %4494 = vmatprep.mubr.bf16.mxu1 %v8299_v11  ;;  %4535 = vmatprep.mubr.bf16.mxu0 %v8299_v11 }
 0xec4   :  { %4465 = vmatpush1.bf16.msra.mxu1 %v7942_v52  ;;  %4506 = vmatpush1.bf16.msra.mxu0 %v7736_v46 }
 0xec5   :  { %4466 = vmatprep.subr.bf16.mxu1 %v7946_v3  ;;  %4507 = vmatprep.subr.bf16.mxu0 %v7738_v30 }
 0xec8   :  { %4467 = vmatpush1.bf16.msra.mxu1 %v7950_v5  ;;  %4508 = vmatpush1.bf16.msra.mxu0 %v7742_v28 }
 0xec9   :  { %4468 = vmatprep.subr.bf16.mxu1 %v7954_v0  ;;  %4509 = vmatprep.subr.bf16.mxu0 %v7744_v27 }
 0xecc   :  { %4469 = vmatpush1.bf16.msra.mxu1 %v7958_v36  ;;  %4510 = vmatpush1.bf16.msra.mxu0 %v7748_v1 }
 0xecd   :  { %4470 = vmatprep.subr.bf16.mxu1 %v7962_v6  ;;  %4511 = vmatprep.subr.bf16.mxu0 %v7750_v20 }
 0xed0   :  { %4471 = vmatpush1.bf16.msra.mxu1 %v7966_v61  ;;  %4512 = vmatpush1.bf16.msra.mxu0 %v7754_v38 }
 0xed1   :  { %4472 = vmatprep.subr.bf16.mxu1 %v7970_v16  ;;  %4513 = vmatprep.subr.bf16.mxu0 %v7756_v41 }
 0xed4   :  { %4473 = vmatpush1.bf16.msra.mxu1 %v7974_v49  ;;  %4514 = vmatpush1.bf16.msra.mxu0 %v7760_v12 }
 0xed5   :  { %4474 = vmatprep.subr.bf16.mxu1 %v7978_v4  ;;  %4515 = vmatprep.subr.bf16.mxu0 %v7762_v63 }
 0xed8   :  { %4475 = vmatpush1.bf16.msra.mxu1 %v7982_v22  ;;  %4516 = vmatpush1.bf16.msra.mxu0 %v7766_v53 }
 0xed9   :  { %4476 = vmatprep.subr.bf16.mxu1 %v7986_v37  ;;  %4517 = vmatprep.subr.bf16.mxu0 %v7768_v29 }
 0xedc   :  { %4477 = vmatpush1.bf16.msra.mxu1 %v7990_v24  ;;  %4518 = vmatpush1.bf16.msra.mxu0 %v7772_v21 }
 0xedd   :  { %4573 = vmatprep.subr.bf16.mxu1 %v7994_v8  ;;  %4614 = vmatprep.subr.bf16.mxu0 %v7606_v7 }
 0xf92   :  { %v4385_v47 = vpop.f32.mrb[132].mxu1  ;;  %v4426_v40 = vpop.f32.mrb[136].mxu0 }
 0xf93   :  { %v4386_v10 = vadd.f32 %v4385_v47, %v8553_v9  ;;  %v4427_v14 = vadd.f32 %v4426_v40, %v8554_v13  ;;  %v4387_v62 = vpop.f32.mrb[133].mxu1  ;;  %v4428_v50 = vpop.f32.mrb[137].mxu0 }
 0xf94   :  { %v4388_v57 = vadd.f32 %v4387_v62, %v8555_v51  ;;  %v4429_v23 = vadd.f32 %v4428_v50, %v8556_v60  ;;  %v4389_v15 = vpop.f32.mrb[134].mxu1  ;;  %v4430_v2 = vpop.f32.mrb[138].mxu0  ;;  %v8557_v62 = vld [vmem:[#allocation143_spill] sm:$0xff]  ;;  %v8558_v51 = vld [vmem:[#allocation145_spill] sm:$0xff] }
 0xf95   :  { %v5245_v42 = vmul.f32 -1.442695, %v4386_v10  ;;  %v4390_v33 = vpop.f32.mrb[135].mxu1  ;;  %v4431_v26 = vpop.f32.mrb[139].mxu0  ;;  %v8559_v15 = vld [vmem:[#allocation144_spill] sm:$0xff] }
 0xf96   :  { %v5246_v17 = vmul.f32 -1.442695, %v4388_v57  ;;  %v5247_v7 = vmul.f32 -1.442695, %v4429_v23 }
 0xf97   :  { %5907 = vpow2.f32 %v5245_v42  ;;  %v8560_v42 = vld [vmem:[#allocation146_spill] sm:$0xff] }
 0xf98   :  { %5909 = vpow2.f32 %v5246_v17 }
 0xf99   :  { %5911 = vpow2.f32 %v5247_v7 }
 0xf9a   :  { %5913 = vtanh.f32 %v4427_v14 }
 0xfa1   :  { %v5908_v31 = vpop.eup %5907 }
 0xfa2   :  { %v5910_v19 = vpop.eup %5909  ;;  %v4436_v43 = vadd.f32 1.0, %v5908_v31 }
 0xfa3   :  { %v4442_v45 = vadd.f32 1.0, %v5910_v19  ;;  %v5912_v34 = vpop.eup %5911 }
 0xfa4   :  { %5915 = vrcp.f32 %v4436_v43  ;;  %v5914_v58 = vpop.eup %5913  ;;  %v4449_v59 = vadd.f32 1.0, %v5912_v34 }
 0xfa5   :  { %5917 = vrcp.f32 %v4442_v45 }
 0xfa6   :  { %5919 = vrcp.f32 %v4449_v59 }
 0xfae   :  { %v5916_v44 = vpop.eup %5915 }
 0xfaf   :  { %v5918_v56 = vpop.eup %5917  ;;  %v4453_v32 = vmul.f32 %v5916_v44, %v5914_v58 }
 0xfb0   :  { %v4452_v55 = vmul.f32 %v5918_v56, %v7929_v25  ;;  %v5920_v47 = vpop.eup %5919  ;;  %v5987_v25 = vld [vmem:[#allocation6 + $0x18] sm:$0xff] }
 0xfb2   :  { %v8003_v35 = vadd.f32 %v4453_v32, %v4452_v55 }
 0xfb4   :  { %5921 = vtanh.f32 %v8003_v35 }
 0xfbe   :  { %v5922_v40 = vpop.eup %5921 }
 0xfbf   :  { %v4456_v9 = vmul.f32 %v5922_v40, %v5920_v47 }
 0xfc1   :  { %v4457_v10 = vpack.c.bf16 %v4456_v9, %v4456_v9 }
 0xfc3   :  { %4495 = vmatmul.mubr.bf16.vlgmr.msra.gmra.mrb[136].mxu1 %v4457_v10  ;;  %4536 = vmatmul.mubr.bf16.vlgmr.msra.gmra.mrb[140].mxu0 %v4457_v10 }
 0xfc4   :  { %4574 = vmatpush1.bf16.msra.mxu1 %v7932_v18  ;;  %4615 = vmatpush1.bf16.msra.mxu0 %v7729_v48 }
 0xfc5   :  { %4575 = vmatprep.subr.bf16.mxu1 %v7936_v54  ;;  %4616 = vmatprep.subr.bf16.mxu0 %v7731_v39 }
 0xfc6   :  { %4605 = vmatprep.mubr.bf16.mxu1 %v8299_v11  ;;  %4646 = vmatprep.mubr.bf16.mxu0 %v8299_v11 }
 0xfc8   :  { %4576 = vmatpush1.bf16.msra.mxu1 %v7942_v52  ;;  %4617 = vmatpush1.bf16.msra.mxu0 %v7736_v46 }
 0xfc9   :  { %4577 = vmatprep.subr.bf16.mxu1 %v7946_v3  ;;  %4618 = vmatprep.subr.bf16.mxu0 %v7738_v30 }
 0xfcc   :  { %4578 = vmatpush1.bf16.msra.mxu1 %v7950_v5  ;;  %4619 = vmatpush1.bf16.msra.mxu0 %v7742_v28 }
 0xfcd   :  { %4579 = vmatprep.subr.bf16.mxu1 %v7954_v0  ;;  %4620 = vmatprep.subr.bf16.mxu0 %v7744_v27 }
 0xfd0   :  { %4580 = vmatpush1.bf16.msra.mxu1 %v7958_v36  ;;  %4621 = vmatpush1.bf16.msra.mxu0 %v7748_v1 }
 0xfd1   :  { %4581 = vmatprep.subr.bf16.mxu1 %v7962_v6  ;;  %4622 = vmatprep.subr.bf16.mxu0 %v7750_v20 }
 0xfd4   :  { %4582 = vmatpush1.bf16.msra.mxu1 %v7966_v61  ;;  %4623 = vmatpush1.bf16.msra.mxu0 %v7754_v38 }
 0xfd5   :  { %4583 = vmatprep.subr.bf16.mxu1 %v7970_v16  ;;  %4624 = vmatprep.subr.bf16.mxu0 %v7756_v41 }
 0xfd8   :  { %4584 = vmatpush1.bf16.msra.mxu1 %v7974_v49  ;;  %4625 = vmatpush1.bf16.msra.mxu0 %v7760_v12 }
 0xfd9   :  { %4585 = vmatprep.subr.bf16.mxu1 %v7978_v4  ;;  %4626 = vmatprep.subr.bf16.mxu0 %v7762_v63 }
 0xfdc   :  { %4586 = vmatpush1.bf16.msra.mxu1 %v7982_v22  ;;  %4627 = vmatpush1.bf16.msra.mxu0 %v7766_v53 }
 0xfdd   :  { %4587 = vmatprep.subr.bf16.mxu1 %v7986_v37  ;;  %4628 = vmatprep.subr.bf16.mxu0 %v7768_v29 }
 0xfe0   :  { %4588 = vmatpush1.bf16.msra.mxu1 %v7990_v24  ;;  %4629 = vmatpush1.bf16.msra.mxu0 %v7772_v21 }
 0xfe1   :  { %4684 = vmatprep.subr.bf16.mxu1 %v7994_v8  ;;  %4725 = vmatprep.subr.bf16.mxu0 %v5987_v25 }
0x1096   :  { %v4496_v13 = vpop.f32.mrb[136].mxu1  ;;  %v4537_v14 = vpop.f32.mrb[140].mxu0 }
0x1097   :  { %v4497_v50 = vadd.f32 %v4496_v13, %v8557_v62  ;;  %v4538_v57 = vadd.f32 %v4537_v14, %v8558_v51  ;;  %v4498_v60 = vpop.f32.mrb[137].mxu1  ;;  %v4539_v23 = vpop.f32.mrb[141].mxu0 }
0x1098   :  { %v4499_v2 = vadd.f32 %v4498_v60, %v8559_v15  ;;  %v4540_v33 = vadd.f32 %v4539_v23, %v8560_v42  ;;  %v4500_v26 = vpop.f32.mrb[138].mxu1  ;;  %v4541_v17 = vpop.f32.mrb[142].mxu0  ;;  %v8566_v15 = vld [vmem:[#allocation38_spill] sm:$0xff]  ;;  %v8568_v42 = vld [vmem:[#allocation39_spill] sm:$0xff] }
0x1099   :  { %v5248_v7 = vmul.f32 -1.442695, %v4497_v50  ;;  %v4501_v31 = vpop.f32.mrb[139].mxu1  ;;  %v4542_v19 = vpop.f32.mrb[143].mxu0  ;;  %v8570_v26 = vld [vmem:[#allocation40_spill] sm:$0xff]  ;;  %v8571_v17 = vld [vmem:[#allocation49_spill] sm:$0xff] }
0x109a   :  { %v5249_v8 = vmul.f32 -1.442695, %v4499_v2  ;;  %v5250_v43 = vmul.f32 -1.442695, %v4540_v33  ;;  %v8567_v2 = vld [vmem:[#allocation47_spill] sm:$0xff]  ;;  %v8569_v33 = vld [vmem:[#allocation48_spill] sm:$0xff] }
0x109b   :  { %5923 = vpow2.f32 %v5248_v7  ;;  %v8572_v7 = vld [vmem:[#allocation41_spill] sm:$0xff]  ;;  %v8573_v31 = vld [vmem:[#allocation50_spill] sm:$0xff] }
0x109c   :  { %5925 = vpow2.f32 %v5249_v8  ;;  %v8574_v19 = vld [vmem:[#allocation42_spill] sm:$0xff]  ;;  %v8575_v8 = vld [vmem:[#allocation51_spill] sm:$0xff] }
0x109d   :  { %5927 = vpow2.f32 %v5250_v43  ;;  %v8577_v43 = vld [vmem:[#allocation52_spill] sm:$0xff] }
0x109e   :  { %5929 = vtanh.f32 %v4538_v57 }
0x10a5   :  { %v5924_v45 = vpop.eup %5923 }
0x10a6   :  { %v5926_v34 = vpop.eup %5925  ;;  %v4547_v58 = vadd.f32 1.0, %v5924_v45  ;;  %v8578_v45 = vld [vmem:[#allocation44_spill] sm:$0xff] }
0x10a7   :  { %v4553_v44 = vadd.f32 1.0, %v5926_v34  ;;  %v5928_v56 = vpop.eup %5927  ;;  %v8579_v34 = vld [vmem:[#allocation53_spill] sm:$0xff] }
0x10a8   :  { %5931 = vrcp.f32 %v4547_v58  ;;  %v5930_v32 = vpop.eup %5929  ;;  %v4560_v40 = vadd.f32 1.0, %v5928_v56  ;;  %v8580_v58 = vld [vmem:[#allocation45_spill] sm:$0xff]  ;;  %v4791_v56 = vld [vmem:[#allocation8] sm:$0xff] }
0x10a9   :  { %5933 = vrcp.f32 %v4553_v44  ;;  %v4792_v44 = vld [vmem:[#allocation8 + $0x8] sm:$0xff] }
0x10aa   :  { %5935 = vrcp.f32 %v4560_v40  ;;  %v4798_v40 = vld [vmem:[#allocation8 + $0x38] sm:$0xff] }
0x10b2   :  { %v5932_v59 = vpop.eup %5931 }
0x10b3   :  { %v5934_v55 = vpop.eup %5933  ;;  %v4564_v47 = vmul.f32 %v5932_v59, %v5930_v32  ;;  %v4794_v32 = vld [vmem:[#allocation8 + $0x18] sm:$0xff]  ;;  %v4793_v59 = vld [vmem:[#allocation8 + $0x10] sm:$0xff] }
0x10b4   :  { %v4563_v9 = vmul.f32 %v5934_v55, %v8003_v35  ;;  %v5936_v25 = vpop.eup %5935  ;;  %v4796_v55 = vld [vmem:[#allocation8 + $0x28] sm:$0xff] }
0x10b6   :  { %v8044_v10 = vadd.f32 %v4564_v47, %v4563_v9  ;;  %v4795_v47 = vld [vmem:[#allocation8 + $0x20] sm:$0xff]  ;;  %v4797_v9 = vld [vmem:[#allocation8 + $0x30] sm:$0xff] }
0x10b8   :  { %5937 = vtanh.f32 %v8044_v10 }
0x10c2   :  { %v5938_v13 = vpop.eup %5937 }
0x10c3   :  { %v4567_v14 = vmul.f32 %v5938_v13, %v5936_v25  ;;  %v4799_v25 = vld [vmem:[#allocation8 + $0x40] sm:$0xff]  ;;  %v4802_v13 = vld [vmem:[#allocation8 + $0x58] sm:$0xff] }
0x10c5   :  { %v4568_v62 = vpack.c.bf16 %v4567_v14, %v4567_v14  ;;  %v4801_v14 = vld [vmem:[#allocation8 + $0x50] sm:$0xff] }
0x10c7   :  { %4606 = vmatmul.mubr.bf16.vlgmr.msra.gmra.mrb[140].mxu1 %v4568_v62  ;;  %4647 = vmatmul.mubr.bf16.vlgmr.msra.gmra.mrb[144].mxu0 %v4568_v62  ;;  %v4804_v62 = vld [vmem:[#allocation8 + $0x68] sm:$0xff] }
0x10c8   :  { %4685 = vmatpush1.bf16.msra.mxu1 %v7932_v18  ;;  %4726 = vmatpush1.bf16.msra.mxu0 %v7729_v48  ;;  %v8561_v48 = vld [vmem:[#allocation46_spill] sm:$0xff] }
0x10c9   :  { %4686 = vmatprep.subr.bf16.mxu1 %v7936_v54  ;;  %4727 = vmatprep.subr.bf16.mxu0 %v7731_v39 }
0x10ca   :  { %4716 = vmatprep.mubr.bf16.mxu1 %v8299_v11  ;;  %4757 = vmatprep.mubr.bf16.mxu0 %v8299_v11 }
0x10cc   :  { %4687 = vmatpush1.bf16.msra.mxu1 %v7942_v52  ;;  %4728 = vmatpush1.bf16.msra.mxu0 %v7736_v46 }
0x10cd   :  { %4688 = vmatprep.subr.bf16.mxu1 %v7946_v3  ;;  %4729 = vmatprep.subr.bf16.mxu0 %v7738_v30  ;;  %v8562_v30 = vld [vmem:[#allocation95_spill] sm:$0xff] }
0x10d0   :  { %4689 = vmatpush1.bf16.msra.mxu1 %v7950_v5  ;;  %4730 = vmatpush1.bf16.msra.mxu0 %v7742_v28 }
0x10d1   :  { %4690 = vmatprep.subr.bf16.mxu1 %v7954_v0  ;;  %4731 = vmatprep.subr.bf16.mxu0 %v7744_v27  ;;  %v8563_v27 = vld [vmem:[#allocation97_spill] sm:$0xff] }
0x10d4   :  { %4691 = vmatpush1.bf16.msra.mxu1 %v7958_v36  ;;  %4732 = vmatpush1.bf16.msra.mxu0 %v7748_v1 }
0x10d5   :  { %4692 = vmatprep.subr.bf16.mxu1 %v7962_v6  ;;  %4733 = vmatprep.subr.bf16.mxu0 %v7750_v20 }
0x10d8   :  { %4693 = vmatpush1.bf16.msra.mxu1 %v7966_v61  ;;  %4734 = vmatpush1.bf16.msra.mxu0 %v7754_v38 }
0x10d9   :  { %4694 = vmatprep.subr.bf16.mxu1 %v7970_v16  ;;  %4735 = vmatprep.subr.bf16.mxu0 %v7756_v41  ;;  %v8564_v41 = vld [vmem:[#allocation96_spill] sm:$0xff] }
0x10dc   :  { %4695 = vmatpush1.bf16.msra.mxu1 %v7974_v49  ;;  %4736 = vmatpush1.bf16.msra.mxu0 %v7760_v12 }
0x10dd   :  { %4696 = vmatprep.subr.bf16.mxu1 %v7978_v4  ;;  %4737 = vmatprep.subr.bf16.mxu0 %v7762_v63  ;;  %v8565_v63 = vld [vmem:[#allocation99_spill] sm:$0xff] }
0x10e0   :  { %4697 = vmatpush1.bf16.msra.mxu1 %v7982_v22  ;;  %4738 = vmatpush1.bf16.msra.mxu0 %v7766_v53 }
0x10e1   :  { %4698 = vmatprep.subr.bf16.mxu1 %v7986_v37  ;;  %4739 = vmatprep.subr.bf16.mxu0 %v7768_v29 }
0x10e4   :  { %4699 = vmatpush1.bf16.msra.mxu1 %v7990_v24  ;;  %4740 = vmatpush1.bf16.msra.mxu0 %v7772_v21 }
0x10e5   :  { %5265 = vmatprep.subr.bf16.mxu0 %v8561_v48  ;;  %4807 = vmatprep.subr.bf16.mxu1 %v4792_v44  ;;  %v4803_v48 = vld [vmem:[#allocation8 + $0x60] sm:$0xff] }
0x10e6   :  { %v8587_v44 = vld [vmem:[#allocation98_spill] sm:$0xff] }
0x119a   :  { %v4607_v39 = vpop.f32.mrb[140].mxu1  ;;  %v4648_v46 = vpop.f32.mrb[144].mxu0 }
0x119b   :  { %v4608_v28 = vadd.f32 %v4607_v39, %v8562_v30  ;;  %v4649_v1 = vadd.f32 %v4648_v46, %v8563_v27  ;;  %v4609_v20 = vpop.f32.mrb[141].mxu1  ;;  %v4650_v38 = vpop.f32.mrb[145].mxu0  ;;  %v4806_v39 = vld [vmem:[#allocation8 + $0x78] sm:$0xff]  ;;  %v4805_v46 = vld [vmem:[#allocation8 + $0x70] sm:$0xff]  ;;  %v8581_v27 = vld [vmem:[#allocation138_spill] sm:$0xff] }
0x119c   :  { %v4610_v12 = vadd.f32 %v4609_v20, %v8564_v41  ;;  %v4651_v53 = vadd.f32 %v4650_v38, %v8565_v63  ;;  %v4611_v18 = vpop.f32.mrb[142].mxu1  ;;  %v4652_v29 = vpop.f32.mrb[146].mxu0  ;;  %v8582_v20 = vld [vmem:[#allocation141_spill] sm:$0xff]  ;;  %v8583_v63 = vld [vmem:[#allocation140_spill] sm:$0xff] }
0x119d   :  { %v5251_v54 = vmul.f32 -1.442695, %v4608_v28  ;;  %v4612_v52 = vpop.f32.mrb[143].mxu1  ;;  %v4653_v3 = vpop.f32.mrb[147].mxu0  ;;  %v8584_v18 = vld [vmem:[#allocation142_spill] sm:$0xff] }
0x119e   :  { %v5252_v21 = vmul.f32 -1.442695, %v4610_v12  ;;  %v5253_v5 = vmul.f32 -1.442695, %v4651_v53 }
0x119f   :  { %5939 = vpow2.f32 %v5251_v54 }
0x11a0   :  { %5941 = vpow2.f32 %v5252_v21 }
0x11a1   :  { %5943 = vpow2.f32 %v5253_v5 }
0x11a2   :  { %5945 = vtanh.f32 %v4649_v1 }
0x11a9   :  { %v5940_v0 = vpop.eup %5939 }
0x11aa   :  { %v5942_v36 = vpop.eup %5941  ;;  %v4658_v6 = vadd.f32 1.0, %v5940_v0 }
0x11ab   :  { %v4664_v61 = vadd.f32 1.0, %v5942_v36  ;;  %v5944_v16 = vpop.eup %5943 }
0x11ac   :  { %5947 = vrcp.f32 %v4658_v6  ;;  %v5946_v49 = vpop.eup %5945  ;;  %v4671_v24 = vadd.f32 1.0, %v5944_v16 }
0x11ad   :  { %5949 = vrcp.f32 %v4664_v61 }
0x11ae   :  { %5951 = vrcp.f32 %v4671_v24 }
0x11b6   :  { %v5948_v4 = vpop.eup %5947 }
0x11b7   :  { %v5950_v22 = vpop.eup %5949  ;;  %v4675_v37 = vmul.f32 %v5948_v4, %v5946_v49 }
0x11b8   :  { %v4674_v35 = vmul.f32 %v5950_v22, %v8044_v10  ;;  %v5952_v51 = vpop.eup %5951  ;;  %v4800_v10 = vld [vmem:[#allocation8 + $0x48] sm:$0xff] }
0x11ba   :  { %v8085_v50 = vadd.f32 %v4675_v37, %v4674_v35 }
0x11bc   :  { %5953 = vtanh.f32 %v8085_v50 }
0x11c6   :  { %v5954_v57 = vpop.eup %5953 }
0x11c7   :  { %v4678_v60 = vmul.f32 %v5954_v57, %v5952_v51 }
0x11c9   :  { %v4679_v23 = vpack.c.bf16 %v4678_v60, %v4678_v60 }
0x11cb   :  { %4717 = vmatmul.mubr.bf16.vlgmr.msra.gmra.mrb[144].mxu1 %v4679_v23  ;;  %4758 = vmatmul.mubr.bf16.vlgmr.msra.gmra.mrb[148].mxu0 %v4679_v23 }
0x11cc   :  { %4839 = vmatprep.mubr.bf16.mxu1 %v8299_v11  ;;  %5266 = vmatpush3.bf16.msra.mxu0 %v8566_v15  ;;  %v8576_v11 = vld [vmem:[#allocation43_spill] sm:$0xff] }
0x11cd   :  { %5267 = vmatprep.subr.bf16.mxu0 %v8567_v2  ;;  %4808 = vmatpush1.bf16.msra.mxu1 %v4791_v56 }
0x11ce   :  { %4809 = vmatprep.subr.bf16.mxu1 %v4794_v32 }
0x11d0   :  { %5268 = vmatpush3.bf16.msra.mxu0 %v8568_v42 }
0x11d1   :  { %5269 = vmatprep.subr.bf16.mxu0 %v8569_v33  ;;  %4810 = vmatpush1.bf16.msra.mxu1 %v4793_v59  ;;  %v4931_v33 = vld [vmem:[#allocation10] sm:$0xff]  ;;  %v8588_v59 = vld [vmem:[#allocation101_spill] sm:$0xff] }
0x11d2   :  { %4811 = vmatprep.subr.bf16.mxu1 %v4796_v55 }
0x11d4   :  { %5270 = vmatpush3.bf16.msra.mxu0 %v8570_v26  ;;  %v6117_v26 = vmov 0.0  }
0x11d5   :  { %5271 = vmatprep.subr.bf16.mxu0 %v8571_v17  ;;  %4812 = vmatpush1.bf16.msra.mxu1 %v4795_v47  ;;  %v4932_v17 = vld [vmem:[#allocation10 + $0x8] sm:$0xff] }
0x11d6   :  { %4813 = vmatprep.subr.bf16.mxu1 %v4798_v40 }
0x11d8   :  { %5272 = vmatpush3.bf16.msra.mxu0 %v8572_v7  ;;  %v4933_v7 = vld [vmem:[#allocation10 + $0x10] sm:$0xff] }
0x11d9   :  { %5273 = vmatprep.subr.bf16.mxu0 %v8573_v31  ;;  %4814 = vmatpush1.bf16.msra.mxu1 %v4797_v9  ;;  %v4935_v31 = vld [vmem:[#allocation10 + $0x20] sm:$0xff] }
0x11da   :  { %4815 = vmatprep.subr.bf16.mxu1 %v4800_v10 }
0x11dc   :  { %5274 = vmatpush3.bf16.msra.mxu0 %v8574_v19  ;;  %v4936_v19 = vld [vmem:[#allocation10 + $0x28] sm:$0xff] }
0x11dd   :  { %5275 = vmatprep.subr.bf16.mxu0 %v8575_v8  ;;  %4816 = vmatpush1.bf16.msra.mxu1 %v4799_v25  ;;  %v4848_v8 = vld [vmem:[%s8136_s11] sm:$0x3] }
0x11de   :  { %4817 = vmatprep.subr.bf16.mxu1 %v4802_v13 }
0x11e0   :  { %5276 = vmatpush3.bf16.msra.mxu0 %v8576_v11  ;;  %v8585_v11 = vld [vmem:[#allocation87_spill] sm:$0xff] }
0x11e1   :  { %5277 = vmatprep.subr.bf16.mxu0 %v8577_v43  ;;  %4818 = vmatpush1.bf16.msra.mxu1 %v4801_v14  ;;  %v4853_v43 = vrot.slane %v4848_v8, %v8585_v11 }
0x11e2   :  { %4819 = vmatprep.subr.bf16.mxu1 %v4804_v62 }
0x11e4   :  { %5278 = vmatpush3.bf16.msra.mxu0 %v8578_v45 }
0x11e5   :  { %5279 = vmatprep.subr.bf16.mxu0 %v8579_v34  ;;  %4820 = vmatpush1.bf16.msra.mxu1 %v4803_v48  ;;  %v8586_v34 = vld [vmem:[#allocation90_spill] sm:$0xff]  ;;  %v4937_v48 = vld [vmem:[#allocation10 + $0x30] sm:$0xff] }
0x11e6   :  { %4821 = vmatprep.subr.bf16.mxu1 %v4806_v39  ;;  %v4938_v39 = vld [vmem:[#allocation10 + $0x38] sm:$0xff] }
0x11e8   :  { %5280 = vmatpush3.bf16.msra.mxu0 %v8580_v58  ;;  %v4857_v58 = vrot.slane %v4848_v8, %v8586_v34 }
0x11e9   :  { %4822 = vmatpush1.bf16.msra.mxu1 %v4805_v46 }
0x11ea   :  { %5296 = vmatprep.subr.bf16.mxu1 %v6117_v26 }
0x129e   :  { %v4718_v30 = vpop.f32.mrb[144].mxu1  ;;  %v4759_v28 = vpop.f32.mrb[148].mxu0 }
0x129f   :  { %v4719_v1 = vadd.f32 %v4718_v30, %v8581_v27  ;;  %v4760_v38 = vadd.f32 %v4759_v28, %v8582_v20  ;;  %v4720_v41 = vpop.f32.mrb[145].mxu1  ;;  %v4761_v12 = vpop.f32.mrb[149].mxu0  ;;  %v5257_v30 = vld [vmem:[%s8138_s13] ss:$0 sm:$0xff] }
0x12a0   :  { %v4721_v53 = vadd.f32 %v4720_v41, %v8583_v63  ;;  %v4762_v29 = vadd.f32 %v4761_v12, %v8584_v18  ;;  %v4722_v54 = vpop.f32.mrb[146].mxu1  ;;  %v4763_v52 = vpop.f32.mrb[150].mxu0  ;;  %v5258_v63 = vld [vmem:[%s8140_s15] ss:$0 sm:$0xff] }
0x12a1   :  { %v5254_v3 = vmul.f32 -1.442695, %v4719_v1  ;;  %v4723_v21 = vpop.f32.mrb[147].mxu1  ;;  %v4764_v5 = vpop.f32.mrb[151].mxu0 }
0x12a2   :  { %v5255_v0 = vmul.f32 -1.442695, %v4721_v53  ;;  %v5256_v36 = vmul.f32 -1.442695, %v4762_v29 }
0x12a3   :  { %5955 = vpow2.f32 %v5254_v3 }
0x12a4   :  { %5957 = vpow2.f32 %v5255_v0 }
0x12a5   :  { %5959 = vpow2.f32 %v5256_v36 }
0x12a6   :  { %5961 = vtanh.f32 %v4760_v38 }
0x12ad   :  { %v5956_v6 = vpop.eup %5955 }
0x12ae   :  { %v5958_v61 = vpop.eup %5957  ;;  %v4769_v16 = vadd.f32 1.0, %v5956_v6 }
0x12af   :  { %v4775_v49 = vadd.f32 1.0, %v5958_v61  ;;  %v5960_v4 = vpop.eup %5959 }
0x12b0   :  { %5963 = vrcp.f32 %v4769_v16  ;;  %v5962_v22 = vpop.eup %5961  ;;  %v4782_v51 = vadd.f32 1.0, %v5960_v4 }
0x12b1   :  { %5965 = vrcp.f32 %v4775_v49 }
0x12b2   :  { %5967 = vrcp.f32 %v4782_v51 }
0x12ba   :  { %v5964_v37 = vpop.eup %5963 }
0x12bb   :  { %v5966_v24 = vpop.eup %5965  ;;  %v4786_v35 = vmul.f32 %v5964_v37, %v5962_v22 }
0x12bc   :  { %v4785_v57 = vmul.f32 %v5966_v24, %v8085_v50  ;;  %v5968_v23 = vpop.eup %5967  ;;  %v4934_v50 = vld [vmem:[#allocation10 + $0x18] sm:$0xff] }
0x12be   :  { %v4787_v60 = vadd.f32 %v4786_v35, %v4785_v57 }
0x12c0   :  { %5969 = vtanh.f32 %v4787_v60 }
0x12ca   :  { %v5970_v15 = vpop.eup %5969 }
0x12cb   :  { %v4789_v2 = vmul.f32 %v5970_v15, %v5968_v23 }
0x12cd   :  { %v4790_v42 = vpack.c.bf16 %v4789_v2, %v4789_v2 }
0x12cf   :  { %4840 = vmatmul.mubr.bf16.vlgmr.msra.gmra.mrb[148].mxu1 %v4790_v42 }
0x12d0   :  { %5297 = vmatpush3.bf16.msra.mxu1 %v4931_v33  ;;  %5312 = vmatprep.mubr.msk.bf16.mxu1 %vm6118_vm0, %v6117_v26 }
0x12d1   :  { %5298 = vmatprep.subr.bf16.mxu1 %v6117_v26 }
0x12d4   :  { %5299 = vmatpush3.bf16.msra.mxu1 %v4932_v17 }
0x12d5   :  { %5300 = vmatprep.subr.bf16.mxu1 %v6117_v26 }
0x12d8   :  { %5301 = vmatpush3.bf16.msra.mxu1 %v4933_v7 }
0x12d9   :  { %5302 = vmatprep.subr.bf16.mxu1 %v6117_v26 }
0x12dc   :  { %5303 = vmatpush3.bf16.msra.mxu1 %v4934_v50 }
0x12dd   :  { %5304 = vmatprep.subr.bf16.mxu1 %v6117_v26 }
0x12e0   :  { %5305 = vmatpush3.bf16.msra.mxu1 %v4935_v31 }
0x12e1   :  { %5306 = vmatprep.subr.bf16.mxu1 %v6117_v26 }
0x12e4   :  { %5307 = vmatpush3.bf16.msra.mxu1 %v4936_v19 }
0x12e5   :  { %5308 = vmatprep.subr.bf16.mxu1 %v6117_v26 }
0x12e8   :  { %5309 = vmatpush3.bf16.msra.mxu1 %v4937_v48 }
0x12e9   :  { %5310 = vmatprep.subr.bf16.mxu1 %v6117_v26 }
0x12ec   :  { %5311 = vmatpush3.bf16.msra.mxu1 %v4938_v39 }
0x13a2   :  { %v4841_v45 = vpop.f32.mrb[148].mxu1 }
0x13a3   :  { %v4842_v56 = vadd.f32 %v4841_v45, %v8587_v44  ;;  %v4843_v32 = vpop.f32.mrb[149].mxu1 }
0x13a4   :  { %v4844_v55 = vadd.f32 %v4843_v32, %v8588_v59  ;;  %v4845_v47 = vpop.f32.mrb[150].mxu1 }
0x13a5   :  { %v4860_v40 = vadd.f32 %v4853_v43, %v4842_v56  ;;  %v4846_v9 = vpop.f32.mrb[151].mxu1 }
0x13a6   :  { %v4861_v10 = vadd.f32 %v4857_v58, %v4844_v55 }
0x13a7   :  { %v4862_v25 = vmax.f32 %v4860_v40, 0.0 }
0x13a8   :  { %v4863_v13 = vmax.f32 %v4861_v10, 0.0 }
0x13a9   :  { %v4864_v62 = vpack.c.bf16 %v4862_v25, %v4862_v25 }
0x13aa   :  { %v4865_v14 = vpack.c.bf16 %v4863_v13, %v4863_v13 }
0x13ac   :  { %4921 = vmatprep.mubr.bf16.mxu0 %v4865_v14 }
0x13ad   :  { %4922 = vmatmul.mubr.bf16.vlgmr.msra.gmra.mrb[152].mxu0 %v4864_v62 }
0x1480   :  { %v5281_v46 = vpop.f32.mrb[152].mxu0 }
0x1481   :  { %v5282_v28 = vpop.f32.mrb[153].mxu0 }
0x1482   :  { %v5283_v27 = vadd.f32 %v5282_v28, %v5281_v46  ;;  %v5284_v1 = vpop.f32.mrb[154].mxu0 }
0x1483   :  { %v5285_v20 = vpop.f32.mrb[155].mxu0 }
0x1484   :  { %v4924_v38 = vadd.f32 %v5283_v27, %v5257_v30 }
0x1486   :  { %v4929_v41 = vmax.f32 %v4924_v38, 0.0 }
0x1488   :  { %v4930_v12 = vpack.c.bf16 %v4929_v41, %v4929_v41 }
0x148a   :  { %5313 = vmatmul.mubr.bf16.vlgmr.msra.gmra.mrb[152].mxu1 %v4930_v12 }
0x155d   :  { %v4980_v53 = vpop.f32.mrb[152].mxu1 }
0x155e   :  { %v4981_v18 = vadd.f32 %v5258_v63, %v4980_v53  ;;  %v5314_v29 = vpop.f32.mrb[153].mxu1 }
0x155f   :  { %v4983_v54 = vpop.f32.mrb[154].mxu1 }
0x1560   :  { %4986 = vst [vmem:[%s8141_s16] sm:$0xff] %v4981_v18  ;;  %v5315_v52 = vpop.f32.mrb[155].mxu1 }
0x1561   :  { %4991 = vsyncpa [#allocation13], 1 }
0x1562   :  { %4992 = vsyncpa [#allocation15], 1 }
0x1563   :  { %4993 = vsyncmov [#allocation11] }
0x1566   :  { %s4994_s13 = vpop.sfrf %4993 }
0x1567   :  { %p5259_p4 = scmp.ne.s32.totalorder %s4994_s13, 0 }
0x1569   :  { %4998 = shalt.err (%p5259_p4)  }
0x156a   :  { %5000 = vsyncmov [#allocation11 + $0x1] }
0x156d   :  { %s5001_s28 = vpop.sfrf %5000 }
0x156e   :  { %p5260_p5 = scmp.ne.s32.totalorder %s5001_s28, 0 }
0x1570   :  { %5005 = shalt.err (%p5260_p5)  }
0x1571   :  { %5007 = vsyncmov [#allocation11 + $0x2] }
0x1574   :  { %s5008_s15 = vpop.sfrf %5007 }
0x1575   :  { %p5261_p6 = scmp.ne.s32.totalorder %s5008_s15, 0 }
0x1577   :  { %5012 = shalt.err (%p5261_p6)  }
0x1578   :  { %5014 = vsyncmov [#allocation11 + $0x3] }
0x157b   :  { %s5015_s29 = vpop.sfrf %5014 }
0x157c   :  { %p5262_p7 = scmp.ne.s32.totalorder %s5015_s29, 0 }
0x157e   :  { %5019 = shalt.err (%p5262_p7)  }
0x157f   :  { %5021 = vsyncmov [#allocation11 + $0x4] }
0x1582   :  { %s5022_s16 = vpop.sfrf %5021 }
0x1583   :  { %p5263_p8 = scmp.ne.s32.totalorder %s5022_s16, 0 }
0x1585   :  { %5026 = shalt.err (%p5263_p8)  }
0x1586   :  { %5028 = vsyncmov [#allocation11 + $0x5] }
0x1589   :  { %s5029_s8 = vpop.sfrf %5028 }
0x158a   :  { %p5264_p9 = scmp.ne.s32.totalorder %s5029_s8, 0 }
0x158c   :  { %5033 = shalt.err (%p5264_p9)  }

</bundles_post_ra>
